<compile_context>
chip_gen: v7x
topology: tpu7x:2x2x1
jax: 0.10.0
libtpu: 0.0.40
codegen_flags: <defaults>
</compile_context>

<pallas_src>
import functools
import numpy as np

import jax
import jax.numpy as jnp
from jax.experimental import pallas as pl
from jax.experimental.pallas import tpu as pltpu

LN_EPS = 1e-5
MATMUL_DTYPE = jnp.bfloat16       # MXU operand dtype (f32 accumulation)
VMEM_LIMIT_BYTES = 64 * 1024 * 1024


# ----------------------------------------------------------------------------
# window partition / reverse (pure reshuffles -> JAX glue)
# ----------------------------------------------------------------------------
def window_partition(x, ws):
    B, H, W, C = x.shape
    x = x.reshape(B, H // ws, ws, W // ws, ws, C)
    return x.transpose(0, 1, 3, 2, 4, 5).reshape(-1, ws, ws, C)


def window_reverse(windows, ws, H, W):
    B = windows.shape[0] // ((H // ws) * (W // ws))
    x = windows.reshape(B, H // ws, W // ws, ws, ws, -1)
    return x.transpose(0, 1, 3, 2, 4, 5).reshape(B, H, W, -1)


# ----------------------------------------------------------------------------
# helpers
# ----------------------------------------------------------------------------
def _layernorm(v, g, b):
    mu = jnp.mean(v, axis=-1, keepdims=True)
    var = jnp.mean(jnp.square(v - mu), axis=-1, keepdims=True)
    return (v - mu) * jax.lax.rsqrt(var + LN_EPS) * g + b


def _gelu_exact(z):
    return 0.5 * z * (1.0 + jax.lax.erf(z * 0.7071067811865476))


def _pick_windows_per_step(B, nW, N, max_rows=1024):
    """Windows per attention grid step: a multiple of nW (whole images), chosen
    so the projection matmul M-dim (WIN*N rows) is as large as possible (<=1024
    rows), with a mild preference for >=2 grid steps (v7x megacore) when that
    does not shrink the M-dim below ~256 rows."""
    d = 1
    for cand in range(1, B + 1):
        if B % cand == 0 and cand * nW * N <= max_rows:
            d = cand
    if (B // d) == 1 and d % 2 == 0 and (d // 2) * nW * N >= 256:
        d //= 2
    return d * nW


def _pick_row_tile(T, cap=512):
    """Largest multiple-of-8 divisor of T that is <= cap (falls back to T)."""
    start = min(T, cap) - (min(T, cap) % 8)
    for t in range(start, 7, -8):
        if T % t == 0:
            return t
    return T


# ----------------------------------------------------------------------------
# Pallas kernels
# ----------------------------------------------------------------------------
def _attn_kernel(nW, num_heads, head_dim,
                 x_ref, y_ref, bias_ref, g1_ref, b1_ref,
                 wq_ref, bq_ref, wk_ref, bk_ref, wv_ref, bv_ref, wp_ref, bp_ref,
                 o_ref, acc_ref):
    WIN, N, C = x_ref.shape
    d = WIN // nW                      # whole images per step
    cd = wq_ref.dtype                  # matmul operand dtype (bf16)

    g1 = g1_ref[...]
    b1 = b1_ref[...]
    x = x_ref[...].reshape(WIN * N, C).astype(jnp.float32)
    y = y_ref[...].reshape(WIN * N, C).astype(jnp.float32)
    xn = _layernorm(x, g1, b1).astype(cd)
    yn = _layernorm(y, g1, b1).astype(cd)

    # Big projections over all batched windows (scale pre-folded into wq/bq,
    # K/V weights pre-split -> no kv concatenate, no lane-slice of a (., 2C)).
    q = jnp.dot(xn, wq_ref[...], preferred_element_type=jnp.float32) + bq_ref[...]
    kx = jnp.dot(xn, wk_ref[...], preferred_element_type=jnp.float32) + bk_ref[...]
    ky = jnp.dot(yn, wk_ref[...], preferred_element_type=jnp.float32) + bk_ref[...]
    vx = jnp.dot(xn, wv_ref[...], preferred_element_type=jnp.float32) + bv_ref[...]
    vy = jnp.dot(yn, wv_ref[...], preferred_element_type=jnp.float32) + bv_ref[...]

    bias = bias_ref[...].astype(jnp.float32)           # (nW, nh, N, N) half bias

    def add_bias(s, bias_h):
        # windows within the step cycle through the nW per-window biases
        return (s.reshape(d, nW, N, N) + bias_h[None]).reshape(WIN, N, N)

    for h in range(num_heads):
        sl = slice(h * head_dim, (h + 1) * head_dim)
        qh = q[:, sl].reshape(WIN, N, head_dim).astype(cd)
        kxh = kx[:, sl].reshape(WIN, N, head_dim).astype(cd)
        kyh = ky[:, sl].reshape(WIN, N, head_dim).astype(cd)
        vxh = vx[:, sl].reshape(WIN, N, head_dim).astype(cd)
        vyh = vy[:, sl].reshape(WIN, N, head_dim).astype(cd)

        bias_h = bias[:, h]                            # (nW, N, N)
        sxh = add_bias(jnp.einsum('wnd,wmd->wnm', qh, kxh,
                                  preferred_element_type=jnp.float32), bias_h)
        syh = add_bias(jnp.einsum('wnd,wmd->wnm', qh, kyh,
                                  preferred_element_type=jnp.float32), bias_h)

        # joint softmax over the concatenated [x-keys | y-keys] axis (the
        # PyTorch bias/mask is cat([b, b], -1) so both halves use bias_h)
        m = jnp.maximum(sxh.max(-1, keepdims=True), syh.max(-1, keepdims=True))
        exh = jnp.exp(sxh - m)
        eyh = jnp.exp(syh - m)
        inv = pl.reciprocal(exh.sum(-1, keepdims=True) + eyh.sum(-1, keepdims=True),
                            approx=True)
        pxh = (exh * inv).astype(cd)
        pyh = (eyh * inv).astype(cd)

        oh = jnp.einsum('wnm,wmd->wnd', pxh, vxh, preferred_element_type=jnp.float32)
        oh = oh + jnp.einsum('wnm,wmd->wnd', pyh, vyh, preferred_element_type=jnp.float32)
        acc_ref[:, :, sl] = oh                         # per-head write, no concat

    out = acc_ref[...].reshape(WIN * N, C).astype(cd)
    out = jnp.dot(out, wp_ref[...], preferred_element_type=jnp.float32) + bp_ref[...]
    o_ref[...] = out.reshape(WIN, N, C).astype(o_ref.dtype)


def _mlp_kernel(sc_ref, a_ref, g2_ref, b2_ref, w1_ref, bb1_ref, w2_ref, bb2_ref,
                o_ref):
    cd = w1_ref.dtype
    h = sc_ref[...].astype(jnp.float32) + a_ref[...].astype(jnp.float32)  # residual 1
    hn = _layernorm(h, g2_ref[...], b2_ref[...])
    z = jnp.dot(hn.astype(cd), w1_ref[...], preferred_element_type=jnp.float32) + bb1_ref[...]
    z = _gelu_exact(z)
    out = h + (jnp.dot(z.astype(cd), w2_ref[...], preferred_element_type=jnp.float32)
               + bb2_ref[...])                                            # residual 2
    o_ref[...] = out.astype(o_ref.dtype)


# ----------------------------------------------------------------------------
# pallas_call wrappers
# ----------------------------------------------------------------------------
def window_cross_attention(x_win, y_win, p, num_heads, nW):
    B_, N, C = x_win.shape
    head_dim = C // num_heads
    scale = head_dim ** (-0.5)
    B = B_ // nW
    WIN = _pick_windows_per_step(B, nW, N)
    grid = B_ // WIN
    cd = MATMUL_DTYPE

    # fold the qk scale into the query projection (exact); bf16 weights halve
    # DMA bytes / VMEM residency; biases stay f32 (added to f32 accumulators).
    wq = (p['wq'] * scale).astype(cd)
    bq = (p['bq'] * scale).astype(jnp.float32)
    wk = p['wk'].astype(cd)
    wv = p['wv'].astype(cd)
    wp = p['wp'].astype(cd)

    kernel = functools.partial(_attn_kernel, nW, num_heads, head_dim)
    const = lambda a: pl.BlockSpec(a.shape, lambda i: (0,) * a.ndim)

    return pl.pallas_call(
        kernel,
        out_shape=jax.ShapeDtypeStruct((B_, N, C), x_win.dtype),
        grid=(grid,),
        in_specs=[
            pl.BlockSpec((WIN, N, C), lambda i: (i, 0, 0)),
            pl.BlockSpec((WIN, N, C), lambda i: (i, 0, 0)),
            const(p['bias_half']),         # un-tiled (nW, nh, N, N), constant index
            const(p['g1']), const(p['b1']),
            const(wq), const(bq),
            const(wk), const(p['bk']),
            const(wv), const(p['bv']),
            const(wp), const(p['bp']),
        ],
        out_specs=pl.BlockSpec((WIN, N, C), lambda i: (i, 0, 0)),
        scratch_shapes=[pltpu.VMEM((WIN, N, C), jnp.float32)],
        compiler_params=pltpu.CompilerParams(
            dimension_semantics=("parallel",),
            vmem_limit_bytes=VMEM_LIMIT_BYTES),
    )(x_win, y_win, p['bias_half'], p['g1'], p['b1'],
      wq, bq, wk, p['bk'], wv, p['bv'], wp, p['bp'])


def mlp_block(shortcut, attn_res, p):
    T_total, C = shortcut.shape
    tile = _pick_row_tile(T_total, cap=512)
    cd = MATMUL_DTYPE
    w1 = p['w1'].astype(cd)
    w2 = p['w2'].astype(cd)
    const = lambda a: pl.BlockSpec(a.shape, lambda i: (0,) * a.ndim)
    return pl.pallas_call(
        _mlp_kernel,
        out_shape=jax.ShapeDtypeStruct((T_total, C), shortcut.dtype),
        grid=(T_total // tile,),
        in_specs=[
            pl.BlockSpec((tile, C), lambda i: (i, 0)),
            pl.BlockSpec((tile, C), lambda i: (i, 0)),
            const(p['g2']), const(p['b2']),
            const(w1), const(p['bb1']),
            const(w2), const(p['bb2']),
        ],
        out_specs=pl.BlockSpec((tile, C), lambda i: (i, 0)),
        compiler_params=pltpu.CompilerParams(
            dimension_semantics=("parallel",),
            vmem_limit_bytes=VMEM_LIMIT_BYTES),
    )(shortcut, attn_res, p['g2'], p['b2'], w1, p['bb1'], w2, p['bb2'])


# ----------------------------------------------------------------------------
# Full block forward (glue + kernels)
# ----------------------------------------------------------------------------
def swin_cross_block_forward(x, y, params, cfg):
    H, W = cfg['input_resolution']
    ws, ss, nh = cfg['window_size'], cfg['shift_size'], cfg['num_heads']
    B, L, C = x.shape
    assert L == H * W
    N = ws * ws
    nW = (H // ws) * (W // ws)

    shortcut = x
    xs = x.reshape(B, H, W, C)
    ys = y.reshape(B, H, W, C)
    if ss > 0:
        xs = jnp.roll(xs, shift=(-ss, -ss), axis=(1, 2))
        ys = jnp.roll(ys, shift=(-ss, -ss), axis=(1, 2))
    x_win = window_partition(xs, ws).reshape(-1, N, C)
    y_win = window_partition(ys, ws).reshape(-1, N, C)

    attn_win = window_cross_attention(x_win, y_win, params, nh, nW)
    attn_win = attn_win.reshape(-1, ws, ws, C)
    xr = window_reverse(attn_win, ws, H, W)
    if ss > 0:
        xr = jnp.roll(xr, shift=(ss, ss), axis=(1, 2))
    attn_res = xr.reshape(B * L, C)

    out = mlp_block(shortcut.reshape(B * L, C), attn_res, params)
    return out.reshape(B, L, C)


# ----------------------------------------------------------------------------
# deterministic parameter init (synthetic; mirrors nn.Module shapes)
# ----------------------------------------------------------------------------
def init_params(key, dim, num_heads, window_size, shift_size, input_resolution, mlp_ratio):
    H, W = input_resolution
    ws = window_size
    N = ws * ws
    hidden = int(dim * mlp_ratio)
    ks = jax.random.split(key, 10)

    p = {
        'g1': jnp.ones((1, dim), jnp.float32),
        'b1': jnp.zeros((1, dim), jnp.float32),
        'g2': jnp.ones((1, dim), jnp.float32),
        'b2': jnp.zeros((1, dim), jnp.float32),
        'wq': 0.02 * jax.random.normal(ks[0], (dim, dim), jnp.float32),
        'bq': 0.01 * jax.random.normal(ks[1], (1, dim), jnp.float32),
        'wk': 0.02 * jax.random.normal(ks[2], (dim, dim), jnp.float32),
        'bk': 0.01 * jax.random.normal(ks[3], (1, dim), jnp.float32),
        'wv': 0.02 * jax.random.normal(ks[4], (dim, dim), jnp.float32),
        'bv': 0.01 * jax.random.normal(ks[5], (1, dim), jnp.float32),
        'wp': 0.02 * jax.random.normal(ks[6], (dim, dim), jnp.float32),
        'bp': jnp.zeros((1, dim), jnp.float32),
        'w1': 0.02 * jax.random.normal(ks[7], (dim, hidden), jnp.float32),
        'bb1': jnp.zeros((1, hidden), jnp.float32),
        'w2': 0.02 * jax.random.normal(ks[8], (hidden, dim), jnp.float32),
        'bb2': jnp.zeros((1, dim), jnp.float32),
    }

    # relative position bias table + index (as in the PyTorch module)
    table = 0.02 * jax.random.normal(ks[9], ((2 * ws - 1) * (2 * ws - 1), num_heads),
                                     jnp.float32)
    coords = np.stack(np.meshgrid(np.arange(ws), np.arange(ws), indexing='ij'))
    coords_flat = coords.reshape(2, -1)
    rel = coords_flat[:, :, None] - coords_flat[:, None, :]
    rel = rel.transpose(1, 2, 0).astype(np.int64)
    rel[:, :, 0] += ws - 1
    rel[:, :, 1] += ws - 1
    rel[:, :, 0] *= 2 * ws - 1
    rpi = rel.sum(-1)                                                   # (N, N)

    rel_bias = table[jnp.asarray(rpi.reshape(-1))].reshape(N, N, num_heads)
    rel_bias = rel_bias.transpose(2, 0, 1)                              # (nh, N, N)

    nW = (H // ws) * (W // ws)
    if shift_size > 0:
        img_mask = np.zeros((1, H, W, 1), np.float32)
        slices = (slice(0, -ws), slice(-ws, -shift_size), slice(-shift_size, None))
        cnt = 0
        for hsl in slices:
            for wsl in slices:
                img_mask[:, hsl, wsl, :] = cnt
                cnt += 1
        mask_windows = window_partition(jnp.asarray(img_mask), ws).reshape(-1, N)
        attn_mask = mask_windows[:, None, :] - mask_windows[:, :, None]  # (nW, N, N)
        attn_mask = jnp.where(attn_mask != 0, -100.0, 0.0).astype(jnp.float32)
        bias_half = rel_bias[None, :, :, :] + attn_mask[:, None, :, :]
    else:
        bias_half = jnp.broadcast_to(rel_bias[None], (nW, num_heads, N, N))
    # The module uses cat([bias, bias], -1): both key halves share the same
    # per-window (nW, nh, N, N) half bias -> store only the half.
    p['bias_half'] = jnp.asarray(bias_half, jnp.float32)
    return p


# ----------------------------------------------------------------------------
# pure-JAX reference (for correctness check; all f32)
# ----------------------------------------------------------------------------
def reference_forward(x, y, p, cfg):
    H, W = cfg['input_resolution']
    ws, ss, nh = cfg['window_size'], cfg['shift_size'], cfg['num_heads']
    B, L, C = x.shape
    N = ws * ws
    hd = C // nh
    scale = hd ** (-0.5)

    def ln(v, g, b):
        mu = v.mean(-1, keepdims=True)
        var = ((v - mu) ** 2).mean(-1, keepdims=True)
        return (v - mu) / jnp.sqrt(var + LN_EPS) * g + b

    shortcut = x
    xs = x.reshape(B, H, W, C)
    ys = y.reshape(B, H, W, C)
    if ss > 0:
        xs = jnp.roll(xs, shift=(-ss, -ss), axis=(1, 2))
        ys = jnp.roll(ys, shift=(-ss, -ss), axis=(1, 2))
    xw = window_partition(xs, ws).reshape(-1, N, C)
    yw = window_partition(ys, ws).reshape(-1, N, C)
    B_ = xw.shape[0]

    xn = ln(xw, p['g1'], p['b1'])
    yn = ln(yw, p['g1'], p['b1'])
    q = xn @ p['wq'] + p['bq']
    cat = jnp.concatenate([xn, yn], axis=1)                    # (B_, 2N, C)
    k = cat @ p['wk'] + p['bk']
    v = cat @ p['wv'] + p['bv']
    q = q.reshape(B_, N, nh, hd).transpose(0, 2, 1, 3) * scale
    k = k.reshape(B_, 2 * N, nh, hd).transpose(0, 2, 1, 3)
    v = v.reshape(B_, 2 * N, nh, hd).transpose(0, 2, 1, 3)
    bias_full = jnp.concatenate([p['bias_half'], p['bias_half']], axis=-1)  # (nW,nh,N,2N)
    bias_full = jnp.tile(bias_full, (B, 1, 1, 1))
    attn = jnp.einsum('bhnd,bhmd->bhnm', q, k) + bias_full
    attn = jax.nn.softmax(attn, axis=-1)
    out = jnp.einsum('bhnm,bhmd->bhnd', attn, v).transpose(0, 2, 1, 3).reshape(B_, N, C)
    out = out @ p['wp'] + p['bp']

    out = out.reshape(-1, ws, ws, C)
    xr = window_reverse(out, ws, H, W)
    if ss > 0:
        xr = jnp.roll(xr, shift=(ss, ss), axis=(1, 2))
    h = shortcut + xr.reshape(B, L, C)
    hn = ln(h, p['g2'], p['b2'])
    z = _gelu_exact(hn @ p['w1'] + p['bb1'])
    return h + (z @ p['w2'] + p['bb2'])


# ----------------------------------------------------------------------------
if __name__ == "__main__":
    # small config consistent with the module
    dim = 32
    num_heads = 4
    H = W = 8
    window_size = 4
    shift_size = 2
    mlp_ratio = 4.0
    B = 2
    L = H * W

    cfg = dict(input_resolution=(H, W), window_size=window_size,
               shift_size=shift_size, num_heads=num_heads)

    key = jax.random.PRNGKey(0)
    kx, ky, kp = jax.random.split(key, 3)
    x = jax.random.normal(kx, (B, L, dim), jnp.float32)
    y = jax.random.normal(ky, (B, L, dim), jnp.float32)
    params = init_params(kp, dim, num_heads, window_size, shift_size, (H, W), mlp_ratio)

    fwd = jax.jit(lambda xx, yy, pp: swin_cross_block_forward(xx, yy, pp, cfg))
    out = jax.block_until_ready(fwd(x, y, params))

    ref = jax.block_until_ready(reference_forward(x, y, params, cfg))
    # bf16 MXU operands + approx-reciprocal softmax vs f32 reference
    np.testing.assert_allclose(np.asarray(out), np.asarray(ref), rtol=2e-2, atol=2e-2)

    print("KERNEL_OK")
</pallas_src>

<mosaic_0001>
module attributes {stable_mosaic.version = 11 : i64} {
  func.func @_attn_kernel(%arg0: i32, %arg1: memref<8x16x32xf32, #tpu.memory_space<vmem>>, %arg2: memref<8x16x32xf32, #tpu.memory_space<vmem>>, %arg3: memref<4x4x16x16xf32, #tpu.memory_space<vmem>>, %arg4: memref<1x32xf32, #tpu.memory_space<vmem>>, %arg5: memref<1x32xf32, #tpu.memory_space<vmem>>, %arg6: memref<32x32xbf16, #tpu.memory_space<vmem>>, %arg7: memref<1x32xf32, #tpu.memory_space<vmem>>, %arg8: memref<32x32xbf16, #tpu.memory_space<vmem>>, %arg9: memref<1x32xf32, #tpu.memory_space<vmem>>, %arg10: memref<32x32xbf16, #tpu.memory_space<vmem>>, %arg11: memref<1x32xf32, #tpu.memory_space<vmem>>, %arg12: memref<32x32xbf16, #tpu.memory_space<vmem>>, %arg13: memref<1x32xf32, #tpu.memory_space<vmem>>, %arg14: memref<8x16x32xf32, #tpu.memory_space<vmem>>, %arg15: memref<8x16x32xf32, #tpu.memory_space<vmem>>) attributes {dimension_semantics = [#tpu.dimension_semantics<parallel>], iteration_bounds = array<i64: 1>, scalar_prefetch = 0 : i64, scratch_operands = 1 : i64, tpu.core_type = #tpu.core_type<tc>, window_params = [{transform_indices = @transform_0, window_bounds = array<i64: 8, 16, 32>}, {transform_indices = @transform_1, window_bounds = array<i64: 8, 16, 32>}, {pipeline_mode = #tpu.pipeline_mode<synchronous>, transform_indices = @transform_2, window_bounds = array<i64: 4, 4, 16, 16>}, {pipeline_mode = #tpu.pipeline_mode<synchronous>, transform_indices = @transform_3, window_bounds = array<i64: 1, 32>}, {pipeline_mode = #tpu.pipeline_mode<synchronous>, transform_indices = @transform_4, window_bounds = array<i64: 1, 32>}, {pipeline_mode = #tpu.pipeline_mode<synchronous>, transform_indices = @transform_5, window_bounds = array<i64: 32, 32>}, {pipeline_mode = #tpu.pipeline_mode<synchronous>, transform_indices = @transform_6, window_bounds = array<i64: 1, 32>}, {pipeline_mode = #tpu.pipeline_mode<synchronous>, transform_indices = @transform_7, window_bounds = array<i64: 32, 32>}, {pipeline_mode = #tpu.pipeline_mode<synchronous>, transform_indices = @transform_8, window_bounds = array<i64: 1, 32>}, {pipeline_mode = #tpu.pipeline_mode<synchronous>, transform_indices = @transform_9, window_bounds = array<i64: 32, 32>}, {pipeline_mode = #tpu.pipeline_mode<synchronous>, transform_indices = @transform_10, window_bounds = array<i64: 1, 32>}, {pipeline_mode = #tpu.pipeline_mode<synchronous>, transform_indices = @transform_11, window_bounds = array<i64: 32, 32>}, {pipeline_mode = #tpu.pipeline_mode<synchronous>, transform_indices = @transform_12, window_bounds = array<i64: 1, 32>}, {transform_indices = @transform_13, window_bounds = array<i64: 8, 16, 32>}]} {
    %c0 = arith.constant 0 : index
    %c0_0 = arith.constant 0 : index
    %0 = vector.load %arg4[%c0, %c0_0] : memref<1x32xf32, #tpu.memory_space<vmem>>, vector<1x32xf32>
    %c0_1 = arith.constant 0 : index
    %c0_2 = arith.constant 0 : index
    %1 = vector.load %arg5[%c0_1, %c0_2] : memref<1x32xf32, #tpu.memory_space<vmem>>, vector<1x32xf32>
    %c0_3 = arith.constant 0 : index
    %c0_4 = arith.constant 0 : index
    %c0_5 = arith.constant 0 : index
    %2 = vector.load %arg1[%c0_3, %c0_4, %c0_5] : memref<8x16x32xf32, #tpu.memory_space<vmem>>, vector<8x16x32xf32>
    %3 = vector.shape_cast %2 : vector<8x16x32xf32> to vector<128x32xf32>
    %c0_6 = arith.constant 0 : index
    %c0_7 = arith.constant 0 : index
    %c0_8 = arith.constant 0 : index
    %4 = vector.load %arg2[%c0_6, %c0_7, %c0_8] : memref<8x16x32xf32, #tpu.memory_space<vmem>>, vector<8x16x32xf32>
    %5 = vector.shape_cast %4 : vector<8x16x32xf32> to vector<128x32xf32>
    %cst = arith.constant dense<0.000000e+00> : vector<128xf32>
    %6 = vector.multi_reduction <add>, %3, %cst [1] : vector<128x32xf32> to vector<128xf32>
    %7 = vector.shape_cast %6 : vector<128xf32> to vector<128x1xf32>
    %cst_9 = arith.constant 3.200000e+01 : f32
    %8 = vector.broadcast %cst_9 : f32 to vector<128x1xf32>
    %9 = arith.divf %7, %8 : vector<128x1xf32>
    %10 = vector.broadcast %9 : vector<128x1xf32> to vector<128x32xf32>
    %11 = arith.subf %3, %10 : vector<128x32xf32>
    %12 = arith.mulf %11, %11 : vector<128x32xf32>
    %cst_10 = arith.constant dense<0.000000e+00> : vector<128xf32>
    %13 = vector.multi_reduction <add>, %12, %cst_10 [1] : vector<128x32xf32> to vector<128xf32>
    %14 = vector.shape_cast %13 : vector<128xf32> to vector<128x1xf32>
    %cst_11 = arith.constant 3.200000e+01 : f32
    %15 = vector.broadcast %cst_11 : f32 to vector<128x1xf32>
    %16 = arith.divf %14, %15 : vector<128x1xf32>
    %17 = vector.broadcast %9 : vector<128x1xf32> to vector<128x32xf32>
    %18 = arith.subf %3, %17 : vector<128x32xf32>
    %cst_12 = arith.constant 9.99999974E-6 : f32
    %19 = vector.broadcast %cst_12 : f32 to vector<128x1xf32>
    %20 = arith.addf %16, %19 : vector<128x1xf32>
    %21 = math.rsqrt %20 : vector<128x1xf32>
    %22 = vector.broadcast %21 : vector<128x1xf32> to vector<128x32xf32>
    %23 = arith.mulf %18, %22 : vector<128x32xf32>
    %24 = vector.broadcast %0 : vector<1x32xf32> to vector<128x32xf32>
    %25 = arith.mulf %23, %24 : vector<128x32xf32>
    %26 = vector.broadcast %1 : vector<1x32xf32> to vector<128x32xf32>
    %27 = arith.addf %25, %26 : vector<128x32xf32>
    %28 = arith.truncf %27 : vector<128x32xf32> to vector<128x32xbf16>
    %cst_13 = arith.constant dense<0.000000e+00> : vector<128xf32>
    %29 = vector.multi_reduction <add>, %5, %cst_13 [1] : vector<128x32xf32> to vector<128xf32>
    %30 = vector.shape_cast %29 : vector<128xf32> to vector<128x1xf32>
    %cst_14 = arith.constant 3.200000e+01 : f32
    %31 = vector.broadcast %cst_14 : f32 to vector<128x1xf32>
    %32 = arith.divf %30, %31 : vector<128x1xf32>
    %33 = vector.broadcast %32 : vector<128x1xf32> to vector<128x32xf32>
    %34 = arith.subf %5, %33 : vector<128x32xf32>
    %35 = arith.mulf %34, %34 : vector<128x32xf32>
    %cst_15 = arith.constant dense<0.000000e+00> : vector<128xf32>
    %36 = vector.multi_reduction <add>, %35, %cst_15 [1] : vector<128x32xf32> to vector<128xf32>
    %37 = vector.shape_cast %36 : vector<128xf32> to vector<128x1xf32>
    %cst_16 = arith.constant 3.200000e+01 : f32
    %38 = vector.broadcast %cst_16 : f32 to vector<128x1xf32>
    %39 = arith.divf %37, %38 : vector<128x1xf32>
    %40 = vector.broadcast %32 : vector<128x1xf32> to vector<128x32xf32>
    %41 = arith.subf %5, %40 : vector<128x32xf32>
    %cst_17 = arith.constant 9.99999974E-6 : f32
    %42 = vector.broadcast %cst_17 : f32 to vector<128x1xf32>
    %43 = arith.addf %39, %42 : vector<128x1xf32>
    %44 = math.rsqrt %43 : vector<128x1xf32>
    %45 = vector.broadcast %44 : vector<128x1xf32> to vector<128x32xf32>
    %46 = arith.mulf %41, %45 : vector<128x32xf32>
    %47 = vector.broadcast %0 : vector<1x32xf32> to vector<128x32xf32>
    %48 = arith.mulf %46, %47 : vector<128x32xf32>
    %49 = vector.broadcast %1 : vector<1x32xf32> to vector<128x32xf32>
    %50 = arith.addf %48, %49 : vector<128x32xf32>
    %51 = arith.truncf %50 : vector<128x32xf32> to vector<128x32xbf16>
    %c0_18 = arith.constant 0 : index
    %c0_19 = arith.constant 0 : index
    %52 = vector.load %arg6[%c0_18, %c0_19] : memref<32x32xbf16, #tpu.memory_space<vmem>>, vector<32x32xbf16>
    %cst_20 = arith.constant dense<0.000000e+00> : vector<128x32xf32>
    %53 = tpu.matmul %28, %52, %cst_20 {dimension_numbers = #tpu.dot_dimension_numbers<[1], [0], [0], [1], [0, 0, 1, 1], [], []>} : vector<128x32xbf16>, vector<32x32xbf16>, vector<128x32xf32> -> vector<128x32xf32>
    %c0_21 = arith.constant 0 : index
    %c0_22 = arith.constant 0 : index
    %54 = vector.load %arg7[%c0_21, %c0_22] : memref<1x32xf32, #tpu.memory_space<vmem>>, vector<1x32xf32>
    %55 = vector.broadcast %54 : vector<1x32xf32> to vector<128x32xf32>
    %56 = arith.addf %53, %55 : vector<128x32xf32>
    %c0_23 = arith.constant 0 : index
    %c0_24 = arith.constant 0 : index
    %57 = vector.load %arg8[%c0_23, %c0_24] : memref<32x32xbf16, #tpu.memory_space<vmem>>, vector<32x32xbf16>
    %cst_25 = arith.constant dense<0.000000e+00> : vector<128x32xf32>
    %58 = tpu.matmul %28, %57, %cst_25 {dimension_numbers = #tpu.dot_dimension_numbers<[1], [0], [0], [1], [0, 0, 1, 1], [], []>} : vector<128x32xbf16>, vector<32x32xbf16>, vector<128x32xf32> -> vector<128x32xf32>
    %c0_26 = arith.constant 0 : index
    %c0_27 = arith.constant 0 : index
    %59 = vector.load %arg9[%c0_26, %c0_27] : memref<1x32xf32, #tpu.memory_space<vmem>>, vector<1x32xf32>
    %60 = vector.broadcast %59 : vector<1x32xf32> to vector<128x32xf32>
    %61 = arith.addf %58, %60 : vector<128x32xf32>
    %c0_28 = arith.constant 0 : index
    %c0_29 = arith.constant 0 : index
    %62 = vector.load %arg8[%c0_28, %c0_29] : memref<32x32xbf16, #tpu.memory_space<vmem>>, vector<32x32xbf16>
    %cst_30 = arith.constant dense<0.000000e+00> : vector<128x32xf32>
    %63 = tpu.matmul %51, %62, %cst_30 {dimension_numbers = #tpu.dot_dimension_numbers<[1], [0], [0], [1], [0, 0, 1, 1], [], []>} : vector<128x32xbf16>, vector<32x32xbf16>, vector<128x32xf32> -> vector<128x32xf32>
    %c0_31 = arith.constant 0 : index
    %c0_32 = arith.constant 0 : index
    %64 = vector.load %arg9[%c0_31, %c0_32] : memref<1x32xf32, #tpu.memory_space<vmem>>, vector<1x32xf32>
    %65 = vector.broadcast %64 : vector<1x32xf32> to vector<128x32xf32>
    %66 = arith.addf %63, %65 : vector<128x32xf32>
    %c0_33 = arith.constant 0 : index
    %c0_34 = arith.constant 0 : index
    %67 = vector.load %arg10[%c0_33, %c0_34] : memref<32x32xbf16, #tpu.memory_space<vmem>>, vector<32x32xbf16>
    %cst_35 = arith.constant dense<0.000000e+00> : vector<128x32xf32>
    %68 = tpu.matmul %28, %67, %cst_35 {dimension_numbers = #tpu.dot_dimension_numbers<[1], [0], [0], [1], [0, 0, 1, 1], [], []>} : vector<128x32xbf16>, vector<32x32xbf16>, vector<128x32xf32> -> vector<128x32xf32>
    %c0_36 = arith.constant 0 : index
    %c0_37 = arith.constant 0 : index
    %69 = vector.load %arg11[%c0_36, %c0_37] : memref<1x32xf32, #tpu.memory_space<vmem>>, vector<1x32xf32>
    %70 = vector.broadcast %69 : vector<1x32xf32> to vector<128x32xf32>
    %71 = arith.addf %68, %70 : vector<128x32xf32>
    %c0_38 = arith.constant 0 : index
    %c0_39 = arith.constant 0 : index
    %72 = vector.load %arg10[%c0_38, %c0_39] : memref<32x32xbf16, #tpu.memory_space<vmem>>, vector<32x32xbf16>
    %cst_40 = arith.constant dense<0.000000e+00> : vector<128x32xf32>
    %73 = tpu.matmul %51, %72, %cst_40 {dimension_numbers = #tpu.dot_dimension_numbers<[1], [0], [0], [1], [0, 0, 1, 1], [], []>} : vector<128x32xbf16>, vector<32x32xbf16>, vector<128x32xf32> -> vector<128x32xf32>
    %c0_41 = arith.constant 0 : index
    %c0_42 = arith.constant 0 : index
    %74 = vector.load %arg11[%c0_41, %c0_42] : memref<1x32xf32, #tpu.memory_space<vmem>>, vector<1x32xf32>
    %75 = vector.broadcast %74 : vector<1x32xf32> to vector<128x32xf32>
    %76 = arith.addf %73, %75 : vector<128x32xf32>
    %c0_43 = arith.constant 0 : index
    %c0_44 = arith.constant 0 : index
    %c0_45 = arith.constant 0 : index
    %c0_46 = arith.constant 0 : index
    %77 = vector.load %arg3[%c0_43, %c0_44, %c0_45, %c0_46] : memref<4x4x16x16xf32, #tpu.memory_space<vmem>>, vector<4x4x16x16xf32>
    %78 = vector.extract_strided_slice %56 {offsets = [0, 0], sizes = [128, 8], strides = [1, 1]} : vector<128x32xf32> to vector<128x8xf32>
    %79 = vector.shape_cast %78 : vector<128x8xf32> to vector<8x16x8xf32>
    %80 = arith.truncf %79 : vector<8x16x8xf32> to vector<8x16x8xbf16>
    %81 = vector.extract_strided_slice %61 {offsets = [0, 0], sizes = [128, 8], strides = [1, 1]} : vector<128x32xf32> to vector<128x8xf32>
    %82 = vector.shape_cast %81 : vector<128x8xf32> to vector<8x16x8xf32>
    %83 = arith.truncf %82 : vector<8x16x8xf32> to vector<8x16x8xbf16>
    %84 = vector.extract_strided_slice %66 {offsets = [0, 0], sizes = [128, 8], strides = [1, 1]} : vector<128x32xf32> to vector<128x8xf32>
    %85 = vector.shape_cast %84 : vector<128x8xf32> to vector<8x16x8xf32>
    %86 = arith.truncf %85 : vector<8x16x8xf32> to vector<8x16x8xbf16>
    %87 = vector.extract_strided_slice %71 {offsets = [0, 0], sizes = [128, 8], strides = [1, 1]} : vector<128x32xf32> to vector<128x8xf32>
    %88 = vector.shape_cast %87 : vector<128x8xf32> to vector<8x16x8xf32>
    %89 = arith.truncf %88 : vector<8x16x8xf32> to vector<8x16x8xbf16>
    %90 = vector.extract_strided_slice %76 {offsets = [0, 0], sizes = [128, 8], strides = [1, 1]} : vector<128x32xf32> to vector<128x8xf32>
    %91 = vector.shape_cast %90 : vector<128x8xf32> to vector<8x16x8xf32>
    %92 = arith.truncf %91 : vector<8x16x8xf32> to vector<8x16x8xbf16>
    %93 = vector.extract_strided_slice %77 {offsets = [0, 0, 0, 0], sizes = [4, 1, 16, 16], strides = [1, 1, 1, 1]} : vector<4x4x16x16xf32> to vector<4x1x16x16xf32>
    %94 = vector.shape_cast %93 : vector<4x1x16x16xf32> to vector<4x16x16xf32>
    "tpu.trace_start"() <{level = 10 : i32, message = "wnd,wmd->wnm"}> : () -> ()
    %cst_47 = arith.constant dense<0.000000e+00> : vector<8x16x16xf32>
    %95 = tpu.matmul %80, %83, %cst_47 {dimension_numbers = #tpu.dot_dimension_numbers<[2], [2], [1], [1], [0, 0, 0, 1, 1, 1], [0], [0]>} : vector<8x16x8xbf16>, vector<8x16x8xbf16>, vector<8x16x16xf32> -> vector<8x16x16xf32>
    "tpu.trace_stop"() : () -> ()
    %96 = vector.shape_cast %95 : vector<8x16x16xf32> to vector<2x4x16x16xf32>
    %97 = vector.shape_cast %94 : vector<4x16x16xf32> to vector<1x4x16x16xf32>
    %98 = vector.broadcast %97 : vector<1x4x16x16xf32> to vector<2x4x16x16xf32>
    %99 = arith.addf %96, %98 : vector<2x4x16x16xf32>
    %100 = vector.shape_cast %99 : vector<2x4x16x16xf32> to vector<8x16x16xf32>
    "tpu.trace_start"() <{level = 10 : i32, message = "wnd,wmd->wnm"}> : () -> ()
    %cst_48 = arith.constant dense<0.000000e+00> : vector<8x16x16xf32>
    %101 = tpu.matmul %80, %86, %cst_48 {dimension_numbers = #tpu.dot_dimension_numbers<[2], [2], [1], [1], [0, 0, 0, 1, 1, 1], [0], [0]>} : vector<8x16x8xbf16>, vector<8x16x8xbf16>, vector<8x16x16xf32> -> vector<8x16x16xf32>
    "tpu.trace_stop"() : () -> ()
    %102 = vector.shape_cast %101 : vector<8x16x16xf32> to vector<2x4x16x16xf32>
    %103 = vector.shape_cast %94 : vector<4x16x16xf32> to vector<1x4x16x16xf32>
    %104 = vector.broadcast %103 : vector<1x4x16x16xf32> to vector<2x4x16x16xf32>
    %105 = arith.addf %102, %104 : vector<2x4x16x16xf32>
    %106 = vector.shape_cast %105 : vector<2x4x16x16xf32> to vector<8x16x16xf32>
    %cst_49 = arith.constant dense<0xFF800000> : vector<8x16xf32>
    %107 = vector.multi_reduction <maximumf>, %100, %cst_49 [2] : vector<8x16x16xf32> to vector<8x16xf32>
    %108 = vector.shape_cast %107 : vector<8x16xf32> to vector<8x16x1xf32>
    %cst_50 = arith.constant dense<0xFF800000> : vector<8x16xf32>
    %109 = vector.multi_reduction <maximumf>, %106, %cst_50 [2] : vector<8x16x16xf32> to vector<8x16xf32>
    %110 = vector.shape_cast %109 : vector<8x16xf32> to vector<8x16x1xf32>
    %111 = arith.maximumf %108, %110 : vector<8x16x1xf32>
    %112 = vector.broadcast %111 : vector<8x16x1xf32> to vector<8x16x16xf32>
    %113 = arith.subf %100, %112 : vector<8x16x16xf32>
    %114 = math.exp %113 : vector<8x16x16xf32>
    %115 = vector.broadcast %111 : vector<8x16x1xf32> to vector<8x16x16xf32>
    %116 = arith.subf %106, %115 : vector<8x16x16xf32>
    %117 = math.exp %116 : vector<8x16x16xf32>
    %cst_51 = arith.constant dense<0.000000e+00> : vector<8x16xf32>
    %118 = vector.multi_reduction <add>, %114, %cst_51 [2] : vector<8x16x16xf32> to vector<8x16xf32>
    %119 = vector.shape_cast %118 : vector<8x16xf32> to vector<8x16x1xf32>
    %cst_52 = arith.constant dense<0.000000e+00> : vector<8x16xf32>
    %120 = vector.multi_reduction <add>, %117, %cst_52 [2] : vector<8x16x16xf32> to vector<8x16xf32>
    %121 = vector.shape_cast %120 : vector<8x16xf32> to vector<8x16x1xf32>
    %122 = arith.addf %119, %121 : vector<8x16x1xf32>
    %123 = tpu.reciprocal %122 {approx = true} : vector<8x16x1xf32> -> vector<8x16x1xf32>
    %124 = vector.broadcast %123 : vector<8x16x1xf32> to vector<8x16x16xf32>
    %125 = arith.mulf %114, %124 : vector<8x16x16xf32>
    %126 = arith.truncf %125 : vector<8x16x16xf32> to vector<8x16x16xbf16>
    %127 = vector.broadcast %123 : vector<8x16x1xf32> to vector<8x16x16xf32>
    %128 = arith.mulf %117, %127 : vector<8x16x16xf32>
    %129 = arith.truncf %128 : vector<8x16x16xf32> to vector<8x16x16xbf16>
    "tpu.trace_start"() <{level = 10 : i32, message = "wnm,wmd->wnd"}> : () -> ()
    %cst_53 = arith.constant dense<0.000000e+00> : vector<8x16x8xf32>
    %130 = tpu.matmul %126, %89, %cst_53 {dimension_numbers = #tpu.dot_dimension_numbers<[2], [1], [1], [2], [0, 0, 0, 1, 1, 2], [0], [0]>} : vector<8x16x16xbf16>, vector<8x16x8xbf16>, vector<8x16x8xf32> -> vector<8x16x8xf32>
    %cst_54 = arith.constant dense<0.000000e+00> : vector<8x16x8xf32>
    %131 = tpu.matmul %129, %92, %cst_54 {dimension_numbers = #tpu.dot_dimension_numbers<[2], [1], [1], [2], [0, 0, 0, 1, 1, 2], [0], [0]>} : vector<8x16x16xbf16>, vector<8x16x8xbf16>, vector<8x16x8xf32> -> vector<8x16x8xf32>
    "tpu.trace_stop"() : () -> ()
    %132 = arith.addf %130, %131 : vector<8x16x8xf32>
    %c0_55 = arith.constant 0 : index
    %c0_56 = arith.constant 0 : index
    %c0_57 = arith.constant 0 : index
    %133 = vector.load %arg15[%c0_55, %c0_56, %c0_57] : memref<8x16x32xf32, #tpu.memory_space<vmem>>, vector<8x16x8xf32>
    tpu.vector_store %arg15[%c0_55, %c0_56, %c0_57], %132 {strides = array<i32>} : memref<8x16x32xf32, #tpu.memory_space<vmem>>, vector<8x16x8xf32>,
    %134 = vector.extract_strided_slice %56 {offsets = [0, 8], sizes = [128, 8], strides = [1, 1]} : vector<128x32xf32> to vector<128x8xf32>
    %135 = vector.shape_cast %134 : vector<128x8xf32> to vector<8x16x8xf32>
    %136 = arith.truncf %135 : vector<8x16x8xf32> to vector<8x16x8xbf16>
    %137 = vector.extract_strided_slice %61 {offsets = [0, 8], sizes = [128, 8], strides = [1, 1]} : vector<128x32xf32> to vector<128x8xf32>
    %138 = vector.shape_cast %137 : vector<128x8xf32> to vector<8x16x8xf32>
    %139 = arith.truncf %138 : vector<8x16x8xf32> to vector<8x16x8xbf16>
    %140 = vector.extract_strided_slice %66 {offsets = [0, 8], sizes = [128, 8], strides = [1, 1]} : vector<128x32xf32> to vector<128x8xf32>
    %141 = vector.shape_cast %140 : vector<128x8xf32> to vector<8x16x8xf32>
    %142 = arith.truncf %141 : vector<8x16x8xf32> to vector<8x16x8xbf16>
    %143 = vector.extract_strided_slice %71 {offsets = [0, 8], sizes = [128, 8], strides = [1, 1]} : vector<128x32xf32> to vector<128x8xf32>
    %144 = vector.shape_cast %143 : vector<128x8xf32> to vector<8x16x8xf32>
    %145 = arith.truncf %144 : vector<8x16x8xf32> to vector<8x16x8xbf16>
    %146 = vector.extract_strided_slice %76 {offsets = [0, 8], sizes = [128, 8], strides = [1, 1]} : vector<128x32xf32> to vector<128x8xf32>
    %147 = vector.shape_cast %146 : vector<128x8xf32> to vector<8x16x8xf32>
    %148 = arith.truncf %147 : vector<8x16x8xf32> to vector<8x16x8xbf16>
    %149 = vector.extract_strided_slice %77 {offsets = [0, 1, 0, 0], sizes = [4, 1, 16, 16], strides = [1, 1, 1, 1]} : vector<4x4x16x16xf32> to vector<4x1x16x16xf32>
    %150 = vector.shape_cast %149 : vector<4x1x16x16xf32> to vector<4x16x16xf32>
    "tpu.trace_start"() <{level = 10 : i32, message = "wnd,wmd->wnm"}> : () -> ()
    %cst_58 = arith.constant dense<0.000000e+00> : vector<8x16x16xf32>
    %151 = tpu.matmul %136, %139, %cst_58 {dimension_numbers = #tpu.dot_dimension_numbers<[2], [2], [1], [1], [0, 0, 0, 1, 1, 1], [0], [0]>} : vector<8x16x8xbf16>, vector<8x16x8xbf16>, vector<8x16x16xf32> -> vector<8x16x16xf32>
    "tpu.trace_stop"() : () -> ()
    %152 = vector.shape_cast %151 : vector<8x16x16xf32> to vector<2x4x16x16xf32>
    %153 = vector.shape_cast %150 : vector<4x16x16xf32> to vector<1x4x16x16xf32>
    %154 = vector.broadcast %153 : vector<1x4x16x16xf32> to vector<2x4x16x16xf32>
    %155 = arith.addf %152, %154 : vector<2x4x16x16xf32>
    %156 = vector.shape_cast %155 : vector<2x4x16x16xf32> to vector<8x16x16xf32>
    "tpu.trace_start"() <{level = 10 : i32, message = "wnd,wmd->wnm"}> : () -> ()
    %cst_59 = arith.constant dense<0.000000e+00> : vector<8x16x16xf32>
    %157 = tpu.matmul %136, %142, %cst_59 {dimension_numbers = #tpu.dot_dimension_numbers<[2], [2], [1], [1], [0, 0, 0, 1, 1, 1], [0], [0]>} : vector<8x16x8xbf16>, vector<8x16x8xbf16>, vector<8x16x16xf32> -> vector<8x16x16xf32>
    "tpu.trace_stop"() : () -> ()
    %158 = vector.shape_cast %157 : vector<8x16x16xf32> to vector<2x4x16x16xf32>
    %159 = vector.shape_cast %150 : vector<4x16x16xf32> to vector<1x4x16x16xf32>
    %160 = vector.broadcast %159 : vector<1x4x16x16xf32> to vector<2x4x16x16xf32>
    %161 = arith.addf %158, %160 : vector<2x4x16x16xf32>
    %162 = vector.shape_cast %161 : vector<2x4x16x16xf32> to vector<8x16x16xf32>
    %cst_60 = arith.constant dense<0xFF800000> : vector<8x16xf32>
    %163 = vector.multi_reduction <maximumf>, %156, %cst_60 [2] : vector<8x16x16xf32> to vector<8x16xf32>
    %164 = vector.shape_cast %163 : vector<8x16xf32> to vector<8x16x1xf32>
    %cst_61 = arith.constant dense<0xFF800000> : vector<8x16xf32>
    %165 = vector.multi_reduction <maximumf>, %162, %cst_61 [2] : vector<8x16x16xf32> to vector<8x16xf32>
    %166 = vector.shape_cast %165 : vector<8x16xf32> to vector<8x16x1xf32>
    %167 = arith.maximumf %164, %166 : vector<8x16x1xf32>
    %168 = vector.broadcast %167 : vector<8x16x1xf32> to vector<8x16x16xf32>
    %169 = arith.subf %156, %168 : vector<8x16x16xf32>
    %170 = math.exp %169 : vector<8x16x16xf32>
    %171 = vector.broadcast %167 : vector<8x16x1xf32> to vector<8x16x16xf32>
    %172 = arith.subf %162, %171 : vector<8x16x16xf32>
    %173 = math.exp %172 : vector<8x16x16xf32>
    %cst_62 = arith.constant dense<0.000000e+00> : vector<8x16xf32>
    %174 = vector.multi_reduction <add>, %170, %cst_62 [2] : vector<8x16x16xf32> to vector<8x16xf32>
    %175 = vector.shape_cast %174 : vector<8x16xf32> to vector<8x16x1xf32>
    %cst_63 = arith.constant dense<0.000000e+00> : vector<8x16xf32>
    %176 = vector.multi_reduction <add>, %173, %cst_63 [2] : vector<8x16x16xf32> to vector<8x16xf32>
    %177 = vector.shape_cast %176 : vector<8x16xf32> to vector<8x16x1xf32>
    %178 = arith.addf %175, %177 : vector<8x16x1xf32>
    %179 = tpu.reciprocal %178 {approx = true} : vector<8x16x1xf32> -> vector<8x16x1xf32>
    %180 = vector.broadcast %179 : vector<8x16x1xf32> to vector<8x16x16xf32>
    %181 = arith.mulf %170, %180 : vector<8x16x16xf32>
    %182 = arith.truncf %181 : vector<8x16x16xf32> to vector<8x16x16xbf16>
    %183 = vector.broadcast %179 : vector<8x16x1xf32> to vector<8x16x16xf32>
    %184 = arith.mulf %173, %183 : vector<8x16x16xf32>
    %185 = arith.truncf %184 : vector<8x16x16xf32> to vector<8x16x16xbf16>
    "tpu.trace_start"() <{level = 10 : i32, message = "wnm,wmd->wnd"}> : () -> ()
    %cst_64 = arith.constant dense<0.000000e+00> : vector<8x16x8xf32>
    %186 = tpu.matmul %182, %145, %cst_64 {dimension_numbers = #tpu.dot_dimension_numbers<[2], [1], [1], [2], [0, 0, 0, 1, 1, 2], [0], [0]>} : vector<8x16x16xbf16>, vector<8x16x8xbf16>, vector<8x16x8xf32> -> vector<8x16x8xf32>
    %cst_65 = arith.constant dense<0.000000e+00> : vector<8x16x8xf32>
    %187 = tpu.matmul %185, %148, %cst_65 {dimension_numbers = #tpu.dot_dimension_numbers<[2], [1], [1], [2], [0, 0, 0, 1, 1, 2], [0], [0]>} : vector<8x16x16xbf16>, vector<8x16x8xbf16>, vector<8x16x8xf32> -> vector<8x16x8xf32>
    "tpu.trace_stop"() : () -> ()
    %188 = arith.addf %186, %187 : vector<8x16x8xf32>
    %c0_66 = arith.constant 0 : index
    %c0_67 = arith.constant 0 : index
    %c8 = arith.constant 8 : index
    %189 = vector.load %arg15[%c0_66, %c0_67, %c8] : memref<8x16x32xf32, #tpu.memory_space<vmem>>, vector<8x16x8xf32>
    tpu.vector_store %arg15[%c0_66, %c0_67, %c8], %188 {strides = array<i32>} : memref<8x16x32xf32, #tpu.memory_space<vmem>>, vector<8x16x8xf32>,
    %190 = vector.extract_strided_slice %56 {offsets = [0, 16], sizes = [128, 8], strides = [1, 1]} : vector<128x32xf32> to vector<128x8xf32>
    %191 = vector.shape_cast %190 : vector<128x8xf32> to vector<8x16x8xf32>
    %192 = arith.truncf %191 : vector<8x16x8xf32> to vector<8x16x8xbf16>
    %193 = vector.extract_strided_slice %61 {offsets = [0, 16], sizes = [128, 8], strides = [1, 1]} : vector<128x32xf32> to vector<128x8xf32>
    %194 = vector.shape_cast %193 : vector<128x8xf32> to vector<8x16x8xf32>
    %195 = arith.truncf %194 : vector<8x16x8xf32> to vector<8x16x8xbf16>
    %196 = vector.extract_strided_slice %66 {offsets = [0, 16], sizes = [128, 8], strides = [1, 1]} : vector<128x32xf32> to vector<128x8xf32>
    %197 = vector.shape_cast %196 : vector<128x8xf32> to vector<8x16x8xf32>
    %198 = arith.truncf %197 : vector<8x16x8xf32> to vector<8x16x8xbf16>
    %199 = vector.extract_strided_slice %71 {offsets = [0, 16], sizes = [128, 8], strides = [1, 1]} : vector<128x32xf32> to vector<128x8xf32>
    %200 = vector.shape_cast %199 : vector<128x8xf32> to vector<8x16x8xf32>
    %201 = arith.truncf %200 : vector<8x16x8xf32> to vector<8x16x8xbf16>
    %202 = vector.extract_strided_slice %76 {offsets = [0, 16], sizes = [128, 8], strides = [1, 1]} : vector<128x32xf32> to vector<128x8xf32>
    %203 = vector.shape_cast %202 : vector<128x8xf32> to vector<8x16x8xf32>
    %204 = arith.truncf %203 : vector<8x16x8xf32> to vector<8x16x8xbf16>
    %205 = vector.extract_strided_slice %77 {offsets = [0, 2, 0, 0], sizes = [4, 1, 16, 16], strides = [1, 1, 1, 1]} : vector<4x4x16x16xf32> to vector<4x1x16x16xf32>
    %206 = vector.shape_cast %205 : vector<4x1x16x16xf32> to vector<4x16x16xf32>
    "tpu.trace_start"() <{level = 10 : i32, message = "wnd,wmd->wnm"}> : () -> ()
    %cst_68 = arith.constant dense<0.000000e+00> : vector<8x16x16xf32>
    %207 = tpu.matmul %192, %195, %cst_68 {dimension_numbers = #tpu.dot_dimension_numbers<[2], [2], [1], [1], [0, 0, 0, 1, 1, 1], [0], [0]>} : vector<8x16x8xbf16>, vector<8x16x8xbf16>, vector<8x16x16xf32> -> vector<8x16x16xf32>
    "tpu.trace_stop"() : () -> ()
    %208 = vector.shape_cast %207 : vector<8x16x16xf32> to vector<2x4x16x16xf32>
    %209 = vector.shape_cast %206 : vector<4x16x16xf32> to vector<1x4x16x16xf32>
    %210 = vector.broadcast %209 : vector<1x4x16x16xf32> to vector<2x4x16x16xf32>
    %211 = arith.addf %208, %210 : vector<2x4x16x16xf32>
    %212 = vector.shape_cast %211 : vector<2x4x16x16xf32> to vector<8x16x16xf32>
    "tpu.trace_start"() <{level = 10 : i32, message = "wnd,wmd->wnm"}> : () -> ()
    %cst_69 = arith.constant dense<0.000000e+00> : vector<8x16x16xf32>
    %213 = tpu.matmul %192, %198, %cst_69 {dimension_numbers = #tpu.dot_dimension_numbers<[2], [2], [1], [1], [0, 0, 0, 1, 1, 1], [0], [0]>} : vector<8x16x8xbf16>, vector<8x16x8xbf16>, vector<8x16x16xf32> -> vector<8x16x16xf32>
    "tpu.trace_stop"() : () -> ()
    %214 = vector.shape_cast %213 : vector<8x16x16xf32> to vector<2x4x16x16xf32>
    %215 = vector.shape_cast %206 : vector<4x16x16xf32> to vector<1x4x16x16xf32>
    %216 = vector.broadcast %215 : vector<1x4x16x16xf32> to vector<2x4x16x16xf32>
    %217 = arith.addf %214, %216 : vector<2x4x16x16xf32>
    %218 = vector.shape_cast %217 : vector<2x4x16x16xf32> to vector<8x16x16xf32>
    %cst_70 = arith.constant dense<0xFF800000> : vector<8x16xf32>
    %219 = vector.multi_reduction <maximumf>, %212, %cst_70 [2] : vector<8x16x16xf32> to vector<8x16xf32>
    %220 = vector.shape_cast %219 : vector<8x16xf32> to vector<8x16x1xf32>
    %cst_71 = arith.constant dense<0xFF800000> : vector<8x16xf32>
    %221 = vector.multi_reduction <maximumf>, %218, %cst_71 [2] : vector<8x16x16xf32> to vector<8x16xf32>
    %222 = vector.shape_cast %221 : vector<8x16xf32> to vector<8x16x1xf32>
    %223 = arith.maximumf %220, %222 : vector<8x16x1xf32>
    %224 = vector.broadcast %223 : vector<8x16x1xf32> to vector<8x16x16xf32>
    %225 = arith.subf %212, %224 : vector<8x16x16xf32>
    %226 = math.exp %225 : vector<8x16x16xf32>
    %227 = vector.broadcast %223 : vector<8x16x1xf32> to vector<8x16x16xf32>
    %228 = arith.subf %218, %227 : vector<8x16x16xf32>
    %229 = math.exp %228 : vector<8x16x16xf32>
    %cst_72 = arith.constant dense<0.000000e+00> : vector<8x16xf32>
    %230 = vector.multi_reduction <add>, %226, %cst_72 [2] : vector<8x16x16xf32> to vector<8x16xf32>
    %231 = vector.shape_cast %230 : vector<8x16xf32> to vector<8x16x1xf32>
    %cst_73 = arith.constant dense<0.000000e+00> : vector<8x16xf32>
    %232 = vector.multi_reduction <add>, %229, %cst_73 [2] : vector<8x16x16xf32> to vector<8x16xf32>
    %233 = vector.shape_cast %232 : vector<8x16xf32> to vector<8x16x1xf32>
    %234 = arith.addf %231, %233 : vector<8x16x1xf32>
    %235 = tpu.reciprocal %234 {approx = true} : vector<8x16x1xf32> -> vector<8x16x1xf32>
    %236 = vector.broadcast %235 : vector<8x16x1xf32> to vector<8x16x16xf32>
    %237 = arith.mulf %226, %236 : vector<8x16x16xf32>
    %238 = arith.truncf %237 : vector<8x16x16xf32> to vector<8x16x16xbf16>
    %239 = vector.broadcast %235 : vector<8x16x1xf32> to vector<8x16x16xf32>
    %240 = arith.mulf %229, %239 : vector<8x16x16xf32>
    %241 = arith.truncf %240 : vector<8x16x16xf32> to vector<8x16x16xbf16>
    "tpu.trace_start"() <{level = 10 : i32, message = "wnm,wmd->wnd"}> : () -> ()
    %cst_74 = arith.constant dense<0.000000e+00> : vector<8x16x8xf32>
    %242 = tpu.matmul %238, %201, %cst_74 {dimension_numbers = #tpu.dot_dimension_numbers<[2], [1], [1], [2], [0, 0, 0, 1, 1, 2], [0], [0]>} : vector<8x16x16xbf16>, vector<8x16x8xbf16>, vector<8x16x8xf32> -> vector<8x16x8xf32>
    %cst_75 = arith.constant dense<0.000000e+00> : vector<8x16x8xf32>
    %243 = tpu.matmul %241, %204, %cst_75 {dimension_numbers = #tpu.dot_dimension_numbers<[2], [1], [1], [2], [0, 0, 0, 1, 1, 2], [0], [0]>} : vector<8x16x16xbf16>, vector<8x16x8xbf16>, vector<8x16x8xf32> -> vector<8x16x8xf32>
    "tpu.trace_stop"() : () -> ()
    %244 = arith.addf %242, %243 : vector<8x16x8xf32>
    %c0_76 = arith.constant 0 : index
    %c0_77 = arith.constant 0 : index
    %c16 = arith.constant 16 : index
    %245 = vector.load %arg15[%c0_76, %c0_77, %c16] : memref<8x16x32xf32, #tpu.memory_space<vmem>>, vector<8x16x8xf32>
    tpu.vector_store %arg15[%c0_76, %c0_77, %c16], %244 {strides = array<i32>} : memref<8x16x32xf32, #tpu.memory_space<vmem>>, vector<8x16x8xf32>,
    %246 = vector.extract_strided_slice %56 {offsets = [0, 24], sizes = [128, 8], strides = [1, 1]} : vector<128x32xf32> to vector<128x8xf32>
    %247 = vector.shape_cast %246 : vector<128x8xf32> to vector<8x16x8xf32>
    %248 = arith.truncf %247 : vector<8x16x8xf32> to vector<8x16x8xbf16>
    %249 = vector.extract_strided_slice %61 {offsets = [0, 24], sizes = [128, 8], strides = [1, 1]} : vector<128x32xf32> to vector<128x8xf32>
    %250 = vector.shape_cast %249 : vector<128x8xf32> to vector<8x16x8xf32>
    %251 = arith.truncf %250 : vector<8x16x8xf32> to vector<8x16x8xbf16>
    %252 = vector.extract_strided_slice %66 {offsets = [0, 24], sizes = [128, 8], strides = [1, 1]} : vector<128x32xf32> to vector<128x8xf32>
    %253 = vector.shape_cast %252 : vector<128x8xf32> to vector<8x16x8xf32>
    %254 = arith.truncf %253 : vector<8x16x8xf32> to vector<8x16x8xbf16>
    %255 = vector.extract_strided_slice %71 {offsets = [0, 24], sizes = [128, 8], strides = [1, 1]} : vector<128x32xf32> to vector<128x8xf32>
    %256 = vector.shape_cast %255 : vector<128x8xf32> to vector<8x16x8xf32>
    %257 = arith.truncf %256 : vector<8x16x8xf32> to vector<8x16x8xbf16>
    %258 = vector.extract_strided_slice %76 {offsets = [0, 24], sizes = [128, 8], strides = [1, 1]} : vector<128x32xf32> to vector<128x8xf32>
    %259 = vector.shape_cast %258 : vector<128x8xf32> to vector<8x16x8xf32>
    %260 = arith.truncf %259 : vector<8x16x8xf32> to vector<8x16x8xbf16>
    %261 = vector.extract_strided_slice %77 {offsets = [0, 3, 0, 0], sizes = [4, 1, 16, 16], strides = [1, 1, 1, 1]} : vector<4x4x16x16xf32> to vector<4x1x16x16xf32>
    %262 = vector.shape_cast %261 : vector<4x1x16x16xf32> to vector<4x16x16xf32>
    "tpu.trace_start"() <{level = 10 : i32, message = "wnd,wmd->wnm"}> : () -> ()
    %cst_78 = arith.constant dense<0.000000e+00> : vector<8x16x16xf32>
    %263 = tpu.matmul %248, %251, %cst_78 {dimension_numbers = #tpu.dot_dimension_numbers<[2], [2], [1], [1], [0, 0, 0, 1, 1, 1], [0], [0]>} : vector<8x16x8xbf16>, vector<8x16x8xbf16>, vector<8x16x16xf32> -> vector<8x16x16xf32>
    "tpu.trace_stop"() : () -> ()
    %264 = vector.shape_cast %263 : vector<8x16x16xf32> to vector<2x4x16x16xf32>
    %265 = vector.shape_cast %262 : vector<4x16x16xf32> to vector<1x4x16x16xf32>
    %266 = vector.broadcast %265 : vector<1x4x16x16xf32> to vector<2x4x16x16xf32>
    %267 = arith.addf %264, %266 : vector<2x4x16x16xf32>
    %268 = vector.shape_cast %267 : vector<2x4x16x16xf32> to vector<8x16x16xf32>
    "tpu.trace_start"() <{level = 10 : i32, message = "wnd,wmd->wnm"}> : () -> ()
    %cst_79 = arith.constant dense<0.000000e+00> : vector<8x16x16xf32>
    %269 = tpu.matmul %248, %254, %cst_79 {dimension_numbers = #tpu.dot_dimension_numbers<[2], [2], [1], [1], [0, 0, 0, 1, 1, 1], [0], [0]>} : vector<8x16x8xbf16>, vector<8x16x8xbf16>, vector<8x16x16xf32> -> vector<8x16x16xf32>
    "tpu.trace_stop"() : () -> ()
    %270 = vector.shape_cast %269 : vector<8x16x16xf32> to vector<2x4x16x16xf32>
    %271 = vector.shape_cast %262 : vector<4x16x16xf32> to vector<1x4x16x16xf32>
    %272 = vector.broadcast %271 : vector<1x4x16x16xf32> to vector<2x4x16x16xf32>
    %273 = arith.addf %270, %272 : vector<2x4x16x16xf32>
    %274 = vector.shape_cast %273 : vector<2x4x16x16xf32> to vector<8x16x16xf32>
    %cst_80 = arith.constant dense<0xFF800000> : vector<8x16xf32>
    %275 = vector.multi_reduction <maximumf>, %268, %cst_80 [2] : vector<8x16x16xf32> to vector<8x16xf32>
    %276 = vector.shape_cast %275 : vector<8x16xf32> to vector<8x16x1xf32>
    %cst_81 = arith.constant dense<0xFF800000> : vector<8x16xf32>
    %277 = vector.multi_reduction <maximumf>, %274, %cst_81 [2] : vector<8x16x16xf32> to vector<8x16xf32>
    %278 = vector.shape_cast %277 : vector<8x16xf32> to vector<8x16x1xf32>
    %279 = arith.maximumf %276, %278 : vector<8x16x1xf32>
    %280 = vector.broadcast %279 : vector<8x16x1xf32> to vector<8x16x16xf32>
    %281 = arith.subf %268, %280 : vector<8x16x16xf32>
    %282 = math.exp %281 : vector<8x16x16xf32>
    %283 = vector.broadcast %279 : vector<8x16x1xf32> to vector<8x16x16xf32>
    %284 = arith.subf %274, %283 : vector<8x16x16xf32>
    %285 = math.exp %284 : vector<8x16x16xf32>
    %cst_82 = arith.constant dense<0.000000e+00> : vector<8x16xf32>
    %286 = vector.multi_reduction <add>, %282, %cst_82 [2] : vector<8x16x16xf32> to vector<8x16xf32>
    %287 = vector.shape_cast %286 : vector<8x16xf32> to vector<8x16x1xf32>
    %cst_83 = arith.constant dense<0.000000e+00> : vector<8x16xf32>
    %288 = vector.multi_reduction <add>, %285, %cst_83 [2] : vector<8x16x16xf32> to vector<8x16xf32>
    %289 = vector.shape_cast %288 : vector<8x16xf32> to vector<8x16x1xf32>
    %290 = arith.addf %287, %289 : vector<8x16x1xf32>
    %291 = tpu.reciprocal %290 {approx = true} : vector<8x16x1xf32> -> vector<8x16x1xf32>
    %292 = vector.broadcast %291 : vector<8x16x1xf32> to vector<8x16x16xf32>
    %293 = arith.mulf %282, %292 : vector<8x16x16xf32>
    %294 = arith.truncf %293 : vector<8x16x16xf32> to vector<8x16x16xbf16>
    %295 = vector.broadcast %291 : vector<8x16x1xf32> to vector<8x16x16xf32>
    %296 = arith.mulf %285, %295 : vector<8x16x16xf32>
    %297 = arith.truncf %296 : vector<8x16x16xf32> to vector<8x16x16xbf16>
    "tpu.trace_start"() <{level = 10 : i32, message = "wnm,wmd->wnd"}> : () -> ()
    %cst_84 = arith.constant dense<0.000000e+00> : vector<8x16x8xf32>
    %298 = tpu.matmul %294, %257, %cst_84 {dimension_numbers = #tpu.dot_dimension_numbers<[2], [1], [1], [2], [0, 0, 0, 1, 1, 2], [0], [0]>} : vector<8x16x16xbf16>, vector<8x16x8xbf16>, vector<8x16x8xf32> -> vector<8x16x8xf32>
    %cst_85 = arith.constant dense<0.000000e+00> : vector<8x16x8xf32>
    %299 = tpu.matmul %297, %260, %cst_85 {dimension_numbers = #tpu.dot_dimension_numbers<[2], [1], [1], [2], [0, 0, 0, 1, 1, 2], [0], [0]>} : vector<8x16x16xbf16>, vector<8x16x8xbf16>, vector<8x16x8xf32> -> vector<8x16x8xf32>
    "tpu.trace_stop"() : () -> ()
    %300 = arith.addf %298, %299 : vector<8x16x8xf32>
    %c0_86 = arith.constant 0 : index
    %c0_87 = arith.constant 0 : index
    %c24 = arith.constant 24 : index
    %301 = vector.load %arg15[%c0_86, %c0_87, %c24] : memref<8x16x32xf32, #tpu.memory_space<vmem>>, vector<8x16x8xf32>
    tpu.vector_store %arg15[%c0_86, %c0_87, %c24], %300 {strides = array<i32>} : memref<8x16x32xf32, #tpu.memory_space<vmem>>, vector<8x16x8xf32>,
    %c0_88 = arith.constant 0 : index
    %c0_89 = arith.constant 0 : index
    %c0_90 = arith.constant 0 : index
    %302 = vector.load %arg15[%c0_88, %c0_89, %c0_90] : memref<8x16x32xf32, #tpu.memory_space<vmem>>, vector<8x16x32xf32>
    %303 = vector.shape_cast %302 : vector<8x16x32xf32> to vector<128x32xf32>
    %304 = arith.truncf %303 : vector<128x32xf32> to vector<128x32xbf16>
    %c0_91 = arith.constant 0 : index
    %c0_92 = arith.constant 0 : index
    %305 = vector.load %arg12[%c0_91, %c0_92] : memref<32x32xbf16, #tpu.memory_space<vmem>>, vector<32x32xbf16>
    %cst_93 = arith.constant dense<0.000000e+00> : vector<128x32xf32>
    %306 = tpu.matmul %304, %305, %cst_93 {dimension_numbers = #tpu.dot_dimension_numbers<[1], [0], [0], [1], [0, 0, 1, 1], [], []>} : vector<128x32xbf16>, vector<32x32xbf16>, vector<128x32xf32> -> vector<128x32xf32>
    %c0_94 = arith.constant 0 : index
    %c0_95 = arith.constant 0 : index
    %307 = vector.load %arg13[%c0_94, %c0_95] : memref<1x32xf32, #tpu.memory_space<vmem>>, vector<1x32xf32>
    %308 = vector.broadcast %307 : vector<1x32xf32> to vector<128x32xf32>
    %309 = arith.addf %306, %308 : vector<128x32xf32>
    %310 = vector.shape_cast %309 : vector<128x32xf32> to vector<8x16x32xf32>
    %c0_96 = arith.constant 0 : index
    %c0_97 = arith.constant 0 : index
    %c0_98 = arith.constant 0 : index
    %311 = vector.load %arg14[%c0_96, %c0_97, %c0_98] : memref<8x16x32xf32, #tpu.memory_space<vmem>>, vector<8x16x32xf32>
    tpu.vector_store %arg14[%c0_96, %c0_97, %c0_98], %310 {strides = array<i32>} : memref<8x16x32xf32, #tpu.memory_space<vmem>>, vector<8x16x32xf32>,
    return
  }
  func.func @transform_0(%arg0: i32) -> (i32, i32, i32) {
    %c0_i32 = arith.constant 0 : i32
    %c0_i32_0 = arith.constant 0 : i32
    %c0_i32_1 = arith.constant 0 : i32
    return %arg0, %c0_i32, %c0_i32_0 : i32, i32, i32
  }
  func.func @transform_1(%arg0: i32) -> (i32, i32, i32) {
    %c0_i32 = arith.constant 0 : i32
    %c0_i32_0 = arith.constant 0 : i32
    %c0_i32_1 = arith.constant 0 : i32
    return %arg0, %c0_i32, %c0_i32_0 : i32, i32, i32
  }
  func.func @transform_2(%arg0: i32) -> (i32, i32, i32, i32) {
    %c0_i32 = arith.constant 0 : i32
    %c0_i32_0 = arith.constant 0 : i32
    %c0_i32_1 = arith.constant 0 : i32
    %c0_i32_2 = arith.constant 0 : i32
    %c0_i32_3 = arith.constant 0 : i32
    return %c0_i32, %c0_i32_0, %c0_i32_1, %c0_i32_2 : i32, i32, i32, i32
  }
  func.func @transform_3(%arg0: i32) -> (i32, i32) {
    %c0_i32 = arith.constant 0 : i32
    %c0_i32_0 = arith.constant 0 : i32
    %c0_i32_1 = arith.constant 0 : i32
    return %c0_i32, %c0_i32_0 : i32, i32
  }
  func.func @transform_4(%arg0: i32) -> (i32, i32) {
    %c0_i32 = arith.constant 0 : i32
    %c0_i32_0 = arith.constant 0 : i32
    %c0_i32_1 = arith.constant 0 : i32
    return %c0_i32, %c0_i32_0 : i32, i32
  }
  func.func @transform_5(%arg0: i32) -> (i32, i32) {
    %c0_i32 = arith.constant 0 : i32
    %c0_i32_0 = arith.constant 0 : i32
    %c0_i32_1 = arith.constant 0 : i32
    return %c0_i32, %c0_i32_0 : i32, i32
  }
  func.func @transform_6(%arg0: i32) -> (i32, i32) {
    %c0_i32 = arith.constant 0 : i32
    %c0_i32_0 = arith.constant 0 : i32
    %c0_i32_1 = arith.constant 0 : i32
    return %c0_i32, %c0_i32_0 : i32, i32
  }
  func.func @transform_7(%arg0: i32) -> (i32, i32) {
    %c0_i32 = arith.constant 0 : i32
    %c0_i32_0 = arith.constant 0 : i32
    %c0_i32_1 = arith.constant 0 : i32
    return %c0_i32, %c0_i32_0 : i32, i32
  }
  func.func @transform_8(%arg0: i32) -> (i32, i32) {
    %c0_i32 = arith.constant 0 : i32
    %c0_i32_0 = arith.constant 0 : i32
    %c0_i32_1 = arith.constant 0 : i32
    return %c0_i32, %c0_i32_0 : i32, i32
  }
  func.func @transform_9(%arg0: i32) -> (i32, i32) {
    %c0_i32 = arith.constant 0 : i32
    %c0_i32_0 = arith.constant 0 : i32
    %c0_i32_1 = arith.constant 0 : i32
    return %c0_i32, %c0_i32_0 : i32, i32
  }
  func.func @transform_10(%arg0: i32) -> (i32, i32) {
    %c0_i32 = arith.constant 0 : i32
    %c0_i32_0 = arith.constant 0 : i32
    %c0_i32_1 = arith.constant 0 : i32
    return %c0_i32, %c0_i32_0 : i32, i32
  }
  func.func @transform_11(%arg0: i32) -> (i32, i32) {
    %c0_i32 = arith.constant 0 : i32
    %c0_i32_0 = arith.constant 0 : i32
    %c0_i32_1 = arith.constant 0 : i32
    return %c0_i32, %c0_i32_0 : i32, i32
  }
  func.func @transform_12(%arg0: i32) -> (i32, i32) {
    %c0_i32 = arith.constant 0 : i32
    %c0_i32_0 = arith.constant 0 : i32
    %c0_i32_1 = arith.constant 0 : i32
    return %c0_i32, %c0_i32_0 : i32, i32
  }
  func.func @transform_13(%arg0: i32) -> (i32, i32, i32) {
    %c0_i32 = arith.constant 0 : i32
    %c0_i32_0 = arith.constant 0 : i32
    %c0_i32_1 = arith.constant 0 : i32
    return %arg0, %c0_i32, %c0_i32_0 : i32, i32, i32
  }
}

module attributes {stable_mosaic.version = 11 : i64} {
  func.func @_mlp_kernel(%arg0: i32, %arg1: memref<128x32xf32, #tpu.memory_space<vmem>>, %arg2: memref<128x32xf32, #tpu.memory_space<vmem>>, %arg3: memref<1x32xf32, #tpu.memory_space<vmem>>, %arg4: memref<1x32xf32, #tpu.memory_space<vmem>>, %arg5: memref<32x128xbf16, #tpu.memory_space<vmem>>, %arg6: memref<1x128xf32, #tpu.memory_space<vmem>>, %arg7: memref<128x32xbf16, #tpu.memory_space<vmem>>, %arg8: memref<1x32xf32, #tpu.memory_space<vmem>>, %arg9: memref<128x32xf32, #tpu.memory_space<vmem>>) attributes {dimension_semantics = [#tpu.dimension_semantics<parallel>], iteration_bounds = array<i64: 1>, scalar_prefetch = 0 : i64, scratch_operands = 0 : i64, tpu.core_type = #tpu.core_type<tc>, window_params = [{transform_indices = @transform_0, window_bounds = array<i64: 128, 32>}, {transform_indices = @transform_1, window_bounds = array<i64: 128, 32>}, {pipeline_mode = #tpu.pipeline_mode<synchronous>, transform_indices = @transform_2, window_bounds = array<i64: 1, 32>}, {pipeline_mode = #tpu.pipeline_mode<synchronous>, transform_indices = @transform_3, window_bounds = array<i64: 1, 32>}, {pipeline_mode = #tpu.pipeline_mode<synchronous>, transform_indices = @transform_4, window_bounds = array<i64: 32, 128>}, {pipeline_mode = #tpu.pipeline_mode<synchronous>, transform_indices = @transform_5, window_bounds = array<i64: 1, 128>}, {pipeline_mode = #tpu.pipeline_mode<synchronous>, transform_indices = @transform_6, window_bounds = array<i64: 128, 32>}, {pipeline_mode = #tpu.pipeline_mode<synchronous>, transform_indices = @transform_7, window_bounds = array<i64: 1, 32>}, {transform_indices = @transform_8, window_bounds = array<i64: 128, 32>}]} {
    %c0 = arith.constant 0 : index
    %c0_0 = arith.constant 0 : index
    %0 = vector.load %arg1[%c0, %c0_0] : memref<128x32xf32, #tpu.memory_space<vmem>>, vector<128x32xf32>
    %c0_1 = arith.constant 0 : index
    %c0_2 = arith.constant 0 : index
    %1 = vector.load %arg2[%c0_1, %c0_2] : memref<128x32xf32, #tpu.memory_space<vmem>>, vector<128x32xf32>
    %2 = arith.addf %0, %1 : vector<128x32xf32>
    %c0_3 = arith.constant 0 : index
    %c0_4 = arith.constant 0 : index
    %3 = vector.load %arg3[%c0_3, %c0_4] : memref<1x32xf32, #tpu.memory_space<vmem>>, vector<1x32xf32>
    %c0_5 = arith.constant 0 : index
    %c0_6 = arith.constant 0 : index
    %4 = vector.load %arg4[%c0_5, %c0_6] : memref<1x32xf32, #tpu.memory_space<vmem>>, vector<1x32xf32>
    %cst = arith.constant dense<0.000000e+00> : vector<128xf32>
    %5 = vector.multi_reduction <add>, %2, %cst [1] : vector<128x32xf32> to vector<128xf32>
    %6 = vector.shape_cast %5 : vector<128xf32> to vector<128x1xf32>
    %cst_7 = arith.constant 3.200000e+01 : f32
    %7 = vector.broadcast %cst_7 : f32 to vector<128x1xf32>
    %8 = arith.divf %6, %7 : vector<128x1xf32>
    %9 = vector.broadcast %8 : vector<128x1xf32> to vector<128x32xf32>
    %10 = arith.subf %2, %9 : vector<128x32xf32>
    %11 = arith.mulf %10, %10 : vector<128x32xf32>
    %cst_8 = arith.constant dense<0.000000e+00> : vector<128xf32>
    %12 = vector.multi_reduction <add>, %11, %cst_8 [1] : vector<128x32xf32> to vector<128xf32>
    %13 = vector.shape_cast %12 : vector<128xf32> to vector<128x1xf32>
    %cst_9 = arith.constant 3.200000e+01 : f32
    %14 = vector.broadcast %cst_9 : f32 to vector<128x1xf32>
    %15 = arith.divf %13, %14 : vector<128x1xf32>
    %16 = vector.broadcast %8 : vector<128x1xf32> to vector<128x32xf32>
    %17 = arith.subf %2, %16 : vector<128x32xf32>
    %cst_10 = arith.constant 9.99999974E-6 : f32
    %18 = vector.broadcast %cst_10 : f32 to vector<128x1xf32>
    %19 = arith.addf %15, %18 : vector<128x1xf32>
    %20 = math.rsqrt %19 : vector<128x1xf32>
    %21 = vector.broadcast %20 : vector<128x1xf32> to vector<128x32xf32>
    %22 = arith.mulf %17, %21 : vector<128x32xf32>
    %23 = vector.broadcast %3 : vector<1x32xf32> to vector<128x32xf32>
    %24 = arith.mulf %22, %23 : vector<128x32xf32>
    %25 = vector.broadcast %4 : vector<1x32xf32> to vector<128x32xf32>
    %26 = arith.addf %24, %25 : vector<128x32xf32>
    %27 = arith.truncf %26 : vector<128x32xf32> to vector<128x32xbf16>
    %c0_11 = arith.constant 0 : index
    %c0_12 = arith.constant 0 : index
    %28 = vector.load %arg5[%c0_11, %c0_12] : memref<32x128xbf16, #tpu.memory_space<vmem>>, vector<32x128xbf16>
    %cst_13 = arith.constant dense<0.000000e+00> : vector<128x128xf32>
    %29 = tpu.matmul %27, %28, %cst_13 {dimension_numbers = #tpu.dot_dimension_numbers<[1], [0], [0], [1], [0, 0, 1, 1], [], []>} : vector<128x32xbf16>, vector<32x128xbf16>, vector<128x128xf32> -> vector<128x128xf32>
    %c0_14 = arith.constant 0 : index
    %c0_15 = arith.constant 0 : index
    %30 = vector.load %arg6[%c0_14, %c0_15] : memref<1x128xf32, #tpu.memory_space<vmem>>, vector<1x128xf32>
    %31 = vector.broadcast %30 : vector<1x128xf32> to vector<128x128xf32>
    %32 = arith.addf %29, %31 : vector<128x128xf32>
    %cst_16 = arith.constant 5.000000e-01 : f32
    %33 = vector.broadcast %cst_16 : f32 to vector<128x128xf32>
    %34 = arith.mulf %33, %32 : vector<128x128xf32>
    %cst_17 = arith.constant 0.707106769 : f32
    %35 = vector.broadcast %cst_17 : f32 to vector<128x128xf32>
    %36 = arith.mulf %32, %35 : vector<128x128xf32>
    %37 = math.erf %36 : vector<128x128xf32>
    %cst_18 = arith.constant 1.000000e+00 : f32
    %38 = vector.broadcast %cst_18 : f32 to vector<128x128xf32>
    %39 = arith.addf %38, %37 : vector<128x128xf32>
    %40 = arith.mulf %34, %39 : vector<128x128xf32>
    %41 = arith.truncf %40 : vector<128x128xf32> to vector<128x128xbf16>
    %c0_19 = arith.constant 0 : index
    %c0_20 = arith.constant 0 : index
    %42 = vector.load %arg7[%c0_19, %c0_20] : memref<128x32xbf16, #tpu.memory_space<vmem>>, vector<128x32xbf16>
    %cst_21 = arith.constant dense<0.000000e+00> : vector<128x32xf32>
    %43 = tpu.matmul %41, %42, %cst_21 {dimension_numbers = #tpu.dot_dimension_numbers<[1], [0], [0], [1], [0, 0, 1, 1], [], []>} : vector<128x128xbf16>, vector<128x32xbf16>, vector<128x32xf32> -> vector<128x32xf32>
    %c0_22 = arith.constant 0 : index
    %c0_23 = arith.constant 0 : index
    %44 = vector.load %arg8[%c0_22, %c0_23] : memref<1x32xf32, #tpu.memory_space<vmem>>, vector<1x32xf32>
    %45 = vector.broadcast %44 : vector<1x32xf32> to vector<128x32xf32>
    %46 = arith.addf %43, %45 : vector<128x32xf32>
    %47 = arith.addf %2, %46 : vector<128x32xf32>
    %c0_24 = arith.constant 0 : index
    %c0_25 = arith.constant 0 : index
    %48 = vector.load %arg9[%c0_24, %c0_25] : memref<128x32xf32, #tpu.memory_space<vmem>>, vector<128x32xf32>
    tpu.vector_store %arg9[%c0_24, %c0_25], %47 {strides = array<i32>} : memref<128x32xf32, #tpu.memory_space<vmem>>, vector<128x32xf32>,
    return
  }
  func.func @transform_0(%arg0: i32) -> (i32, i32) {
    %c0_i32 = arith.constant 0 : i32
    %c0_i32_0 = arith.constant 0 : i32
    return %arg0, %c0_i32 : i32, i32
  }
  func.func @transform_1(%arg0: i32) -> (i32, i32) {
    %c0_i32 = arith.constant 0 : i32
    %c0_i32_0 = arith.constant 0 : i32
    return %arg0, %c0_i32 : i32, i32
  }
  func.func @transform_2(%arg0: i32) -> (i32, i32) {
    %c0_i32 = arith.constant 0 : i32
    %c0_i32_0 = arith.constant 0 : i32
    %c0_i32_1 = arith.constant 0 : i32
    return %c0_i32, %c0_i32_0 : i32, i32
  }
  func.func @transform_3(%arg0: i32) -> (i32, i32) {
    %c0_i32 = arith.constant 0 : i32
    %c0_i32_0 = arith.constant 0 : i32
    %c0_i32_1 = arith.constant 0 : i32
    return %c0_i32, %c0_i32_0 : i32, i32
  }
  func.func @transform_4(%arg0: i32) -> (i32, i32) {
    %c0_i32 = arith.constant 0 : i32
    %c0_i32_0 = arith.constant 0 : i32
    %c0_i32_1 = arith.constant 0 : i32
    return %c0_i32, %c0_i32_0 : i32, i32
  }
  func.func @transform_5(%arg0: i32) -> (i32, i32) {
    %c0_i32 = arith.constant 0 : i32
    %c0_i32_0 = arith.constant 0 : i32
    %c0_i32_1 = arith.constant 0 : i32
    return %c0_i32, %c0_i32_0 : i32, i32
  }
  func.func @transform_6(%arg0: i32) -> (i32, i32) {
    %c0_i32 = arith.constant 0 : i32
    %c0_i32_0 = arith.constant 0 : i32
    %c0_i32_1 = arith.constant 0 : i32
    return %c0_i32, %c0_i32_0 : i32, i32
  }
  func.func @transform_7(%arg0: i32) -> (i32, i32) {
    %c0_i32 = arith.constant 0 : i32
    %c0_i32_0 = arith.constant 0 : i32
    %c0_i32_1 = arith.constant 0 : i32
    return %c0_i32, %c0_i32_0 : i32, i32
  }
  func.func @transform_8(%arg0: i32) -> (i32, i32) {
    %c0_i32 = arith.constant 0 : i32
    %c0_i32_0 = arith.constant 0 : i32
    return %arg0, %c0_i32 : i32, i32
  }
}

</mosaic_0001>

<bundles_post_ra>
// kernel: _lambda_.3
= control target key start
LH: loop header
LB: loop body
LE: loop exit
PB: predicated region body
PF: predicated region fallthrough
CT: control target
= control target key end

     0   :  { %13 = vsyncpa [#allocation3], 0  ;;  %s1801_s0 = inlined_call_operand.hbm [shape: f32[128,32], index: 0, kind: input, shape index: {}]   ;;  %s1802_s1 = inlined_call_operand.hbm [shape: f32[128,32], index: 1, kind: input, shape index: {}]   ;;  %s1803_s2 = inlined_call_operand.hbm [shape: f32[1,32], index: 2, kind: input, shape index: {}]   ;;  %s1804_s3 = inlined_call_operand.hbm [shape: f32[1,32], index: 3, kind: input, shape index: {}]   ;;  %s1805_s4 = inlined_call_operand.hbm [shape: bf16[32,128], index: 4, kind: input, shape index: {}]   ;;  %s1806_s5 = inlined_call_operand.hbm [shape: f32[1,128], index: 5, kind: input, shape index: {}]   ;;  %s1807_s6 = inlined_call_operand.hbm [shape: bf16[128,32], index: 6, kind: input, shape index: {}]   ;;  %s1808_s7 = inlined_call_operand.hbm [shape: f32[1,32], index: 7, kind: input, shape index: {}]   ;;  %s1809_s8 = inlined_call_operand.hbm [shape: f32[128,32], index: 8, kind: output, shape index: {}]  }
   0x1   :  { %14 = vsyncpa [#allocation6], 0 }
   0x2   :  { %15 = vsyncpa [#allocation9], 0 }
   0x3   :  { %16 = vsyncpa [#allocation12], 0 }
   0x4   :  { %17 = vsyncpa [#allocation15], 0 }
   0x5   :  { %18 = vsyncpa [#allocation4], 0  ;;  %s1310_s27 = smov [#allocation5]   ;;  %s1311_s29 = smov [#allocation8]  }
   0x6   :  { %s36_s28 = sshll.u32 %s1310_s27, 4  ;;  %s59_s30 = sshll.u32 %s1311_s29, 4  ;;  %s37_s28 = int_to_ptr.vmem [resolvable:$true] %s36_s28  ;;  %s1368_s30 = int_to_ptr.vmem [resolvable:$true] %s59_s30 }
   0x7   :  { %s1100_s11 = scalar_lea.hbm %s1802_s1, 2048 }
   0x8   :  { %p1101_p0 = scmp.ne.s32.totalorder %s1802_s1, %s1100_s11  ;;  %p1104_p1 = scmp.lt.u32.totalorder %s1100_s11, %s1802_s1 }
   0xa   :  { %p1106_p2 = pnand %p1104_p1, %p1101_p0 }
   0xc   :  { %1109 = shalt.err (!%p1106_p2)
}
   0xd   :  { %s1110_s16 = scalar_lea.vmem %s37_s28, 2048  ;;  %p1115_p4 = scmp.lt.s32.totalorder %s37_s28, %s37_s28 }
   0xe   :  { %p1111_p3 = scmp.ne.s32.totalorder %s37_s28, %s1110_s16  ;;  %p1116_p5 = scmp.lt.s32.totalorder %s1110_s16, %s1110_s16 }
  0x10   :  { %p1117_p6 = por %p1116_p5, %p1115_p4 }
  0x12   :  { %p1118_p7 = pnand %p1117_p6, %p1111_p3 }
  0x14   :  { %1121 = shalt.err (!%p1118_p7)
}
  0x15   :  { %s1312_s17 = smov 128   ;;  %s1313_s18 = smov 8  }
  0x16   :  { %42 = dma.hbm_to_vmem [thread:$0]  %s1802_s1, 2048, %s37_s28, [#allocation6], %s1312_s17, %s1312_s17, %s1313_s18  }
  0x17   :  { %s1122_s23 = scalar_lea.hbm %s1804_s3, 16 }
  0x18   :  { %p1123_p8 = scmp.ne.s32.totalorder %s1804_s3, %s1122_s23  ;;  %p1126_p9 = scmp.lt.u32.totalorder %s1122_s23, %s1804_s3 }
  0x1a   :  { %p1128_p10 = pnand %p1126_p9, %p1123_p8 }
  0x1c   :  { %1131 = shalt.err (!%p1128_p10)
}
  0x1d   :  { %s1132_s29 = scalar_lea.vmem %s1368_s30, 16  ;;  %s1136_s1 = scalar_lea.vmem %s1368_s30, 32 }
  0x1e   :  { %p1133_p11 = scmp.ne.s32.totalorder %s1368_s30, %s1132_s29  ;;  %p1137_p12 = scmp.lt.s32.totalorder %s1368_s30, %s1368_s30 }
  0x1f   :  { %p1138_p13 = scmp.lt.s32.totalorder %s1136_s1, %s1132_s29 }
  0x21   :  { %p1139_p0 = por %p1138_p13, %p1137_p12 }
  0x23   :  { %p1140_p1 = pnand %p1139_p0, %p1133_p11 }
  0x25   :  { %1143 = shalt.err (!%p1140_p1)
}
  0x26   :  { %62 = dma.hbm_to_vmem [thread:$0]  %s1804_s3, 16, %s1368_s30, [#allocation9]  }
  0x27   :  { %s1314_s10 = smov [#allocation11]   ;;  %s1315_s12 = smov [#allocation2]  }
  0x28   :  { %s81_s11 = sshll.u32 %s1314_s10, 4  ;;  %s24_s13 = sshll.u32 %s1315_s12, 4  ;;  %s82_s11 = int_to_ptr.vmem [resolvable:$true] %s81_s11  ;;  %s1403_s13 = int_to_ptr.vmem [resolvable:$true] %s24_s13 }
  0x29   :  { %s1144_s16 = scalar_lea.hbm %s1806_s5, 16 }
  0x2a   :  { %p1145_p2 = scmp.ne.s32.totalorder %s1806_s5, %s1144_s16  ;;  %p1148_p3 = scmp.lt.u32.totalorder %s1144_s16, %s1806_s5 }
  0x2c   :  { %p1150_p4 = pnand %p1148_p3, %p1145_p2 }
  0x2e   :  { %1153 = shalt.err (!%p1150_p4)
}
  0x2f   :  { %s1154_s3 = scalar_lea.vmem %s82_s11, 16  ;;  %s1158_s30 = scalar_lea.vmem %s82_s11, 32 }
  0x30   :  { %p1155_p5 = scmp.ne.s32.totalorder %s82_s11, %s1154_s3  ;;  %p1159_p6 = scmp.lt.s32.totalorder %s82_s11, %s82_s11 }
  0x31   :  { %p1160_p7 = scmp.lt.s32.totalorder %s1158_s30, %s1154_s3 }
  0x33   :  { %p1161_p8 = por %p1160_p7, %p1159_p6 }
  0x35   :  { %p1162_p9 = pnand %p1161_p8, %p1155_p5 }
  0x37   :  { %1165 = shalt.err (!%p1162_p9)
}
  0x38   :  { %84 = dma.hbm_to_vmem [thread:$0]  %s1806_s5, 16, %s82_s11, [#allocation12]  }
  0x39   :  { %s1166_s27 = scalar_lea.hbm %s1801_s0, 2048 }
  0x3a   :  { %p1167_p10 = scmp.ne.s32.totalorder %s1801_s0, %s1166_s27  ;;  %p1170_p11 = scmp.lt.u32.totalorder %s1166_s27, %s1801_s0 }
  0x3c   :  { %p1172_p12 = pnand %p1170_p11, %p1167_p10 }
  0x3e   :  { %1175 = shalt.err (!%p1172_p12)
}
  0x3f   :  { %s1176_s10 = scalar_lea.vmem %s1403_s13, 2048  ;;  %p1181_p0 = scmp.lt.s32.totalorder %s1403_s13, %s1403_s13 }
  0x40   :  { %p1177_p13 = scmp.ne.s32.totalorder %s1403_s13, %s1176_s10  ;;  %p1182_p1 = scmp.lt.s32.totalorder %s1176_s10, %s1176_s10 }
  0x42   :  { %p1183_p2 = por %p1182_p1, %p1181_p0 }
  0x44   :  { %p1184_p3 = pnand %p1183_p2, %p1177_p13 }
  0x46   :  { %1187 = shalt.err (!%p1184_p3)
}
  0x47   :  { %30 = dma.hbm_to_vmem [thread:$0]  %s1801_s0, 2048, %s1403_s13, [#allocation3], %s1312_s17, %s1312_s17, %s1313_s18  }
  0x48   :  { %s1316_s12 = smov [#allocation7]   ;;  %s1317_s15 = smov [#allocation10]  }
  0x49   :  { %s49_s14 = sshll.u32 %s1316_s12, 4  ;;  %s68_s16 = sshll.u32 %s1317_s15, 4  ;;  %s50_s14 = int_to_ptr.vmem [resolvable:$true] %s49_s14  ;;  %s1437_s16 = int_to_ptr.vmem [resolvable:$true] %s68_s16 }
  0x4a   :  { %s1188_s21 = scalar_lea.hbm %s1803_s2, 16 }
  0x4b   :  { %p1189_p4 = scmp.ne.s32.totalorder %s1803_s2, %s1188_s21  ;;  %p1192_p5 = scmp.lt.u32.totalorder %s1188_s21, %s1803_s2 }
  0x4d   :  { %p1194_p6 = pnand %p1192_p5, %p1189_p4 }
  0x4f   :  { %1197 = shalt.err (!%p1194_p6)
}
  0x50   :  { %s1198_s0 = scalar_lea.vmem %s50_s14, 16  ;;  %s1202_s13 = scalar_lea.vmem %s50_s14, 32 }
  0x51   :  { %p1199_p7 = scmp.ne.s32.totalorder %s50_s14, %s1198_s0  ;;  %p1203_p8 = scmp.lt.s32.totalorder %s50_s14, %s50_s14 }
  0x52   :  { %p1204_p9 = scmp.lt.s32.totalorder %s1202_s13, %s1198_s0 }
  0x54   :  { %p1205_p10 = por %p1204_p9, %p1203_p8 }
  0x56   :  { %p1206_p11 = pnand %p1205_p10, %p1199_p7 }
  0x58   :  { %1209 = shalt.err (!%p1206_p11)
}
  0x59   :  { %52 = dma.hbm_to_vmem [thread:$0]  %s1803_s2, 16, %s50_s14, [#allocation6]  }
  0x5a   :  { %s1210_s29 = scalar_lea.hbm %s1805_s4, 256 }
  0x5b   :  { %p1211_p12 = scmp.ne.s32.totalorder %s1805_s4, %s1210_s29  ;;  %p1214_p13 = scmp.lt.u32.totalorder %s1210_s29, %s1805_s4 }
  0x5d   :  { %p1216_p0 = pnand %p1214_p13, %p1211_p12 }
  0x5f   :  { %1219 = shalt.err (!%p1216_p0)
}
  0x60   :  { %s1220_s5 = scalar_lea.vmem %s1437_s16, 256  ;;  %p1225_p2 = scmp.lt.s32.totalorder %s1437_s16, %s1437_s16 }
  0x61   :  { %p1221_p1 = scmp.ne.s32.totalorder %s1437_s16, %s1220_s5  ;;  %p1226_p3 = scmp.lt.s32.totalorder %s1220_s5, %s1220_s5 }
  0x63   :  { %p1227_p4 = por %p1226_p3, %p1225_p2 }
  0x65   :  { %p1228_p5 = pnand %p1227_p4, %p1221_p1 }
  0x67   :  { %1231 = shalt.err (!%p1228_p5)
}
  0x68   :  { %s1318_s2 = smov 64   ;;  %s1319_s11 = smov 4  }
  0x69   :  { %74 = dma.hbm_to_vmem [thread:$0]  %s1805_s4, 256, %s1437_s16, [#allocation9], %s1318_s2, %s1318_s2, %s1319_s11  }
  0x6a   :  { %s1320_s15 = smov [#allocation13]   ;;  %s1321_s20 = smov [#allocation14]  }
  0x6b   :  { %s90_s19 = sshll.u32 %s1320_s15, 4  ;;  %s103_s21 = sshll.u32 %s1321_s20, 4  ;;  %s91_s19 = int_to_ptr.vmem [resolvable:$true] %s90_s19  ;;  %s104_s21 = int_to_ptr.vmem [resolvable:$true] %s103_s21 }
  0x6c   :  { %s1232_s30 = scalar_lea.hbm %s1807_s6, 1024 }
  0x6d   :  { %p1233_p6 = scmp.ne.s32.totalorder %s1807_s6, %s1232_s30  ;;  %p1236_p7 = scmp.lt.u32.totalorder %s1232_s30, %s1807_s6 }
  0x6f   :  { %p1238_p8 = pnand %p1236_p7, %p1233_p6 }
  0x71   :  { %1241 = shalt.err (!%p1238_p8)
}
  0x72   :  { %s1242_s4 = scalar_lea.vmem %s91_s19, 1024  ;;  %p1247_p10 = scmp.lt.s32.totalorder %s91_s19, %s91_s19 }
  0x73   :  { %p1243_p9 = scmp.ne.s32.totalorder %s91_s19, %s1242_s4  ;;  %p1248_p11 = scmp.lt.s32.totalorder %s1242_s4, %s1242_s4 }
  0x75   :  { %p1249_p12 = por %p1248_p11, %p1247_p10 }
  0x77   :  { %p1250_p13 = pnand %p1249_p12, %p1243_p9 }
  0x79   :  { %1253 = shalt.err (!%p1250_p13)
}
  0x7a   :  { %96 = dma.hbm_to_vmem [thread:$0]  %s1807_s6, 1024, %s91_s19, [#allocation12], %s1318_s2, %s1318_s2, %s1319_s11  }
  0x7b   :  { %s1254_s29 = scalar_lea.hbm %s1808_s7, 16 }
  0x7c   :  { %p1255_p0 = scmp.ne.s32.totalorder %s1808_s7, %s1254_s29  ;;  %p1258_p1 = scmp.lt.u32.totalorder %s1254_s29, %s1808_s7 }
  0x7e   :  { %p1260_p2 = pnand %p1258_p1, %p1255_p0 }
  0x80   :  { %1263 = shalt.err (!%p1260_p2)
}
  0x81   :  { %s1264_s5 = scalar_lea.vmem %s104_s21, 16  ;;  %s1268_s12 = scalar_lea.vmem %s104_s21, 32 }
  0x82   :  { %p1265_p3 = scmp.ne.s32.totalorder %s104_s21, %s1264_s5  ;;  %p1269_p4 = scmp.lt.s32.totalorder %s104_s21, %s104_s21 }
  0x83   :  { %p1270_p5 = scmp.lt.s32.totalorder %s1268_s12, %s1264_s5 }
  0x85   :  { %p1271_p6 = por %p1270_p5, %p1269_p4 }
  0x87   :  { %p1272_p7 = pnand %p1271_p6, %p1265_p3 }
  0x89   :  { %1275 = shalt.err (!%p1272_p7)
}
  0x8a   :  { %106 = dma.hbm_to_vmem [thread:$0]  %s1808_s7, 16, %s104_s21, [#allocation15]  }
  0x8b   :  { %1298 = dma.done.wait [#allocation3], 2048  }
  0x8c   :  { %1299 = vsyncadd [#allocation3], 4294965248 }
  0x8d   :  { %1300 = dma.done.wait [#allocation6], 2064  }
  0x8e   :  { %1301 = vsyncadd [#allocation6], 4294965232 }
  0x8f   :  { %1302 = dma.done.wait [#allocation9], 272  }
  0x90   :  { %1303 = vsyncadd [#allocation9], 4294967024 }
  0x91   :  { %1304 = dma.done.wait [#allocation12], 1040  }
  0x92   :  { %1305 = vsyncadd [#allocation12], 4294966256 }
  0x93   :  { %1306 = dma.done.wait [#allocation15], 16  }
  0x94   :  { %1307 = vsyncadd [#allocation15], 4294967280  ;;  %v132_v0 = vld [vmem:[#allocation2] sm:$0xff]  ;;  %vm182_vm0 = vcmask 261120   ;;  %v134_v2 = vld [vmem:[#allocation2 + $0x10] sm:$0xff]  ;;  %s1322_s7 = smov [#allocation16]  }
  0x95   :  { %v148_v1 = vld [vmem:[#allocation5] sm:$0xff]  ;;  %v150_v4 = vld [vmem:[#allocation5 + $0x10] sm:$0xff]  ;;  %v133_v5 = vld [vmem:[#allocation2 + $0x8] sm:$0xff]  ;;  %s881_s11 = sshll.u32 %s1322_s7, 4  ;;  %s882_s11 = int_to_ptr.vmem [resolvable:$true] %s881_s11 }
  0x96   :  { %v1492_v3 = vadd.f32 %v148_v1, %v132_v0  ;;  %v149_v6 = vld [vmem:[#allocation5 + $0x8] sm:$0xff]  ;;  %v1494_v7 = vadd.f32 %v150_v4, %v134_v2  ;;  %v135_v9 = vld [vmem:[#allocation2 + $0x18] sm:$0xff]  ;;  %v136_v11 = vld [vmem:[#allocation2 + $0x20] sm:$0xff]  ;;  %s1276_s14 = scalar_lea.vmem %s882_s11, 2048  ;;  %p1281_p9 = scmp.lt.s32.totalorder %s882_s11, %s882_s11 }
  0x97   :  { %v1496_v8 = vadd.f32 %v149_v6, %v133_v5  ;;  %v151_v10 = vld [vmem:[#allocation5 + $0x18] sm:$0xff]  ;;  %v152_v14 = vld [vmem:[#allocation5 + $0x20] sm:$0xff]  ;;  %v137_v15 = vld [vmem:[#allocation2 + $0x28] sm:$0xff]  ;;  %p1277_p8 = scmp.ne.s32.totalorder %s882_s11, %s1276_s14  ;;  %p1282_p10 = scmp.lt.s32.totalorder %s1276_s14, %s1276_s14 }
  0x98   :  { %v183_v12 = vsel %vm182_vm0, %v1492_v3, 0.0  ;;  %v1500_v13 = vadd.f32 %v151_v10, %v135_v9  ;;  %v153_v16 = vld [vmem:[#allocation5 + $0x28] sm:$0xff]  ;;  %v189_v17 = vsel %vm182_vm0, %v1494_v7, 0.0  ;;  %v1506_v19 = vadd.f32 %v152_v14, %v136_v11  ;;  %v138_v20 = vld [vmem:[#allocation2 + $0x30] sm:$0xff]  ;;  %v139_v22 = vld [vmem:[#allocation2 + $0x38] sm:$0xff] }
  0x99   :  { %184 = vadd.xlane.f32.xlu0 %v183_v12  ;;  %190 = vadd.xlane.f32.xlu1 %v189_v17  ;;  %v186_v18 = vsel %vm182_vm0, %v1496_v8, 0.0  ;;  %v154_v21 = vld [vmem:[#allocation5 + $0x30] sm:$0xff]  ;;  %v1510_v24 = vadd.f32 %v153_v16, %v137_v15  ;;  %v155_v25 = vld [vmem:[#allocation5 + $0x38] sm:$0xff]  ;;  %v140_v26 = vld [vmem:[#allocation2 + $0x40] sm:$0xff]  ;;  %p1283_p11 = por %p1282_p10, %p1281_p9 }
  0x9a   :  { %v192_v23 = vsel %vm182_vm0, %v1500_v13, 0.0  ;;  %v156_v27 = vld [vmem:[#allocation5 + $0x40] sm:$0xff]  ;;  %v1512_v28 = vadd.f32 %v154_v21, %v138_v20  ;;  %v195_v29 = vsel %vm182_vm0, %v1506_v19, 0.0  ;;  %v1516_v30 = vadd.f32 %v155_v25, %v139_v22  ;;  %v141_v33 = vld [vmem:[#allocation2 + $0x48] sm:$0xff]  ;;  %v142_v36 = vld [vmem:[#allocation2 + $0x50] sm:$0xff] }
  0x9b   :  { %v1518_v31 = vadd.f32 %v156_v27, %v140_v26  ;;  %v198_v32 = vsel %vm182_vm0, %v1510_v24, 0.0  ;;  %v157_v34 = vld [vmem:[#allocation5 + $0x48] sm:$0xff]  ;;  %v158_v37 = vld [vmem:[#allocation5 + $0x50] sm:$0xff]  ;;  %v143_v40 = vld [vmem:[#allocation2 + $0x58] sm:$0xff]  ;;  %p1284_p12 = pnand %p1283_p11, %p1277_p8 }
  0x9c   :  { %v201_v35 = vsel %vm182_vm0, %v1512_v28, 0.0  ;;  %v204_v38 = vsel %vm182_vm0, %v1516_v30, 0.0  ;;  %v159_v41 = vld [vmem:[#allocation5 + $0x58] sm:$0xff]  ;;  %v1528_v42 = vadd.f32 %v157_v34, %v141_v33  ;;  %v1530_v43 = vadd.f32 %v158_v37, %v142_v36  ;;  %v144_v46 = vld [vmem:[#allocation2 + $0x60] sm:$0xff]  ;;  %v145_v48 = vld [vmem:[#allocation2 + $0x68] sm:$0xff] }
  0x9d   :  { %187 = vadd.xlane.f32.xlu0 %v186_v18  ;;  %193 = vadd.xlane.f32.xlu1 %v192_v23  ;;  %v207_v39 = vsel %vm182_vm0, %v1518_v31, 0.0  ;;  %v1534_v45 = vadd.f32 %v159_v41, %v143_v40  ;;  %v160_v47 = vld [vmem:[#allocation5 + $0x60] sm:$0xff]  ;;  %v161_v49 = vld [vmem:[#allocation5 + $0x68] sm:$0xff]  ;;  %v146_v54 = vld [vmem:[#allocation2 + $0x70] sm:$0xff] }
  0x9e   :  { %v210_v44 = vsel %vm182_vm0, %v1528_v42, 0.0  ;;  %v213_v50 = vsel %vm182_vm0, %v1530_v43, 0.0  ;;  %v1538_v51 = vadd.f32 %v160_v47, %v144_v46  ;;  %v1542_v53 = vadd.f32 %v161_v49, %v145_v48  ;;  %v162_v55 = vld [vmem:[#allocation5 + $0x70] sm:$0xff]  ;;  %v147_v56 = vld [vmem:[#allocation2 + $0x78] sm:$0xff] }
  0x9f   :  { %v216_v52 = vsel %vm182_vm0, %v1534_v45, 0.0  ;;  %v163_v57 = vld [vmem:[#allocation5 + $0x78] sm:$0xff]  ;;  %v1546_v59 = vadd.f32 %v162_v55, %v146_v54 }
  0xa0   :  { %v219_v58 = vsel %vm182_vm0, %v1538_v51, 0.0  ;;  %v222_v60 = vsel %vm182_vm0, %v1542_v53, 0.0  ;;  %v1550_v61 = vadd.f32 %v163_v57, %v147_v56 }
  0xa1   :  { %196 = vadd.xlane.f32.xlu0 %v195_v29  ;;  %199 = vadd.xlane.f32.xlu1 %v198_v32  ;;  %v225_v62 = vsel %vm182_vm0, %v1546_v59, 0.0 }
  0xa2   :  { %v228_v63 = vsel %vm182_vm0, %v1550_v61, 0.0 }
  0xa5   :  { %202 = vadd.xlane.f32.xlu0 %v201_v35  ;;  %205 = vadd.xlane.f32.xlu1 %v204_v38 }
  0xa9   :  { %208 = vadd.xlane.f32.xlu0 %v207_v39  ;;  %211 = vadd.xlane.f32.xlu1 %v210_v44 }
  0xad   :  { %214 = vadd.xlane.f32.xlu0 %v213_v50  ;;  %217 = vadd.xlane.f32.xlu1 %v216_v52 }
  0xb1   :  { %220 = vadd.xlane.f32.xlu0 %v219_v58  ;;  %223 = vadd.xlane.f32.xlu1 %v222_v60 }
  0xb5   :  { %226 = vadd.xlane.f32.xlu0 %v225_v62  ;;  %229 = vadd.xlane.f32.xlu1 %v228_v63 }
 0x126   :  { %v185_v0 = vpop.xlane.xlu0 %184  ;;  %v191_v2 = vpop.xlane.xlu1 %190 }
 0x127   :  { %v232_v1 = vmul.f32 0.03125, %v185_v0  ;;  %v234_v4 = vmul.f32 0.03125, %v191_v2 }
 0x129   :  { %v1557_v5 = vsub.f32 %v1492_v3, %v232_v1  ;;  %v1560_v6 = vsub.f32 %v1494_v7, %v234_v4 }
 0x12a   :  { %v188_v9 = vpop.xlane.xlu0 %187  ;;  %v194_v11 = vpop.xlane.xlu1 %193 }
 0x12b   :  { %v233_v10 = vmul.f32 0.03125, %v188_v9  ;;  %v264_v12 = vmul.f32 %v1557_v5, %v1557_v5  ;;  %v235_v14 = vmul.f32 0.03125, %v194_v11  ;;  %v266_v15 = vmul.f32 %v1560_v6, %v1560_v6 }
 0x12d   :  { %v1567_v16 = vsub.f32 %v1496_v8, %v233_v10  ;;  %v280_v17 = vsel %vm182_vm0, %v264_v12, 0.0  ;;  %v1571_v18 = vsub.f32 %v1500_v13, %v235_v14  ;;  %v286_v23 = vsel %vm182_vm0, %v266_v15, 0.0 }
 0x12e   :  { %281 = vadd.xlane.f32.xlu0 %v280_v17  ;;  %v197_v20 = vpop.xlane.xlu0 %196  ;;  %v200_v22 = vpop.xlane.xlu1 %199 }
 0x12f   :  { %v236_v21 = vmul.f32 0.03125, %v197_v20  ;;  %v265_v25 = vmul.f32 %v1567_v16, %v1567_v16  ;;  %v237_v26 = vmul.f32 0.03125, %v200_v22  ;;  %v267_v27 = vmul.f32 %v1571_v18, %v1571_v18 }
 0x131   :  { %v1579_v29 = vsub.f32 %v1506_v19, %v236_v21  ;;  %v283_v32 = vsel %vm182_vm0, %v265_v25, 0.0  ;;  %v1583_v33 = vsub.f32 %v1510_v24, %v237_v26  ;;  %v289_v37 = vsel %vm182_vm0, %v267_v27, 0.0 }
 0x132   :  { %287 = vadd.xlane.f32.xlu0 %v286_v23  ;;  %284 = vadd.xlane.f32.xlu1 %v283_v32  ;;  %v203_v34 = vpop.xlane.xlu0 %202  ;;  %v206_v36 = vpop.xlane.xlu1 %205 }
 0x133   :  { %v238_v35 = vmul.f32 0.03125, %v203_v34  ;;  %v268_v38 = vmul.f32 %v1579_v29, %v1579_v29  ;;  %v239_v39 = vmul.f32 0.03125, %v206_v36  ;;  %v269_v40 = vmul.f32 %v1583_v33, %v1583_v33 }
 0x135   :  { %v1591_v41 = vsub.f32 %v1512_v28, %v238_v35  ;;  %v292_v44 = vsel %vm182_vm0, %v268_v38, 0.0  ;;  %v1595_v46 = vsub.f32 %v1516_v30, %v239_v39  ;;  %v295_v50 = vsel %vm182_vm0, %v269_v40, 0.0 }
 0x136   :  { %290 = vadd.xlane.f32.xlu1 %v289_v37  ;;  %293 = vadd.xlane.f32.xlu0 %v292_v44  ;;  %v209_v47 = vpop.xlane.xlu0 %208  ;;  %v212_v49 = vpop.xlane.xlu1 %211 }
 0x137   :  { %v240_v48 = vmul.f32 0.03125, %v209_v47  ;;  %v270_v52 = vmul.f32 %v1591_v41, %v1591_v41  ;;  %v241_v54 = vmul.f32 0.03125, %v212_v49  ;;  %v271_v55 = vmul.f32 %v1595_v46, %v1595_v46 }
 0x139   :  { %v1603_v56 = vsub.f32 %v1518_v31, %v240_v48  ;;  %v298_v57 = vsel %vm182_vm0, %v270_v52, 0.0  ;;  %v1607_v58 = vsub.f32 %v1528_v42, %v241_v54  ;;  %v301_v0 = vsel %vm182_vm0, %v271_v55, 0.0  ;;  %v1026_v54 = vld [vmem:[#allocation10] sm:$0xff]   ;;  %v1027_v55 = vld [vmem:[#allocation10 + $0x8] sm:$0xff]  }
 0x13a   :  { %296 = vadd.xlane.f32.xlu1 %v295_v50  ;;  %299 = vadd.xlane.f32.xlu0 %v298_v57  ;;  %v215_v60 = vpop.xlane.xlu0 %214  ;;  %v218_v63 = vpop.xlane.xlu1 %217  ;;  %v1652_v57 = vld [vmem:[#allocation13] sm:$0xff]  }
 0x13b   :  { %v242_v62 = vmul.f32 0.03125, %v215_v60  ;;  %v272_v1 = vmul.f32 %v1603_v56, %v1603_v56  ;;  %v243_v2 = vmul.f32 0.03125, %v218_v63  ;;  %v273_v4 = vmul.f32 %v1607_v58, %v1607_v58  ;;  %945 = vmatprep.subr.bf16.mxu0 %v1026_v54  ;;  %v1655_v60 = vld [vmem:[#allocation13 + $0x8] sm:$0xff]   ;;  %997 = vmatprep.subr.bf16.mxu1 %v1652_v57 }
 0x13c   :  { %946 = vmatpush3.bf16.msra.mxu0 %v1026_v54  ;;  %1005 = vmatpush3.bf16.msra.mxu1 %v1652_v57 }
 0x13d   :  { %v1615_v9 = vsub.f32 %v1530_v43, %v242_v62  ;;  %v304_v10 = vsel %vm182_vm0, %v272_v1, 0.0  ;;  %v1619_v11 = vsub.f32 %v1534_v45, %v243_v2  ;;  %v307_v17 = vsel %vm182_vm0, %v273_v4, 0.0  ;;  %947 = vmatprep.subr.bf16.mxu0 %v1027_v55  ;;  %998 = vmatprep.subr.bf16.mxu1 %v1655_v60 }
 0x13e   :  { %302 = vadd.xlane.f32.xlu1 %v301_v0  ;;  %305 = vadd.xlane.f32.xlu0 %v304_v10  ;;  %v221_v12 = vpop.xlane.xlu0 %220  ;;  %v224_v15 = vpop.xlane.xlu1 %223 }
 0x13f   :  { %v244_v14 = vmul.f32 0.03125, %v221_v12  ;;  %v274_v20 = vmul.f32 %v1615_v9, %v1615_v9  ;;  %v245_v21 = vmul.f32 0.03125, %v224_v15  ;;  %v275_v22 = vmul.f32 %v1619_v11, %v1619_v11 }
 0x140   :  { %948 = vmatpush3.bf16.msra.mxu0 %v1027_v55  ;;  %1006 = vmatpush3.bf16.msra.mxu1 %v1655_v60 }
 0x141   :  { %v1627_v23 = vsub.f32 %v1538_v51, %v244_v14  ;;  %v310_v25 = vsel %vm182_vm0, %v274_v20, 0.0  ;;  %v1631_v26 = vsub.f32 %v1542_v53, %v245_v21  ;;  %v313_v35 = vsel %vm182_vm0, %v275_v22, 0.0  ;;  %965 = vmatprep.subr.bf16.mxu0 %v1652_v57 }
 0x142   :  { %308 = vadd.xlane.f32.xlu1 %v307_v17  ;;  %311 = vadd.xlane.f32.xlu0 %v310_v25  ;;  %v227_v27 = vpop.xlane.xlu0 %226  ;;  %v230_v34 = vpop.xlane.xlu1 %229 }
 0x143   :  { %v246_v32 = vmul.f32 0.03125, %v227_v27  ;;  %v276_v36 = vmul.f32 %v1627_v23, %v1627_v23  ;;  %v247_v37 = vmul.f32 0.03125, %v230_v34  ;;  %v277_v38 = vmul.f32 %v1631_v26, %v1631_v26 }
 0x145   :  { %v1639_v39 = vsub.f32 %v1546_v59, %v246_v32  ;;  %v316_v40 = vsel %vm182_vm0, %v276_v36, 0.0  ;;  %v1643_v44 = vsub.f32 %v1550_v61, %v247_v37  ;;  %v319_v47 = vsel %vm182_vm0, %v277_v38, 0.0 }
 0x146   :  { %314 = vadd.xlane.f32.xlu1 %v313_v35  ;;  %317 = vadd.xlane.f32.xlu0 %v316_v40 }
 0x147   :  { %v278_v48 = vmul.f32 %v1639_v39, %v1639_v39  ;;  %v279_v49 = vmul.f32 %v1643_v44, %v1643_v44 }
 0x149   :  { %v322_v50 = vsel %vm182_vm0, %v278_v48, 0.0  ;;  %v325_v52 = vsel %vm182_vm0, %v279_v49, 0.0 }
 0x14a   :  { %320 = vadd.xlane.f32.xlu1 %v319_v47  ;;  %323 = vadd.xlane.f32.xlu0 %v322_v50 }
 0x14e   :  { %326 = vadd.xlane.f32.xlu1 %v325_v52  ;;  %v1662_v52 = vld [vmem:[#allocation7] ss:$0 sm:$0xff] }
 0x1bb   :  { %v282_v62 = vpop.xlane.xlu0 %281 }
 0x1bc   :  { %v328_v63 = vmul.f32 0.03125, %v282_v62 }
 0x1be   :  { %v344_v0 = vadd.f32 1e-05, %v328_v63 }
 0x1bf   :  { %v285_v1 = vpop.xlane.xlu1 %284  ;;  %v288_v2 = vpop.xlane.xlu0 %287 }
 0x1c0   :  { %1036 = vrsqrt.f32 %v344_v0  ;;  %v329_v4 = vmul.f32 0.03125, %v285_v1  ;;  %v330_v10 = vmul.f32 0.03125, %v288_v2 }
 0x1c2   :  { %v345_v12 = vadd.f32 1e-05, %v329_v4  ;;  %v346_v14 = vadd.f32 1e-05, %v330_v10 }
 0x1c3   :  { %v291_v15 = vpop.xlane.xlu1 %290  ;;  %v294_v17 = vpop.xlane.xlu0 %293 }
 0x1c4   :  { %1038 = vrsqrt.f32 %v345_v12  ;;  %v331_v20 = vmul.f32 0.03125, %v291_v15  ;;  %v332_v21 = vmul.f32 0.03125, %v294_v17 }
 0x1c5   :  { %1040 = vrsqrt.f32 %v346_v14  ;;  %v1667_v14 = vld [vmem:[#allocation8] ss:$0 sm:$0xff] }
 0x1c6   :  { %v347_v22 = vadd.f32 1e-05, %v331_v20  ;;  %v348_v25 = vadd.f32 1e-05, %v332_v21 }
 0x1c7   :  { %v297_v27 = vpop.xlane.xlu1 %296  ;;  %v300_v32 = vpop.xlane.xlu0 %299 }
 0x1c8   :  { %1042 = vrsqrt.f32 %v347_v22  ;;  %v333_v34 = vmul.f32 0.03125, %v297_v27  ;;  %v334_v35 = vmul.f32 0.03125, %v300_v32 }
 0x1c9   :  { %1044 = vrsqrt.f32 %v348_v25 }
 0x1ca   :  { %v1037_v36 = vpop.eup %1036  ;;  %v349_v37 = vadd.f32 1e-05, %v333_v34  ;;  %v350_v38 = vadd.f32 1e-05, %v334_v35 }
 0x1cb   :  { %v303_v40 = vpop.xlane.xlu1 %302  ;;  %v306_v47 = vpop.xlane.xlu0 %305  ;;  %v376_v48 = vmul.f32 %v1037_v36, %v1557_v5 }
 0x1cc   :  { %1046 = vrsqrt.f32 %v349_v37  ;;  %v335_v49 = vmul.f32 0.03125, %v303_v40  ;;  %v336_v50 = vmul.f32 0.03125, %v306_v47 }
 0x1cd   :  { %1048 = vrsqrt.f32 %v350_v38  ;;  %v398_v4 = vmul.f32 %v1662_v52, %v376_v48 }
 0x1ce   :  { %v1039_v54 = vpop.eup %1038  ;;  %v351_v55 = vadd.f32 1e-05, %v335_v49  ;;  %v352_v62 = vadd.f32 1e-05, %v336_v50 }
 0x1cf   :  { %v1041_v63 = vpop.eup %1040  ;;  %v309_v0 = vpop.xlane.xlu1 %308  ;;  %v377_v2 = vmul.f32 %v1039_v54, %v1567_v16  ;;  %v420_v32 = vadd.f32 %v1667_v14, %v398_v4 }
 0x1d0   :  { %v312_v1 = vpop.xlane.xlu0 %311  ;;  %v378_v10 = vmul.f32 %v1041_v63, %v1560_v6  ;;  %1050 = vrsqrt.f32 %v351_v55  ;;  %v337_v5 = vmul.f32 0.03125, %v309_v0 }
 0x1d1   :  { %v338_v12 = vmul.f32 0.03125, %v312_v1  ;;  %1052 = vrsqrt.f32 %v352_v62  ;;  %v399_v15 = vmul.f32 %v1662_v52, %v377_v2 }
 0x1d2   :  { %v1043_v17 = vpop.eup %1042  ;;  %v353_v20 = vadd.f32 1e-05, %v337_v5  ;;  %v400_v34 = vmul.f32 %v1662_v52, %v378_v10 }
 0x1d3   :  { %v354_v21 = vadd.f32 1e-05, %v338_v12  ;;  %v1045_v22 = vpop.eup %1044  ;;  %v379_v25 = vmul.f32 %v1043_v17, %v1571_v18  ;;  %v315_v27 = vpop.xlane.xlu1 %314  ;;  %v421_v6 = vadd.f32 %v1667_v14, %v399_v15 }
 0x1d4   :  { %v318_v16 = vpop.xlane.xlu0 %317  ;;  %v380_v35 = vmul.f32 %v1045_v22, %v1579_v29  ;;  %1054 = vrsqrt.f32 %v353_v20  ;;  %v339_v36 = vmul.f32 0.03125, %v315_v27  ;;  %v422_v62 = vadd.f32 %v1667_v14, %v400_v34 }
 0x1d5   :  { %v340_v37 = vmul.f32 0.03125, %v318_v16  ;;  %1056 = vrsqrt.f32 %v354_v21  ;;  %v436_v38 = vpack.c.bf16 %v421_v6, %v420_v32  ;;  %v401_v40 = vmul.f32 %v1662_v52, %v379_v25 }
 0x1d6   :  { %v1047_v47 = vpop.eup %1046  ;;  %v355_v48 = vadd.f32 1e-05, %v339_v36  ;;  %v402_v63 = vmul.f32 %v1662_v52, %v380_v35 }
 0x1d7   :  { %v356_v18 = vadd.f32 1e-05, %v340_v37  ;;  %v1049_v49 = vpop.eup %1048  ;;  %v381_v50 = vmul.f32 %v1047_v47, %v1583_v33  ;;  %v321_v54 = vpop.xlane.xlu1 %320  ;;  %949 = vmatprep.mubr.msk.bf16.mxu0 %vm182_vm0, %v436_v38  ;;  %v423_v29 = vadd.f32 %v1667_v14, %v401_v40 }
 0x1d8   :  { %v324_v55 = vpop.xlane.xlu0 %323  ;;  %v382_v0 = vmul.f32 %v1049_v49, %v1591_v41  ;;  %1058 = vrsqrt.f32 %v355_v48  ;;  %v341_v1 = vmul.f32 0.03125, %v321_v54  ;;  %v424_v21 = vadd.f32 %v1667_v14, %v402_v63 }
 0x1d9   :  { %v342_v2 = vmul.f32 0.03125, %v324_v55  ;;  %1060 = vrsqrt.f32 %v356_v18  ;;  %v437_v4 = vpack.c.bf16 %v423_v29, %v422_v62  ;;  %v403_v10 = vmul.f32 %v1662_v52, %v381_v50 }
 0x1da   :  { %v1051_v33 = vpop.eup %1050  ;;  %v357_v5 = vadd.f32 1e-05, %v341_v1  ;;  %v404_v22 = vmul.f32 %v1662_v52, %v382_v0 }
 0x1db   :  { %v358_v12 = vadd.f32 1e-05, %v342_v2  ;;  %v1053_v15 = vpop.eup %1052  ;;  %v383_v17 = vmul.f32 %v1051_v33, %v1595_v46  ;;  %v327_v20 = vpop.xlane.xlu1 %326  ;;  %950 = vmatmul.mubr.msk.bf16.vlgmr.msra.gmra.mrb[0].mxu0 %vm182_vm0, %v437_v4  ;;  %v425_v41 = vadd.f32 %v1667_v14, %v403_v10 }
 0x1dc   :  { %v384_v25 = vmul.f32 %v1053_v15, %v1603_v56  ;;  %1062 = vrsqrt.f32 %v357_v5  ;;  %v343_v27 = vmul.f32 0.03125, %v327_v20  ;;  %966 = vmatpush3.bf16.msra.mxu0 %v1652_v57  ;;  %v426_v36 = vadd.f32 %v1667_v14, %v404_v22  ;;  %v1035_v22 = vld [vmem:[#allocation13 + $0x38] sm:$0xff]  }
 0x1dd   :  { %1064 = vrsqrt.f32 %v358_v12  ;;  %v438_v16 = vpack.c.bf16 %v425_v41, %v424_v21  ;;  %v405_v32 = vmul.f32 %v1662_v52, %v383_v17  ;;  %967 = vmatprep.subr.bf16.mxu0 %v1655_v60  ;;  %v1031_v21 = vld [vmem:[#allocation13 + $0x18] sm:$0xff]   ;;  %v1033_v41 = vld [vmem:[#allocation13 + $0x28] sm:$0xff]  }
 0x1de   :  { %v1055_v46 = vpop.eup %1054  ;;  %v359_v6 = vadd.f32 1e-05, %v343_v27  ;;  %v406_v37 = vmul.f32 %v1662_v52, %v384_v25  ;;  %v1724_v25 = vld [vmem:[#allocation11] ss:$0 sm:$0xff] }
 0x1df   :  { %v1057_v34 = vpop.eup %1056  ;;  %v385_v35 = vmul.f32 %v1055_v46, %v1607_v58  ;;  %953 = vmatprep.mubr.msk.bf16.mxu0 %vm182_vm0, %v438_v16  ;;  %v427_v56 = vadd.f32 %v1667_v14, %v405_v32 }
 0x1e0   :  { %v386_v57 = vmul.f32 %v1057_v34, %v1615_v9  ;;  %1066 = vrsqrt.f32 %v359_v6  ;;  %968 = vmatpush3.bf16.msra.mxu0 %v1655_v60  ;;  %v428_v18 = vadd.f32 %v1667_v14, %v406_v37 }
 0x1e1   :  { %v439_v38 = vpack.c.bf16 %v427_v56, %v426_v36  ;;  %v407_v40 = vmul.f32 %v1662_v52, %v385_v35 }
 0x1e2   :  { %v1059_v47 = vpop.eup %1058  ;;  %v408_v50 = vmul.f32 %v1662_v52, %v386_v57 }
 0x1e3   :  { %v1061_v48 = vpop.eup %1060  ;;  %v387_v58 = vmul.f32 %v1059_v47, %v1619_v11  ;;  %954 = vmatmul.mubr.msk.bf16.gmra.mrb[4].mxu0 %vm182_vm0, %v439_v38  ;;  %v429_v49 = vadd.f32 %v1667_v14, %v407_v40 }
 0x1e4   :  { %v388_v9 = vmul.f32 %v1061_v48, %v1627_v23  ;;  %v430_v11 = vadd.f32 %v1667_v14, %v408_v50 }
 0x1e5   :  { %v440_v54 = vpack.c.bf16 %v429_v49, %v428_v18  ;;  %v409_v60 = vmul.f32 %v1662_v52, %v387_v58 }
 0x1e6   :  { %v1063_v55 = vpop.eup %1062  ;;  %v410_v0 = vmul.f32 %v1662_v52, %v388_v9 }
 0x1e7   :  { %v1065_v62 = vpop.eup %1064  ;;  %v389_v29 = vmul.f32 %v1063_v55, %v1631_v26  ;;  %957 = vmatprep.mubr.msk.bf16.mxu0 %vm182_vm0, %v440_v54  ;;  %v431_v63 = vadd.f32 %v1667_v14, %v409_v60 }
 0x1e8   :  { %v390_v1 = vmul.f32 %v1065_v62, %v1639_v39  ;;  %v432_v26 = vadd.f32 %v1667_v14, %v410_v0 }
 0x1e9   :  { %v441_v2 = vpack.c.bf16 %v431_v63, %v430_v11  ;;  %v411_v23 = vmul.f32 %v1662_v52, %v389_v29 }
 0x1ea   :  { %v1067_v4 = vpop.eup %1066  ;;  %v412_v5 = vmul.f32 %v1662_v52, %v390_v1 }
 0x1eb   :  { %v391_v10 = vmul.f32 %v1067_v4, %v1643_v44  ;;  %958 = vmatmul.mubr.msk.bf16.gmra.mrb[8].mxu0 %vm182_vm0, %v441_v2  ;;  %v433_v33 = vadd.f32 %v1667_v14, %v411_v23  ;;  %v1030_v44 = vld [vmem:[#allocation13 + $0x10] sm:$0xff]  }
 0x1ec   :  { %v434_v39 = vadd.f32 %v1667_v14, %v412_v5  ;;  %969 = vmatprep.subr.bf16.mxu0 %v1030_v44  ;;  %999 = vmatprep.subr.bf16.mxu1 %v1030_v44 }
 0x1ed   :  { %v442_v12 = vpack.c.bf16 %v433_v33, %v432_v26  ;;  %v413_v15 = vmul.f32 %v1662_v52, %v391_v10  ;;  %970 = vmatpush3.bf16.msra.mxu0 %v1030_v44  ;;  %1007 = vmatpush3.bf16.msra.mxu1 %v1030_v44  ;;  %v1032_v52 = vld [vmem:[#allocation13 + $0x20] sm:$0xff]  }
 0x1ee   :  { %971 = vmatprep.subr.bf16.mxu0 %v1031_v21  ;;  %1000 = vmatprep.subr.bf16.mxu1 %v1031_v21 }
 0x1ef   :  { %961 = vmatprep.mubr.msk.bf16.mxu0 %vm182_vm0, %v442_v12  ;;  %v435_v17 = vadd.f32 %v1667_v14, %v413_v15  ;;  %v1034_v14 = vld [vmem:[#allocation13 + $0x30] sm:$0xff]  }
 0x1f1   :  { %v443_v20 = vpack.c.bf16 %v435_v17, %v434_v39  ;;  %972 = vmatpush3.bf16.msra.mxu0 %v1031_v21  ;;  %1008 = vmatpush3.bf16.msra.mxu1 %v1031_v21 }
 0x1f2   :  { %973 = vmatprep.subr.bf16.mxu0 %v1032_v52  ;;  %1001 = vmatprep.subr.bf16.mxu1 %v1032_v52 }
 0x1f3   :  { %962 = vmatmul.mubr.msk.bf16.gmra.mrb[12].mxu0 %vm182_vm0, %v443_v20 }
 0x1f5   :  { %974 = vmatpush3.bf16.msra.mxu0 %v1032_v52  ;;  %1009 = vmatpush3.bf16.msra.mxu1 %v1032_v52 }
 0x1f6   :  { %975 = vmatprep.subr.bf16.mxu0 %v1033_v41  ;;  %1002 = vmatprep.subr.bf16.mxu1 %v1033_v41 }
 0x1f9   :  { %976 = vmatpush3.bf16.msra.mxu0 %v1033_v41  ;;  %1010 = vmatpush3.bf16.msra.mxu1 %v1033_v41 }
 0x1fa   :  { %977 = vmatprep.subr.bf16.mxu0 %v1034_v14  ;;  %1003 = vmatprep.subr.bf16.mxu1 %v1034_v14 }
 0x1fd   :  { %978 = vmatpush3.bf16.msra.mxu0 %v1034_v14  ;;  %1011 = vmatpush3.bf16.msra.mxu1 %v1034_v14 }
 0x1fe   :  { %979 = vmatprep.subr.bf16.mxu0 %v1035_v22  ;;  %1004 = vmatprep.subr.bf16.mxu1 %v1035_v22 }
 0x201   :  { %980 = vmatpush3.bf16.msra.mxu0 %v1035_v22  ;;  %1012 = vmatpush3.bf16.msra.mxu1 %v1035_v22 }
 0x2ae   :  { %v951_v27 = vpop.f32.mrb[0].mxu0 }
 0x2af   :  { %v534_v16 = vadd.f32 %v951_v27, %v1724_v25  ;;  %v525_v32 = vpop.f32.mrb[1].mxu0 }
 0x2b0   :  { %v526_v46 = vadd.f32 %v1724_v25, %v525_v32  ;;  %v952_v6 = vpop.f32.mrb[2].mxu0 }
 0x2b1   :  { %v606_v34 = vmul.f32 0.70710677, %v534_v16  ;;  %v537_v35 = vadd.f32 %v952_v6, %v1724_v25  ;;  %v528_v36 = vpop.f32.mrb[3].mxu0  ;;  %v590_v26 = vmul.f32 0.5, %v534_v16 }
 0x2b2   :  { %v604_v56 = vmul.f32 0.70710677, %v526_v46  ;;  %v529_v37 = vadd.f32 %v1724_v25, %v528_v36  ;;  %v588_v39 = vmul.f32 0.5, %v526_v46 }
 0x2b3   :  { %1068 = verf.f32 %v606_v34  ;;  %v607_v57 = vmul.f32 0.70710677, %v537_v35  ;;  %v591_v33 = vmul.f32 0.5, %v537_v35 }
 0x2b4   :  { %1070 = verf.f32 %v604_v56  ;;  %v605_v38 = vmul.f32 0.70710677, %v529_v37  ;;  %v589_v17 = vmul.f32 0.5, %v529_v37 }
 0x2b5   :  { %1072 = verf.f32 %v607_v57 }
 0x2b6   :  { %1074 = verf.f32 %v605_v38  ;;  %v955_v40 = vpop.f32.mrb[4].mxu0 }
 0x2b7   :  { %v550_v47 = vadd.f32 %v955_v40, %v1724_v25  ;;  %v541_v48 = vpop.f32.mrb[5].mxu0 }
 0x2b8   :  { %v542_v58 = vadd.f32 %v1724_v25, %v541_v48  ;;  %v956_v18 = vpop.f32.mrb[6].mxu0 }
 0x2b9   :  { %v610_v49 = vmul.f32 0.70710677, %v550_v47  ;;  %v553_v50 = vadd.f32 %v956_v18, %v1724_v25  ;;  %v544_v9 = vpop.f32.mrb[7].mxu0  ;;  %v594_v38 = vmul.f32 0.5, %v550_v47 }
 0x2ba   :  { %v608_v54 = vmul.f32 0.70710677, %v542_v58  ;;  %v1734_v60 = vadd.f32 %v1724_v25, %v544_v9 }
 0x2bb   :  { %1076 = verf.f32 %v610_v49  ;;  %v611_v55 = vmul.f32 0.70710677, %v553_v50  ;;  %v595_v9 = vmul.f32 0.5, %v553_v50 }
 0x2bc   :  { %1078 = verf.f32 %v608_v54  ;;  %v609_v62 = vmul.f32 0.70710677, %v1734_v60 }
 0x2bd   :  { %v1069_v29 = vpop.eup %1068  ;;  %1080 = verf.f32 %v611_v55 }
 0x2be   :  { %v1071_v11 = vpop.eup %1070  ;;  %v638_v63 = vadd.f32 1.0, %v1069_v29  ;;  %1082 = verf.f32 %v609_v62  ;;  %v959_v0 = vpop.f32.mrb[8].mxu0 }
 0x2bf   :  { %v1073_v1 = vpop.eup %1072  ;;  %v636_v2 = vadd.f32 1.0, %v1071_v11  ;;  %v1738_v23 = vadd.f32 %v959_v0, %v1724_v25  ;;  %v557_v4 = vpop.f32.mrb[9].mxu0  ;;  %v592_v11 = vmul.f32 0.5, %v542_v58 }
 0x2c0   :  { %v1075_v10 = vpop.eup %1074  ;;  %v639_v5 = vadd.f32 1.0, %v1073_v1  ;;  %v1741_v12 = vadd.f32 %v1724_v25, %v557_v4  ;;  %v960_v15 = vpop.f32.mrb[10].mxu0  ;;  %v654_v52 = vmul.f32 %v638_v63, %v590_v26  ;;  %v593_v4 = vmul.f32 0.5, %v1734_v60 }
 0x2c1   :  { %v637_v20 = vadd.f32 1.0, %v1075_v10  ;;  %v614_v44 = vmul.f32 0.70710677, %v1738_v23  ;;  %v560_v21 = vpop.f32.mrb[11].mxu0  ;;  %v569_v22 = vadd.f32 %v960_v15, %v1724_v25  ;;  %v652_v27 = vmul.f32 %v636_v2, %v588_v39 }
 0x2c2   :  { %v655_v41 = vmul.f32 %v639_v5, %v591_v33  ;;  %v612_v14 = vmul.f32 0.70710677, %v1741_v12  ;;  %v561_v32 = vadd.f32 %v1724_v25, %v560_v21 }
 0x2c3   :  { %v653_v16 = vmul.f32 %v637_v20, %v589_v17  ;;  %1084 = verf.f32 %v614_v44  ;;  %v615_v34 = vmul.f32 0.70710677, %v569_v22 }
 0x2c4   :  { %v669_v6 = vpack.c.bf16 %v655_v41, %v654_v52  ;;  %1086 = verf.f32 %v612_v14  ;;  %v613_v35 = vmul.f32 0.70710677, %v561_v32  ;;  %v599_v14 = vmul.f32 0.5, %v569_v22 }
 0x2c5   :  { %v1077_v46 = vpop.eup %1076  ;;  %v668_v36 = vpack.c.bf16 %v653_v16, %v652_v27  ;;  %1088 = verf.f32 %v615_v34  ;;  %v596_v16 = vmul.f32 0.5, %v1741_v12 }
 0x2c6   :  { %v1079_v56 = vpop.eup %1078  ;;  %v963_v37 = vpop.f32.mrb[12].mxu0  ;;  %v642_v40 = vadd.f32 1.0, %v1077_v46  ;;  %1090 = verf.f32 %v613_v35 }
 0x2c7   :  { %v1081_v57 = vpop.eup %1080  ;;  %v582_v48 = vadd.f32 %v963_v37, %v1724_v25  ;;  %v573_v18 = vpop.f32.mrb[13].mxu0  ;;  %981 = vmatprep.mubr.bf16.mxu0 %v668_v36  ;;  %v640_v29 = vadd.f32 1.0, %v1079_v56 }
 0x2c8   :  { %v1083_v49 = vpop.eup %1082  ;;  %v643_v54 = vadd.f32 1.0, %v1081_v57  ;;  %v574_v55 = vadd.f32 %v1724_v25, %v573_v18  ;;  %v964_v62 = vpop.f32.mrb[14].mxu0  ;;  %982 = vmatmul.mubr.bf16.vlgmr.msra.gmra.mrb[16].mxu0 %v669_v6  ;;  %v658_v33 = vmul.f32 %v642_v40, %v594_v38  ;;  %v597_v6 = vmul.f32 0.5, %v561_v32 }
 0x2c9   :  { %v618_v63 = vmul.f32 0.70710677, %v582_v48  ;;  %v585_v0 = vadd.f32 %v964_v62, %v1724_v25  ;;  %v576_v1 = vpop.f32.mrb[15].mxu0  ;;  %v641_v47 = vadd.f32 1.0, %v1083_v49  ;;  %v656_v15 = vmul.f32 %v640_v29, %v592_v11 }
 0x2ca   :  { %v659_v2 = vmul.f32 %v643_v54, %v595_v9  ;;  %v616_v10 = vmul.f32 0.70710677, %v574_v55  ;;  %v577_v26 = vadd.f32 %v1724_v25, %v576_v1  ;;  %v598_v25 = vmul.f32 0.5, %v1738_v23 }
 0x2cb   :  { %1092 = verf.f32 %v618_v63  ;;  %v619_v50 = vmul.f32 0.70710677, %v585_v0  ;;  %v657_v39 = vmul.f32 %v641_v47, %v593_v4  ;;  %v602_v23 = vmul.f32 0.5, %v582_v48 }
 0x2cc   :  { %1094 = verf.f32 %v616_v10  ;;  %v617_v5 = vmul.f32 0.70710677, %v577_v26  ;;  %v671_v58 = vpack.c.bf16 %v659_v2, %v658_v33  ;;  %v603_v22 = vmul.f32 0.5, %v585_v0  ;;  %v910_v10 = vld [vmem:[#allocation14] ss:$0 sm:$0xff] }
 0x2cd   :  { %v1085_v17 = vpop.eup %1084  ;;  %1096 = verf.f32 %v619_v50  ;;  %v670_v44 = vpack.c.bf16 %v657_v39, %v656_v15  ;;  %v600_v29 = vmul.f32 0.5, %v574_v55  ;;  %v601_v12 = vmul.f32 0.5, %v577_v26 }
 0x2ce   :  { %v1087_v20 = vpop.eup %1086  ;;  %1098 = verf.f32 %v617_v5  ;;  %v646_v21 = vadd.f32 1.0, %v1085_v17 }
 0x2cf   :  { %v1089_v52 = vpop.eup %1088  ;;  %v644_v41 = vadd.f32 1.0, %v1087_v20  ;;  %985 = vmatprep.mubr.bf16.mxu1 %v670_v44 }
 0x2d0   :  { %v1091_v60 = vpop.eup %1090  ;;  %v647_v27 = vadd.f32 1.0, %v1089_v52  ;;  %986 = vmatmul.mubr.bf16.vlgmr.msra.gmra.mrb[0].mxu1 %v671_v58  ;;  %v662_v46 = vmul.f32 %v646_v21, %v598_v25 }
 0x2d1   :  { %v645_v34 = vadd.f32 1.0, %v1091_v60  ;;  %v660_v36 = vmul.f32 %v644_v41, %v596_v16 }
 0x2d2   :  { %v663_v35 = vmul.f32 %v647_v27, %v599_v14 }
 0x2d3   :  { %v661_v56 = vmul.f32 %v645_v34, %v597_v6 }
 0x2d4   :  { %v673_v57 = vpack.c.bf16 %v663_v35, %v662_v46 }
 0x2d5   :  { %v1093_v37 = vpop.eup %1092  ;;  %v672_v18 = vpack.c.bf16 %v661_v56, %v660_v36 }
 0x2d6   :  { %v1095_v38 = vpop.eup %1094  ;;  %v650_v40 = vadd.f32 1.0, %v1093_v37 }
 0x2d7   :  { %v1097_v49 = vpop.eup %1096  ;;  %v648_v9 = vadd.f32 1.0, %v1095_v38  ;;  %989 = vmatprep.mubr.bf16.mxu1 %v672_v18 }
 0x2d8   :  { %v1099_v54 = vpop.eup %1098  ;;  %v651_v62 = vadd.f32 1.0, %v1097_v49  ;;  %990 = vmatmul.mubr.bf16.gmra.mrb[4].mxu1 %v673_v57  ;;  %v666_v11 = vmul.f32 %v650_v40, %v602_v23 }
 0x2d9   :  { %v649_v32 = vadd.f32 1.0, %v1099_v54  ;;  %v664_v1 = vmul.f32 %v648_v9, %v600_v29 }
 0x2da   :  { %v667_v63 = vmul.f32 %v651_v62, %v603_v22 }
 0x2db   :  { %v665_v47 = vmul.f32 %v649_v32, %v601_v12 }
 0x2dc   :  { %v675_v2 = vpack.c.bf16 %v667_v63, %v666_v11 }
 0x2dd   :  { %v674_v4 = vpack.c.bf16 %v665_v47, %v664_v1 }
 0x2df   :  { %993 = vmatprep.mubr.bf16.mxu1 %v674_v4 }
 0x2e0   :  { %994 = vmatmul.mubr.bf16.gmra.mrb[8].mxu1 %v675_v2 }
 0x39b   :  { %v983_v33 = vpop.f32.mrb[16].mxu0 }
 0x39c   :  { %v790_v50 = vadd.f32 %v983_v33, %v910_v10  ;;  %v781_v5 = vpop.f32.mrb[17].mxu0 }
 0x39d   :  { %v782_v48 = vadd.f32 %v910_v10, %v781_v5  ;;  %v984_v0 = vpop.f32.mrb[18].mxu0 }
 0x39e   :  { %v846_v15 = vadd.f32 %v790_v50, %v1494_v7  ;;  %v793_v55 = vadd.f32 %v984_v0, %v910_v10  ;;  %v784_v26 = vpop.f32.mrb[19].mxu0 }
 0x39f   :  { %v844_v39 = vadd.f32 %v782_v48, %v1492_v3  ;;  %v785_v17 = vadd.f32 %v910_v10, %v784_v26 }
 0x3a0   :  { %862 = vst.msk [vmem:[#allocation16 + $0x10] sm:$0xff] %vm182_vm0, %v846_v15  ;;  %v847_v58 = vadd.f32 %v793_v55, %v1500_v13 }
 0x3a1   :  { %860 = vst.msk [vmem:[#allocation16] sm:$0xff] %vm182_vm0, %v844_v39  ;;  %v845_v20 = vadd.f32 %v785_v17, %v1496_v8 }
 0x3a2   :  { %863 = vst.msk [vmem:[#allocation16 + $0x18] sm:$0xff] %vm182_vm0, %v847_v58 }
 0x3a3   :  { %861 = vst.msk [vmem:[#allocation16 + $0x8] sm:$0xff] %vm182_vm0, %v845_v20  ;;  %v987_v44 = vpop.f32.mrb[0].mxu1 }
 0x3a4   :  { %v806_v21 = vadd.f32 %v987_v44, %v910_v10  ;;  %v797_v7 = vpop.f32.mrb[1].mxu1 }
 0x3a5   :  { %v798_v52 = vadd.f32 %v910_v10, %v797_v7  ;;  %v988_v41 = vpop.f32.mrb[2].mxu1 }
 0x3a6   :  { %v850_v3 = vadd.f32 %v806_v21, %v1512_v28  ;;  %v809_v60 = vadd.f32 %v988_v41, %v910_v10  ;;  %v800_v25 = vpop.f32.mrb[3].mxu1 }
 0x3a7   :  { %v848_v14 = vadd.f32 %v798_v52, %v1506_v19  ;;  %v801_v13 = vadd.f32 %v910_v10, %v800_v25 }
 0x3a8   :  { %866 = vst.msk [vmem:[#allocation16 + $0x30] sm:$0xff] %vm182_vm0, %v850_v3  ;;  %v851_v8 = vadd.f32 %v809_v60, %v1516_v30 }
 0x3a9   :  { %864 = vst.msk [vmem:[#allocation16 + $0x20] sm:$0xff] %vm182_vm0, %v848_v14  ;;  %v849_v27 = vadd.f32 %v801_v13, %v1510_v24 }
 0x3aa   :  { %867 = vst.msk [vmem:[#allocation16 + $0x38] sm:$0xff] %vm182_vm0, %v851_v8 }
 0x3ab   :  { %865 = vst.msk [vmem:[#allocation16 + $0x28] sm:$0xff] %vm182_vm0, %v849_v27  ;;  %v991_v16 = vpop.f32.mrb[4].mxu1 }
 0x3ac   :  { %v822_v6 = vadd.f32 %v991_v16, %v910_v10  ;;  %v813_v28 = vpop.f32.mrb[5].mxu1 }
 0x3ad   :  { %v814_v34 = vadd.f32 %v910_v10, %v813_v28  ;;  %v992_v46 = vpop.f32.mrb[6].mxu1 }
 0x3ae   :  { %v854_v19 = vadd.f32 %v822_v6, %v1530_v43  ;;  %v825_v35 = vadd.f32 %v992_v46, %v910_v10  ;;  %v816_v36 = vpop.f32.mrb[7].mxu1 }
 0x3af   :  { %v852_v56 = vadd.f32 %v814_v34, %v1518_v31  ;;  %v817_v30 = vadd.f32 %v910_v10, %v816_v36 }
 0x3b0   :  { %870 = vst.msk [vmem:[#allocation16 + $0x50] sm:$0xff] %vm182_vm0, %v854_v19  ;;  %v855_v24 = vadd.f32 %v825_v35, %v1534_v45 }
 0x3b1   :  { %868 = vst.msk [vmem:[#allocation16 + $0x40] sm:$0xff] %vm182_vm0, %v852_v56  ;;  %v853_v37 = vadd.f32 %v817_v30, %v1528_v42 }
 0x3b2   :  { %871 = vst.msk [vmem:[#allocation16 + $0x58] sm:$0xff] %vm182_vm0, %v855_v24 }
 0x3b3   :  { %869 = vst.msk [vmem:[#allocation16 + $0x48] sm:$0xff] %vm182_vm0, %v853_v37  ;;  %v995_v57 = vpop.f32.mrb[8].mxu1 }
 0x3b4   :  { %v838_v38 = vadd.f32 %v995_v57, %v910_v10  ;;  %v829_v43 = vpop.f32.mrb[9].mxu1 }
 0x3b5   :  { %v830_v40 = vadd.f32 %v910_v10, %v829_v43  ;;  %v996_v18 = vpop.f32.mrb[10].mxu1 }
 0x3b6   :  { %v858_v31 = vadd.f32 %v838_v38, %v1546_v59  ;;  %v841_v49 = vadd.f32 %v996_v18, %v910_v10  ;;  %v832_v9 = vpop.f32.mrb[11].mxu1 }
 0x3b7   :  { %v856_v45 = vadd.f32 %v830_v40, %v1538_v51  ;;  %v833_v54 = vadd.f32 %v910_v10, %v832_v9 }
 0x3b8   :  { %874 = vst.msk [vmem:[#allocation16 + $0x70] sm:$0xff] %vm182_vm0, %v858_v31  ;;  %v859_v42 = vadd.f32 %v841_v49, %v1550_v61 }
 0x3b9   :  { %872 = vst.msk [vmem:[#allocation16 + $0x60] sm:$0xff] %vm182_vm0, %v856_v45  ;;  %v857_v23 = vadd.f32 %v833_v54, %v1542_v53 }
 0x3ba   :  { %875 = vst.msk [vmem:[#allocation16 + $0x78] sm:$0xff] %vm182_vm0, %v859_v42 }
 0x3bb   :  { %873 = vst.msk [vmem:[#allocation16 + $0x68] sm:$0xff] %vm182_vm0, %v857_v23 }
 0x3bc   :  { %1287 = shalt.err (!%p1284_p12)
}
 0x3bd   :  { %s1288_s20 = scalar_lea.hbm %s1809_s8, 2048 }
 0x3be   :  { %p1289_p13 = scmp.ne.s32.totalorder %s1809_s8, %s1288_s20  ;;  %p1292_p0 = scmp.lt.u32.totalorder %s1288_s20, %s1809_s8 }
 0x3c0   :  { %p1294_p1 = pnand %p1292_p0, %p1289_p13 }
 0x3c2   :  { %1297 = shalt.err (!%p1294_p1)
}
 0x3c3   :  { %887 = dma.vmem_to_hbm [thread:$0]  %s882_s11, 2048, %s1809_s8, [#allocation4], %s1312_s17, %s1312_s17, %s1313_s18  }
 0x3c4   :  { %1308 = dma.done.wait [#allocation4], 2048  }
 0x3c5   :  { %1309 = vsyncadd [#allocation4], 4294965248 }
 0x3c6   :  { %891 = vsyncpa [#allocation3], 1 }
 0x3c7   :  { %892 = vsyncpa [#allocation6], 1 }
 0x3c8   :  { %893 = vsyncpa [#allocation9], 1 }
 0x3c9   :  { %894 = vsyncpa [#allocation12], 1 }
 0x3ca   :  { %895 = vsyncpa [#allocation15], 1 }
 0x3cb   :  { %896 = vsyncpa [#allocation4], 1 }

// kernel: _lambda_.2
= control target key start
LH: loop header
LB: loop body
LE: loop exit
PB: predicated region body
PF: predicated region fallthrough
CT: control target
= control target key end

     0   :  { %18 = vsyncpa [#allocation4], 0  ;;  %s15929_s0 = inlined_call_operand.hbm [shape: f32[8,16,32], index: 0, kind: input, shape index: {}]   ;;  %s15930_s1 = inlined_call_operand.hbm [shape: f32[8,16,32], index: 1, kind: input, shape index: {}]   ;;  %s15931_s2 = inlined_call_operand.hbm [shape: f32[4,4,16,16], index: 2, kind: input, shape index: {}]   ;;  %s15932_s3 = inlined_call_operand.hbm [shape: f32[1,32], index: 3, kind: input, shape index: {}]   ;;  %s15933_s4 = inlined_call_operand.hbm [shape: f32[1,32], index: 4, kind: input, shape index: {}]   ;;  %s15934_s5 = inlined_call_operand.hbm [shape: bf16[32,32], index: 5, kind: input, shape index: {}]   ;;  %s15935_s6 = inlined_call_operand.hbm [shape: f32[1,32], index: 6, kind: input, shape index: {}]   ;;  %s15936_s7 = inlined_call_operand.hbm [shape: bf16[32,32], index: 7, kind: input, shape index: {}]   ;;  %s15937_s8 = inlined_call_operand.hbm [shape: f32[1,32], index: 8, kind: input, shape index: {}]   ;;  %s15938_s9 = inlined_call_operand.hbm [shape: bf16[32,32], index: 9, kind: input, shape index: {}]   ;;  %s15939_s10 = inlined_call_operand.hbm [shape: f32[1,32], index: 10, kind: input, shape index: {}]   ;;  %s15940_s11 = inlined_call_operand.hbm [shape: bf16[32,32], index: 11, kind: input, shape index: {}]   ;;  %s15941_s12 = inlined_call_operand.hbm [shape: f32[1,32], index: 12, kind: input, shape index: {}]   ;;  %s15942_s13 = inlined_call_operand.hbm [shape: f32[8,16,32], index: 13, kind: output, shape index: {}]  }
   0x1   :  { %19 = vsyncpa [#allocation7], 0 }
   0x2   :  { %20 = vsyncpa [#allocation10], 0 }
   0x3   :  { %21 = vsyncpa [#allocation13], 0 }
   0x4   :  { %22 = vsyncpa [#allocation16], 0 }
   0x5   :  { %23 = vsyncpa [#allocation19], 0 }
   0x6   :  { %24 = vsyncpa [#allocation22], 0 }
   0x7   :  { %25 = vsyncpa [#allocation5], 0  ;;  %s11947_s25 = smov [#allocation6]   ;;  %s11948_s27 = smov [#allocation9]  }
   0x8   :  { %s43_s26 = sshll.u32 %s11947_s25, 4  ;;  %s68_s28 = sshll.u32 %s11948_s27, 4  ;;  %s44_s26 = int_to_ptr.vmem [resolvable:$true] %s43_s26  ;;  %s12042_s28 = int_to_ptr.vmem [resolvable:$true] %s68_s28 }
   0x9   :  { %s11623_s14 = scalar_lea.hbm %s15930_s1, 2048 }
   0xa   :  { %p11624_p0 = scmp.ne.s32.totalorder %s15930_s1, %s11623_s14  ;;  %p11627_p1 = scmp.lt.u32.totalorder %s11623_s14, %s15930_s1 }
   0xc   :  { %p11629_p2 = pnand %p11627_p1, %p11624_p0 }
   0xe   :  { %11632 = shalt.err (!%p11629_p2)
}
   0xf   :  { %s11633_s19 = scalar_lea.vmem %s44_s26, 2048  ;;  %p11638_p4 = scmp.lt.s32.totalorder %s44_s26, %s44_s26 }
  0x10   :  { %p11634_p3 = scmp.ne.s32.totalorder %s44_s26, %s11633_s19  ;;  %p11639_p5 = scmp.lt.s32.totalorder %s11633_s19, %s11633_s19 }
  0x12   :  { %p11640_p6 = por %p11639_p5, %p11638_p4 }
  0x14   :  { %p11641_p7 = pnand %p11640_p6, %p11634_p3 }
  0x16   :  { %11644 = shalt.err (!%p11641_p7)
}
  0x17   :  { %s11949_s20 = smov 128   ;;  %s11950_s21 = smov 8  }
  0x18   :  { %49 = dma.hbm_to_vmem [thread:$0]  %s15930_s1, 2048, %s44_s26, [#allocation7], %s11949_s20, %s11949_s20, %s11950_s21  }
  0x19   :  { %s11645_s27 = scalar_lea.hbm %s15932_s3, 16 }
  0x1a   :  { %p11646_p8 = scmp.ne.s32.totalorder %s15932_s3, %s11645_s27  ;;  %p11649_p9 = scmp.lt.u32.totalorder %s11645_s27, %s15932_s3 }
  0x1c   :  { %p11651_p10 = pnand %p11649_p9, %p11646_p8 }
  0x1e   :  { %11654 = shalt.err (!%p11651_p10)
}
  0x1f   :  { %s11655_s16 = scalar_lea.vmem %s12042_s28, 16  ;;  %s11659_s1 = scalar_lea.vmem %s12042_s28, 32 }
  0x20   :  { %p11656_p11 = scmp.ne.s32.totalorder %s12042_s28, %s11655_s16  ;;  %p11660_p12 = scmp.lt.s32.totalorder %s12042_s28, %s12042_s28 }
  0x21   :  { %p11661_p13 = scmp.lt.s32.totalorder %s11659_s1, %s11655_s16 }
  0x23   :  { %p11662_p0 = por %p11661_p13, %p11660_p12 }
  0x25   :  { %p11663_p1 = pnand %p11662_p0, %p11656_p11 }
  0x27   :  { %11666 = shalt.err (!%p11663_p1)
}
  0x28   :  { %71 = dma.hbm_to_vmem [thread:$0]  %s15932_s3, 16, %s12042_s28, [#allocation10]  }
  0x29   :  { %s11951_s18 = smov [#allocation12]   ;;  %s11667_s24 = scalar_lea.hbm %s15934_s5, 256 }
  0x2a   :  { %s87_s19 = sshll.u32 %s11951_s18, 4  ;;  %p11668_p2 = scmp.ne.s32.totalorder %s15934_s5, %s11667_s24  ;;  %s88_s19 = int_to_ptr.vmem [resolvable:$true] %s87_s19 }
  0x2b   :  { %p11671_p3 = scmp.lt.u32.totalorder %s11667_s24, %s15934_s5 }
  0x2d   :  { %p11673_p4 = pnand %p11671_p3, %p11668_p2 }
  0x2f   :  { %11676 = shalt.err (!%p11673_p4)
}
  0x30   :  { %s11677_s14 = scalar_lea.vmem %s88_s19, 256  ;;  %p11682_p6 = scmp.lt.s32.totalorder %s88_s19, %s88_s19 }
  0x31   :  { %p11678_p5 = scmp.ne.s32.totalorder %s88_s19, %s11677_s14  ;;  %p11683_p7 = scmp.lt.s32.totalorder %s11677_s14, %s11677_s14 }
  0x33   :  { %p11684_p8 = por %p11683_p7, %p11682_p6 }
  0x35   :  { %p11685_p9 = pnand %p11684_p8, %p11678_p5 }
  0x37   :  { %11688 = shalt.err (!%p11685_p9)
}
  0x38   :  { %s11952_s3 = smov 64   ;;  %s11953_s28 = smov 4  }
  0x39   :  { %93 = dma.hbm_to_vmem [thread:$0]  %s15934_s5, 256, %s88_s19, [#allocation13], %s11952_s3, %s11952_s3, %s11953_s28  }
  0x3a   :  { %s11954_s1 = smov [#allocation15]   ;;  %s11955_s17 = smov [#allocation18]  }
  0x3b   :  { %s109_s26 = sshll.u32 %s11954_s1, 4  ;;  %s131_s18 = sshll.u32 %s11955_s17, 4  ;;  %s110_s26 = int_to_ptr.vmem [resolvable:$true] %s109_s26  ;;  %s132_s18 = int_to_ptr.vmem [resolvable:$true] %s131_s18 }
  0x3c   :  { %s11689_s24 = scalar_lea.hbm %s15936_s7, 256 }
  0x3d   :  { %p11690_p10 = scmp.ne.s32.totalorder %s15936_s7, %s11689_s24  ;;  %p11693_p11 = scmp.lt.u32.totalorder %s11689_s24, %s15936_s7 }
  0x3f   :  { %p11695_p12 = pnand %p11693_p11, %p11690_p10 }
  0x41   :  { %11698 = shalt.err (!%p11695_p12)
}
  0x42   :  { %s11699_s5 = scalar_lea.vmem %s110_s26, 256  ;;  %p11704_p0 = scmp.lt.s32.totalorder %s110_s26, %s110_s26 }
  0x43   :  { %p11700_p13 = scmp.ne.s32.totalorder %s110_s26, %s11699_s5  ;;  %p11705_p1 = scmp.lt.s32.totalorder %s11699_s5, %s11699_s5 }
  0x45   :  { %p11706_p2 = por %p11705_p1, %p11704_p0 }
  0x47   :  { %p11707_p3 = pnand %p11706_p2, %p11700_p13 }
  0x49   :  { %11710 = shalt.err (!%p11707_p3)
}
  0x4a   :  { %115 = dma.hbm_to_vmem [thread:$0]  %s15936_s7, 256, %s110_s26, [#allocation16], %s11952_s3, %s11952_s3, %s11953_s28  }
  0x4b   :  { %s11711_s1 = scalar_lea.hbm %s15938_s9, 256 }
  0x4c   :  { %p11712_p4 = scmp.ne.s32.totalorder %s15938_s9, %s11711_s1  ;;  %p11715_p5 = scmp.lt.u32.totalorder %s11711_s1, %s15938_s9 }
  0x4e   :  { %p11717_p6 = pnand %p11715_p5, %p11712_p4 }
  0x50   :  { %11720 = shalt.err (!%p11717_p6)
}
  0x51   :  { %s11721_s25 = scalar_lea.vmem %s132_s18, 256  ;;  %p11726_p8 = scmp.lt.s32.totalorder %s132_s18, %s132_s18 }
  0x52   :  { %p11722_p7 = scmp.ne.s32.totalorder %s132_s18, %s11721_s25  ;;  %p11727_p9 = scmp.lt.s32.totalorder %s11721_s25, %s11721_s25 }
  0x54   :  { %p11728_p10 = por %p11727_p9, %p11726_p8 }
  0x56   :  { %p11729_p11 = pnand %p11728_p10, %p11722_p7 }
  0x58   :  { %11732 = shalt.err (!%p11729_p11)
}
  0x59   :  { %137 = dma.hbm_to_vmem [thread:$0]  %s15938_s9, 256, %s132_s18, [#allocation19], %s11952_s3, %s11952_s3, %s11953_s28  }
  0x5a   :  { %s11956_s27 = smov [#allocation21]   ;;  %s11957_s30 = smov [#allocation3]  }
  0x5b   :  { %s153_s29 = sshll.u32 %s11956_s27, 4  ;;  %s31_s5 = sshll.u32 %s11957_s30, 4  ;;  %s154_s29 = int_to_ptr.vmem [resolvable:$true] %s153_s29  ;;  %s32_s5 = int_to_ptr.vmem [resolvable:$true] %s31_s5 }
  0x5c   :  { %s11733_s15 = scalar_lea.hbm %s15940_s11, 256 }
  0x5d   :  { %p11734_p12 = scmp.ne.s32.totalorder %s15940_s11, %s11733_s15  ;;  %p11737_p13 = scmp.lt.u32.totalorder %s11733_s15, %s15940_s11 }
  0x5f   :  { %p11739_p0 = pnand %p11737_p13, %p11734_p12 }
  0x61   :  { %11742 = shalt.err (!%p11739_p0)
}
  0x62   :  { %s11743_s9 = scalar_lea.vmem %s154_s29, 256  ;;  %p11748_p2 = scmp.lt.s32.totalorder %s154_s29, %s154_s29 }
  0x63   :  { %p11744_p1 = scmp.ne.s32.totalorder %s154_s29, %s11743_s9  ;;  %p11749_p3 = scmp.lt.s32.totalorder %s11743_s9, %s11743_s9 }
  0x65   :  { %p11750_p4 = por %p11749_p3, %p11748_p2 }
  0x67   :  { %p11751_p5 = pnand %p11750_p4, %p11744_p1 }
  0x69   :  { %11754 = shalt.err (!%p11751_p5)
}
  0x6a   :  { %159 = dma.hbm_to_vmem [thread:$0]  %s15940_s11, 256, %s154_s29, [#allocation22], %s11952_s3, %s11952_s3, %s11953_s28  }
  0x6b   :  { %s11755_s7 = scalar_lea.hbm %s15929_s0, 2048 }
  0x6c   :  { %p11756_p6 = scmp.ne.s32.totalorder %s15929_s0, %s11755_s7  ;;  %p11759_p7 = scmp.lt.u32.totalorder %s11755_s7, %s15929_s0 }
  0x6e   :  { %p11761_p8 = pnand %p11759_p7, %p11756_p6 }
  0x70   :  { %11764 = shalt.err (!%p11761_p8)
}
  0x71   :  { %s11765_s14 = scalar_lea.vmem %s32_s5, 2048  ;;  %p11770_p10 = scmp.lt.s32.totalorder %s32_s5, %s32_s5 }
  0x72   :  { %p11766_p9 = scmp.ne.s32.totalorder %s32_s5, %s11765_s14  ;;  %p11771_p11 = scmp.lt.s32.totalorder %s11765_s14, %s11765_s14 }
  0x74   :  { %p11772_p12 = por %p11771_p11, %p11770_p10 }
  0x76   :  { %p11773_p13 = pnand %p11772_p12, %p11766_p9 }
  0x78   :  { %11776 = shalt.err (!%p11773_p13)
}
  0x79   :  { %37 = dma.hbm_to_vmem [thread:$0]  %s15929_s0, 2048, %s32_s5, [#allocation4], %s11949_s20, %s11949_s20, %s11950_s21  }
  0x7a   :  { %s11958_s28 = smov [#allocation8]   ;;  %s11959_s15 = smov [#allocation11]  }
  0x7b   :  { %s55_s29 = sshll.u32 %s11958_s28, 4  ;;  %s78_s16 = sshll.u32 %s11959_s15, 4  ;;  %s56_s29 = int_to_ptr.vmem [resolvable:$true] %s55_s29  ;;  %s79_s16 = int_to_ptr.vmem [resolvable:$true] %s78_s16 }
  0x7c   :  { %s11777_s22 = scalar_lea.hbm %s15931_s2, 4096 }
  0x7d   :  { %p11778_p0 = scmp.ne.s32.totalorder %s15931_s2, %s11777_s22  ;;  %p11781_p1 = scmp.lt.u32.totalorder %s11777_s22, %s15931_s2 }
  0x7f   :  { %p11783_p2 = pnand %p11781_p1, %p11778_p0 }
  0x81   :  { %11786 = shalt.err (!%p11783_p2)
}
  0x82   :  { %s11787_s0 = scalar_lea.vmem %s56_s29, 4096  ;;  %p11792_p4 = scmp.lt.s32.totalorder %s56_s29, %s56_s29 }
  0x83   :  { %p11788_p3 = scmp.ne.s32.totalorder %s56_s29, %s11787_s0  ;;  %p11793_p5 = scmp.lt.s32.totalorder %s11787_s0, %s11787_s0 }
  0x85   :  { %p11794_p6 = por %p11793_p5, %p11792_p4 }
  0x87   :  { %p11795_p7 = pnand %p11794_p6, %p11788_p3 }
  0x89   :  { %11798 = shalt.err (!%p11795_p7)
}
  0x8a   :  { %61 = dma.hbm_to_vmem [thread:$0]  %s15931_s2, 4096, %s56_s29, [#allocation7], %s11949_s20, %s11949_s20, %s11950_s21  }
  0x8b   :  { %s11799_s27 = scalar_lea.hbm %s15933_s4, 16 }
  0x8c   :  { %p11800_p8 = scmp.ne.s32.totalorder %s15933_s4, %s11799_s27  ;;  %p11803_p9 = scmp.lt.u32.totalorder %s11799_s27, %s15933_s4 }
  0x8e   :  { %p11805_p10 = pnand %p11803_p9, %p11800_p8 }
  0x90   :  { %11808 = shalt.err (!%p11805_p10)
}
  0x91   :  { %s11809_s3 = scalar_lea.vmem %s79_s16, 16  ;;  %s11813_s28 = scalar_lea.vmem %s79_s16, 32 }
  0x92   :  { %p11810_p11 = scmp.ne.s32.totalorder %s79_s16, %s11809_s3  ;;  %p11814_p12 = scmp.lt.s32.totalorder %s79_s16, %s79_s16 }
  0x93   :  { %p11815_p13 = scmp.lt.s32.totalorder %s11813_s28, %s11809_s3 }
  0x95   :  { %p11816_p0 = por %p11815_p13, %p11814_p12 }
  0x97   :  { %p11817_p1 = pnand %p11816_p0, %p11810_p11 }
  0x99   :  { %11820 = shalt.err (!%p11817_p1)
}
  0x9a   :  { %81 = dma.hbm_to_vmem [thread:$0]  %s15933_s4, 16, %s79_s16, [#allocation10]  }
  0x9b   :  { %s11960_s15 = smov [#allocation14]   ;;  %s11961_s17 = smov [#allocation17]  }
  0x9c   :  { %s100_s1 = sshll.u32 %s11960_s15, 4  ;;  %s122_s22 = sshll.u32 %s11961_s17, 4  ;;  %s101_s1 = int_to_ptr.vmem [resolvable:$true] %s100_s1  ;;  %s123_s22 = int_to_ptr.vmem [resolvable:$true] %s122_s22 }
  0x9d   :  { %s11821_s23 = scalar_lea.hbm %s15935_s6, 16 }
  0x9e   :  { %p11822_p2 = scmp.ne.s32.totalorder %s15935_s6, %s11821_s23  ;;  %p11825_p3 = scmp.lt.u32.totalorder %s11821_s23, %s15935_s6 }
  0xa0   :  { %p11827_p4 = pnand %p11825_p3, %p11822_p2 }
  0xa2   :  { %11830 = shalt.err (!%p11827_p4)
}
  0xa3   :  { %s11831_s4 = scalar_lea.vmem %s101_s1, 16  ;;  %s11835_s16 = scalar_lea.vmem %s101_s1, 32 }
  0xa4   :  { %p11832_p5 = scmp.ne.s32.totalorder %s101_s1, %s11831_s4  ;;  %p11836_p6 = scmp.lt.s32.totalorder %s101_s1, %s101_s1 }
  0xa5   :  { %p11837_p7 = scmp.lt.s32.totalorder %s11835_s16, %s11831_s4 }
  0xa7   :  { %p11838_p8 = por %p11837_p7, %p11836_p6 }
  0xa9   :  { %p11839_p9 = pnand %p11838_p8, %p11832_p5 }
  0xab   :  { %11842 = shalt.err (!%p11839_p9)
}
  0xac   :  { %103 = dma.hbm_to_vmem [thread:$0]  %s15935_s6, 16, %s101_s1, [#allocation13]  }
  0xad   :  { %s11843_s19 = scalar_lea.hbm %s15937_s8, 16 }
  0xae   :  { %p11844_p10 = scmp.ne.s32.totalorder %s15937_s8, %s11843_s19  ;;  %p11847_p11 = scmp.lt.u32.totalorder %s11843_s19, %s15937_s8 }
  0xb0   :  { %p11849_p12 = pnand %p11847_p11, %p11844_p10 }
  0xb2   :  { %11852 = shalt.err (!%p11849_p12)
}
  0xb3   :  { %s11853_s2 = scalar_lea.vmem %s123_s22, 16  ;;  %s11857_s29 = scalar_lea.vmem %s123_s22, 32 }
  0xb4   :  { %p11854_p13 = scmp.ne.s32.totalorder %s123_s22, %s11853_s2  ;;  %p11858_p0 = scmp.lt.s32.totalorder %s123_s22, %s123_s22 }
  0xb5   :  { %p11859_p1 = scmp.lt.s32.totalorder %s11857_s29, %s11853_s2 }
  0xb7   :  { %p11860_p2 = por %p11859_p1, %p11858_p0 }
  0xb9   :  { %p11861_p3 = pnand %p11860_p2, %p11854_p13 }
  0xbb   :  { %11864 = shalt.err (!%p11861_p3)
}
  0xbc   :  { %125 = dma.hbm_to_vmem [thread:$0]  %s15937_s8, 16, %s123_s22, [#allocation16]  }
  0xbd   :  { %s11962_s1 = smov [#allocation20]   ;;  %s11963_s9 = smov [#allocation23]  }
  0xbe   :  { %s144_s17 = sshll.u32 %s11962_s1, 4  ;;  %s166_s18 = sshll.u32 %s11963_s9, 4  ;;  %s145_s17 = int_to_ptr.vmem [resolvable:$true] %s144_s17  ;;  %s167_s18 = int_to_ptr.vmem [resolvable:$true] %s166_s18 }
  0xbf   :  { %s11865_s0 = scalar_lea.hbm %s15939_s10, 16 }
  0xc0   :  { %p11866_p4 = scmp.ne.s32.totalorder %s15939_s10, %s11865_s0  ;;  %p11869_p5 = scmp.lt.u32.totalorder %s11865_s0, %s15939_s10 }
  0xc2   :  { %p11871_p6 = pnand %p11869_p5, %p11866_p4 }
  0xc4   :  { %11874 = shalt.err (!%p11871_p6)
}
  0xc5   :  { %s11875_s8 = scalar_lea.vmem %s145_s17, 16  ;;  %s11879_s22 = scalar_lea.vmem %s145_s17, 32 }
  0xc6   :  { %p11876_p7 = scmp.ne.s32.totalorder %s145_s17, %s11875_s8  ;;  %p11880_p8 = scmp.lt.s32.totalorder %s145_s17, %s145_s17 }
  0xc7   :  { %p11881_p9 = scmp.lt.s32.totalorder %s11879_s22, %s11875_s8 }
  0xc9   :  { %p11882_p10 = por %p11881_p9, %p11880_p8 }
  0xcb   :  { %p11883_p11 = pnand %p11882_p10, %p11876_p7 }
  0xcd   :  { %11886 = shalt.err (!%p11883_p11)
}
  0xce   :  { %147 = dma.hbm_to_vmem [thread:$0]  %s15939_s10, 16, %s145_s17, [#allocation19]  }
  0xcf   :  { %s11887_s19 = scalar_lea.hbm %s15941_s12, 16 }
  0xd0   :  { %p11888_p12 = scmp.ne.s32.totalorder %s15941_s12, %s11887_s19  ;;  %p11891_p13 = scmp.lt.u32.totalorder %s11887_s19, %s15941_s12 }
  0xd2   :  { %p11893_p0 = pnand %p11891_p13, %p11888_p12 }
  0xd4   :  { %11896 = shalt.err (!%p11893_p0)
}
  0xd5   :  { %s11897_s2 = scalar_lea.vmem %s167_s18, 16  ;;  %s11901_s29 = scalar_lea.vmem %s167_s18, 32 }
  0xd6   :  { %p11898_p1 = scmp.ne.s32.totalorder %s167_s18, %s11897_s2  ;;  %p11902_p2 = scmp.lt.s32.totalorder %s167_s18, %s167_s18 }
  0xd7   :  { %p11903_p3 = scmp.lt.s32.totalorder %s11901_s29, %s11897_s2 }
  0xd9   :  { %p11904_p4 = por %p11903_p3, %p11902_p2 }
  0xdb   :  { %p11905_p5 = pnand %p11904_p4, %p11898_p1 }
  0xdd   :  { %11908 = shalt.err (!%p11905_p5)
}
  0xde   :  { %169 = dma.hbm_to_vmem [thread:$0]  %s15941_s12, 16, %s167_s18, [#allocation22]  }
  0xdf   :  { %11931 = dma.done.wait [#allocation4], 2048  }
  0xe0   :  { %11932 = vsyncadd [#allocation4], 4294965248 }
  0xe1   :  { %11933 = dma.done.wait [#allocation7], 6144  }
  0xe2   :  { %11934 = vsyncadd [#allocation7], 4294961152 }
  0xe3   :  { %11935 = dma.done.wait [#allocation10], 32  }
  0xe4   :  { %11936 = vsyncadd [#allocation10], 4294967264 }
  0xe5   :  { %11937 = dma.done.wait [#allocation13], 272  }
  0xe6   :  { %11938 = vsyncadd [#allocation13], 4294967024 }
  0xe7   :  { %11939 = dma.done.wait [#allocation16], 272  }
  0xe8   :  { %11940 = vsyncadd [#allocation16], 4294967024 }
  0xe9   :  { %11941 = dma.done.wait [#allocation19], 272  }
  0xea   :  { %11942 = vsyncadd [#allocation19], 4294967024 }
  0xeb   :  { %11943 = dma.done.wait [#allocation22], 272  }
  0xec   :  { %11944 = vsyncadd [#allocation22], 4294967024  ;;  %vm244_vm0 = vcmask 261120   ;;  %v12227_v0 = vld [vmem:[#allocation3 + $0x40] sm:$0xff]  ;;  %v12229_v1 = vld [vmem:[#allocation3 + $0x50] sm:$0xff]  ;;  %vm11965_vm1 = vmmov 0  }
  0xed   :  { %v12231_v2 = vld [vmem:[#allocation3 + $0x48] sm:$0xff]  ;;  %v269_v3 = vsel %vm244_vm0, %v12227_v0, 0.0  ;;  %v275_v4 = vsel %vm244_vm0, %v12229_v1, 0.0  ;;  %v12237_v5 = vld [vmem:[#allocation3 + $0x58] sm:$0xff]  ;;  %v12243_v8 = vld [vmem:[#allocation3 + $0x60] sm:$0xff]  ;;  %vm1428_vm2 = vcmask 64512  }
  0xee   :  { %270 = vadd.xlane.f32.xlu0 %v269_v3  ;;  %276 = vadd.xlane.f32.xlu1 %v275_v4  ;;  %v272_v6 = vsel %vm244_vm0, %v12231_v2, 0.0  ;;  %v278_v7 = vsel %vm244_vm0, %v12237_v5, 0.0  ;;  %v12245_v9 = vld [vmem:[#allocation3 + $0x68] sm:$0xff]  ;;  %v281_v10 = vsel %vm244_vm0, %v12243_v8, 0.0  ;;  %v12251_v12 = vld [vmem:[#allocation3 + $0x70] sm:$0xff]  ;;  %v12253_v13 = vld [vmem:[#allocation3 + $0x78] sm:$0xff] }
  0xef   :  { %v284_v11 = vsel %vm244_vm0, %v12245_v9, 0.0  ;;  %v12255_v14 = vld [vmem:[#allocation3] sm:$0xff]  ;;  %v12257_v15 = vld [vmem:[#allocation3 + $0x8] sm:$0xff]  ;;  %v287_v16 = vsel %vm244_vm0, %v12251_v12, 0.0  ;;  %v290_v17 = vsel %vm244_vm0, %v12253_v13, 0.0  ;;  %v12267_v20 = vld [vmem:[#allocation3 + $0x10] sm:$0xff] }
  0xf0   :  { %v245_v18 = vsel %vm244_vm0, %v12255_v14, 0.0  ;;  %v248_v19 = vsel %vm244_vm0, %v12257_v15, 0.0  ;;  %v12269_v21 = vld [vmem:[#allocation3 + $0x18] sm:$0xff]  ;;  %v251_v22 = vsel %vm244_vm0, %v12267_v20, 0.0  ;;  %v12275_v24 = vld [vmem:[#allocation3 + $0x20] sm:$0xff]  ;;  %v12277_v25 = vld [vmem:[#allocation3 + $0x28] sm:$0xff] }
  0xf1   :  { %v254_v23 = vsel %vm244_vm0, %v12269_v21, 0.0  ;;  %v257_v26 = vsel %vm244_vm0, %v12275_v24, 0.0  ;;  %v260_v27 = vsel %vm244_vm0, %v12277_v25, 0.0  ;;  %v12283_v28 = vld [vmem:[#allocation3 + $0x30] sm:$0xff]  ;;  %v12285_v29 = vld [vmem:[#allocation3 + $0x38] sm:$0xff]  ;;  %v12291_v32 = vld [vmem:[#allocation6] sm:$0xff] }
  0xf2   :  { %273 = vadd.xlane.f32.xlu0 %v272_v6  ;;  %279 = vadd.xlane.f32.xlu1 %v278_v7  ;;  %v263_v30 = vsel %vm244_vm0, %v12283_v28, 0.0  ;;  %v266_v31 = vsel %vm244_vm0, %v12285_v29, 0.0  ;;  %v12293_v33 = vld [vmem:[#allocation6 + $0x8] sm:$0xff]  ;;  %v506_v34 = vsel %vm244_vm0, %v12291_v32, 0.0  ;;  %v12299_v36 = vld [vmem:[#allocation6 + $0x10] sm:$0xff]  ;;  %v12301_v37 = vld [vmem:[#allocation6 + $0x18] sm:$0xff] }
  0xf3   :  { %v509_v35 = vsel %vm244_vm0, %v12293_v33, 0.0  ;;  %v512_v38 = vsel %vm244_vm0, %v12299_v36, 0.0  ;;  %v515_v39 = vsel %vm244_vm0, %v12301_v37, 0.0  ;;  %v12307_v40 = vld [vmem:[#allocation6 + $0x20] sm:$0xff]  ;;  %v12309_v41 = vld [vmem:[#allocation6 + $0x28] sm:$0xff]  ;;  %v12315_v44 = vld [vmem:[#allocation6 + $0x30] sm:$0xff] }
  0xf4   :  { %v518_v42 = vsel %vm244_vm0, %v12307_v40, 0.0  ;;  %v521_v43 = vsel %vm244_vm0, %v12309_v41, 0.0  ;;  %v12317_v45 = vld [vmem:[#allocation6 + $0x38] sm:$0xff]  ;;  %v524_v46 = vsel %vm244_vm0, %v12315_v44, 0.0  ;;  %v12323_v48 = vld [vmem:[#allocation6 + $0x40] sm:$0xff]  ;;  %v12325_v49 = vld [vmem:[#allocation6 + $0x48] sm:$0xff] }
  0xf5   :  { %v527_v47 = vsel %vm244_vm0, %v12317_v45, 0.0  ;;  %v530_v50 = vsel %vm244_vm0, %v12323_v48, 0.0  ;;  %v533_v51 = vsel %vm244_vm0, %v12325_v49, 0.0  ;;  %v12331_v52 = vld [vmem:[#allocation6 + $0x50] sm:$0xff]  ;;  %v12333_v53 = vld [vmem:[#allocation6 + $0x58] sm:$0xff]  ;;  %v12339_v56 = vld [vmem:[#allocation6 + $0x60] sm:$0xff] }
  0xf6   :  { %282 = vadd.xlane.f32.xlu0 %v281_v10  ;;  %285 = vadd.xlane.f32.xlu1 %v284_v11  ;;  %v536_v54 = vsel %vm244_vm0, %v12331_v52, 0.0  ;;  %v539_v55 = vsel %vm244_vm0, %v12333_v53, 0.0  ;;  %v12341_v57 = vld [vmem:[#allocation6 + $0x68] sm:$0xff]  ;;  %v542_v58 = vsel %vm244_vm0, %v12339_v56, 0.0  ;;  %v12347_v60 = vld [vmem:[#allocation6 + $0x70] sm:$0xff]  ;;  %v12349_v61 = vld [vmem:[#allocation6 + $0x78] sm:$0xff] }
  0xf7   :  { %v545_v59 = vsel %vm244_vm0, %v12341_v57, 0.0  ;;  %v548_v62 = vsel %vm244_vm0, %v12347_v60, 0.0  ;;  %v551_v63 = vsel %vm244_vm0, %v12349_v61, 0.0  ;;  %vm2189_vm3 = vcmask 130048   ;;  %s11966_s12 = smov 120   ;;  %s11967_s15 = smov 112  }
  0xf8   :  { %s11968_s1 = smov 104   ;;  %s11969_s17 = smov 16   ;;  %vm5342_vm4 = vcmask 130112   ;;  %vm7367_vm5 = vcmask 195712   ;;  %vm9392_vm6 = vcmask 261312  }
  0xf9   :  { %s11970_s9 = smov 24   ;;  %s11971_s18 = smov [#allocation24]  }
  0xfa   :  { %288 = vadd.xlane.f32.xlu0 %v287_v16  ;;  %291 = vadd.xlane.f32.xlu1 %v290_v17  ;;  %s9598_s23 = sshll.u32 %s11971_s18, 4  ;;  %s9599_s23 = int_to_ptr.vmem [resolvable:$true] %s9598_s23 }
  0xfb   :  { %s11909_s24 = scalar_lea.vmem %s9599_s23, 2048  ;;  %p11914_p7 = scmp.lt.s32.totalorder %s9599_s23, %s9599_s23 }
  0xfc   :  { %p11910_p6 = scmp.ne.s32.totalorder %s9599_s23, %s11909_s24  ;;  %p11915_p8 = scmp.lt.s32.totalorder %s11909_s24, %s11909_s24 }
  0xfe   :  { %246 = vadd.xlane.f32.xlu0 %v245_v18  ;;  %249 = vadd.xlane.f32.xlu1 %v248_v19  ;;  %p11916_p9 = por %p11915_p8, %p11914_p7 }
 0x100   :  { %p11917_p10 = pnand %p11916_p9, %p11910_p6 }
 0x102   :  { %252 = vadd.xlane.f32.xlu0 %v251_v22  ;;  %255 = vadd.xlane.f32.xlu1 %v254_v23 }
 0x106   :  { %258 = vadd.xlane.f32.xlu0 %v257_v26  ;;  %261 = vadd.xlane.f32.xlu1 %v260_v27 }
 0x10a   :  { %264 = vadd.xlane.f32.xlu0 %v263_v30  ;;  %267 = vadd.xlane.f32.xlu1 %v266_v31 }
 0x10e   :  { %507 = vadd.xlane.f32.xlu0 %v506_v34  ;;  %510 = vadd.xlane.f32.xlu1 %v509_v35 }
 0x112   :  { %513 = vadd.xlane.f32.xlu0 %v512_v38  ;;  %516 = vadd.xlane.f32.xlu1 %v515_v39 }
 0x116   :  { %519 = vadd.xlane.f32.xlu0 %v518_v42  ;;  %522 = vadd.xlane.f32.xlu1 %v521_v43 }
 0x11a   :  { %525 = vadd.xlane.f32.xlu0 %v524_v46  ;;  %528 = vadd.xlane.f32.xlu1 %v527_v47 }
 0x11e   :  { %531 = vadd.xlane.f32.xlu0 %v530_v50  ;;  %534 = vadd.xlane.f32.xlu1 %v533_v51 }
 0x122   :  { %537 = vadd.xlane.f32.xlu0 %v536_v54  ;;  %540 = vadd.xlane.f32.xlu1 %v539_v55 }
 0x126   :  { %543 = vadd.xlane.f32.xlu0 %v542_v58  ;;  %546 = vadd.xlane.f32.xlu1 %v545_v59 }
 0x12a   :  { %549 = vadd.xlane.f32.xlu0 %v548_v62  ;;  %552 = vadd.xlane.f32.xlu1 %v551_v63 }
 0x17b   :  { %v271_v3 = vpop.xlane.xlu0 %270  ;;  %v277_v4 = vpop.xlane.xlu1 %276 }
 0x17c   :  { %v302_v6 = vmul.f32 0.03125, %v271_v3  ;;  %v304_v7 = vmul.f32 0.03125, %v277_v4 }
 0x17e   :  { %v12356_v10 = vsub.f32 %v12227_v0, %v302_v6  ;;  %v12359_v11 = vsub.f32 %v12229_v1, %v304_v7 }
 0x17f   :  { %v274_v16 = vpop.xlane.xlu0 %273  ;;  %v280_v17 = vpop.xlane.xlu1 %279 }
 0x180   :  { %v303_v18 = vmul.f32 0.03125, %v274_v16  ;;  %v305_v19 = vmul.f32 0.03125, %v280_v17  ;;  %v334_v22 = vmul.f32 %v12356_v10, %v12356_v10  ;;  %v336_v23 = vmul.f32 %v12359_v11, %v12359_v11 }
 0x182   :  { %v12366_v26 = vsub.f32 %v12231_v2, %v303_v18  ;;  %v12369_v27 = vsub.f32 %v12237_v5, %v305_v19  ;;  %v366_v0 = vsel %vm244_vm0, %v334_v22, 0.0  ;;  %v372_v31 = vsel %vm244_vm0, %v336_v23, 0.0 }
 0x183   :  { %v283_v1 = vpop.xlane.xlu0 %282  ;;  %367 = vadd.xlane.f32.xlu0 %v366_v0  ;;  %v286_v30 = vpop.xlane.xlu1 %285 }
 0x184   :  { %v306_v34 = vmul.f32 0.03125, %v283_v1  ;;  %v307_v35 = vmul.f32 0.03125, %v286_v30  ;;  %v335_v38 = vmul.f32 %v12366_v26, %v12366_v26  ;;  %v337_v39 = vmul.f32 %v12369_v27, %v12369_v27 }
 0x186   :  { %v12378_v2 = vsub.f32 %v12243_v8, %v306_v34  ;;  %v12381_v5 = vsub.f32 %v12245_v9, %v307_v35  ;;  %v369_v42 = vsel %vm244_vm0, %v335_v38, 0.0  ;;  %v375_v47 = vsel %vm244_vm0, %v337_v39, 0.0 }
 0x187   :  { %v289_v43 = vpop.xlane.xlu0 %288  ;;  %370 = vadd.xlane.f32.xlu1 %v369_v42  ;;  %373 = vadd.xlane.f32.xlu0 %v372_v31  ;;  %v292_v46 = vpop.xlane.xlu1 %291 }
 0x188   :  { %v308_v50 = vmul.f32 0.03125, %v289_v43  ;;  %v309_v51 = vmul.f32 0.03125, %v292_v46  ;;  %v338_v54 = vmul.f32 %v12378_v2, %v12378_v2  ;;  %v339_v8 = vmul.f32 %v12381_v5, %v12381_v5 }
 0x18a   :  { %v12390_v55 = vsub.f32 %v12251_v12, %v308_v50  ;;  %v12393_v9 = vsub.f32 %v12253_v13, %v309_v51  ;;  %v378_v58 = vsel %vm244_vm0, %v338_v54, 0.0  ;;  %v381_v62 = vsel %vm244_vm0, %v339_v8, 0.0 }
 0x18b   :  { %376 = vadd.xlane.f32.xlu1 %v375_v47  ;;  %379 = vadd.xlane.f32.xlu0 %v378_v58  ;;  %v247_v59 = vpop.xlane.xlu0 %246  ;;  %v250_v63 = vpop.xlane.xlu1 %249 }
 0x18c   :  { %v294_v3 = vmul.f32 0.03125, %v247_v59  ;;  %v295_v4 = vmul.f32 0.03125, %v250_v63  ;;  %v340_v6 = vmul.f32 %v12390_v55, %v12390_v55  ;;  %v341_v12 = vmul.f32 %v12393_v9, %v12393_v9 }
 0x18e   :  { %v12402_v7 = vsub.f32 %v12255_v14, %v294_v3  ;;  %v12405_v13 = vsub.f32 %v12257_v15, %v295_v4  ;;  %v384_v16 = vsel %vm244_vm0, %v340_v6, 0.0  ;;  %v387_v18 = vsel %vm244_vm0, %v341_v12, 0.0 }
 0x18f   :  { %382 = vadd.xlane.f32.xlu1 %v381_v62  ;;  %385 = vadd.xlane.f32.xlu0 %v384_v16  ;;  %v253_v17 = vpop.xlane.xlu0 %252  ;;  %v256_v19 = vpop.xlane.xlu1 %255 }
 0x190   :  { %v296_v22 = vmul.f32 0.03125, %v253_v17  ;;  %v297_v23 = vmul.f32 0.03125, %v256_v19  ;;  %v326_v0 = vmul.f32 %v12402_v7, %v12402_v7  ;;  %v327_v14 = vmul.f32 %v12405_v13, %v12405_v13 }
 0x192   :  { %v12414_v1 = vsub.f32 %v12267_v20, %v296_v22  ;;  %v12417_v15 = vsub.f32 %v12269_v21, %v297_v23  ;;  %v342_v30 = vsel %vm244_vm0, %v326_v0, 0.0  ;;  %v345_v34 = vsel %vm244_vm0, %v327_v14, 0.0 }
 0x193   :  { %388 = vadd.xlane.f32.xlu1 %v387_v18  ;;  %343 = vadd.xlane.f32.xlu0 %v342_v30  ;;  %v259_v31 = vpop.xlane.xlu0 %258  ;;  %v262_v35 = vpop.xlane.xlu1 %261 }
 0x194   :  { %v298_v38 = vmul.f32 0.03125, %v259_v31  ;;  %v299_v39 = vmul.f32 0.03125, %v262_v35  ;;  %v328_v42 = vmul.f32 %v12414_v1, %v12414_v1  ;;  %v329_v20 = vmul.f32 %v12417_v15, %v12417_v15 }
 0x196   :  { %v12426_v43 = vsub.f32 %v12275_v24, %v298_v38  ;;  %v12429_v21 = vsub.f32 %v12277_v25, %v299_v39  ;;  %v348_v46 = vsel %vm244_vm0, %v328_v42, 0.0  ;;  %v351_v50 = vsel %vm244_vm0, %v329_v20, 0.0 }
 0x197   :  { %346 = vadd.xlane.f32.xlu1 %v345_v34  ;;  %349 = vadd.xlane.f32.xlu0 %v348_v46  ;;  %v265_v47 = vpop.xlane.xlu0 %264  ;;  %v268_v51 = vpop.xlane.xlu1 %267 }
 0x198   :  { %v300_v54 = vmul.f32 0.03125, %v265_v47  ;;  %v301_v8 = vmul.f32 0.03125, %v268_v51  ;;  %v330_v58 = vmul.f32 %v12426_v43, %v12426_v43  ;;  %v331_v24 = vmul.f32 %v12429_v21, %v12429_v21 }
 0x19a   :  { %v12438_v59 = vsub.f32 %v12283_v28, %v300_v54  ;;  %v12441_v25 = vsub.f32 %v12285_v29, %v301_v8  ;;  %v354_v62 = vsel %vm244_vm0, %v330_v58, 0.0  ;;  %v357_v3 = vsel %vm244_vm0, %v331_v24, 0.0  ;;  %v11167_v58 = vld [vmem:[#allocation12] sm:$0xff]  }
 0x19b   :  { %352 = vadd.xlane.f32.xlu1 %v351_v50  ;;  %355 = vadd.xlane.f32.xlu0 %v354_v62  ;;  %v508_v63 = vpop.xlane.xlu0 %507  ;;  %v511_v4 = vpop.xlane.xlu1 %510 }
 0x19c   :  { %v554_v6 = vmul.f32 0.03125, %v508_v63  ;;  %v555_v12 = vmul.f32 0.03125, %v511_v4  ;;  %v332_v16 = vmul.f32 %v12438_v59, %v12438_v59  ;;  %v333_v28 = vmul.f32 %v12441_v25, %v12441_v25  ;;  %11010 = vmatprep.subr.bf16.mxu1 %v11167_v58  ;;  %10122 = vmatprep.subr.bf16.mxu0 %v11167_v58 }
 0x19d   :  { %11012 = vmatpush3.bf16.msra.mxu1 %v11167_v58  ;;  %10123 = vmatpush3.bf16.msra.mxu0 %v11167_v58 }
 0x19e   :  { %v12450_v17 = vsub.f32 %v12291_v32, %v554_v6  ;;  %v12453_v29 = vsub.f32 %v12293_v33, %v555_v12  ;;  %v360_v18 = vsel %vm244_vm0, %v332_v16, 0.0  ;;  %v363_v22 = vsel %vm244_vm0, %v333_v28, 0.0  ;;  %v11168_v28 = vld [vmem:[#allocation12 + $0x8] sm:$0xff]  }
 0x19f   :  { %358 = vadd.xlane.f32.xlu1 %v357_v3  ;;  %361 = vadd.xlane.f32.xlu0 %v360_v18  ;;  %v514_v19 = vpop.xlane.xlu0 %513  ;;  %v517_v23 = vpop.xlane.xlu1 %516 }
 0x1a0   :  { %v556_v0 = vmul.f32 0.03125, %v514_v19  ;;  %v557_v14 = vmul.f32 0.03125, %v517_v23  ;;  %v586_v30 = vmul.f32 %v12450_v17, %v12450_v17  ;;  %v587_v32 = vmul.f32 %v12453_v29, %v12453_v29  ;;  %11011 = vmatprep.subr.bf16.mxu1 %v11168_v28  ;;  %10124 = vmatprep.subr.bf16.mxu0 %v11168_v28 }
 0x1a1   :  { %11013 = vmatpush3.bf16.msra.mxu1 %v11168_v28  ;;  %10125 = vmatpush3.bf16.msra.mxu0 %v11168_v28 }
 0x1a2   :  { %v12462_v31 = vsub.f32 %v12299_v36, %v556_v0  ;;  %v12465_v33 = vsub.f32 %v12301_v37, %v557_v14  ;;  %v602_v34 = vsel %vm244_vm0, %v586_v30, 0.0  ;;  %v605_v38 = vsel %vm244_vm0, %v587_v32, 0.0 }
 0x1a3   :  { %364 = vadd.xlane.f32.xlu1 %v363_v22  ;;  %603 = vadd.xlane.f32.xlu0 %v602_v34  ;;  %v520_v35 = vpop.xlane.xlu0 %519  ;;  %v523_v39 = vpop.xlane.xlu1 %522 }
 0x1a4   :  { %v558_v42 = vmul.f32 0.03125, %v520_v35  ;;  %v559_v20 = vmul.f32 0.03125, %v523_v39  ;;  %v588_v46 = vmul.f32 %v12462_v31, %v12462_v31  ;;  %v589_v36 = vmul.f32 %v12465_v33, %v12465_v33 }
 0x1a6   :  { %v12474_v47 = vsub.f32 %v12307_v40, %v558_v42  ;;  %v12477_v37 = vsub.f32 %v12309_v41, %v559_v20  ;;  %v608_v50 = vsel %vm244_vm0, %v588_v46, 0.0  ;;  %v611_v54 = vsel %vm244_vm0, %v589_v36, 0.0 }
 0x1a7   :  { %606 = vadd.xlane.f32.xlu1 %v605_v38  ;;  %609 = vadd.xlane.f32.xlu0 %v608_v50  ;;  %v526_v51 = vpop.xlane.xlu0 %525  ;;  %v529_v8 = vpop.xlane.xlu1 %528 }
 0x1a8   :  { %v560_v24 = vmul.f32 0.03125, %v526_v51  ;;  %v561_v62 = vmul.f32 0.03125, %v529_v8  ;;  %v590_v63 = vmul.f32 %v12474_v47, %v12474_v47  ;;  %v591_v40 = vmul.f32 %v12477_v37, %v12477_v37 }
 0x1aa   :  { %v12486_v41 = vsub.f32 %v12315_v44, %v560_v24  ;;  %v12489_v3 = vsub.f32 %v12317_v45, %v561_v62  ;;  %v614_v4 = vsel %vm244_vm0, %v590_v63, 0.0  ;;  %v617_v12 = vsel %vm244_vm0, %v591_v40, 0.0 }
 0x1ab   :  { %612 = vadd.xlane.f32.xlu1 %v611_v54  ;;  %615 = vadd.xlane.f32.xlu0 %v614_v4  ;;  %v532_v6 = vpop.xlane.xlu0 %531  ;;  %v535_v16 = vpop.xlane.xlu1 %534 }
 0x1ac   :  { %v562_v18 = vmul.f32 0.03125, %v532_v6  ;;  %v563_v19 = vmul.f32 0.03125, %v535_v16  ;;  %v592_v44 = vmul.f32 %v12486_v41, %v12486_v41  ;;  %v593_v45 = vmul.f32 %v12489_v3, %v12489_v3 }
 0x1ae   :  { %v12498_v22 = vsub.f32 %v12323_v48, %v562_v18  ;;  %v12501_v23 = vsub.f32 %v12325_v49, %v563_v19  ;;  %v620_v0 = vsel %vm244_vm0, %v592_v44, 0.0  ;;  %v623_v30 = vsel %vm244_vm0, %v593_v45, 0.0 }
 0x1af   :  { %618 = vadd.xlane.f32.xlu1 %v617_v12  ;;  %621 = vadd.xlane.f32.xlu0 %v620_v0  ;;  %v538_v14 = vpop.xlane.xlu0 %537  ;;  %v541_v32 = vpop.xlane.xlu1 %540  ;;  %v12533_v12 = vld [vmem:[#allocation15] sm:$0xff]  }
 0x1b0   :  { %v564_v34 = vmul.f32 0.03125, %v538_v14  ;;  %v565_v35 = vmul.f32 0.03125, %v541_v32  ;;  %v594_v38 = vmul.f32 %v12498_v22, %v12498_v22  ;;  %v595_v48 = vmul.f32 %v12501_v23, %v12501_v23  ;;  %10142 = vmatprep.subr.bf16.mxu1 %v12533_v12  ;;  %10162 = vmatprep.subr.bf16.mxu0 %v12533_v12 }
 0x1b2   :  { %v12510_v49 = vsub.f32 %v12331_v52, %v564_v34  ;;  %v12513_v39 = vsub.f32 %v12333_v53, %v565_v35  ;;  %v626_v42 = vsel %vm244_vm0, %v594_v38, 0.0  ;;  %v629_v46 = vsel %vm244_vm0, %v595_v48, 0.0 }
 0x1b3   :  { %624 = vadd.xlane.f32.xlu1 %v623_v30  ;;  %627 = vadd.xlane.f32.xlu0 %v626_v42  ;;  %v544_v20 = vpop.xlane.xlu0 %543  ;;  %v547_v36 = vpop.xlane.xlu1 %546 }
 0x1b4   :  { %v566_v50 = vmul.f32 0.03125, %v544_v20  ;;  %v567_v51 = vmul.f32 0.03125, %v547_v36  ;;  %v596_v54 = vmul.f32 %v12510_v49, %v12510_v49  ;;  %v597_v52 = vmul.f32 %v12513_v39, %v12513_v39 }
 0x1b6   :  { %v12522_v8 = vsub.f32 %v12339_v56, %v566_v50  ;;  %v12525_v53 = vsub.f32 %v12341_v57, %v567_v51  ;;  %v632_v58 = vsel %vm244_vm0, %v596_v54, 0.0  ;;  %v635_v62 = vsel %vm244_vm0, %v597_v52, 0.0 }
 0x1b7   :  { %630 = vadd.xlane.f32.xlu1 %v629_v46  ;;  %633 = vadd.xlane.f32.xlu0 %v632_v58  ;;  %v550_v24 = vpop.xlane.xlu0 %549  ;;  %v553_v63 = vpop.xlane.xlu1 %552 }
 0x1b8   :  { %v568_v40 = vmul.f32 0.03125, %v550_v24  ;;  %v569_v4 = vmul.f32 0.03125, %v553_v63  ;;  %v598_v6 = vmul.f32 %v12522_v8, %v12522_v8  ;;  %v599_v56 = vmul.f32 %v12525_v53, %v12525_v53 }
 0x1ba   :  { %v12536_v57 = vsub.f32 %v12347_v60, %v568_v40  ;;  %v12539_v16 = vsub.f32 %v12349_v61, %v569_v4  ;;  %v638_v28 = vsel %vm244_vm0, %v598_v6, 0.0  ;;  %v641_v18 = vsel %vm244_vm0, %v599_v56, 0.0 }
 0x1bb   :  { %636 = vadd.xlane.f32.xlu1 %v635_v62  ;;  %639 = vadd.xlane.f32.xlu0 %v638_v28 }
 0x1bc   :  { %v600_v19 = vmul.f32 %v12536_v57, %v12536_v57  ;;  %v601_v60 = vmul.f32 %v12539_v16, %v12539_v16 }
 0x1be   :  { %v644_v44 = vsel %vm244_vm0, %v600_v19, 0.0  ;;  %v647_v61 = vsel %vm244_vm0, %v601_v60, 0.0  ;;  %v12552_v19 = vld [vmem:[#allocation9] ss:$0 sm:$0xff] }
 0x1bf   :  { %642 = vadd.xlane.f32.xlu1 %v641_v18  ;;  %645 = vadd.xlane.f32.xlu0 %v644_v44 }
 0x1c3   :  { %648 = vadd.xlane.f32.xlu1 %v647_v61 }
 0x210   :  { %v368_v45 = vpop.xlane.xlu0 %367 }
 0x211   :  { %v398_v0 = vmul.f32 0.03125, %v368_v45 }
 0x213   :  { %v414_v14 = vadd.f32 1e-05, %v398_v0 }
 0x214   :  { %v371_v30 = vpop.xlane.xlu1 %370  ;;  %v374_v32 = vpop.xlane.xlu0 %373 }
 0x215   :  { %11175 = vrsqrt.f32 %v414_v14  ;;  %v399_v34 = vmul.f32 0.03125, %v371_v30  ;;  %v400_v35 = vmul.f32 0.03125, %v374_v32 }
 0x217   :  { %v415_v38 = vadd.f32 1e-05, %v399_v34  ;;  %v416_v48 = vadd.f32 1e-05, %v400_v35 }
 0x218   :  { %v377_v42 = vpop.xlane.xlu1 %376  ;;  %v380_v20 = vpop.xlane.xlu0 %379 }
 0x219   :  { %11177 = vrsqrt.f32 %v415_v38  ;;  %v401_v46 = vmul.f32 0.03125, %v377_v42  ;;  %v402_v36 = vmul.f32 0.03125, %v380_v20 }
 0x21a   :  { %11179 = vrsqrt.f32 %v416_v48 }
 0x21b   :  { %v417_v50 = vadd.f32 1e-05, %v401_v46  ;;  %v418_v51 = vadd.f32 1e-05, %v402_v36 }
 0x21c   :  { %v383_v54 = vpop.xlane.xlu1 %382  ;;  %v386_v52 = vpop.xlane.xlu0 %385 }
 0x21d   :  { %11181 = vrsqrt.f32 %v417_v50  ;;  %v403_v58 = vmul.f32 0.03125, %v383_v54  ;;  %v404_v24 = vmul.f32 0.03125, %v386_v52 }
 0x21e   :  { %11183 = vrsqrt.f32 %v418_v51 }
 0x21f   :  { %v11176_v62 = vpop.eup %11175  ;;  %v419_v63 = vadd.f32 1e-05, %v403_v58  ;;  %v420_v40 = vadd.f32 1e-05, %v404_v24 }
 0x220   :  { %v389_v4 = vpop.xlane.xlu1 %388  ;;  %v344_v6 = vpop.xlane.xlu0 %343  ;;  %v446_v56 = vmul.f32 %v11176_v62, %v12356_v10  ;;  %v12556_v10 = vld [vmem:[#allocation11] ss:$0 sm:$0xff] }
 0x221   :  { %11185 = vrsqrt.f32 %v419_v63  ;;  %v405_v28 = vmul.f32 0.03125, %v389_v4  ;;  %v390_v18 = vmul.f32 0.03125, %v344_v6 }
 0x222   :  { %11187 = vrsqrt.f32 %v420_v40  ;;  %v468_v32 = vmul.f32 %v12552_v19, %v446_v56 }
 0x223   :  { %v11178_v60 = vpop.eup %11177  ;;  %v421_v44 = vadd.f32 1e-05, %v405_v28  ;;  %v406_v61 = vadd.f32 1e-05, %v390_v18 }
 0x224   :  { %v11180_v45 = vpop.eup %11179  ;;  %v347_v0 = vpop.xlane.xlu1 %346  ;;  %v447_v30 = vmul.f32 %v11178_v60, %v12366_v26  ;;  %v490_v26 = vadd.f32 %v12556_v10, %v468_v32 }
 0x225   :  { %v350_v14 = vpop.xlane.xlu0 %349  ;;  %11189 = vrsqrt.f32 %v421_v44  ;;  %v391_v34 = vmul.f32 0.03125, %v347_v0  ;;  %v448_v38 = vmul.f32 %v11180_v45, %v12359_v11 }
 0x226   :  { %v392_v35 = vmul.f32 0.03125, %v350_v14  ;;  %11191 = vrsqrt.f32 %v406_v61  ;;  %v469_v48 = vmul.f32 %v12552_v19, %v447_v30 }
 0x227   :  { %v11182_v42 = vpop.eup %11181  ;;  %v407_v20 = vadd.f32 1e-05, %v391_v34  ;;  %v470_v58 = vmul.f32 %v12552_v19, %v448_v38  ;;  %v12578_v34 = vld [vmem:[#allocation15 + $0x8] sm:$0xff]  }
 0x228   :  { %v408_v46 = vadd.f32 1e-05, %v392_v35  ;;  %v11184_v36 = vpop.eup %11183  ;;  %v353_v50 = vpop.xlane.xlu1 %352  ;;  %v491_v54 = vadd.f32 %v12556_v10, %v469_v48  ;;  %v449_v52 = vmul.f32 %v11182_v42, %v12369_v27 }
 0x229   :  { %v356_v51 = vpop.xlane.xlu0 %355  ;;  %11193 = vrsqrt.f32 %v407_v20  ;;  %v393_v24 = vmul.f32 0.03125, %v353_v50  ;;  %v450_v40 = vmul.f32 %v11184_v36, %v12378_v2  ;;  %v492_v27 = vadd.f32 %v12556_v10, %v470_v58 }
 0x22a   :  { %v394_v11 = vmul.f32 0.03125, %v356_v51  ;;  %11195 = vrsqrt.f32 %v408_v46  ;;  %v12564_v62 = vpack.c.bf16 %v491_v54, %v490_v26  ;;  %v471_v63 = vmul.f32 %v12552_v19, %v449_v52 }
 0x22b   :  { %v11186_v4 = vpop.eup %11185  ;;  %v409_v6 = vadd.f32 1e-05, %v393_v24  ;;  %v472_v45 = vmul.f32 %v12552_v19, %v450_v40  ;;  %v12592_v24 = vld [vmem:[#allocation18] sm:$0xff]  }
 0x22c   :  { %v410_v56 = vadd.f32 1e-05, %v394_v11  ;;  %v11188_v28 = vpop.eup %11187  ;;  %v359_v18 = vpop.xlane.xlu1 %358  ;;  %10134 = vmatprep.mubr.msk.bf16.mxu1 %vm244_vm0, %v12564_v62  ;;  %v493_v44 = vadd.f32 %v12556_v10, %v471_v63  ;;  %v451_v61 = vmul.f32 %v11186_v4, %v12381_v5 }
 0x22d   :  { %v362_v60 = vpop.xlane.xlu0 %361  ;;  %11197 = vrsqrt.f32 %v409_v6  ;;  %v395_v0 = vmul.f32 0.03125, %v359_v18  ;;  %v452_v14 = vmul.f32 %v11188_v28, %v12390_v55  ;;  %v494_v46 = vadd.f32 %v12556_v10, %v472_v45 }
 0x22e   :  { %v396_v2 = vmul.f32 0.03125, %v362_v60  ;;  %11199 = vrsqrt.f32 %v410_v56  ;;  %v12575_v30 = vpack.c.bf16 %v493_v44, %v492_v27  ;;  %v473_v32 = vmul.f32 %v12552_v19, %v451_v61 }
 0x22f   :  { %v11190_v35 = vpop.eup %11189  ;;  %v411_v38 = vadd.f32 1e-05, %v395_v0  ;;  %v474_v50 = vmul.f32 %v12552_v19, %v452_v14 }
 0x230   :  { %v412_v48 = vadd.f32 1e-05, %v396_v2  ;;  %v11192_v42 = vpop.eup %11191  ;;  %v365_v20 = vpop.xlane.xlu1 %364  ;;  %10135 = vmatmul.mubr.msk.bf16.vlgmr.msra.gmra.mrb[0].mxu1 %vm244_vm0, %v12575_v30  ;;  %v495_v55 = vadd.f32 %v12556_v10, %v473_v32  ;;  %v453_v36 = vmul.f32 %v11190_v35, %v12393_v9 }
 0x231   :  { %v604_v5 = vpop.xlane.xlu0 %603  ;;  %11201 = vrsqrt.f32 %v411_v38  ;;  %v397_v51 = vmul.f32 0.03125, %v365_v20  ;;  %10143 = vmatpush3.bf16.msra.mxu1 %v12533_v12  ;;  %v438_v58 = vmul.f32 %v11192_v42, %v12402_v7  ;;  %v496_v56 = vadd.f32 %v12556_v10, %v474_v50 }
 0x232   :  { %v650_v26 = vmul.f32 0.03125, %v604_v5  ;;  %11203 = vrsqrt.f32 %v412_v48  ;;  %v12587_v54 = vpack.c.bf16 %v495_v55, %v494_v46  ;;  %v475_v52 = vmul.f32 %v12552_v19, %v453_v36  ;;  %10144 = vmatprep.subr.bf16.mxu1 %v12578_v34 }
 0x233   :  { %v11194_v11 = vpop.eup %11193  ;;  %v413_v9 = vadd.f32 1e-05, %v397_v51  ;;  %v460_v7 = vmul.f32 %v12552_v19, %v438_v58 }
 0x234   :  { %v666_v63 = vadd.f32 1e-05, %v650_v26  ;;  %v11196_v40 = vpop.eup %11195  ;;  %v607_v4 = vpop.xlane.xlu1 %606  ;;  %10138 = vmatprep.mubr.msk.bf16.mxu1 %vm244_vm0, %v12587_v54  ;;  %v497_v28 = vadd.f32 %v12556_v10, %v475_v52  ;;  %v439_v18 = vmul.f32 %v11194_v11, %v12405_v13 }
 0x235   :  { %v610_v6 = vpop.xlane.xlu0 %609  ;;  %11205 = vrsqrt.f32 %v413_v9  ;;  %v651_v60 = vmul.f32 0.03125, %v607_v4  ;;  %10145 = vmatpush3.bf16.msra.mxu1 %v12578_v34  ;;  %v440_v44 = vmul.f32 %v11196_v40, %v12414_v1  ;;  %v482_v1 = vadd.f32 %v12556_v10, %v460_v7 }
 0x236   :  { %v652_v27 = vmul.f32 0.03125, %v610_v6  ;;  %11207 = vrsqrt.f32 %v666_v63  ;;  %v12602_v61 = vpack.c.bf16 %v497_v28, %v496_v56  ;;  %v461_v45 = vmul.f32 %v12552_v19, %v439_v18  ;;  %10182 = vmatprep.subr.bf16.mxu1 %v12592_v24  ;;  %v12628_v18 = vld [vmem:[#allocation18 + $0x8] sm:$0xff]  }
 0x237   :  { %v11198_v0 = vpop.eup %11197  ;;  %v667_v2 = vadd.f32 1e-05, %v651_v60  ;;  %v462_v13 = vmul.f32 %v12552_v19, %v440_v44 }
 0x238   :  { %v668_v14 = vadd.f32 1e-05, %v652_v27  ;;  %v11200_v32 = vpop.eup %11199  ;;  %v613_v35 = vpop.xlane.xlu1 %612  ;;  %10139 = vmatmul.mubr.msk.bf16.gmra.mrb[4].mxu1 %vm244_vm0, %v12602_v61  ;;  %v483_v48 = vadd.f32 %v12556_v10, %v461_v45  ;;  %v441_v42 = vmul.f32 %v11198_v0, %v12417_v15 }
 0x239   :  { %v616_v38 = vpop.xlane.xlu0 %615  ;;  %11209 = vrsqrt.f32 %v667_v2  ;;  %v653_v20 = vmul.f32 0.03125, %v613_v35  ;;  %v442_v36 = vmul.f32 %v11200_v32, %v12426_v43  ;;  %v484_v52 = vadd.f32 %v12556_v10, %v462_v13 }
 0x23a   :  { %v654_v5 = vmul.f32 0.03125, %v616_v38  ;;  %11211 = vrsqrt.f32 %v668_v14  ;;  %v12612_v46 = vpack.c.bf16 %v483_v48, %v482_v1  ;;  %v463_v55 = vmul.f32 %v12552_v19, %v441_v42 }
 0x23b   :  { %v11202_v50 = vpop.eup %11201  ;;  %v669_v51 = vadd.f32 1e-05, %v653_v20  ;;  %v464_v43 = vmul.f32 %v12552_v19, %v442_v36 }
 0x23c   :  { %v670_v26 = vadd.f32 1e-05, %v654_v5  ;;  %v11204_v58 = vpop.eup %11203  ;;  %v619_v11 = vpop.xlane.xlu1 %618  ;;  %10126 = vmatprep.mubr.msk.bf16.mxu0 %vm244_vm0, %v12612_v46  ;;  %10146 = vmatprep.mubr.msk.bf16.mxu1 %vm244_vm0, %v12612_v46  ;;  %v485_v15 = vadd.f32 %v12556_v10, %v463_v55  ;;  %v443_v63 = vmul.f32 %v11202_v50, %v12429_v21 }
 0x23d   :  { %v622_v9 = vpop.xlane.xlu0 %621  ;;  %11213 = vrsqrt.f32 %v669_v51  ;;  %v655_v40 = vmul.f32 0.03125, %v619_v11  ;;  %v444_v6 = vmul.f32 %v11204_v58, %v12438_v59  ;;  %v486_v59 = vadd.f32 %v12556_v10, %v464_v43 }
 0x23e   :  { %v656_v4 = vmul.f32 0.03125, %v622_v9  ;;  %11215 = vrsqrt.f32 %v670_v26  ;;  %v12625_v56 = vpack.c.bf16 %v485_v15, %v484_v52  ;;  %v465_v28 = vmul.f32 %v12552_v19, %v443_v63 }
 0x23f   :  { %v11206_v7 = vpop.eup %11205  ;;  %v671_v60 = vadd.f32 1e-05, %v655_v40  ;;  %v466_v44 = vmul.f32 %v12552_v19, %v444_v6 }
 0x240   :  { %v672_v27 = vadd.f32 1e-05, %v656_v4  ;;  %v11208_v21 = vpop.eup %11207  ;;  %v625_v45 = vpop.xlane.xlu1 %624  ;;  %10127 = vmatmul.mubr.msk.bf16.vlgmr.msra.gmra.mrb[0].mxu0 %vm244_vm0, %v12625_v56  ;;  %10147 = vmatmul.mubr.msk.bf16.vlgmr.msra.gmra.mrb[8].mxu1 %vm244_vm0, %v12625_v56  ;;  %v487_v2 = vadd.f32 %v12556_v10, %v465_v28  ;;  %v445_v14 = vmul.f32 %v11206_v7, %v12441_v25 }
 0x241   :  { %v628_v0 = vpop.xlane.xlu0 %627  ;;  %11217 = vrsqrt.f32 %v671_v60  ;;  %v657_v13 = vmul.f32 0.03125, %v625_v45  ;;  %10163 = vmatpush3.bf16.msra.mxu0 %v12533_v12  ;;  %10183 = vmatpush3.bf16.msra.mxu1 %v12592_v24  ;;  %v698_v1 = vmul.f32 %v11208_v21, %v12450_v17  ;;  %v488_v20 = vadd.f32 %v12556_v10, %v466_v44 }
 0x242   :  { %v658_v32 = vmul.f32 0.03125, %v628_v0  ;;  %11219 = vrsqrt.f32 %v672_v27  ;;  %v12640_v35 = vpack.c.bf16 %v487_v2, %v486_v59  ;;  %v467_v38 = vmul.f32 %v12552_v19, %v445_v14  ;;  %10164 = vmatprep.subr.bf16.mxu0 %v12578_v34  ;;  %10184 = vmatprep.subr.bf16.mxu1 %v12628_v18 }
 0x243   :  { %v11210_v48 = vpop.eup %11209  ;;  %v673_v25 = vadd.f32 1e-05, %v657_v13  ;;  %v714_v50 = vmul.f32 %v12552_v19, %v698_v1 }
 0x244   :  { %v674_v42 = vadd.f32 1e-05, %v658_v32  ;;  %v11212_v5 = vpop.eup %11211  ;;  %v631_v12 = vpop.xlane.xlu1 %630  ;;  %10130 = vmatprep.mubr.msk.bf16.mxu0 %vm244_vm0, %v12640_v35  ;;  %10150 = vmatprep.mubr.msk.bf16.mxu1 %vm244_vm0, %v12640_v35  ;;  %v489_v36 = vadd.f32 %v12556_v10, %v467_v38  ;;  %v699_v17 = vmul.f32 %v11210_v48, %v12453_v29 }
 0x245   :  { %v634_v55 = vpop.xlane.xlu0 %633  ;;  %v700_v51 = vmul.f32 %v11212_v5, %v12462_v31  ;;  %11221 = vrsqrt.f32 %v673_v25  ;;  %v659_v26 = vmul.f32 0.03125, %v631_v12  ;;  %10165 = vmatpush3.bf16.msra.mxu0 %v12578_v34  ;;  %10185 = vmatpush3.bf16.msra.mxu1 %v12628_v18  ;;  %v730_v63 = vadd.f32 %v12556_v10, %v714_v50 }
 0x246   :  { %v660_v52 = vmul.f32 0.03125, %v634_v55  ;;  %11223 = vrsqrt.f32 %v674_v42  ;;  %v12657_v58 = vpack.c.bf16 %v489_v36, %v488_v20  ;;  %v715_v11 = vmul.f32 %v12552_v19, %v699_v17  ;;  %10202 = vmatprep.subr.bf16.mxu0 %v12592_v24 }
 0x247   :  { %v11214_v9 = vpop.eup %11213  ;;  %v675_v29 = vadd.f32 1e-05, %v659_v26  ;;  %v716_v43 = vmul.f32 %v12552_v19, %v700_v51 }
 0x248   :  { %v676_v15 = vadd.f32 1e-05, %v660_v52  ;;  %v11216_v31 = vpop.eup %11215  ;;  %v701_v40 = vmul.f32 %v11214_v9, %v12465_v33  ;;  %v637_v34 = vpop.xlane.xlu1 %636  ;;  %10131 = vmatmul.mubr.msk.bf16.gmra.mrb[4].mxu0 %vm244_vm0, %v12657_v58  ;;  %10151 = vmatmul.mubr.msk.bf16.gmra.mrb[12].mxu1 %vm244_vm0, %v12657_v58  ;;  %v731_v6 = vadd.f32 %v12556_v10, %v715_v11 }
 0x249   :  { %v640_v4 = vpop.xlane.xlu0 %639  ;;  %11225 = vrsqrt.f32 %v675_v29  ;;  %v661_v28 = vmul.f32 0.03125, %v637_v34  ;;  %10154 = vmatprep.mubr.msk.bf16.mxu1 %vm244_vm0, %v12564_v62  ;;  %v702_v27 = vmul.f32 %v11216_v31, %v12474_v47  ;;  %v732_v59 = vadd.f32 %v12556_v10, %v716_v43 }
 0x24a   :  { %v662_v7 = vmul.f32 0.03125, %v640_v4  ;;  %v717_v60 = vmul.f32 %v12552_v19, %v701_v40  ;;  %11227 = vrsqrt.f32 %v676_v15  ;;  %v12672_v33 = vpack.c.bf16 %v731_v6, %v730_v63 }
 0x24b   :  { %v11218_v44 = vpop.eup %11217  ;;  %v677_v21 = vadd.f32 1e-05, %v661_v28  ;;  %v718_v38 = vmul.f32 %v12552_v19, %v702_v27 }
 0x24c   :  { %v678_v45 = vadd.f32 1e-05, %v662_v7  ;;  %v11220_v0 = vpop.eup %11219  ;;  %v733_v2 = vadd.f32 %v12556_v10, %v717_v60  ;;  %v643_v14 = vpop.xlane.xlu1 %642  ;;  %10166 = vmatprep.mubr.msk.bf16.mxu0 %vm244_vm0, %v12672_v33  ;;  %v703_v32 = vmul.f32 %v11218_v44, %v12477_v37 }
 0x24d   :  { %v646_v13 = vpop.xlane.xlu0 %645  ;;  %11229 = vrsqrt.f32 %v677_v21  ;;  %v663_v1 = vmul.f32 0.03125, %v643_v14  ;;  %v704_v48 = vmul.f32 %v11220_v0, %v12486_v41  ;;  %v734_v55 = vadd.f32 %v12556_v10, %v718_v38 }
 0x24e   :  { %v664_v47 = vmul.f32 0.03125, %v646_v13  ;;  %11231 = vrsqrt.f32 %v678_v45  ;;  %v12682_v25 = vpack.c.bf16 %v733_v2, %v732_v59  ;;  %v719_v42 = vmul.f32 %v12552_v19, %v703_v32 }
 0x24f   :  { %v11222_v20 = vpop.eup %11221  ;;  %v679_v5 = vadd.f32 1e-05, %v663_v1  ;;  %v720_v50 = vmul.f32 %v12552_v19, %v704_v48 }
 0x250   :  { %v680_v12 = vadd.f32 1e-05, %v664_v47  ;;  %v11224_v36 = vpop.eup %11223  ;;  %v649_v17 = vpop.xlane.xlu1 %648  ;;  %10155 = vmatmul.mubr.msk.bf16.gmra.mrb[16].mxu1 %vm244_vm0, %v12575_v30  ;;  %10167 = vmatmul.mubr.msk.bf16.vlgmr.msra.gmra.mrb[8].mxu0 %vm244_vm0, %v12682_v25  ;;  %v735_v37 = vadd.f32 %v12556_v10, %v719_v42  ;;  %v705_v41 = vmul.f32 %v11222_v20, %v12489_v3 }
 0x251   :  { %11233 = vrsqrt.f32 %v679_v5  ;;  %v665_v51 = vmul.f32 0.03125, %v649_v17  ;;  %10158 = vmatprep.mubr.msk.bf16.mxu1 %vm244_vm0, %v12587_v54  ;;  %v706_v26 = vmul.f32 %v11224_v36, %v12498_v22  ;;  %10203 = vmatpush3.bf16.msra.mxu0 %v12592_v24  ;;  %v736_v63 = vadd.f32 %v12556_v10, %v720_v50 }
 0x252   :  { %11235 = vrsqrt.f32 %v680_v12  ;;  %v748_v52 = vpack.c.bf16 %v735_v37, %v734_v55  ;;  %v721_v11 = vmul.f32 %v12552_v19, %v705_v41  ;;  %10204 = vmatprep.subr.bf16.mxu0 %v12628_v18 }
 0x253   :  { %v11226_v9 = vpop.eup %11225  ;;  %v681_v29 = vadd.f32 1e-05, %v665_v51  ;;  %v722_v3 = vmul.f32 %v12552_v19, %v706_v26 }
 0x254   :  { %v11228_v15 = vpop.eup %11227  ;;  %10170 = vmatprep.mubr.msk.bf16.mxu0 %vm244_vm0, %v748_v52  ;;  %v737_v31 = vadd.f32 %v12556_v10, %v721_v11  ;;  %v707_v22 = vmul.f32 %v11226_v9, %v12501_v23 }
 0x255   :  { %11237 = vrsqrt.f32 %v681_v29  ;;  %v708_v24 = vmul.f32 %v11228_v15, %v12510_v49  ;;  %10205 = vmatpush3.bf16.msra.mxu0 %v12628_v18  ;;  %v738_v4 = vadd.f32 %v12556_v10, %v722_v3 }
 0x256   :  { %v749_v43 = vpack.c.bf16 %v737_v31, %v736_v63  ;;  %v723_v40 = vmul.f32 %v12552_v19, %v707_v22 }
 0x257   :  { %v11230_v34 = vpop.eup %11229  ;;  %v724_v49 = vmul.f32 %v12552_v19, %v708_v24 }
 0x258   :  { %v11232_v6 = vpop.eup %11231  ;;  %10159 = vmatmul.mubr.msk.bf16.gmra.mrb[20].mxu1 %vm244_vm0, %v12602_v61  ;;  %10171 = vmatmul.mubr.msk.bf16.gmra.mrb[12].mxu0 %vm244_vm0, %v749_v43  ;;  %v739_v28 = vadd.f32 %v12556_v10, %v723_v40  ;;  %v709_v23 = vmul.f32 %v11230_v34, %v12513_v39 }
 0x259   :  { %10186 = vmatprep.mubr.msk.bf16.mxu1 %vm244_vm0, %v12612_v46  ;;  %v710_v18 = vmul.f32 %v11232_v6, %v12522_v8  ;;  %v740_v45 = vadd.f32 %v12556_v10, %v724_v49 }
 0x25a   :  { %v750_v7 = vpack.c.bf16 %v739_v28, %v738_v4  ;;  %v725_v60 = vmul.f32 %v12552_v19, %v709_v23 }
 0x25b   :  { %v11234_v27 = vpop.eup %11233  ;;  %v726_v44 = vmul.f32 %v12552_v19, %v710_v18 }
 0x25c   :  { %v11236_v21 = vpop.eup %11235  ;;  %10174 = vmatprep.mubr.msk.bf16.mxu0 %vm244_vm0, %v750_v7  ;;  %v741_v39 = vadd.f32 %v12556_v10, %v725_v60  ;;  %v711_v0 = vmul.f32 %v11234_v27, %v12525_v53 }
 0x25d   :  { %v712_v59 = vmul.f32 %v11236_v21, %v12536_v57  ;;  %v742_v14 = vadd.f32 %v12556_v10, %v726_v44 }
 0x25e   :  { %v751_v46 = vpack.c.bf16 %v741_v39, %v740_v45  ;;  %v727_v8 = vmul.f32 %v12552_v19, %v711_v0 }
 0x25f   :  { %v11238_v2 = vpop.eup %11237  ;;  %v728_v38 = vmul.f32 %v12552_v19, %v712_v59 }
 0x260   :  { %10175 = vmatmul.mubr.msk.bf16.gmra.mrb[16].mxu0 %vm244_vm0, %v751_v46  ;;  %10187 = vmatmul.mubr.msk.bf16.vlgmr.msra.gmra.mrb[24].mxu1 %vm244_vm0, %v12625_v56  ;;  %v743_v13 = vadd.f32 %v12556_v10, %v727_v8  ;;  %v713_v32 = vmul.f32 %v11238_v2, %v12539_v16  ;;  %v15943_v16 = vmov 0.0  }
 0x261   :  { %10190 = vmatprep.mubr.msk.bf16.mxu1 %vm244_vm0, %v12640_v35  ;;  %v744_v1 = vadd.f32 %v12556_v10, %v728_v38  ;;  %10222 = vmatprep.subr.bf16.mxu1 %v15943_v16 }
 0x262   :  { %v752_v53 = vpack.c.bf16 %v743_v13, %v742_v14  ;;  %v729_v57 = vmul.f32 %v12552_v19, %v713_v32  ;;  %10246 = vmatprep.subr.bf16.mxu0 %v15943_v16  ;;  %v9618_v19 = vld [vmem:[#allocation14] ss:$0 sm:$0xff] }
 0x264   :  { %10178 = vmatprep.mubr.msk.bf16.mxu0 %vm244_vm0, %v752_v53  ;;  %v745_v47 = vadd.f32 %v12556_v10, %v729_v57 }
 0x266   :  { %v753_v48 = vpack.c.bf16 %v745_v47, %v744_v1 }
 0x268   :  { %10179 = vmatmul.mubr.msk.bf16.gmra.mrb[20].mxu0 %vm244_vm0, %v753_v48  ;;  %10191 = vmatmul.mubr.msk.bf16.gmra.mrb[28].mxu1 %vm244_vm0, %v12657_v58 }
 0x269   :  { %10194 = vmatprep.mubr.msk.bf16.mxu1 %vm244_vm0, %v12564_v62  ;;  %10206 = vmatprep.mubr.msk.bf16.mxu0 %vm244_vm0, %v12672_v33 }
 0x270   :  { %10195 = vmatmul.mubr.msk.bf16.gmra.mrb[32].mxu1 %vm244_vm0, %v12575_v30  ;;  %10207 = vmatmul.mubr.msk.bf16.vlgmr.msra.gmra.mrb[24].mxu0 %vm244_vm0, %v12682_v25 }
 0x271   :  { %10198 = vmatprep.mubr.msk.bf16.mxu1 %vm244_vm0, %v12587_v54  ;;  %10210 = vmatprep.mubr.msk.bf16.mxu0 %vm244_vm0, %v748_v52  ;;  %v12773_v52 = vld [vmem:[#allocation17] ss:$0 sm:$0xff] }
 0x278   :  { %10199 = vmatmul.mubr.msk.bf16.gmra.mrb[36].mxu1 %vm244_vm0, %v12602_v61  ;;  %10211 = vmatmul.mubr.msk.bf16.gmra.mrb[28].mxu0 %vm244_vm0, %v749_v43 }
 0x279   :  { %10214 = vmatprep.mubr.msk.bf16.mxu0 %vm244_vm0, %v750_v7  ;;  %10224 = vmatprep.mubr.msk.bf16.mxu1 %vm11965_vm1, %v15943_v16 }
 0x280   :  { %10215 = vmatmul.mubr.msk.bf16.gmra.mrb[32].mxu0 %vm244_vm0, %v751_v46 }
 0x281   :  { %10218 = vmatprep.mubr.msk.bf16.mxu0 %vm244_vm0, %v752_v53 }
 0x288   :  { %10219 = vmatmul.mubr.msk.bf16.gmra.mrb[36].mxu0 %vm244_vm0, %v753_v48 }
 0x289   :  { %10248 = vmatprep.mubr.msk.bf16.mxu0 %vm11965_vm1, %v15943_v16 }
 0x303   :  { %v10136_v10 = vpop.f32.mrb[0].mxu1 }
 0x304   :  { %v867_v62 = vpop.f32.mrb[1].mxu1  ;;  %v876_v54 = vadd.f32 %v10136_v10, %v9618_v19 }
 0x305   :  { %v10137_v30 = vpop.f32.mrb[2].mxu1  ;;  %v868_v35 = vadd.f32 %v9618_v19, %v867_v62 }
 0x306   :  { %v879_v61 = vadd.f32 %v10137_v30, %v9618_v19  ;;  %v870_v56 = vpop.f32.mrb[3].mxu1 }
 0x307   :  { %v871_v58 = vadd.f32 %v9618_v19, %v870_v56 }
 0x308   :  { %v12765_v33 = vpack.c.bf16 %v879_v61, %v876_v54 }
 0x309   :  { %v12767_v25 = vpack.c.bf16 %v871_v58, %v868_v35 }
 0x30a   :  { %16020 = vst [vmem:[#allocation33_spill] sm:$0xff] %v12765_v33 }
 0x30b   :  { %16021 = vst [vmem:[#allocation34_spill] sm:$0xff] %v12767_v25  ;;  %v10140_v42 = vpop.f32.mrb[4].mxu1 }
 0x30c   :  { %v883_v20 = vpop.f32.mrb[5].mxu1  ;;  %v892_v12 = vadd.f32 %v10140_v42, %v9618_v19 }
 0x30d   :  { %v10141_v5 = vpop.f32.mrb[6].mxu1  ;;  %v884_v17 = vadd.f32 %v9618_v19, %v883_v20 }
 0x30e   :  { %v895_v55 = vadd.f32 %v10141_v5, %v9618_v19  ;;  %v886_v36 = vpop.f32.mrb[7].mxu1 }
 0x30f   :  { %v887_v37 = vadd.f32 %v9618_v19, %v886_v36 }
 0x310   :  { %v12769_v41 = vpack.c.bf16 %v895_v55, %v892_v12 }
 0x311   :  { %v12771_v50 = vpack.c.bf16 %v887_v37, %v884_v17 }
 0x312   :  { %16022 = vst [vmem:[#allocation35_spill] sm:$0xff] %v12769_v41 }
 0x313   :  { %16023 = vst [vmem:[#allocation36_spill] sm:$0xff] %v12771_v50  ;;  %v10128_v51 = vpop.f32.mrb[0].mxu0  ;;  %v10148_v26 = vpop.f32.mrb[8].mxu1 }
 0x314   :  { %v835_v11 = vpop.f32.mrb[1].mxu0  ;;  %v955_v9 = vpop.f32.mrb[9].mxu1  ;;  %v844_v15 = vadd.f32 %v10128_v51, %v9618_v19  ;;  %v964_v63 = vadd.f32 %v10148_v26, %v12773_v52 }
 0x315   :  { %v10129_v29 = vpop.f32.mrb[2].mxu0  ;;  %v10149_v3 = vpop.f32.mrb[10].mxu1  ;;  %v836_v40 = vadd.f32 %v9618_v19, %v835_v11  ;;  %v956_v34 = vadd.f32 %v12773_v52, %v955_v9 }
 0x316   :  { %v847_v31 = vadd.f32 %v10129_v29, %v9618_v19  ;;  %v967_v22 = vadd.f32 %v10149_v3, %v12773_v52  ;;  %v838_v24 = vpop.f32.mrb[3].mxu0  ;;  %v958_v43 = vpop.f32.mrb[11].mxu1 }
 0x317   :  { %v839_v4 = vadd.f32 %v9618_v19, %v838_v24  ;;  %v959_v6 = vadd.f32 %v12773_v52, %v958_v43 }
 0x318   :  { %v12779_v28 = vpack.c.bf16 %v847_v31, %v844_v15  ;;  %v12781_v23 = vpack.c.bf16 %v967_v22, %v964_v63 }
 0x319   :  { %v12783_v49 = vpack.c.bf16 %v839_v4, %v836_v40  ;;  %v12785_v18 = vpack.c.bf16 %v959_v6, %v956_v34 }
 0x31a   :  { %16024 = vst [vmem:[#allocation37_spill] sm:$0xff] %v12779_v28  ;;  %16025 = vst [vmem:[#allocation38_spill] sm:$0xff] %v12781_v23  ;;  %v1480_v30 = vsel %vm1428_vm2, %v12781_v23, 0 }
 0x31b   :  { %16026 = vst [vmem:[#allocation39_spill] sm:$0xff] %v12783_v49  ;;  %16027 = vst [vmem:[#allocation40_spill] sm:$0xff] %v12785_v18  ;;  %v10132_v7 = vpop.f32.mrb[4].mxu0  ;;  %v10152_v60 = vpop.f32.mrb[12].mxu1  ;;  %v1433_v27 = vsel %vm1428_vm2, %v12785_v18, 0 }
 0x31c   :  { %v851_v44 = vpop.f32.mrb[5].mxu0  ;;  %v971_v21 = vpop.f32.mrb[13].mxu1  ;;  %10223 = vmatpush3.bf16.xpose.msra.mxu1 %v1433_v27  ;;  %v860_v0 = vadd.f32 %v10132_v7, %v9618_v19  ;;  %v980_v59 = vadd.f32 %v10152_v60, %v12773_v52 }
 0x31d   :  { %v10133_v45 = vpop.f32.mrb[6].mxu0  ;;  %v10153_v39 = vpop.f32.mrb[14].mxu1  ;;  %10228 = vmatprep.subr.bf16.mxu1 %v15943_v16  ;;  %v852_v13 = vadd.f32 %v9618_v19, %v851_v44  ;;  %v972_v32 = vadd.f32 %v12773_v52, %v971_v21 }
 0x31e   :  { %v863_v46 = vadd.f32 %v10133_v45, %v9618_v19  ;;  %v983_v8 = vadd.f32 %v10153_v39, %v12773_v52  ;;  %v854_v2 = vpop.f32.mrb[7].mxu0  ;;  %v974_v14 = vpop.f32.mrb[15].mxu1 }
 0x31f   :  { %v855_v38 = vadd.f32 %v9618_v19, %v854_v2  ;;  %v975_v53 = vadd.f32 %v12773_v52, %v974_v14 }
 0x320   :  { %v12794_v57 = vpack.c.bf16 %v863_v46, %v860_v0  ;;  %v12796_v1 = vpack.c.bf16 %v983_v8, %v980_v59  ;;  %v12851_v8 = vld [vmem:[#allocation20] ss:$0 sm:$0xff] }
 0x321   :  { %v12798_v47 = vpack.c.bf16 %v855_v38, %v852_v13  ;;  %v12800_v48 = vpack.c.bf16 %v975_v53, %v972_v32 }
 0x322   :  { %16028 = vst [vmem:[#allocation41_spill] sm:$0xff] %v12794_v57  ;;  %16029 = vst [vmem:[#allocation42_spill] sm:$0xff] %v12796_v1  ;;  %v1574_v13 = vsel %vm1428_vm2, %v12796_v1, 0 }
 0x323   :  { %16030 = vst [vmem:[#allocation43_spill] sm:$0xff] %v12798_v47  ;;  %16031 = vst [vmem:[#allocation44_spill] sm:$0xff] %v12800_v48  ;;  %v10156_v10 = vpop.f32.mrb[16].mxu1  ;;  %v10168_v62 = vpop.f32.mrb[8].mxu0  ;;  %10225 = vmatmul.mubr.msk.bf16.vlgmr.msra.gmra.mrb[40].mxu1 %vm1428_vm2, %v12783_v49  ;;  %v1527_v15 = vsel %vm1428_vm2, %v12800_v48, 0 }
 0x324   :  { %v987_v54 = vpop.f32.mrb[17].mxu1  ;;  %v1076_v19 = vpop.f32.mrb[9].mxu0  ;;  %10229 = vmatpush3.bf16.xpose.msra.mxu1 %v1480_v30  ;;  %10230 = vmatprep.mubr.msk.bf16.mxu1 %vm11965_vm1, %v15943_v16  ;;  %v996_v35 = vadd.f32 %v10156_v10, %v12773_v52  ;;  %v1085_v58 = vadd.f32 %v10168_v62, %v12773_v52 }
 0x325   :  { %v10157_v61 = vpop.f32.mrb[18].mxu1  ;;  %v10169_v56 = vpop.f32.mrb[10].mxu0  ;;  %10234 = vmatprep.subr.bf16.mxu1 %v15943_v16  ;;  %v988_v55 = vadd.f32 %v12773_v52, %v987_v54  ;;  %v1077_v36 = vadd.f32 %v12773_v52, %v1076_v19 }
 0x326   :  { %v999_v42 = vadd.f32 %v10157_v61, %v12773_v52  ;;  %v1088_v20 = vadd.f32 %v10169_v56, %v12773_v52  ;;  %v990_v5 = vpop.f32.mrb[19].mxu1  ;;  %v1079_v12 = vpop.f32.mrb[11].mxu0 }
 0x327   :  { %v991_v17 = vadd.f32 %v12773_v52, %v990_v5  ;;  %v1080_v37 = vadd.f32 %v12773_v52, %v1079_v12 }
 0x328   :  { %v12817_v51 = vpack.c.bf16 %v999_v42, %v996_v35  ;;  %v12819_v26 = vpack.c.bf16 %v1088_v20, %v1085_v58 }
 0x329   :  { %v12821_v11 = vpack.c.bf16 %v991_v17, %v988_v55  ;;  %v12823_v9 = vpack.c.bf16 %v1080_v37, %v1077_v36 }
 0x32a   :  { %16032 = vst [vmem:[#allocation45_spill] sm:$0xff] %v12817_v51  ;;  %16033 = vst [vmem:[#allocation46_spill] sm:$0xff] %v12819_v26 }
 0x32b   :  { %16034 = vst [vmem:[#allocation47_spill] sm:$0xff] %v12821_v11  ;;  %16035 = vst [vmem:[#allocation48_spill] sm:$0xff] %v12823_v9  ;;  %v10160_v29 = vpop.f32.mrb[20].mxu1  ;;  %v10172_v3 = vpop.f32.mrb[12].mxu0  ;;  %10231 = vmatmul.mubr.msk.bf16.vlgmr.msra.gmra.mrb[44].mxu1 %vm1428_vm2, %v12779_v28  ;;  %v1621_v63 = vsel %vm1428_vm2, %v12821_v11, 0 }
 0x32c   :  { %v1003_v31 = vpop.f32.mrb[21].mxu1  ;;  %v1092_v22 = vpop.f32.mrb[13].mxu0  ;;  %10235 = vmatpush3.bf16.xpose.msra.mxu1 %v1527_v15  ;;  %10247 = vmatpush3.bf16.xpose.msra.mxu0 %v1621_v63  ;;  %v1012_v40 = vadd.f32 %v10160_v29, %v12773_v52  ;;  %v1101_v34 = vadd.f32 %v10172_v3, %v12773_v52  ;;  %v1668_v3 = vsel %vm1428_vm2, %v12817_v51, 0  ;;  %v1822_v15 = vsel %vm1428_vm2, %v12823_v9, 0 }
 0x32d   :  { %v10161_v24 = vpop.f32.mrb[22].mxu1  ;;  %v10173_v43 = vpop.f32.mrb[14].mxu0  ;;  %10236 = vmatprep.mubr.msk.bf16.mxu1 %vm11965_vm1, %v15943_v16  ;;  %10240 = vmatprep.subr.bf16.mxu1 %v15943_v16  ;;  %v1004_v27 = vadd.f32 %v12773_v52, %v1003_v31  ;;  %v1093_v44 = vadd.f32 %v12773_v52, %v1092_v22 }
 0x32e   :  { %v1015_v4 = vadd.f32 %v10161_v24, %v12773_v52  ;;  %v1104_v6 = vadd.f32 %v10173_v43, %v12773_v52  ;;  %v1006_v7 = vpop.f32.mrb[23].mxu1  ;;  %v1095_v60 = vpop.f32.mrb[15].mxu0  ;;  %10258 = vmatprep.subr.bf16.mxu0 %v15943_v16 }
 0x32f   :  { %v1007_v21 = vadd.f32 %v12773_v52, %v1006_v7  ;;  %v1096_v45 = vadd.f32 %v12773_v52, %v1095_v60 }
 0x330   :  { %v12843_v39 = vpack.c.bf16 %v1015_v4, %v1012_v40  ;;  %v12845_v0 = vpack.c.bf16 %v1104_v6, %v1101_v34 }
 0x331   :  { %v12847_v59 = vpack.c.bf16 %v1007_v21, %v1004_v27  ;;  %v12849_v46 = vpack.c.bf16 %v1096_v45, %v1093_v44 }
 0x332   :  { %16036 = vst [vmem:[#allocation49_spill] sm:$0xff] %v12843_v39  ;;  %16037 = vst [vmem:[#allocation50_spill] sm:$0xff] %v12845_v0 }
 0x333   :  { %16038 = vst [vmem:[#allocation51_spill] sm:$0xff] %v12847_v59  ;;  %16039 = vst [vmem:[#allocation52_spill] sm:$0xff] %v12849_v46  ;;  %v10176_v2 = vpop.f32.mrb[16].mxu0  ;;  %v10188_v14 = vpop.f32.mrb[24].mxu1  ;;  %10237 = vmatmul.mubr.msk.bf16.vlgmr.msra.gmra.mrb[48].mxu1 %vm1428_vm2, %v12798_v47  ;;  %10249 = vmatmul.mubr.msk.bf16.vlgmr.msra.gmra.mrb[40].mxu0 %vm1428_vm2, %v12767_v25  ;;  %v1715_v32 = vsel %vm1428_vm2, %v12847_v59, 0 }
 0x334   :  { %v1117_v38 = vadd.f32 %v10176_v2, %v12773_v52  ;;  %v1205_v53 = vadd.f32 %v10188_v14, %v12851_v8  ;;  %v1108_v10 = vpop.f32.mrb[17].mxu0  ;;  %v1196_v62 = vpop.f32.mrb[25].mxu1  ;;  %10241 = vmatpush3.bf16.xpose.msra.mxu1 %v1574_v13  ;;  %10259 = vmatpush3.bf16.xpose.msra.mxu0 %v1715_v32 }
 0x335   :  { %v1197_v30 = vadd.f32 %v12851_v8, %v1196_v62  ;;  %v10177_v54 = vpop.f32.mrb[18].mxu0  ;;  %v10189_v19 = vpop.f32.mrb[26].mxu1  ;;  %10242 = vmatprep.mubr.msk.bf16.mxu1 %vm11965_vm1, %v15943_v16  ;;  %10260 = vmatprep.mubr.msk.bf16.mxu0 %vm11965_vm1, %v15943_v16  ;;  %v1109_v42 = vadd.f32 %v12773_v52, %v1108_v10 }
 0x336   :  { %v1120_v61 = vadd.f32 %v10177_v54, %v12773_v52  ;;  %v1208_v56 = vadd.f32 %v10189_v19, %v12851_v8  ;;  %v1111_v35 = vpop.f32.mrb[19].mxu0  ;;  %v1199_v58 = vpop.f32.mrb[27].mxu1  ;;  %10252 = vmatprep.subr.bf16.mxu1 %v15943_v16  ;;  %10270 = vmatprep.subr.bf16.mxu0 %v15943_v16 }
 0x337   :  { %v1112_v20 = vadd.f32 %v12773_v52, %v1111_v35  ;;  %v1200_v5 = vadd.f32 %v12851_v8, %v1199_v58 }
 0x338   :  { %v12875_v12 = vpack.c.bf16 %v1120_v61, %v1117_v38  ;;  %v12877_v55 = vpack.c.bf16 %v1208_v56, %v1205_v53  ;;  %v1910_v53 = vsel %vm1428_vm2, %v12849_v46, 0 }
 0x339   :  { %v12879_v36 = vpack.c.bf16 %v1112_v20, %v1109_v42  ;;  %v12881_v17 = vpack.c.bf16 %v1200_v5, %v1197_v30 }
 0x33a   :  { %16040 = vst [vmem:[#allocation53_spill] sm:$0xff] %v12875_v12  ;;  %16041 = vst [vmem:[#allocation54_spill] sm:$0xff] %v12877_v55 }
 0x33b   :  { %16042 = vst [vmem:[#allocation55_spill] sm:$0xff] %v12879_v36  ;;  %16043 = vst [vmem:[#allocation56_spill] sm:$0xff] %v12881_v17  ;;  %v10180_v37 = vpop.f32.mrb[20].mxu0  ;;  %v10192_v29 = vpop.f32.mrb[28].mxu1  ;;  %10243 = vmatmul.mubr.msk.bf16.vlgmr.msra.gmra.mrb[52].mxu1 %vm1428_vm2, %v12794_v57  ;;  %10261 = vmatmul.mubr.msk.bf16.vlgmr.msra.gmra.mrb[44].mxu0 %vm1428_vm2, %v12771_v50 }
 0x33c   :  { %v1133_v63 = vadd.f32 %v10180_v37, %v12773_v52  ;;  %v1221_v31 = vadd.f32 %v10192_v29, %v12851_v8  ;;  %v1124_v22 = vpop.f32.mrb[21].mxu0  ;;  %v1212_v24 = vpop.f32.mrb[29].mxu1  ;;  %10253 = vmatpush3.bf16.xpose.msra.mxu1 %v1668_v3  ;;  %10271 = vmatpush3.bf16.xpose.msra.mxu0 %v1822_v15 }
 0x33d   :  { %v1213_v43 = vadd.f32 %v12851_v8, %v1212_v24  ;;  %v10181_v40 = vpop.f32.mrb[22].mxu0  ;;  %v10193_v34 = vpop.f32.mrb[30].mxu1  ;;  %10254 = vmatprep.mubr.msk.bf16.mxu1 %vm11965_vm1, %v15943_v16  ;;  %10272 = vmatprep.mubr.msk.bf16.mxu0 %vm11965_vm1, %v15943_v16  ;;  %v1125_v27 = vadd.f32 %v12773_v52, %v1124_v22 }
 0x33e   :  { %v1136_v4 = vadd.f32 %v10181_v40, %v12773_v52  ;;  %v1224_v6 = vadd.f32 %v10193_v34, %v12851_v8  ;;  %v1127_v7 = vpop.f32.mrb[23].mxu0  ;;  %v1215_v60 = vpop.f32.mrb[31].mxu1  ;;  %10264 = vmatprep.subr.bf16.mxu1 %v15943_v16  ;;  %10282 = vmatprep.subr.bf16.mxu0 %v15943_v16  ;;  %v1998_v40 = vsel %vm1428_vm2, %v12879_v36, 0 }
 0x33f   :  { %v1128_v44 = vadd.f32 %v12773_v52, %v1127_v7  ;;  %v1216_v21 = vadd.f32 %v12851_v8, %v1215_v60  ;;  %v1762_v52 = vsel %vm1428_vm2, %v12843_v39, 0 }
 0x340   :  { %v12905_v45 = vpack.c.bf16 %v1136_v4, %v1133_v63  ;;  %v12907_v2 = vpack.c.bf16 %v1224_v6, %v1221_v31 }
 0x341   :  { %v12909_v14 = vpack.c.bf16 %v1128_v44, %v1125_v27  ;;  %v12911_v13 = vpack.c.bf16 %v1216_v21, %v1213_v43  ;;  %v1866_v43 = vsel %vm1428_vm2, %v12819_v26, 0 }
 0x342   :  { %16044 = vst [vmem:[#allocation57_spill] sm:$0xff] %v12905_v45  ;;  %16045 = vst [vmem:[#allocation58_spill] sm:$0xff] %v12907_v2 }
 0x343   :  { %16046 = vst [vmem:[#allocation59_spill] sm:$0xff] %v12909_v14  ;;  %16047 = vst [vmem:[#allocation60_spill] sm:$0xff] %v12911_v13  ;;  %v10196_v32 = vpop.f32.mrb[32].mxu1  ;;  %v10208_v38 = vpop.f32.mrb[24].mxu0  ;;  %10255 = vmatmul.mubr.msk.bf16.vlgmr.msra.gmra.mrb[56].mxu1 %vm1428_vm2, %v12765_v33  ;;  %10273 = vmatmul.mubr.msk.bf16.vlgmr.msra.gmra.mrb[48].mxu0 %vm1428_vm2, %v12783_v49 }
 0x344   :  { %v1237_v10 = vadd.f32 %v10196_v32, %v12851_v8  ;;  %v1228_v62 = vpop.f32.mrb[33].mxu1  ;;  %v1293_v30 = vpop.f32.mrb[25].mxu0  ;;  %10265 = vmatpush3.bf16.xpose.msra.mxu1 %v1762_v52  ;;  %10283 = vmatpush3.bf16.xpose.msra.mxu0 %v1910_v53  ;;  %v1302_v56 = vadd.f32 %v10208_v38, %v12851_v8 }
 0x345   :  { %v1229_v54 = vadd.f32 %v12851_v8, %v1228_v62  ;;  %v10197_v19 = vpop.f32.mrb[34].mxu1  ;;  %v10209_v61 = vpop.f32.mrb[26].mxu0  ;;  %10266 = vmatprep.mubr.msk.bf16.mxu1 %vm11965_vm1, %v15943_v16  ;;  %10284 = vmatprep.mubr.msk.bf16.mxu0 %vm11965_vm1, %v15943_v16  ;;  %v1294_v5 = vadd.f32 %v12851_v8, %v1293_v30 }
 0x346   :  { %v1240_v35 = vadd.f32 %v10197_v19, %v12851_v8  ;;  %v1305_v58 = vadd.f32 %v10209_v61, %v12851_v8  ;;  %v1231_v42 = vpop.f32.mrb[35].mxu1  ;;  %v1296_v20 = vpop.f32.mrb[27].mxu0  ;;  %10276 = vmatprep.subr.bf16.mxu1 %v15943_v16  ;;  %10294 = vmatprep.subr.bf16.mxu0 %v15943_v16 }
 0x347   :  { %v1232_v37 = vadd.f32 %v12851_v8, %v1231_v42  ;;  %v1297_v29 = vadd.f32 %v12851_v8, %v1296_v20 }
 0x348   :  { %v12935_v3 = vpack.c.bf16 %v1240_v35, %v1237_v10  ;;  %v12937_v15 = vpack.c.bf16 %v1305_v58, %v1302_v56  ;;  %v1954_v35 = vsel %vm1428_vm2, %v12845_v0, 0  ;;  %v2086_v58 = vsel %vm1428_vm2, %v12909_v14, 0 }
 0x349   :  { %v12939_v63 = vpack.c.bf16 %v1232_v37, %v1229_v54  ;;  %v12941_v31 = vpack.c.bf16 %v1297_v29, %v1294_v5 }
 0x34a   :  { %16048 = vst [vmem:[#allocation61_spill] sm:$0xff] %v12935_v3  ;;  %16049 = vst [vmem:[#allocation62_spill] sm:$0xff] %v12937_v15 }
 0x34b   :  { %16050 = vst [vmem:[#allocation63_spill] sm:$0xff] %v12939_v63  ;;  %16051 = vst [vmem:[#allocation64_spill] sm:$0xff] %v12941_v31  ;;  %v10200_v22 = vpop.f32.mrb[36].mxu1  ;;  %v10212_v24 = vpop.f32.mrb[28].mxu0  ;;  %10267 = vmatmul.mubr.msk.bf16.vlgmr.msra.gmra.mrb[60].mxu1 %vm1428_vm2, %v12769_v41  ;;  %10285 = vmatmul.mubr.msk.bf16.vlgmr.msra.gmra.mrb[52].mxu0 %vm1428_vm2, %v12798_v47 }
 0x34c   :  { %v1253_v34 = vadd.f32 %v10200_v22, %v12851_v8  ;;  %v1318_v4 = vadd.f32 %v10212_v24, %v12851_v8  ;;  %v1244_v6 = vpop.f32.mrb[37].mxu1  ;;  %v1309_v7 = vpop.f32.mrb[29].mxu0  ;;  %10277 = vmatpush3.bf16.xpose.msra.mxu1 %v1866_v43  ;;  %10295 = vmatpush3.bf16.xpose.msra.mxu0 %v1998_v40 }
 0x34d   :  { %v1245_v60 = vadd.f32 %v12851_v8, %v1244_v6  ;;  %v1310_v27 = vadd.f32 %v12851_v8, %v1309_v7  ;;  %v10201_v44 = vpop.f32.mrb[38].mxu1  ;;  %v10213_v21 = vpop.f32.mrb[30].mxu0  ;;  %10278 = vmatprep.mubr.msk.bf16.mxu1 %vm11965_vm1, %v15943_v16  ;;  %10296 = vmatprep.mubr.msk.bf16.mxu0 %vm11965_vm1, %v15943_v16 }
 0x34e   :  { %v1256_v32 = vadd.f32 %v10201_v44, %v12851_v8  ;;  %v1321_v38 = vadd.f32 %v10213_v21, %v12851_v8  ;;  %v1247_v52 = vpop.f32.mrb[39].mxu1  ;;  %v1312_v53 = vpop.f32.mrb[31].mxu0  ;;  %10288 = vmatprep.subr.bf16.mxu1 %v15943_v16  ;;  %10306 = vmatprep.subr.bf16.mxu0 %v15943_v16 }
 0x34f   :  { %v1248_v10 = vadd.f32 %v12851_v8, %v1247_v52  ;;  %v1313_v62 = vadd.f32 %v12851_v8, %v1312_v53  ;;  %v2130_v53 = vsel %vm1428_vm2, %v12905_v45, 0 }
 0x350   :  { %v12965_v30 = vpack.c.bf16 %v1256_v32, %v1253_v34  ;;  %v12967_v54 = vpack.c.bf16 %v1321_v38, %v1318_v4  ;;  %v2042_v4 = vsel %vm1428_vm2, %v12875_v12, 0 }
 0x351   :  { %v12969_v19 = vpack.c.bf16 %v1248_v10, %v1245_v60  ;;  %v12971_v61 = vpack.c.bf16 %v1313_v62, %v1310_v27  ;;  %v13031_v62 = vld [vmem:[#allocation8 + $0x8] sm:$0xff] }
 0x352   :  { %16052 = vst [vmem:[#allocation65_spill] sm:$0xff] %v12965_v30  ;;  %16053 = vst [vmem:[#allocation66_spill] sm:$0xff] %v12967_v54 }
 0x353   :  { %16054 = vst [vmem:[#allocation67_spill] sm:$0xff] %v12969_v19  ;;  %16055 = vst [vmem:[#allocation68_spill] sm:$0xff] %v12971_v61  ;;  %v10216_v56 = vpop.f32.mrb[32].mxu0  ;;  %10279 = vmatmul.mubr.msk.bf16.vlgmr.msra.gmra.mrb[64].mxu1 %vm1428_vm2, %v12779_v28  ;;  %10297 = vmatmul.mubr.msk.bf16.vlgmr.msra.gmra.mrb[56].mxu0 %vm1428_vm2, %v12767_v25 }
 0x354   :  { %v1334_v42 = vadd.f32 %v10216_v56, %v12851_v8  ;;  %v1325_v20 = vpop.f32.mrb[33].mxu0  ;;  %10289 = vmatpush3.bf16.xpose.msra.mxu1 %v1954_v35  ;;  %10307 = vmatpush3.bf16.xpose.msra.mxu0 %v2086_v58 }
 0x355   :  { %v1326_v5 = vadd.f32 %v12851_v8, %v1325_v20  ;;  %v10217_v37 = vpop.f32.mrb[34].mxu0  ;;  %10290 = vmatprep.mubr.msk.bf16.mxu1 %vm11965_vm1, %v15943_v16  ;;  %10308 = vmatprep.mubr.msk.bf16.mxu0 %vm11965_vm1, %v15943_v16 }
 0x356   :  { %v1337_v29 = vadd.f32 %v10217_v37, %v12851_v8  ;;  %v1328_v22 = vpop.f32.mrb[35].mxu0  ;;  %10300 = vmatprep.subr.bf16.mxu1 %v15943_v16  ;;  %10318 = vmatprep.subr.bf16.mxu0 %v15943_v16 }
 0x357   :  { %v1329_v24 = vadd.f32 %v12851_v8, %v1328_v22 }
 0x358   :  { %v12991_v43 = vpack.c.bf16 %v1337_v29, %v1334_v42  ;;  %v13043_v29 = vld [vmem:[#allocation8 + $0x40] sm:$0xff] }
 0x359   :  { %v12993_v40 = vpack.c.bf16 %v1329_v24, %v1326_v5  ;;  %v13045_v24 = vld [vmem:[#allocation8 + $0x48] sm:$0xff] }
 0x35a   :  { %16056 = vst [vmem:[#allocation69_spill] sm:$0xff] %v12991_v43 }
 0x35b   :  { %16057 = vst [vmem:[#allocation70_spill] sm:$0xff] %v12993_v40  ;;  %v10220_v34 = vpop.f32.mrb[36].mxu0  ;;  %10291 = vmatmul.mubr.msk.bf16.vlgmr.msra.gmra.mrb[68].mxu1 %vm1428_vm2, %v12794_v57  ;;  %10309 = vmatmul.mubr.msk.bf16.vlgmr.msra.gmra.mrb[60].mxu0 %vm1428_vm2, %v12771_v50 }
 0x35c   :  { %v1350_v6 = vadd.f32 %v10220_v34, %v12851_v8  ;;  %v1341_v7 = vpop.f32.mrb[37].mxu0  ;;  %10301 = vmatpush3.bf16.xpose.msra.mxu1 %v2042_v4  ;;  %10319 = vmatpush3.bf16.msra.mxu0 %v12941_v31 }
 0x35d   :  { %v1342_v60 = vadd.f32 %v12851_v8, %v1341_v7  ;;  %v10221_v27 = vpop.f32.mrb[38].mxu0  ;;  %10302 = vmatprep.mubr.msk.bf16.mxu1 %vm11965_vm1, %v15943_v16  ;;  %10312 = vmatprep.subr.bf16.mxu1 %v15943_v16 }
 0x35e   :  { %v1353_v44 = vadd.f32 %v10221_v27, %v12851_v8  ;;  %v1344_v21 = vpop.f32.mrb[39].mxu0  ;;  %10320 = vmatprep.mubr.msk.bf16.mxu0 %vm11965_vm1, %v15943_v16  ;;  %10330 = vmatprep.subr.bf16.mxu0 %v15943_v16 }
 0x35f   :  { %v1345_v32 = vadd.f32 %v12851_v8, %v1344_v21  ;;  %v13029_v8 = vld [vmem:[#allocation8] sm:$0xff] }
 0x360   :  { %v13012_v38 = vpack.c.bf16 %v1353_v44, %v1350_v6  ;;  %v13057_v21 = vld [vmem:[#allocation8 + $0x80] sm:$0xff] }
 0x361   :  { %v13014_v52 = vpack.c.bf16 %v1345_v32, %v1342_v60 }
 0x362   :  { %16058 = vst [vmem:[#allocation71_spill] sm:$0xff] %v13012_v38 }
 0x363   :  { %16059 = vst [vmem:[#allocation72_spill] sm:$0xff] %v13014_v52  ;;  %10303 = vmatmul.mubr.msk.bf16.vlgmr.msra.gmra.mrb[72].mxu1 %vm1428_vm2, %v12765_v33 }
 0x364   :  { %10313 = vmatpush3.bf16.xpose.msra.mxu1 %v2130_v53  ;;  %10314 = vmatprep.mubr.msk.bf16.mxu1 %vm11965_vm1, %v15943_v16 }
 0x365   :  { %10324 = vmatprep.subr.bf16.mxu1 %v15943_v16 }
 0x36b   :  { %10315 = vmatmul.mubr.msk.bf16.vlgmr.msra.gmra.mrb[76].mxu1 %vm1428_vm2, %v12769_v41 }
 0x36c   :  { %10325 = vmatpush3.bf16.msra.mxu1 %v12937_v15  ;;  %10326 = vmatprep.mubr.msk.bf16.mxu1 %vm11965_vm1, %v15943_v16 }
 0x36d   :  { %10336 = vmatprep.subr.bf16.mxu1 %v15943_v16 }
 0x3f6   :  { %v1469_v10 = vpop.f32.mrb[40].mxu1 }
 0x3f7   :  { %v13034_v56 = vadd.f32 %v1469_v10, %v13029_v8  ;;  %v10226_v35 = vpop.f32.mrb[41].mxu1  ;;  %v13059_v10 = vld [vmem:[#allocation8 + $0x88] sm:$0xff] }
 0x3f8   :  { %v1472_v58 = vpop.f32.mrb[42].mxu1 }
 0x3f9   :  { %v13037_v42 = vadd.f32 %v1472_v58, %v13031_v62  ;;  %v10227_v20 = vpop.f32.mrb[43].mxu1  ;;  %v2190_v5 = vsel %vm2189_vm3, %v13034_v56, -inf }
 0x3fa   :  { %2191 = vmax.xlane.f32.xlu0 %v2190_v5 }
 0x3fb   :  { %v2193_v37 = vsel %vm2189_vm3, %v13037_v42, -inf }
 0x3fc   :  { %2194 = vmax.xlane.f32.xlu1 %v2193_v37 }
 0x3fe   :  { %v1516_v22 = vpop.f32.mrb[44].mxu1 }
 0x3ff   :  { %v13048_v34 = vadd.f32 %v1516_v22, %v13043_v29  ;;  %v10232_v4 = vpop.f32.mrb[45].mxu1 }
 0x400   :  { %v1519_v6 = vpop.f32.mrb[46].mxu1 }
 0x401   :  { %v13051_v7 = vadd.f32 %v1519_v6, %v13045_v24  ;;  %v10233_v60 = vpop.f32.mrb[47].mxu1  ;;  %v2196_v27 = vsel %vm2189_vm3, %v13048_v34, -inf }
 0x402   :  { %2197 = vmax.xlane.f32.xlu0 %v2196_v27 }
 0x403   :  { %v2199_v44 = vsel %vm2189_vm3, %v13051_v7, -inf }
 0x404   :  { %2200 = vmax.xlane.f32.xlu1 %v2199_v44 }
 0x406   :  { %v1563_v32 = vpop.f32.mrb[48].mxu1  ;;  %v1657_v53 = vpop.f32.mrb[40].mxu0 }
 0x407   :  { %v13062_v35 = vadd.f32 %v1563_v32, %v13057_v21  ;;  %v10238_v58 = vpop.f32.mrb[49].mxu1  ;;  %v10250_v20 = vpop.f32.mrb[41].mxu0  ;;  %v13065_v22 = vadd.f32 %v1657_v53, %v13029_v8 }
 0x408   :  { %v1566_v5 = vpop.f32.mrb[50].mxu1  ;;  %v1660_v37 = vpop.f32.mrb[42].mxu0  ;;  %v13077_v58 = vld [vmem:[#allocation8 + $0xc0] sm:$0xff] }
 0x409   :  { %v13068_v4 = vadd.f32 %v1566_v5, %v13059_v10  ;;  %v10239_v6 = vpop.f32.mrb[51].mxu1  ;;  %v10251_v60 = vpop.f32.mrb[43].mxu0  ;;  %v2202_v27 = vsel %vm2189_vm3, %v13062_v35, -inf  ;;  %v13073_v44 = vadd.f32 %v1660_v37, %v13031_v62  ;;  %v2214_v53 = vsel %vm2189_vm3, %v13065_v22, -inf }
 0x40a   :  { %2203 = vmax.xlane.f32.xlu0 %v2202_v27  ;;  %v13081_v6 = vld [vmem:[#allocation8 + $0xc8] sm:$0xff] }
 0x40b   :  { %v2205_v32 = vsel %vm2189_vm3, %v13068_v4, -inf  ;;  %v2217_v16 = vsel %vm2189_vm3, %v13073_v44, -inf }
 0x40c   :  { %2206 = vmax.xlane.f32.xlu1 %v2205_v32 }
 0x40e   :  { %v1751_v20 = vpop.f32.mrb[44].mxu0  ;;  %2215 = vmax.xlane.f32.xlu0 %v2214_v53  ;;  %v1610_v5 = vpop.f32.mrb[52].mxu1 }
 0x40f   :  { %v13084_v60 = vadd.f32 %v1610_v5, %v13077_v58  ;;  %v10244_v27 = vpop.f32.mrb[53].mxu1  ;;  %v10262_v37 = vpop.f32.mrb[45].mxu0  ;;  %v13089_v3 = vadd.f32 %v1751_v20, %v13057_v21 }
 0x410   :  { %v1754_v30 = vpop.f32.mrb[46].mxu0  ;;  %2218 = vmax.xlane.f32.xlu1 %v2217_v16  ;;  %v1613_v32 = vpop.f32.mrb[54].mxu1 }
 0x411   :  { %v13092_v19 = vadd.f32 %v1613_v32, %v13081_v6  ;;  %v10245_v53 = vpop.f32.mrb[55].mxu1  ;;  %v10263_v2 = vpop.f32.mrb[47].mxu0  ;;  %v2208_v5 = vsel %vm2189_vm3, %v13084_v60, -inf  ;;  %v13097_v27 = vadd.f32 %v1754_v30, %v13059_v10  ;;  %v2226_v16 = vsel %vm2189_vm3, %v13089_v3, -inf }
 0x412   :  { %2209 = vmax.xlane.f32.xlu0 %v2208_v5 }
 0x413   :  { %v2211_v37 = vsel %vm2189_vm3, %v13092_v19, -inf  ;;  %v2229_v5 = vsel %vm2189_vm3, %v13097_v27, -inf }
 0x414   :  { %2212 = vmax.xlane.f32.xlu1 %v2211_v37 }
 0x416   :  { %v1858_v20 = vpop.f32.mrb[48].mxu0  ;;  %2227 = vmax.xlane.f32.xlu0 %v2226_v16  ;;  %v1704_v32 = vpop.f32.mrb[56].mxu1 }
 0x417   :  { %v13104_v53 = vadd.f32 %v1858_v20, %v13029_v8  ;;  %v10256_v2 = vpop.f32.mrb[57].mxu1  ;;  %v10274_v63 = vpop.f32.mrb[49].mxu0  ;;  %v13109_v13 = vadd.f32 %v1704_v32, %v13043_v29 }
 0x418   :  { %v1861_v30 = vpop.f32.mrb[50].mxu0  ;;  %2230 = vmax.xlane.f32.xlu1 %v2229_v5  ;;  %v1707_v55 = vpop.f32.mrb[58].mxu1 }
 0x419   :  { %v13112_v37 = vadd.f32 %v1861_v30, %v13031_v62  ;;  %v10257_v38 = vpop.f32.mrb[59].mxu1  ;;  %v10275_v16 = vpop.f32.mrb[51].mxu0  ;;  %v2238_v20 = vsel %vm2189_vm3, %v13104_v53, -inf  ;;  %v13117_v63 = vadd.f32 %v1707_v55, %v13045_v24  ;;  %v2220_v32 = vsel %vm2189_vm3, %v13109_v13, -inf }
 0x41a   :  { %2239 = vmax.xlane.f32.xlu0 %v2238_v20 }
 0x41b   :  { %v2241_v2 = vsel %vm2189_vm3, %v13112_v37, -inf  ;;  %v2223_v20 = vsel %vm2189_vm3, %v13117_v63, -inf }
 0x41c   :  { %2242 = vmax.xlane.f32.xlu1 %v2241_v2 }
 0x41e   :  { %v1946_v5 = vpop.f32.mrb[52].mxu0  ;;  %2221 = vmax.xlane.f32.xlu0 %v2220_v32  ;;  %v1798_v30 = vpop.f32.mrb[60].mxu1 }
 0x41f   :  { %v13124_v38 = vadd.f32 %v1946_v5, %v13057_v21  ;;  %v10268_v16 = vpop.f32.mrb[61].mxu1  ;;  %v10286_v17 = vpop.f32.mrb[53].mxu0 }
 0x420   :  { %v1949_v55 = vpop.f32.mrb[54].mxu0  ;;  %2224 = vmax.xlane.f32.xlu1 %v2223_v20  ;;  %v1801_v43 = vpop.f32.mrb[62].mxu1 }
 0x421   :  { %v13129_v52 = vadd.f32 %v1949_v55, %v13059_v10  ;;  %v10269_v2 = vpop.f32.mrb[63].mxu1  ;;  %v10287_v40 = vpop.f32.mrb[55].mxu0  ;;  %v2250_v32 = vsel %vm2189_vm3, %v13124_v38, -inf }
 0x422   :  { %2251 = vmax.xlane.f32.xlu0 %v2250_v32 }
 0x423   :  { %v2253_v5 = vsel %vm2189_vm3, %v13129_v52, -inf }
 0x424   :  { %2254 = vmax.xlane.f32.xlu1 %v2253_v5 }
 0x426   :  { %v1902_v17 = vpop.f32.mrb[64].mxu1  ;;  %v2034_v16 = vpop.f32.mrb[56].mxu0 }
 0x427   :  { %v13136_v54 = vadd.f32 %v1902_v17, %v13043_v29  ;;  %v10280_v20 = vpop.f32.mrb[65].mxu1  ;;  %v10298_v61 = vpop.f32.mrb[57].mxu0  ;;  %v13139_v2 = vadd.f32 %v2034_v16, %v13029_v8 }
 0x428   :  { %v1905_v15 = vpop.f32.mrb[66].mxu1  ;;  %v2037_v55 = vpop.f32.mrb[58].mxu0 }
 0x429   :  { %v13142_v40 = vadd.f32 %v1905_v15, %v13045_v24  ;;  %v10281_v32 = vpop.f32.mrb[67].mxu1  ;;  %v10299_v45 = vpop.f32.mrb[59].mxu0  ;;  %v2244_v5 = vsel %vm2189_vm3, %v13136_v54, -inf  ;;  %v13147_v31 = vadd.f32 %v2037_v55, %v13031_v62  ;;  %v2262_v8 = vsel %vm2189_vm3, %v13139_v2, -inf }
 0x42a   :  { %2245 = vmax.xlane.f32.xlu0 %v2244_v5 }
 0x42b   :  { %v2247_v61 = vsel %vm2189_vm3, %v13142_v40, -inf  ;;  %v2265_v32 = vsel %vm2189_vm3, %v13147_v31, -inf }
 0x42c   :  { %2248 = vmax.xlane.f32.xlu1 %v2247_v61 }
 0x42e   :  { %v2122_v17 = vpop.f32.mrb[60].mxu0  ;;  %2263 = vmax.xlane.f32.xlu0 %v2262_v8  ;;  %v1990_v15 = vpop.f32.mrb[68].mxu1 }
 0x42f   :  { %v13154_v16 = vadd.f32 %v1990_v15, %v13077_v58  ;;  %v10292_v45 = vpop.f32.mrb[69].mxu1  ;;  %v10310_v20 = vpop.f32.mrb[61].mxu0  ;;  %v13159_v5 = vadd.f32 %v2122_v17, %v13057_v21 }
 0x430   :  { %v2125_v62 = vpop.f32.mrb[62].mxu0  ;;  %2266 = vmax.xlane.f32.xlu1 %v2265_v32  ;;  %v1993_v55 = vpop.f32.mrb[70].mxu1 }
 0x431   :  { %v13162_v61 = vadd.f32 %v1993_v55, %v13081_v6  ;;  %v10293_v12 = vpop.f32.mrb[71].mxu1  ;;  %v10311_v8 = vpop.f32.mrb[63].mxu0  ;;  %v2256_v15 = vsel %vm2189_vm3, %v13154_v16, -inf  ;;  %v13167_v45 = vadd.f32 %v2125_v62, %v13059_v10  ;;  %v2274_v21 = vsel %vm2189_vm3, %v13159_v5, -inf }
 0x432   :  { %2257 = vmax.xlane.f32.xlu0 %v2256_v15  ;;  %v13179_v10 = vadd.f32 %v1798_v30, %v13077_v58 }
 0x433   :  { %v2259_v20 = vsel %vm2189_vm3, %v13162_v61, -inf  ;;  %v2277_v55 = vsel %vm2189_vm3, %v13167_v45, -inf }
 0x434   :  { %2260 = vmax.xlane.f32.xlu1 %v2259_v20 }
 0x436   :  { %2275 = vmax.xlane.f32.xlu0 %v2274_v21  ;;  %v2078_v17 = vpop.f32.mrb[72].mxu1 }
 0x437   :  { %v13174_v32 = vadd.f32 %v2078_v17, %v13043_v29  ;;  %v10304_v12 = vpop.f32.mrb[73].mxu1  ;;  %v13187_v29 = vadd.f32 %v1801_v43, %v13081_v6  ;;  %v2232_v17 = vsel %vm2189_vm3, %v13179_v10, -inf }
 0x438   :  { %2278 = vmax.xlane.f32.xlu1 %v2277_v55  ;;  %v2081_v8 = vpop.f32.mrb[74].mxu1 }
 0x439   :  { %v13182_v62 = vadd.f32 %v2081_v8, %v13045_v24  ;;  %v10305_v15 = vpop.f32.mrb[75].mxu1  ;;  %v2268_v20 = vsel %vm2189_vm3, %v13174_v32, -inf  ;;  %v2235_v55 = vsel %vm2189_vm3, %v13187_v29, -inf }
 0x43a   :  { %2269 = vmax.xlane.f32.xlu0 %v2268_v20 }
 0x43b   :  { %v2271_v21 = vsel %vm2189_vm3, %v13182_v62, -inf }
 0x43c   :  { %2272 = vmax.xlane.f32.xlu1 %v2271_v21 }
 0x43e   :  { %2233 = vmax.xlane.f32.xlu0 %v2232_v17  ;;  %v2166_v30 = vpop.f32.mrb[76].mxu1 }
 0x43f   :  { %v13194_v24 = vadd.f32 %v2166_v30, %v13077_v58  ;;  %v10316_v12 = vpop.f32.mrb[77].mxu1 }
 0x440   :  { %2236 = vmax.xlane.f32.xlu1 %v2235_v55  ;;  %v2169_v8 = vpop.f32.mrb[78].mxu1 }
 0x441   :  { %v13199_v43 = vadd.f32 %v2169_v8, %v13081_v6  ;;  %v10317_v15 = vpop.f32.mrb[79].mxu1  ;;  %v2280_v20 = vsel %vm2189_vm3, %v13194_v24, -inf }
 0x442   :  { %2281 = vmax.xlane.f32.xlu0 %v2280_v20 }
 0x443   :  { %v2283_v21 = vsel %vm2189_vm3, %v13199_v43, -inf }
 0x444   :  { %2284 = vmax.xlane.f32.xlu1 %v2283_v21 }
 0x487   :  { %v2192_v58 = vpop.xlane.xlu0 %2191 }
 0x489   :  { %v2195_v17 = vpop.xlane.xlu1 %2194 }
 0x48f   :  { %v2198_v30 = vpop.xlane.xlu0 %2197 }
 0x491   :  { %v2201_v12 = vpop.xlane.xlu1 %2200 }
 0x497   :  { %v2204_v14 = vpop.xlane.xlu0 %2203 }
 0x499   :  { %v2207_v0 = vpop.xlane.xlu1 %2206 }
 0x49b   :  { %v2216_v55 = vpop.xlane.xlu0 %2215 }
 0x49d   :  { %v13205_v36 = vpop.xlane.xlu1 %2218 }
 0x49f   :  { %v13207_v6 = vpop.xlane.xlu0 %2209 }
 0x4a1   :  { %v13209_v8 = vpop.xlane.xlu1 %2212 }
 0x4a3   :  { %v13211_v15 = vpop.xlane.xlu0 %2227 }
 0x4a5   :  { %v13213_v20 = vpop.xlane.xlu1 %2230 }
 0x4a7   :  { %v2240_v26 = vpop.xlane.xlu0 %2239 }
 0x4a8   :  { %v2286_v46 = vmax.f32 %v2192_v58, %v2240_v26 }
 0x4a9   :  { %v2243_v21 = vpop.xlane.xlu1 %2242 }
 0x4aa   :  { %v2302_v9 = vsub.f32 %v13034_v56, %v2286_v46  ;;  %v2350_v41 = vsub.f32 %v13104_v53, %v2286_v46  ;;  %v2287_v39 = vmax.f32 %v2195_v17, %v2243_v21 }
 0x4ab   :  { %v13217_v50 = vpop.xlane.xlu0 %2221 }
 0x4ac   :  { %v2318_v59 = vmul.f32 1.442695, %v2302_v9  ;;  %v2366_v33 = vmul.f32 1.442695, %v2350_v41  ;;  %v2303_v51 = vsub.f32 %v13037_v42, %v2287_v39  ;;  %v2351_v25 = vsub.f32 %v13112_v37, %v2287_v39 }
 0x4ad   :  { %v13221_v11 = vpop.xlane.xlu1 %2224 }
 0x4ae   :  { %11239 = vpow2.f32 %v2318_v59  ;;  %v2320_v57 = vmul.f32 1.442695, %v2303_v51  ;;  %v2368_v1 = vmul.f32 1.442695, %v2351_v25 }
 0x4af   :  { %11241 = vpow2.f32 %v2366_v33  ;;  %v2252_v26 = vpop.xlane.xlu0 %2251 }
 0x4b0   :  { %11243 = vpow2.f32 %v2320_v57  ;;  %v2290_v56 = vmax.f32 %v2204_v14, %v2252_v26 }
 0x4b1   :  { %v2255_v58 = vpop.xlane.xlu1 %2254  ;;  %11245 = vpow2.f32 %v2368_v1 }
 0x4b2   :  { %v2306_v46 = vsub.f32 %v13062_v35, %v2290_v56  ;;  %v2354_v9 = vsub.f32 %v13124_v38, %v2290_v56  ;;  %v2291_v41 = vmax.f32 %v2207_v0, %v2255_v58 }
 0x4b4   :  { %v2326_v53 = vmul.f32 1.442695, %v2306_v46  ;;  %v2374_v42 = vmul.f32 1.442695, %v2354_v9  ;;  %v2307_v39 = vsub.f32 %v13068_v4, %v2291_v41  ;;  %v2355_v37 = vsub.f32 %v13129_v52, %v2291_v41 }
 0x4b6   :  { %11247 = vpow2.f32 %v2326_v53  ;;  %v2328_v51 = vmul.f32 1.442695, %v2307_v39  ;;  %v2376_v25 = vmul.f32 1.442695, %v2355_v37 }
 0x4b7   :  { %11249 = vpow2.f32 %v2374_v42  ;;  %v2246_v33 = vpop.xlane.xlu0 %2245 }
 0x4b8   :  { %v13227_v57 = vpop.eup %11239  ;;  %11251 = vpow2.f32 %v2328_v51  ;;  %v2288_v1 = vmax.f32 %v2198_v30, %v2246_v33 }
 0x4b9   :  { %v13229_v59 = vpop.eup %11241  ;;  %v2249_v14 = vpop.xlane.xlu1 %2248  ;;  %v2398_v0 = vsel %vm2189_vm3, %v13227_v57, 0.0  ;;  %11253 = vpow2.f32 %v2376_v25 }
 0x4ba   :  { %v13233_v35 = vpop.eup %11243  ;;  %v2304_v52 = vsub.f32 %v13048_v34, %v2288_v1  ;;  %v2352_v4 = vsub.f32 %v13136_v54, %v2288_v1  ;;  %v2289_v38 = vmax.f32 %v2201_v12, %v2249_v14  ;;  %2399 = vadd.xlane.f32.xlu0 %v2398_v0  ;;  %v2446_v54 = vsel %vm2189_vm3, %v13229_v59, 0.0 }
 0x4bb   :  { %v2264_v17 = vpop.xlane.xlu0 %2263  ;;  %v2401_v21 = vsel %vm2189_vm3, %v13233_v35, 0.0  ;;  %v13239_v30 = vpop.eup %11245 }
 0x4bc   :  { %v2322_v26 = vmul.f32 1.442695, %v2304_v52  ;;  %v2370_v56 = vmul.f32 1.442695, %v2352_v4  ;;  %v2305_v58 = vsub.f32 %v13051_v7, %v2289_v38  ;;  %v2353_v46 = vsub.f32 %v13142_v40, %v2289_v38  ;;  %2402 = vadd.xlane.f32.xlu1 %v2401_v21 }
 0x4bd   :  { %v2294_v9 = vmax.f32 %v2216_v55, %v2264_v17  ;;  %v2267_v41 = vpop.xlane.xlu1 %2266  ;;  %v2449_v7 = vsel %vm2189_vm3, %v13239_v30, 0.0 }
 0x4be   :  { %11255 = vpow2.f32 %v2322_v26  ;;  %v2324_v34 = vmul.f32 1.442695, %v2305_v58  ;;  %v2295_v12 = vmax.f32 %v13205_v36, %v2267_v41  ;;  %2447 = vadd.xlane.f32.xlu0 %v2446_v54  ;;  %v2372_v53 = vmul.f32 1.442695, %v2353_v46 }
 0x4bf   :  { %11257 = vpow2.f32 %v2370_v56  ;;  %v2310_v42 = vsub.f32 %v13065_v22, %v2294_v9  ;;  %v2258_v39 = vpop.xlane.xlu0 %2257  ;;  %v2358_v55 = vsub.f32 %v13139_v2, %v2294_v9 }
 0x4c0   :  { %v13249_v40 = vpop.eup %11247  ;;  %11259 = vpow2.f32 %v2324_v34  ;;  %v2311_v37 = vsub.f32 %v13073_v44, %v2295_v12  ;;  %v2292_v51 = vmax.f32 %v13207_v6, %v2258_v39  ;;  %2450 = vadd.xlane.f32.xlu1 %v2449_v7  ;;  %v2359_v14 = vsub.f32 %v13147_v31, %v2295_v12 }
 0x4c1   :  { %v13254_v36 = vpop.eup %11249  ;;  %v2334_v25 = vmul.f32 1.442695, %v2310_v42  ;;  %v2261_v33 = vpop.xlane.xlu1 %2260  ;;  %v2410_v22 = vsel %vm2189_vm3, %v13249_v40, 0.0  ;;  %11261 = vpow2.f32 %v2372_v53  ;;  %v2382_v4 = vmul.f32 1.442695, %v2358_v55 }
 0x4c2   :  { %v13258_v1 = vpop.eup %11251  ;;  %2411 = vadd.xlane.f32.xlu0 %v2410_v22  ;;  %v2336_v0 = vmul.f32 1.442695, %v2311_v37  ;;  %v2293_v2 = vmax.f32 %v13209_v8, %v2261_v33  ;;  %v2308_v38 = vsub.f32 %v13084_v60, %v2292_v51  ;;  %v2458_v17 = vsel %vm2189_vm3, %v13254_v36, 0.0 }
 0x4c3   :  { %v2276_v44 = vpop.xlane.xlu0 %2275  ;;  %v2413_v6 = vsel %vm2189_vm3, %v13258_v1, 0.0  ;;  %v13264_v52 = vpop.eup %11253  ;;  %11263 = vpow2.f32 %v2334_v25  ;;  %v2384_v21 = vmul.f32 1.442695, %v2359_v14  ;;  %v2356_v46 = vsub.f32 %v13154_v16, %v2292_v51 }
 0x4c4   :  { %2414 = vadd.xlane.f32.xlu1 %v2413_v6  ;;  %11265 = vpow2.f32 %v2336_v0  ;;  %v2309_v8 = vsub.f32 %v13092_v19, %v2293_v2  ;;  %v2461_v26 = vsel %vm2189_vm3, %v13264_v52, 0.0  ;;  %v2330_v58 = vmul.f32 1.442695, %v2308_v38 }
 0x4c5   :  { %v2279_v31 = vpop.xlane.xlu1 %2278  ;;  %11267 = vpow2.f32 %v2382_v4  ;;  %v2298_v60 = vmax.f32 %v13211_v15, %v2276_v44  ;;  %v2357_v12 = vsub.f32 %v13162_v61, %v2293_v2  ;;  %v2378_v16 = vmul.f32 1.442695, %v2356_v46 }
 0x4c6   :  { %2459 = vadd.xlane.f32.xlu0 %v2458_v17  ;;  %11269 = vpow2.f32 %v2384_v21  ;;  %v2332_v19 = vmul.f32 1.442695, %v2309_v8  ;;  %v2299_v53 = vmax.f32 %v13213_v20, %v2279_v31 }
 0x4c7   :  { %v2270_v41 = vpop.xlane.xlu0 %2269  ;;  %11271 = vpow2.f32 %v2330_v58  ;;  %v2314_v15 = vsub.f32 %v13089_v3, %v2298_v60  ;;  %v2380_v61 = vmul.f32 1.442695, %v2357_v12  ;;  %v2362_v20 = vsub.f32 %v13159_v5, %v2298_v60 }
 0x4c8   :  { %v13272_v56 = vpop.eup %11255  ;;  %2462 = vadd.xlane.f32.xlu1 %v2461_v26  ;;  %11273 = vpow2.f32 %v2332_v19  ;;  %v2315_v51 = vsub.f32 %v13097_v27, %v2299_v53  ;;  %v2296_v33 = vmax.f32 %v13217_v50, %v2270_v41  ;;  %v2363_v5 = vsub.f32 %v13167_v45, %v2299_v53 }
 0x4c9   :  { %v13276_v9 = vpop.eup %11257  ;;  %v2404_v54 = vsel %vm2189_vm3, %v13272_v56, 0.0  ;;  %v2273_v42 = vpop.xlane.xlu1 %2272  ;;  %11275 = vpow2.f32 %v2378_v16  ;;  %v2342_v25 = vmul.f32 1.442695, %v2314_v15  ;;  %v2390_v50 = vmul.f32 1.442695, %v2362_v20 }
 0x4ca   :  { %v13280_v34 = vpop.eup %11259  ;;  %2405 = vadd.xlane.f32.xlu0 %v2404_v54  ;;  %v2452_v55 = vsel %vm2189_vm3, %v13276_v9, 0.0  ;;  %11277 = vpow2.f32 %v2380_v61  ;;  %v2344_v27 = vmul.f32 1.442695, %v2315_v51  ;;  %v2297_v6 = vmax.f32 %v13221_v11, %v2273_v42 }
 0x4cb   :  { %v2407_v39 = vsel %vm2189_vm3, %v13280_v34, 0.0  ;;  %v13287_v7 = vpop.eup %11261  ;;  %v2234_v3 = vpop.xlane.xlu0 %2233  ;;  %11279 = vpow2.f32 %v2342_v25  ;;  %v2312_v4 = vsub.f32 %v13109_v13, %v2296_v33  ;;  %v2392_v45 = vmul.f32 1.442695, %v2363_v5 }
 0x4cc   :  { %2408 = vadd.xlane.f32.xlu1 %v2407_v39  ;;  %v2455_v22 = vsel %vm2189_vm3, %v13287_v7, 0.0  ;;  %11281 = vpow2.f32 %v2344_v27  ;;  %v2360_v11 = vsub.f32 %v13174_v32, %v2296_v33  ;;  %v2313_v26 = vsub.f32 %v13117_v63, %v2297_v6 }
 0x4cd   :  { %v13291_v37 = vpop.eup %11263  ;;  %v2237_v44 = vpop.xlane.xlu1 %2236  ;;  %11283 = vpow2.f32 %v2390_v50  ;;  %v2338_v13 = vmul.f32 1.442695, %v2312_v4  ;;  %v2361_v63 = vsub.f32 %v13182_v62, %v2297_v6 }
 0x4ce   :  { %2453 = vadd.xlane.f32.xlu0 %v2452_v55  ;;  %v13298_v14 = vpop.eup %11265  ;;  %v2422_v0 = vsel %vm2189_vm3, %v13291_v37, 0.0  ;;  %11285 = vpow2.f32 %v2392_v45  ;;  %v2340_v32 = vmul.f32 1.442695, %v2313_v26  ;;  %v2386_v53 = vmul.f32 1.442695, %v2360_v11 }
 0x4cf   :  { %v13302_v2 = vpop.eup %11267  ;;  %v2425_v38 = vsel %vm2189_vm3, %v13298_v14, 0.0  ;;  %v2282_v31 = vpop.xlane.xlu0 %2281  ;;  %11287 = vpow2.f32 %v2338_v13  ;;  %v2388_v61 = vmul.f32 1.442695, %v2361_v63 }
 0x4d0   :  { %2456 = vadd.xlane.f32.xlu1 %v2455_v22  ;;  %v13309_v17 = vpop.eup %11269  ;;  %v2470_v21 = vsel %vm2189_vm3, %v13302_v2, 0.0  ;;  %v2300_v58 = vmax.f32 %v2234_v3, %v2282_v31  ;;  %11289 = vpow2.f32 %v2340_v32 }
 0x4d1   :  { %v13313_v8 = vpop.eup %11271  ;;  %v2285_v46 = vpop.xlane.xlu1 %2284  ;;  %v2473_v60 = vsel %vm2189_vm3, %v13309_v17, 0.0  ;;  %11291 = vpow2.f32 %v2386_v53  ;;  %v16061_v53 = vld [vmem:[#allocation41_spill] sm:$0xff] }
 0x4d2   :  { %2423 = vadd.xlane.f32.xlu0 %v2422_v0  ;;  %v13319_v41 = vpop.eup %11273  ;;  %v2416_v54 = vsel %vm2189_vm3, %v13313_v8, 0.0  ;;  %v2301_v12 = vmax.f32 %v2237_v44, %v2285_v46  ;;  %v2316_v16 = vsub.f32 %v13179_v10, %v2300_v58  ;;  %v2364_v10 = vsub.f32 %v13194_v24, %v2300_v58 }
 0x4d3   :  { %v13323_v19 = vpop.eup %11275  ;;  %v2419_v15 = vsel %vm2189_vm3, %v13319_v41, 0.0  ;;  %11293 = vpow2.f32 %v2388_v61  ;;  %v16065_v61 = vld [vmem:[#allocation33_spill] sm:$0xff] }
 0x4d4   :  { %2426 = vadd.xlane.f32.xlu1 %v2425_v38  ;;  %v13329_v42 = vpop.eup %11277  ;;  %v2464_v39 = vsel %vm2189_vm3, %v13323_v19, 0.0  ;;  %v2317_v62 = vsub.f32 %v13187_v29, %v2301_v12  ;;  %v2346_v20 = vmul.f32 1.442695, %v2316_v16  ;;  %v2365_v29 = vsub.f32 %v13199_v43, %v2301_v12  ;;  %v16060_v12 = vld [vmem:[#allocation42_spill] sm:$0xff]  ;;  %v16062_v16 = vld [vmem:[#allocation47_spill] sm:$0xff] }
 0x4d5   :  { %v13333_v55 = vpop.eup %11279  ;;  %v2467_v51 = vsel %vm2189_vm3, %v13329_v42, 0.0  ;;  %v2394_v0 = vmul.f32 1.442695, %v2364_v10  ;;  %v16068_v10 = vld [vmem:[#allocation49_spill] sm:$0xff] }
 0x4d6   :  { %2471 = vadd.xlane.f32.xlu0 %v2470_v21  ;;  %v13339_v3 = vpop.eup %11281  ;;  %v2434_v25 = vsel %vm2189_vm3, %v13333_v55, 0.0  ;;  %v2348_v22 = vmul.f32 1.442695, %v2317_v62  ;;  %11295 = vpow2.f32 %v2346_v20  ;;  %v2396_v6 = vmul.f32 1.442695, %v2365_v29  ;;  %v16066_v62 = vld [vmem:[#allocation51_spill] sm:$0xff] }
 0x4d7   :  { %v13343_v33 = vpop.eup %11283  ;;  %v2437_v24 = vsel %vm2189_vm3, %v13339_v3, 0.0  ;;  %v16067_v20 = vld [vmem:[#allocation36_spill] sm:$0xff]  ;;  %v16072_v29 = vld [vmem:[#allocation46_spill] sm:$0xff] }
 0x4d8   :  { %2474 = vadd.xlane.f32.xlu1 %v2473_v60  ;;  %v13348_v44 = vpop.eup %11285  ;;  %v2482_v27 = vsel %vm2189_vm3, %v13343_v33, 0.0  ;;  %11297 = vpow2.f32 %v2348_v22  ;;  %v16071_v22 = vld [vmem:[#allocation52_spill] sm:$0xff] }
 0x4d9   :  { %v13352_v5 = vpop.eup %11287  ;;  %11299 = vpow2.f32 %v2394_v0  ;;  %v2485_v43 = vsel %vm2189_vm3, %v13348_v44, 0.0  ;;  %v16073_v0 = vld [vmem:[#allocation55_spill] sm:$0xff] }
 0x4da   :  { %2417 = vadd.xlane.f32.xlu0 %v2416_v54  ;;  %v13356_v50 = vpop.eup %11289  ;;  %v2428_v4 = vsel %vm2189_vm3, %v13352_v5, 0.0  ;;  %11301 = vpow2.f32 %v2396_v6  ;;  %v16076_v6 = vld [vmem:[#allocation53_spill] sm:$0xff] }
 0x4db   :  { %v13360_v38 = vpop.eup %11291  ;;  %v2431_v31 = vsel %vm2189_vm3, %v13356_v50, 0.0 }
 0x4dc   :  { %2420 = vadd.xlane.f32.xlu1 %v2419_v15  ;;  %v2476_v45 = vsel %vm2189_vm3, %v13360_v38, 0.0  ;;  %v16063_v15 = vld [vmem:[#allocation34_spill] sm:$0xff] }
 0x4dd   :  { %v13364_v21 = vpop.eup %11293 }
 0x4de   :  { %2465 = vadd.xlane.f32.xlu0 %v2464_v39  ;;  %v2479_v26 = vsel %vm2189_vm3, %v13364_v21, 0.0  ;;  %v16064_v39 = vld [vmem:[#allocation45_spill] sm:$0xff] }
 0x4e0   :  { %2468 = vadd.xlane.f32.xlu1 %v2467_v51  ;;  %v13368_v11 = vpop.eup %11295  ;;  %v16069_v51 = vld [vmem:[#allocation35_spill] sm:$0xff] }
 0x4e1   :  { %v2440_v58 = vsel %vm2189_vm3, %v13368_v11, 0.0 }
 0x4e2   :  { %2435 = vadd.xlane.f32.xlu0 %v2434_v25  ;;  %v13372_v13 = vpop.eup %11297  ;;  %v16070_v25 = vld [vmem:[#allocation48_spill] sm:$0xff] }
 0x4e3   :  { %v13376_v46 = vpop.eup %11299  ;;  %v2443_v60 = vsel %vm2189_vm3, %v13372_v13, 0.0 }
 0x4e4   :  { %2438 = vadd.xlane.f32.xlu1 %v2437_v24  ;;  %v13380_v54 = vpop.eup %11301  ;;  %v2488_v32 = vsel %vm2189_vm3, %v13376_v46, 0.0  ;;  %v16074_v24 = vld [vmem:[#allocation50_spill] sm:$0xff] }
 0x4e5   :  { %v2491_v63 = vsel %vm2189_vm3, %v13380_v54, 0.0 }
 0x4e6   :  { %2483 = vadd.xlane.f32.xlu0 %v2482_v27  ;;  %v16075_v27 = vld [vmem:[#allocation59_spill] sm:$0xff] }
 0x4e8   :  { %2486 = vadd.xlane.f32.xlu1 %v2485_v43  ;;  %v16077_v43 = vld [vmem:[#allocation64_spill] sm:$0xff] }
 0x4ea   :  { %2429 = vadd.xlane.f32.xlu0 %v2428_v4  ;;  %v16078_v4 = vld [vmem:[#allocation57_spill] sm:$0xff] }
 0x4ec   :  { %2432 = vadd.xlane.f32.xlu1 %v2431_v31  ;;  %v16079_v31 = vld [vmem:[#allocation62_spill] sm:$0xff] }
 0x4ee   :  { %2477 = vadd.xlane.f32.xlu0 %v2476_v45  ;;  %v16080_v45 = vld [vmem:[#allocation68_spill] sm:$0xff] }
 0x4f0   :  { %2480 = vadd.xlane.f32.xlu1 %v2479_v26  ;;  %v16081_v26 = vld [vmem:[#allocation66_spill] sm:$0xff] }
 0x4f2   :  { %2441 = vadd.xlane.f32.xlu0 %v2440_v58 }
 0x4f4   :  { %2444 = vadd.xlane.f32.xlu1 %v2443_v60 }
 0x4f6   :  { %2489 = vadd.xlane.f32.xlu0 %v2488_v32 }
 0x4f8   :  { %2492 = vadd.xlane.f32.xlu1 %v2491_v63 }
 0x509   :  { %3351 = vrot.lane.b32.xlu1 %v12781_v23, %s11966_s12 }
 0x50c   :  { %3298 = vrot.lane.b32.xlu0 %v12785_v18, %s11966_s12 }
 0x50d   :  { %3295 = vrot.lane.b32.xlu1 %v12783_v49, %s11966_s12 }
 0x510   :  { %3348 = vrot.lane.b32.xlu0 %v12779_v28, %s11966_s12 }
 0x511   :  { %3404 = vrot.lane.b32.xlu1 %v12800_v48, %s11966_s12 }
 0x514   :  { %3401 = vrot.lane.b32.xlu0 %v12798_v47, %s11966_s12 }
 0x515   :  { %3457 = vrot.lane.b32.xlu1 %v16060_v12, %s11966_s12 }
 0x518   :  { %3454 = vrot.lane.b32.xlu0 %v16061_v53, %s11966_s12 }
 0x519   :  { %3510 = vrot.lane.b32.xlu1 %v16062_v16, %s11966_s12 }
 0x51c   :  { %3507 = vrot.lane.b32.xlu0 %v16063_v15, %s11966_s12 }
 0x51d   :  { %3563 = vrot.lane.b32.xlu1 %v16064_v39, %s11966_s12 }
 0x520   :  { %3560 = vrot.lane.b32.xlu0 %v16065_v61, %s11966_s12 }
 0x521   :  { %3616 = vrot.lane.b32.xlu1 %v16066_v62, %s11966_s12 }
 0x524   :  { %3613 = vrot.lane.b32.xlu0 %v16067_v20, %s11966_s12 }
 0x525   :  { %3669 = vrot.lane.b32.xlu1 %v16068_v10, %s11966_s12 }
 0x528   :  { %3666 = vrot.lane.b32.xlu0 %v16069_v51, %s11966_s12 }
 0x529   :  { %3735 = vrot.lane.b32.xlu1 %v16070_v25, %s11966_s12 }
 0x52c   :  { %3829 = vrot.lane.b32.xlu0 %v16071_v22, %s11966_s12 }
 0x52d   :  { %3782 = vrot.lane.b32.xlu1 %v16072_v29, %s11966_s12 }
 0x530   :  { %3923 = vrot.lane.b32.xlu0 %v16073_v0, %s11966_s12 }
 0x531   :  { %3876 = vrot.lane.b32.xlu1 %v16074_v24, %s11966_s12 }
 0x534   :  { %4017 = vrot.lane.b32.xlu0 %v16075_v27, %s11966_s12 }
 0x535   :  { %3970 = vrot.lane.b32.xlu1 %v16076_v6, %s11966_s12 }
 0x538   :  { %4511 = vrot.lane.b32.xlu0 %v16077_v43, %s11966_s12 }
 0x539   :  { %4064 = vrot.lane.b32.xlu1 %v16078_v4, %s11966_s12 }
 0x53d   :  { %4559 = vrot.lane.b32.xlu1 %v16079_v31, %s11966_s12 }
 0x541   :  { %4607 = vrot.lane.b32.xlu1 %v16080_v45, %s11966_s12 }
 0x545   :  { %4655 = vrot.lane.b32.xlu1 %v16081_v26, %s11966_s12 }
 0x547   :  { %v2400_v58 = vpop.xlane.xlu0 %2399 }
 0x549   :  { %v2403_v60 = vpop.xlane.xlu1 %2402 }
 0x54b   :  { %v2448_v32 = vpop.xlane.xlu0 %2447 }
 0x54c   :  { %v2494_v63 = vadd.f32 %v2448_v32, %v2400_v58 }
 0x54d   :  { %v2451_v6 = vpop.xlane.xlu1 %2450 }
 0x54e   :  { %11303 = vrcp.f32 %v2494_v63  ;;  %v2495_v24 = vadd.f32 %v2451_v6, %v2403_v60 }
 0x54f   :  { %v2412_v29 = vpop.xlane.xlu0 %2411 }
 0x550   :  { %11305 = vrcp.f32 %v2495_v24 }
 0x551   :  { %v2415_v25 = vpop.xlane.xlu1 %2414 }
 0x553   :  { %v2460_v4 = vpop.xlane.xlu0 %2459 }
 0x554   :  { %v2498_v10 = vadd.f32 %v2460_v4, %v2412_v29  ;;  %v16082_v4 = vmov 0.0  }
 0x555   :  { %v2463_v62 = vpop.xlane.xlu1 %2462 }
 0x556   :  { %11307 = vrcp.f32 %v2498_v10  ;;  %v2499_v31 = vadd.f32 %v2463_v62, %v2415_v25 }
 0x557   :  { %v2406_v39 = vpop.xlane.xlu0 %2405 }
 0x558   :  { %v13442_v16 = vpop.eup %11303  ;;  %11309 = vrcp.f32 %v2499_v31 }
 0x559   :  { %v2409_v43 = vpop.xlane.xlu1 %2408  ;;  %v2550_v58 = vmul.f32 %v13442_v16, %v13229_v59 }
 0x55a   :  { %v13444_v12 = vpop.eup %11305 }
 0x55b   :  { %v2551_v6 = vmul.f32 %v13444_v12, %v13239_v30  ;;  %v2454_v24 = vpop.xlane.xlu0 %2453 }
 0x55c   :  { %v2496_v60 = vadd.f32 %v2454_v24, %v2406_v39 }
 0x55d   :  { %v2566_v32 = vpack.c.bf16 %v2551_v6, %v2550_v58  ;;  %v2457_v29 = vpop.xlane.xlu1 %2456 }
 0x55e   :  { %11311 = vrcp.f32 %v2496_v60  ;;  %v2497_v10 = vadd.f32 %v2457_v29, %v2409_v43 }
 0x55f   :  { %v2424_v62 = vpop.xlane.xlu0 %2423  ;;  %10321 = vmatmul.mubr.msk.bf16.vlgmr.msra.gmra.mrb[64].mxu0 %vm2189_vm3, %v2566_v32  ;;  %v16083_v32 = vld [vmem:[#allocation70_spill] sm:$0xff] }
 0x560   :  { %v13451_v25 = vpop.eup %11307  ;;  %10331 = vmatpush3.bf16.msra.mxu0 %v16080_v45  ;;  %10332 = vmatprep.mubr.msk.bf16.mxu0 %vm11965_vm1, %v16082_v4  ;;  %11313 = vrcp.f32 %v2497_v10 }
 0x561   :  { %10342 = vmatprep.subr.bf16.mxu0 %v16082_v4  ;;  %v2427_v30 = vpop.xlane.xlu1 %2426  ;;  %v2554_v39 = vmul.f32 %v13451_v25, %v13254_v36 }
 0x562   :  { %v13457_v59 = vpop.eup %11309 }
 0x563   :  { %v2555_v43 = vmul.f32 %v13457_v59, %v13264_v52  ;;  %v2472_v31 = vpop.xlane.xlu0 %2471 }
 0x564   :  { %v2502_v63 = vadd.f32 %v2472_v31, %v2424_v62 }
 0x565   :  { %v2568_v58 = vpack.c.bf16 %v2555_v43, %v2554_v39  ;;  %v2475_v6 = vpop.xlane.xlu1 %2474 }
 0x566   :  { %11315 = vrcp.f32 %v2502_v63  ;;  %v2503_v24 = vadd.f32 %v2475_v6, %v2427_v30 }
 0x567   :  { %v2418_v60 = vpop.xlane.xlu0 %2417  ;;  %10333 = vmatmul.mubr.msk.bf16.vlgmr.msra.gmra.mrb[68].mxu0 %vm2189_vm3, %v2568_v58 }
 0x568   :  { %10343 = vmatpush3.bf16.msra.mxu0 %v16083_v32  ;;  %10344 = vmatprep.mubr.msk.bf16.mxu0 %vm11965_vm1, %v16082_v4  ;;  %v13467_v29 = vpop.eup %11311  ;;  %11317 = vrcp.f32 %v2503_v24 }
 0x569   :  { %10354 = vmatprep.subr.bf16.mxu0 %v16082_v4  ;;  %v2421_v36 = vpop.xlane.xlu1 %2420  ;;  %v2552_v62 = vmul.f32 %v13467_v29, %v13276_v9 }
 0x56a   :  { %v13470_v52 = vpop.eup %11313 }
 0x56b   :  { %v2466_v10 = vpop.xlane.xlu0 %2465  ;;  %v2553_v30 = vmul.f32 %v13470_v52, %v13287_v7 }
 0x56c   :  { %v2500_v39 = vadd.f32 %v2466_v10, %v2418_v60 }
 0x56d   :  { %v2469_v43 = vpop.xlane.xlu1 %2468  ;;  %v2567_v31 = vpack.c.bf16 %v2553_v30, %v2552_v62 }
 0x56e   :  { %11319 = vrcp.f32 %v2500_v39  ;;  %v2501_v63 = vadd.f32 %v2469_v43, %v2421_v36 }
 0x56f   :  { %v2436_v58 = vpop.xlane.xlu0 %2435  ;;  %10327 = vmatmul.mubr.msk.bf16.vlgmr.msra.gmra.mrb[80].mxu1 %vm2189_vm3, %v2567_v31 }
 0x570   :  { %v13477_v6 = vpop.eup %11315  ;;  %11321 = vrcp.f32 %v2501_v63  ;;  %10337 = vmatpush3.bf16.msra.mxu1 %v16081_v26  ;;  %10338 = vmatprep.mubr.msk.bf16.mxu1 %vm11965_vm1, %v16082_v4  ;;  %v16084_v63 = vld [vmem:[#allocation72_spill] sm:$0xff]  ;;  %v16085_v26 = vld [vmem:[#allocation69_spill] sm:$0xff] }
 0x571   :  { %v2439_v9 = vpop.xlane.xlu1 %2438  ;;  %10348 = vmatprep.subr.bf16.mxu1 %v16082_v4  ;;  %v2558_v60 = vmul.f32 %v13477_v6, %v13302_v2 }
 0x572   :  { %v13483_v7 = vpop.eup %11317 }
 0x573   :  { %v2484_v24 = vpop.xlane.xlu0 %2483  ;;  %v2559_v36 = vmul.f32 %v13483_v7, %v13309_v17 }
 0x574   :  { %v2506_v10 = vadd.f32 %v2484_v24, %v2436_v58 }
 0x575   :  { %v2487_v62 = vpop.xlane.xlu1 %2486  ;;  %v2570_v30 = vpack.c.bf16 %v2559_v36, %v2558_v60 }
 0x576   :  { %11323 = vrcp.f32 %v2506_v10  ;;  %v2507_v39 = vadd.f32 %v2487_v62, %v2439_v9 }
 0x577   :  { %v2430_v43 = vpop.xlane.xlu0 %2429  ;;  %10345 = vmatmul.mubr.msk.bf16.vlgmr.msra.gmra.mrb[72].mxu0 %vm2189_vm3, %v2570_v30 }
 0x578   :  { %v13490_v31 = vpop.eup %11319  ;;  %11325 = vrcp.f32 %v2507_v39  ;;  %10355 = vmatpush3.bf16.msra.mxu0 %v16084_v63  ;;  %10356 = vmatprep.mubr.msk.bf16.mxu0 %vm11965_vm1, %v16082_v4 }
 0x579   :  { %v2433_v2 = vpop.xlane.xlu1 %2432  ;;  %10366 = vmatprep.subr.bf16.mxu0 %v16082_v4  ;;  %v2556_v9 = vmul.f32 %v13490_v31, %v13323_v19 }
 0x57a   :  { %v13496_v17 = vpop.eup %11321 }
 0x57b   :  { %v2478_v58 = vpop.xlane.xlu0 %2477  ;;  %v2557_v24 = vmul.f32 %v13496_v17, %v13329_v42 }
 0x57c   :  { %v2504_v60 = vadd.f32 %v2478_v58, %v2430_v43 }
 0x57d   :  { %v2481_v36 = vpop.xlane.xlu1 %2480  ;;  %v2569_v10 = vpack.c.bf16 %v2557_v24, %v2556_v9 }
 0x57e   :  { %11327 = vrcp.f32 %v2504_v60  ;;  %v2505_v62 = vadd.f32 %v2481_v36, %v2433_v2 }
 0x57f   :  { %v2442_v30 = vpop.xlane.xlu0 %2441  ;;  %10339 = vmatmul.mubr.msk.bf16.vlgmr.msra.gmra.mrb[84].mxu1 %vm2189_vm3, %v2569_v10 }
 0x580   :  { %v13503_v39 = vpop.eup %11323  ;;  %11329 = vrcp.f32 %v2505_v62  ;;  %10349 = vmatpush3.bf16.msra.mxu1 %v16085_v26  ;;  %10350 = vmatprep.mubr.msk.bf16.mxu1 %vm11965_vm1, %v16082_v4  ;;  %v16086_v62 = vld [vmem:[#allocation56_spill] sm:$0xff] }
 0x581   :  { %v2445_v19 = vpop.xlane.xlu1 %2444  ;;  %10360 = vmatprep.subr.bf16.mxu1 %v16082_v4  ;;  %v2562_v58 = vmul.f32 %v13503_v39, %v13343_v33  ;;  %v2527_v33 = vmul.f32 %v13444_v12, %v13233_v35  ;;  %v16087_v35 = vld [vmem:[#allocation71_spill] sm:$0xff]  ;;  %v16088_v12 = vld [vmem:[#allocation60_spill] sm:$0xff] }
 0x582   :  { %v11326_v42 = vpop.eup %11325 }
 0x583   :  { %v2490_v43 = vpop.xlane.xlu0 %2489  ;;  %v2563_v2 = vmul.f32 %v11326_v42, %v13348_v44 }
 0x584   :  { %v2508_v9 = vadd.f32 %v2490_v43, %v2442_v30  ;;  %v2526_v30 = vmul.f32 %v13442_v16, %v13227_v57  ;;  %v2531_v57 = vmul.f32 %v13457_v59, %v13258_v1 }
 0x585   :  { %v2493_v24 = vpop.xlane.xlu1 %2492  ;;  %v2572_v60 = vpack.c.bf16 %v2563_v2, %v2562_v58 }
 0x586   :  { %11331 = vrcp.f32 %v2508_v9  ;;  %v2509_v36 = vadd.f32 %v2493_v24, %v2445_v19  ;;  %v2542_v2 = vpack.c.bf16 %v2527_v33, %v2526_v30  ;;  %v16090_v33 = vld [vmem:[#allocation63_spill] sm:$0xff]  ;;  %v16091_v30 = vld [vmem:[#allocation58_spill] sm:$0xff] }
 0x587   :  { %10357 = vmatmul.mubr.msk.bf16.vlgmr.msra.gmra.mrb[76].mxu0 %vm2189_vm3, %v2572_v60 }
 0x588   :  { %v13513_v10 = vpop.eup %11327  ;;  %11333 = vrcp.f32 %v2509_v36  ;;  %10367 = vmatpush3.bf16.msra.mxu0 %v16086_v62  ;;  %10368 = vmatprep.mubr.msk.bf16.mxu0 %vm11965_vm1, %v16082_v4  ;;  %v16089_v36 = vld [vmem:[#allocation54_spill] sm:$0xff] }
 0x589   :  { %10378 = vmatprep.subr.bf16.mxu0 %v16082_v4  ;;  %v2560_v19 = vmul.f32 %v13513_v10, %v13360_v38  ;;  %v13545_v1 = vpop.permute.xlu1 %3351 }
 0x58a   :  { %v11330_v44 = vpop.eup %11329 }
 0x58b   :  { %v2561_v43 = vmul.f32 %v11330_v44, %v13364_v21  ;;  %v2530_v21 = vmul.f32 %v13451_v25, %v13249_v40  ;;  %v2529_v40 = vmul.f32 %v13470_v52, %v13280_v34  ;;  %v2534_v25 = vmul.f32 %v13477_v6, %v13291_v37  ;;  %v3299_v52 = vpop.permute.xlu0 %3298 }
 0x58c   :  { %v2532_v37 = vmul.f32 %v13490_v31, %v13313_v8  ;;  %v2538_v6 = vmul.f32 %v13503_v39, %v13333_v55  ;;  %v2537_v8 = vmul.f32 %v11330_v44, %v13356_v50  ;;  %v2536_v55 = vmul.f32 %v13513_v10, %v13352_v5  ;;  %v16094_v44 = vld [vmem:[#allocation65_spill] sm:$0xff] }
 0x58d   :  { %v2571_v58 = vpack.c.bf16 %v2561_v43, %v2560_v19  ;;  %v2544_v60 = vpack.c.bf16 %v2531_v57, %v2530_v21  ;;  %v13565_v34 = vpop.permute.xlu1 %3295  ;;  %v16092_v19 = vld [vmem:[#allocation67_spill] sm:$0xff]  ;;  %v2533_v43 = vmul.f32 %v13496_v17, %v13319_v41 }
 0x58e   :  { %v2547_v57 = vpack.c.bf16 %v2537_v8, %v2536_v55 }
 0x58f   :  { %10351 = vmatmul.mubr.msk.bf16.vlgmr.msra.gmra.mrb[88].mxu1 %vm2189_vm3, %v2571_v58  ;;  %10369 = vmatmul.mubr.msk.bf16.vlgmr.msra.gmra.mrb[64].mxu0 %vm2189_vm3, %v2542_v2  ;;  %v13584_v41 = vpop.permute.xlu0 %3348  ;;  %v3304_v58 = vsel %vm1428_vm2, %v3299_v52, 0  ;;  %v16093_v2 = vld [vmem:[#allocation61_spill] sm:$0xff] }
 0x590   :  { %v13528_v9 = vpop.eup %11331  ;;  %10361 = vmatpush3.bf16.msra.mxu1 %v16087_v35  ;;  %10379 = vmatpush3.bf16.msra.mxu0 %v16088_v12 }
 0x591   :  { %10362 = vmatprep.mubr.msk.bf16.mxu1 %vm11965_vm1, %v16082_v4  ;;  %10372 = vmatprep.subr.bf16.mxu1 %v16082_v4  ;;  %v2564_v16 = vmul.f32 %v13528_v9, %v13376_v46  ;;  %v2535_v46 = vmul.f32 %v13483_v7, %v13298_v14  ;;  %v2540_v5 = vmul.f32 %v13528_v9, %v13368_v11 }
 0x592   :  { %v11334_v38 = vpop.eup %11333  ;;  %10380 = vmatprep.mubr.msk.bf16.mxu0 %vm11965_vm1, %v16082_v4  ;;  %10390 = vmatprep.subr.bf16.mxu0 %v16082_v4 }
 0x593   :  { %v2565_v24 = vmul.f32 %v11334_v38, %v13380_v54  ;;  %v2528_v54 = vmul.f32 %v13467_v29, %v13272_v56  ;;  %v2546_v7 = vpack.c.bf16 %v2535_v46, %v2534_v25  ;;  %v2539_v56 = vmul.f32 %v11326_v42, %v13339_v3  ;;  %v3405_v29 = vpop.permute.xlu1 %3404  ;;  %v13593_v31 = vpop.permute.xlu0 %3401 }
 0x594   :  { %v2545_v3 = vpack.c.bf16 %v2533_v43, %v2532_v37  ;;  %v3410_v50 = vsel %vm1428_vm2, %v3405_v29, 0 }
 0x595   :  { %v2573_v59 = vpack.c.bf16 %v2565_v24, %v2564_v16  ;;  %v2543_v14 = vpack.c.bf16 %v2529_v40, %v2528_v54  ;;  %v2548_v17 = vpack.c.bf16 %v2539_v56, %v2538_v6  ;;  %v2541_v16 = vmul.f32 %v11334_v38, %v13372_v13 }
 0x596   :  { %v3357_v13 = vsel %vm1428_vm2, %v13545_v1, 0 }
 0x597   :  { %10363 = vmatmul.mubr.msk.bf16.vlgmr.msra.gmra.mrb[92].mxu1 %vm2189_vm3, %v2573_v59  ;;  %10381 = vmatmul.mubr.msk.bf16.vlgmr.msra.gmra.mrb[68].mxu0 %vm2189_vm3, %v2544_v60  ;;  %v3458_v42 = vpop.permute.xlu1 %3457  ;;  %v13601_v21 = vpop.permute.xlu0 %3454  ;;  %v2549_v59 = vpack.c.bf16 %v2541_v16, %v2540_v5 }
 0x598   :  { %10373 = vmatpush3.bf16.msra.mxu1 %v16089_v36  ;;  %10391 = vmatpush3.bf16.msra.mxu0 %v16090_v33  ;;  %v3463_v60 = vsel %vm1428_vm2, %v3458_v42, 0 }
 0x599   :  { %10374 = vmatprep.mubr.msk.bf16.mxu1 %vm11965_vm1, %v16082_v4  ;;  %10384 = vmatprep.subr.bf16.mxu1 %v16082_v4 }
 0x59a   :  { %10392 = vmatprep.mubr.msk.bf16.mxu0 %vm11965_vm1, %v16082_v4  ;;  %10402 = vmatprep.subr.bf16.mxu0 %v16082_v4 }
 0x59b   :  { %v3511_v39 = vpop.permute.xlu1 %3510  ;;  %v13617_v24 = vpop.permute.xlu0 %3507 }
 0x59c   :  { %v3516_v38 = vsel %vm1428_vm2, %v3511_v39, 0 }
 0x59f   :  { %10375 = vmatmul.mubr.msk.bf16.vlgmr.msra.gmra.mrb[80].mxu1 %vm2189_vm3, %v2543_v14  ;;  %10393 = vmatmul.mubr.msk.bf16.vlgmr.msra.gmra.mrb[72].mxu0 %vm2189_vm3, %v2546_v7  ;;  %v3564_v10 = vpop.permute.xlu1 %3563  ;;  %v13630_v9 = vpop.permute.xlu0 %3560 }
 0x5a0   :  { %10385 = vmatpush3.bf16.msra.mxu1 %v16091_v30  ;;  %10403 = vmatpush3.bf16.msra.mxu0 %v16092_v19  ;;  %v3569_v52 = vsel %vm1428_vm2, %v3564_v10, 0 }
 0x5a1   :  { %10386 = vmatprep.mubr.msk.bf16.mxu1 %vm11965_vm1, %v16082_v4  ;;  %10396 = vmatprep.subr.bf16.mxu1 %v16082_v4 }
 0x5a2   :  { %10404 = vmatprep.mubr.msk.bf16.mxu0 %vm11965_vm1, %v16082_v4  ;;  %10414 = vmatprep.subr.bf16.mxu0 %v16082_v4 }
 0x5a3   :  { %v3617_v11 = vpop.permute.xlu1 %3616  ;;  %v3614_v46 = vpop.permute.xlu0 %3613 }
 0x5a4   :  { %v3622_v40 = vsel %vm1428_vm2, %v3617_v11, 0 }
 0x5a7   :  { %10387 = vmatmul.mubr.msk.bf16.vlgmr.msra.gmra.mrb[84].mxu1 %vm2189_vm3, %v2545_v3  ;;  %10405 = vmatmul.mubr.msk.bf16.vlgmr.msra.gmra.mrb[76].mxu0 %vm2189_vm3, %v2548_v17  ;;  %v3670_v1 = vpop.permute.xlu1 %3669  ;;  %v13645_v25 = vpop.permute.xlu0 %3666 }
 0x5a8   :  { %10397 = vmatpush3.bf16.msra.mxu1 %v16093_v2  ;;  %10398 = vmatprep.mubr.msk.bf16.mxu1 %vm11965_vm1, %v16082_v4  ;;  %v3675_v43 = vsel %vm1428_vm2, %v3670_v1, 0 }
 0x5a9   :  { %10415 = vmatpush3.bf16.xpose.msra.mxu0 %v3304_v58  ;;  %10408 = vmatprep.subr.bf16.mxu1 %v16082_v4 }
 0x5aa   :  { %10416 = vmatprep.mubr.msk.bf16.mxu0 %vm11965_vm1, %v16082_v4  ;;  %10426 = vmatprep.subr.bf16.mxu0 %v16082_v4 }
 0x5ab   :  { %v3736_v54 = vpop.permute.xlu1 %3735  ;;  %v3830_v7 = vpop.permute.xlu0 %3829 }
 0x5ac   :  { %v3738_v14 = vsel %vm1428_vm2, %v3736_v54, 0  ;;  %v3832_v56 = vsel %vm1428_vm2, %v3830_v7, 0 }
 0x5af   :  { %10399 = vmatmul.mubr.msk.bf16.vlgmr.msra.gmra.mrb[88].mxu1 %vm2189_vm3, %v2547_v57  ;;  %v3924_v29 = vpop.permute.xlu0 %3923  ;;  %v3783_v37 = vpop.permute.xlu1 %3782 }
 0x5b0   :  { %10409 = vmatpush3.bf16.msra.mxu1 %v16094_v44  ;;  %10417 = vmatmul.mubr.msk.bf16.vlgmr.msra.gmra.mrb[80].mxu0 %vm1428_vm2, %v13565_v34  ;;  %v3926_v6 = vsel %vm1428_vm2, %v3924_v29, 0  ;;  %v3785_v3 = vsel %vm1428_vm2, %v3783_v37, 0 }
 0x5b1   :  { %10427 = vmatpush3.bf16.xpose.msra.mxu0 %v3410_v50  ;;  %10410 = vmatprep.mubr.msk.bf16.mxu1 %vm11965_vm1, %v16082_v4 }
 0x5b2   :  { %10428 = vmatprep.mubr.msk.bf16.mxu0 %vm11965_vm1, %v16082_v4  ;;  %10420 = vmatprep.subr.bf16.mxu1 %v16082_v4 }
 0x5b3   :  { %10438 = vmatprep.subr.bf16.mxu0 %v16082_v4  ;;  %v3877_v17 = vpop.permute.xlu1 %3876 }
 0x5b4   :  { %v3879_v58 = vsel %vm1428_vm2, %v3877_v17, 0 }
 0x5b7   :  { %10411 = vmatmul.mubr.msk.bf16.vlgmr.msra.gmra.mrb[92].mxu1 %vm2189_vm3, %v2549_v59  ;;  %v3971_v8 = vpop.permute.xlu1 %3970 }
 0x5b8   :  { %10429 = vmatmul.mubr.msk.bf16.vlgmr.msra.gmra.mrb[84].mxu0 %vm1428_vm2, %v13593_v31  ;;  %10422 = vmatprep.mubr.msk.bf16.mxu1 %vm11965_vm1, %v16082_v4  ;;  %v3973_v55 = vsel %vm1428_vm2, %v3971_v8, 0 }
 0x5b9   :  { %10421 = vmatpush3.bf16.xpose.msra.mxu1 %v3357_v13  ;;  %10439 = vmatpush3.bf16.xpose.msra.mxu0 %v3516_v38 }
 0x5ba   :  { %10440 = vmatprep.mubr.msk.bf16.mxu0 %vm11965_vm1, %v16082_v4  ;;  %10432 = vmatprep.subr.bf16.mxu1 %v16082_v4 }
 0x5bb   :  { %10450 = vmatprep.subr.bf16.mxu0 %v16082_v4 }
 0x5c0   :  { %10423 = vmatmul.mubr.msk.bf16.vlgmr.msra.gmra.mrb[96].mxu1 %vm1428_vm2, %v13584_v41  ;;  %10441 = vmatmul.mubr.msk.bf16.vlgmr.msra.gmra.mrb[88].mxu0 %vm1428_vm2, %v13617_v24 }
 0x5c1   :  { %10433 = vmatpush3.bf16.xpose.msra.mxu1 %v3463_v60  ;;  %10451 = vmatpush3.bf16.xpose.msra.mxu0 %v3622_v40 }
 0x5c2   :  { %10434 = vmatprep.mubr.msk.bf16.mxu1 %vm11965_vm1, %v16082_v4  ;;  %10452 = vmatprep.mubr.msk.bf16.mxu0 %vm11965_vm1, %v16082_v4 }
 0x5c3   :  { %10444 = vmatprep.subr.bf16.mxu1 %v16082_v4  ;;  %10462 = vmatprep.subr.bf16.mxu0 %v16082_v4 }
 0x5c8   :  { %10435 = vmatmul.mubr.msk.bf16.vlgmr.msra.gmra.mrb[100].mxu1 %vm1428_vm2, %v13601_v21  ;;  %10453 = vmatmul.mubr.msk.bf16.vlgmr.msra.gmra.mrb[92].mxu0 %vm1428_vm2, %v3614_v46 }
 0x5c9   :  { %10445 = vmatpush3.bf16.xpose.msra.mxu1 %v3569_v52  ;;  %10463 = vmatpush3.bf16.xpose.msra.mxu0 %v3738_v14 }
 0x5ca   :  { %10446 = vmatprep.mubr.msk.bf16.mxu1 %vm11965_vm1, %v16082_v4  ;;  %10464 = vmatprep.mubr.msk.bf16.mxu0 %vm11965_vm1, %v16082_v4 }
 0x5cb   :  { %10456 = vmatprep.subr.bf16.mxu1 %v16082_v4  ;;  %10474 = vmatprep.subr.bf16.mxu0 %v16082_v4 }
 0x5d0   :  { %10447 = vmatmul.mubr.msk.bf16.vlgmr.msra.gmra.mrb[104].mxu1 %vm1428_vm2, %v13630_v9  ;;  %10465 = vmatmul.mubr.msk.bf16.vlgmr.msra.gmra.mrb[96].mxu0 %vm1428_vm2, %v13565_v34  ;;  %v4018_v34 = vpop.permute.xlu0 %4017 }
 0x5d1   :  { %10457 = vmatpush3.bf16.xpose.msra.mxu1 %v3675_v43  ;;  %10475 = vmatpush3.bf16.xpose.msra.mxu0 %v3832_v56  ;;  %v4020_v42 = vsel %vm1428_vm2, %v4018_v34, 0 }
 0x5d2   :  { %10458 = vmatprep.mubr.msk.bf16.mxu1 %vm11965_vm1, %v16082_v4  ;;  %10476 = vmatprep.mubr.msk.bf16.mxu0 %vm11965_vm1, %v16082_v4 }
 0x5d3   :  { %10468 = vmatprep.subr.bf16.mxu1 %v16082_v4  ;;  %10486 = vmatprep.subr.bf16.mxu0 %v16082_v4 }
 0x5d8   :  { %10459 = vmatmul.mubr.msk.bf16.vlgmr.msra.gmra.mrb[108].mxu1 %vm1428_vm2, %v13645_v25  ;;  %10477 = vmatmul.mubr.msk.bf16.vlgmr.msra.gmra.mrb[100].mxu0 %vm1428_vm2, %v13593_v31  ;;  %v4512_v31 = vpop.permute.xlu0 %4511 }
 0x5d9   :  { %10469 = vmatpush3.bf16.xpose.msra.mxu1 %v3785_v3  ;;  %10487 = vmatpush3.bf16.xpose.msra.mxu0 %v3926_v6  ;;  %v13727_v6 = vld [vmem:[#allocation8 + $0x10] sm:$0xff] }
 0x5da   :  { %10470 = vmatprep.mubr.msk.bf16.mxu1 %vm11965_vm1, %v16082_v4  ;;  %10488 = vmatprep.mubr.msk.bf16.mxu0 %vm11965_vm1, %v16082_v4 }
 0x5db   :  { %10480 = vmatprep.subr.bf16.mxu1 %v16082_v4  ;;  %10498 = vmatprep.subr.bf16.mxu0 %v16082_v4 }
 0x5e0   :  { %10471 = vmatmul.mubr.msk.bf16.vlgmr.msra.gmra.mrb[112].mxu1 %vm1428_vm2, %v13584_v41  ;;  %10489 = vmatmul.mubr.msk.bf16.vlgmr.msra.gmra.mrb[104].mxu0 %vm1428_vm2, %v13617_v24  ;;  %v4065_v41 = vpop.permute.xlu1 %4064 }
 0x5e1   :  { %10481 = vmatpush3.bf16.xpose.msra.mxu1 %v3879_v58  ;;  %10499 = vmatpush3.bf16.xpose.msra.mxu0 %v4020_v42  ;;  %v4067_v39 = vsel %vm1428_vm2, %v4065_v41, 0  ;;  %v13730_v42 = vld [vmem:[#allocation8 + $0x18] sm:$0xff] }
 0x5e2   :  { %10482 = vmatprep.mubr.msk.bf16.mxu1 %vm11965_vm1, %v16082_v4  ;;  %10500 = vmatprep.mubr.msk.bf16.mxu0 %vm11965_vm1, %v16082_v4 }
 0x5e3   :  { %10492 = vmatprep.subr.bf16.mxu1 %v16082_v4  ;;  %10510 = vmatprep.subr.bf16.mxu0 %v16082_v4 }
 0x5e4   :  { %v4560_v57 = vpop.permute.xlu1 %4559 }
 0x5e8   :  { %10483 = vmatmul.mubr.msk.bf16.vlgmr.msra.gmra.mrb[116].mxu1 %vm1428_vm2, %v13601_v21  ;;  %10501 = vmatmul.mubr.msk.bf16.vlgmr.msra.gmra.mrb[108].mxu0 %vm1428_vm2, %v3614_v46 }
 0x5e9   :  { %10493 = vmatpush3.bf16.xpose.msra.mxu1 %v3973_v55  ;;  %10511 = vmatpush3.bf16.msra.mxu0 %v4512_v31 }
 0x5ea   :  { %10494 = vmatprep.mubr.msk.bf16.mxu1 %vm11965_vm1, %v16082_v4  ;;  %10504 = vmatprep.subr.bf16.mxu1 %v16082_v4 }
 0x5eb   :  { %10512 = vmatprep.mubr.msk.bf16.mxu0 %vm11965_vm1, %v16082_v4  ;;  %10522 = vmatprep.subr.bf16.mxu0 %v16082_v4 }
 0x5f0   :  { %10495 = vmatmul.mubr.msk.bf16.vlgmr.msra.gmra.mrb[120].mxu1 %vm1428_vm2, %v13630_v9 }
 0x5f1   :  { %10505 = vmatpush3.bf16.xpose.msra.mxu1 %v4067_v39  ;;  %10506 = vmatprep.mubr.msk.bf16.mxu1 %vm11965_vm1, %v16082_v4 }
 0x5f2   :  { %10516 = vmatprep.subr.bf16.mxu1 %v16082_v4 }
 0x5f8   :  { %10507 = vmatmul.mubr.msk.bf16.vlgmr.msra.gmra.mrb[124].mxu1 %vm1428_vm2, %v13645_v25 }
 0x5f9   :  { %10517 = vmatpush3.bf16.msra.mxu1 %v4560_v57  ;;  %10518 = vmatprep.mubr.msk.bf16.mxu1 %vm11965_vm1, %v16082_v4 }
 0x5fa   :  { %10528 = vmatprep.subr.bf16.mxu1 %v16082_v4 }
 0x662   :  { %v2963_v21 = vpop.f32.mrb[64].mxu0 }
 0x663   :  { %3278 = vst.msk [vmem:[#allocation2] sm:$0xff] %vm1428_vm2, %v2963_v21  ;;  %v10370_v50 = vpop.f32.mrb[65].mxu0 }
 0x664   :  { %v2966_v16 = vpop.f32.mrb[66].mxu0 }
 0x665   :  { %3279 = vst.msk [vmem:[#allocation2 + $0x8] sm:$0xff] %vm1428_vm2, %v2966_v16  ;;  %v10371_v5 = vpop.f32.mrb[67].mxu0  ;;  %v13743_v16 = vld [vmem:[#allocation8 + $0x90] sm:$0xff] }
 0x66a   :  { %v3051_v10 = vpop.f32.mrb[68].mxu0 }
 0x66b   :  { %3282 = vst.msk [vmem:[#allocation2 + $0x20] sm:$0xff] %vm1428_vm2, %v3051_v10  ;;  %v10382_v24 = vpop.f32.mrb[69].mxu0 }
 0x66c   :  { %v3054_v59 = vpop.f32.mrb[70].mxu0 }
 0x66d   :  { %3283 = vst.msk [vmem:[#allocation2 + $0x28] sm:$0xff] %vm1428_vm2, %v3054_v59  ;;  %v10383_v13 = vpop.f32.mrb[71].mxu0  ;;  %v13746_v59 = vld [vmem:[#allocation8 + $0x98] sm:$0xff] }
 0x672   :  { %v3007_v38 = vpop.f32.mrb[80].mxu1  ;;  %v3139_v11 = vpop.f32.mrb[72].mxu0 }
 0x673   :  { %3280 = vst.msk [vmem:[#allocation2 + $0x10] sm:$0xff] %vm1428_vm2, %v3007_v38  ;;  %3286 = vst.msk [vmem:[#allocation2 + $0x40] sm:$0xff] %vm1428_vm2, %v3139_v11  ;;  %v10376_v9 = vpop.f32.mrb[81].mxu1  ;;  %v10394_v1 = vpop.f32.mrb[73].mxu0 }
 0x674   :  { %v3010_v60 = vpop.f32.mrb[82].mxu1  ;;  %v3142_v40 = vpop.f32.mrb[74].mxu0 }
 0x675   :  { %3281 = vst.msk [vmem:[#allocation2 + $0x18] sm:$0xff] %vm1428_vm2, %v3010_v60  ;;  %3287 = vst.msk [vmem:[#allocation2 + $0x48] sm:$0xff] %vm1428_vm2, %v3142_v40  ;;  %v10377_v46 = vpop.f32.mrb[83].mxu1  ;;  %v10395_v54 = vpop.f32.mrb[75].mxu0 }
 0x67a   :  { %v3095_v25 = vpop.f32.mrb[84].mxu1  ;;  %v3227_v52 = vpop.f32.mrb[76].mxu0 }
 0x67b   :  { %3284 = vst.msk [vmem:[#allocation2 + $0x30] sm:$0xff] %vm1428_vm2, %v3095_v25  ;;  %3290 = vst.msk [vmem:[#allocation2 + $0x60] sm:$0xff] %vm1428_vm2, %v3227_v52  ;;  %v10388_v14 = vpop.f32.mrb[85].mxu1  ;;  %v10406_v7 = vpop.f32.mrb[77].mxu0  ;;  %v13759_v25 = vld [vmem:[#allocation8 + $0x50] sm:$0xff] }
 0x67c   :  { %v3098_v43 = vpop.f32.mrb[86].mxu1  ;;  %v3230_v56 = vpop.f32.mrb[78].mxu0  ;;  %v13761_v7 = vld [vmem:[#allocation8 + $0x58] sm:$0xff] }
 0x67d   :  { %3285 = vst.msk [vmem:[#allocation2 + $0x38] sm:$0xff] %vm1428_vm2, %v3098_v43  ;;  %3291 = vst.msk [vmem:[#allocation2 + $0x68] sm:$0xff] %vm1428_vm2, %v3230_v56  ;;  %v10389_v29 = vpop.f32.mrb[87].mxu1  ;;  %v10407_v37 = vpop.f32.mrb[79].mxu0 }
 0x682   :  { %v3183_v3 = vpop.f32.mrb[88].mxu1 }
 0x683   :  { %3288 = vst.msk [vmem:[#allocation2 + $0x50] sm:$0xff] %vm1428_vm2, %v3183_v3  ;;  %v3340_v34 = vpop.f32.mrb[80].mxu0  ;;  %v10400_v17 = vpop.f32.mrb[89].mxu1 }
 0x684   :  { %v13733_v58 = vadd.f32 %v3340_v34, %v13727_v6  ;;  %v10418_v8 = vpop.f32.mrb[81].mxu0  ;;  %v3186_v31 = vpop.f32.mrb[90].mxu1 }
 0x685   :  { %3289 = vst.msk [vmem:[#allocation2 + $0x58] sm:$0xff] %vm1428_vm2, %v3186_v31  ;;  %v3343_v55 = vpop.f32.mrb[82].mxu0  ;;  %v10401_v41 = vpop.f32.mrb[91].mxu1 }
 0x686   :  { %v13737_v39 = vadd.f32 %v3343_v55, %v13730_v42  ;;  %v10419_v57 = vpop.f32.mrb[83].mxu0  ;;  %v4126_v21 = vsel %vm2189_vm3, %v13733_v58, -inf }
 0x687   :  { %4127 = vmax.xlane.f32.xlu0 %v4126_v21  ;;  %v13779_v21 = vld [vmem:[#allocation8 + $0xd0] sm:$0xff] }
 0x688   :  { %v4129_v50 = vsel %vm2189_vm3, %v13737_v39, -inf }
 0x689   :  { %4130 = vmax.xlane.f32.xlu1 %v4129_v50 }
 0x68a   :  { %v3271_v5 = vpop.f32.mrb[92].mxu1 }
 0x68b   :  { %3292 = vst.msk [vmem:[#allocation2 + $0x70] sm:$0xff] %vm1428_vm2, %v3271_v5  ;;  %v3446_v10 = vpop.f32.mrb[84].mxu0  ;;  %v10412_v24 = vpop.f32.mrb[93].mxu1 }
 0x68c   :  { %v13749_v13 = vadd.f32 %v3446_v10, %v13743_v16  ;;  %v10430_v38 = vpop.f32.mrb[85].mxu0  ;;  %v3274_v11 = vpop.f32.mrb[94].mxu1  ;;  %v13783_v24 = vld [vmem:[#allocation8 + $0xd8] sm:$0xff] }
 0x68d   :  { %3293 = vst.msk [vmem:[#allocation2 + $0x78] sm:$0xff] %vm1428_vm2, %v3274_v11  ;;  %v3449_v9 = vpop.f32.mrb[86].mxu0  ;;  %v10413_v1 = vpop.f32.mrb[95].mxu1 }
 0x68e   :  { %v13753_v60 = vadd.f32 %v3449_v9, %v13746_v59  ;;  %v10431_v40 = vpop.f32.mrb[87].mxu0  ;;  %v4138_v46 = vsel %vm2189_vm3, %v13749_v13, -inf }
 0x68f   :  { %4139 = vmax.xlane.f32.xlu0 %v4138_v46 }
 0x690   :  { %v4141_v54 = vsel %vm2189_vm3, %v13753_v60, -inf }
 0x691   :  { %4142 = vmax.xlane.f32.xlu1 %v4141_v54 }
 0x693   :  { %v3393_v52 = vpop.f32.mrb[96].mxu1  ;;  %v3552_v14 = vpop.f32.mrb[88].mxu0 }
 0x694   :  { %v13764_v43 = vadd.f32 %v3393_v52, %v13759_v25  ;;  %v10424_v56 = vpop.f32.mrb[97].mxu1  ;;  %v10442_v29 = vpop.f32.mrb[89].mxu0  ;;  %v13767_v34 = vadd.f32 %v3552_v14, %v13727_v6 }
 0x695   :  { %v3396_v37 = vpop.f32.mrb[98].mxu1  ;;  %v3555_v3 = vpop.f32.mrb[90].mxu0 }
 0x696   :  { %v13770_v17 = vadd.f32 %v3396_v37, %v13761_v7  ;;  %v10425_v8 = vpop.f32.mrb[99].mxu1  ;;  %v10443_v31 = vpop.f32.mrb[91].mxu0  ;;  %v4132_v55 = vsel %vm2189_vm3, %v13764_v43, -inf  ;;  %v13775_v41 = vadd.f32 %v3555_v3, %v13730_v42  ;;  %v4150_v50 = vsel %vm2189_vm3, %v13767_v34, -inf }
 0x697   :  { %4133 = vmax.xlane.f32.xlu0 %v4132_v55 }
 0x698   :  { %v4135_v57 = vsel %vm2189_vm3, %v13770_v17, -inf  ;;  %v4153_v1 = vsel %vm2189_vm3, %v13775_v41, -inf }
 0x699   :  { %4136 = vmax.xlane.f32.xlu1 %v4135_v57 }
 0x69b   :  { %v3658_v5 = vpop.f32.mrb[92].mxu0  ;;  %4151 = vmax.xlane.f32.xlu0 %v4150_v50  ;;  %v3499_v10 = vpop.f32.mrb[100].mxu1 }
 0x69c   :  { %v13786_v38 = vadd.f32 %v3499_v10, %v13779_v21  ;;  %v10436_v11 = vpop.f32.mrb[101].mxu1  ;;  %v10454_v9 = vpop.f32.mrb[93].mxu0  ;;  %v13791_v54 = vadd.f32 %v3658_v5, %v13743_v16 }
 0x69d   :  { %v3661_v40 = vpop.f32.mrb[94].mxu0  ;;  %4154 = vmax.xlane.f32.xlu1 %v4153_v1  ;;  %v3502_v46 = vpop.f32.mrb[102].mxu1 }
 0x69e   :  { %v13794_v52 = vadd.f32 %v3502_v46, %v13783_v24  ;;  %v10437_v14 = vpop.f32.mrb[103].mxu1  ;;  %v10455_v56 = vpop.f32.mrb[95].mxu0  ;;  %v4144_v29 = vsel %vm2189_vm3, %v13786_v38, -inf  ;;  %v13799_v37 = vadd.f32 %v3661_v40, %v13746_v59  ;;  %v4162_v8 = vsel %vm2189_vm3, %v13791_v54, -inf }
 0x69f   :  { %4145 = vmax.xlane.f32.xlu0 %v4144_v29 }
 0x6a0   :  { %v4147_v3 = vsel %vm2189_vm3, %v13794_v52, -inf  ;;  %v4165_v10 = vsel %vm2189_vm3, %v13799_v37, -inf }
 0x6a1   :  { %4148 = vmax.xlane.f32.xlu1 %v4147_v3 }
 0x6a3   :  { %v3774_v31 = vpop.f32.mrb[96].mxu0  ;;  %4163 = vmax.xlane.f32.xlu0 %v4162_v8  ;;  %v3605_v55 = vpop.f32.mrb[104].mxu1 }
 0x6a4   :  { %v13806_v57 = vadd.f32 %v3774_v31, %v13727_v6  ;;  %v10448_v50 = vpop.f32.mrb[105].mxu1  ;;  %v10466_v5 = vpop.f32.mrb[97].mxu0  ;;  %v13811_v1 = vadd.f32 %v3605_v55, %v13759_v25 }
 0x6a5   :  { %v3777_v11 = vpop.f32.mrb[98].mxu0  ;;  %4166 = vmax.xlane.f32.xlu1 %v4165_v10  ;;  %v3608_v9 = vpop.f32.mrb[106].mxu1 }
 0x6a6   :  { %v13814_v40 = vadd.f32 %v3608_v9, %v13761_v7  ;;  %v10449_v46 = vpop.f32.mrb[107].mxu1  ;;  %v10467_v14 = vpop.f32.mrb[99].mxu0  ;;  %v4174_v56 = vsel %vm2189_vm3, %v13806_v57, -inf  ;;  %v13821_v3 = vadd.f32 %v3777_v11, %v13730_v42  ;;  %v4156_v8 = vsel %vm2189_vm3, %v13811_v1, -inf }
 0x6a7   :  { %4175 = vmax.xlane.f32.xlu0 %v4174_v56 }
 0x6a8   :  { %v4159_v29 = vsel %vm2189_vm3, %v13814_v40, -inf  ;;  %v4177_v11 = vsel %vm2189_vm3, %v13821_v3, -inf }
 0x6a9   :  { %4160 = vmax.xlane.f32.xlu1 %v4159_v29 }
 0x6ab   :  { %v3868_v31 = vpop.f32.mrb[100].mxu0  ;;  %4157 = vmax.xlane.f32.xlu0 %v4156_v8  ;;  %v3711_v55 = vpop.f32.mrb[108].mxu1 }
 0x6ac   :  { %v10460_v50 = vpop.f32.mrb[109].mxu1  ;;  %v10478_v5 = vpop.f32.mrb[101].mxu0  ;;  %v13826_v46 = vadd.f32 %v3868_v31, %v13743_v16 }
 0x6ad   :  { %v3714_v10 = vpop.f32.mrb[110].mxu1  ;;  %v3871_v9 = vpop.f32.mrb[102].mxu0  ;;  %v13839_v50 = vadd.f32 %v3711_v55, %v13779_v21 }
 0x6ae   :  { %v13829_v14 = vadd.f32 %v3871_v9, %v13746_v59  ;;  %v10461_v56 = vpop.f32.mrb[111].mxu1  ;;  %v10479_v29 = vpop.f32.mrb[103].mxu0  ;;  %v13834_v45 = vadd.f32 %v3714_v10, %v13783_v24  ;;  %v4186_v31 = vsel %vm2189_vm3, %v13826_v46, -inf }
 0x6af   :  { %4178 = vmax.xlane.f32.xlu0 %v4177_v11 }
 0x6b0   :  { %v4189_v8 = vsel %vm2189_vm3, %v13829_v14, -inf  ;;  %v4171_v11 = vsel %vm2189_vm3, %v13834_v45, -inf }
 0x6b1   :  { %4190 = vmax.xlane.f32.xlu1 %v4189_v8 }
 0x6b3   :  { %v3962_v5 = vpop.f32.mrb[104].mxu0  ;;  %4187 = vmax.xlane.f32.xlu0 %v4186_v31  ;;  %v3821_v9 = vpop.f32.mrb[112].mxu1  ;;  %v4168_v31 = vsel %vm2189_vm3, %v13839_v50, -inf }
 0x6b4   :  { %v10472_v56 = vpop.f32.mrb[113].mxu1  ;;  %v10490_v29 = vpop.f32.mrb[105].mxu0  ;;  %v13846_v48 = vadd.f32 %v3821_v9, %v13759_v25 }
 0x6b5   :  { %v3965_v10 = vpop.f32.mrb[106].mxu0  ;;  %4172 = vmax.xlane.f32.xlu1 %v4171_v11  ;;  %v3824_v4 = vpop.f32.mrb[114].mxu1  ;;  %v13859_v11 = vadd.f32 %v3962_v5, %v13727_v6 }
 0x6b6   :  { %v13849_v55 = vadd.f32 %v3824_v4, %v13761_v7  ;;  %v10473_v8 = vpop.f32.mrb[115].mxu1  ;;  %v10491_v27 = vpop.f32.mrb[107].mxu0  ;;  %v13854_v56 = vadd.f32 %v3965_v10, %v13730_v42  ;;  %v4180_v4 = vsel %vm2189_vm3, %v13846_v48, -inf }
 0x6b7   :  { %4169 = vmax.xlane.f32.xlu0 %v4168_v31 }
 0x6b8   :  { %v4183_v29 = vsel %vm2189_vm3, %v13849_v55, -inf  ;;  %v4201_v31 = vsel %vm2189_vm3, %v13854_v56, -inf }
 0x6b9   :  { %4184 = vmax.xlane.f32.xlu1 %v4183_v29 }
 0x6bb   :  { %v4056_v9 = vpop.f32.mrb[108].mxu0  ;;  %4181 = vmax.xlane.f32.xlu0 %v4180_v4  ;;  %v3915_v27 = vpop.f32.mrb[116].mxu1  ;;  %v4198_v4 = vsel %vm2189_vm3, %v13859_v11, -inf }
 0x6bc   :  { %v10484_v8 = vpop.f32.mrb[117].mxu1  ;;  %v10502_v23 = vpop.f32.mrb[109].mxu0  ;;  %v13866_v0 = vadd.f32 %v3915_v27, %v13779_v21 }
 0x6bd   :  { %v4059_v42 = vpop.f32.mrb[110].mxu0  ;;  %4202 = vmax.xlane.f32.xlu1 %v4201_v31  ;;  %v3918_v10 = vpop.f32.mrb[118].mxu1  ;;  %v13879_v31 = vadd.f32 %v4056_v9, %v13743_v16 }
 0x6be   :  { %v13869_v6 = vadd.f32 %v3918_v10, %v13783_v24  ;;  %v10485_v5 = vpop.f32.mrb[119].mxu1  ;;  %v10503_v29 = vpop.f32.mrb[111].mxu0  ;;  %v13874_v23 = vadd.f32 %v4059_v42, %v13746_v59  ;;  %v4192_v27 = vsel %vm2189_vm3, %v13866_v0, -inf }
 0x6bf   :  { %4199 = vmax.xlane.f32.xlu0 %v4198_v4  ;;  %v4210_v16 = vsel %vm2189_vm3, %v13879_v31, -inf }
 0x6c0   :  { %v4195_v8 = vsel %vm2189_vm3, %v13869_v6, -inf  ;;  %v4213_v29 = vsel %vm2189_vm3, %v13874_v23, -inf }
 0x6c1   :  { %4196 = vmax.xlane.f32.xlu1 %v4195_v8 }
 0x6c3   :  { %4193 = vmax.xlane.f32.xlu0 %v4192_v27  ;;  %v4009_v10 = vpop.f32.mrb[120].mxu1 }
 0x6c4   :  { %v10496_v5 = vpop.f32.mrb[121].mxu1  ;;  %v13886_v59 = vadd.f32 %v4009_v10, %v13759_v25 }
 0x6c5   :  { %4214 = vmax.xlane.f32.xlu1 %v4213_v29  ;;  %v4012_v4 = vpop.f32.mrb[122].mxu1 }
 0x6c6   :  { %v13889_v42 = vadd.f32 %v4012_v4, %v13761_v7  ;;  %v10497_v8 = vpop.f32.mrb[123].mxu1  ;;  %v4204_v27 = vsel %vm2189_vm3, %v13886_v59, -inf }
 0x6c7   :  { %4211 = vmax.xlane.f32.xlu0 %v4210_v16  ;;  %v13911_v16 = vpop.permute.xlu1 %4607 }
 0x6c8   :  { %v4207_v9 = vsel %vm2189_vm3, %v13889_v42, -inf  ;;  %16095 = vst [vmem:[#allocation72_spill] sm:$0xff] %v13911_v16 }
 0x6c9   :  { %4208 = vmax.xlane.f32.xlu1 %v4207_v9 }
 0x6cb   :  { %4205 = vmax.xlane.f32.xlu0 %v4204_v27  ;;  %v4103_v5 = vpop.f32.mrb[124].mxu1  ;;  %v13913_v9 = vpop.permute.xlu1 %4655 }
 0x6cc   :  { %v13898_v25 = vadd.f32 %v4103_v5, %v13779_v21  ;;  %v10508_v10 = vpop.f32.mrb[125].mxu1  ;;  %16096 = vst [vmem:[#allocation56_spill] sm:$0xff] %v13913_v9 }
 0x6cd   :  { %v4106_v7 = vpop.f32.mrb[126].mxu1 }
 0x6ce   :  { %v13901_v29 = vadd.f32 %v4106_v7, %v13783_v24  ;;  %v10509_v4 = vpop.f32.mrb[127].mxu1  ;;  %v4216_v8 = vsel %vm2189_vm3, %v13898_v25, -inf }
 0x6cf   :  { %4217 = vmax.xlane.f32.xlu0 %v4216_v8 }
 0x6d0   :  { %v4219_v21 = vsel %vm2189_vm3, %v13901_v29, -inf }
 0x6da   :  { %4751 = vrot.lane.b32.xlu1 %v16085_v26, %s11966_s12 }
 0x6e5   :  { %4703 = vrot.lane.b32.xlu0 %v16083_v32, %s11966_s12 }
 0x6fe   :  { %4220 = vmax.xlane.f32.xlu1 %v4219_v21 }
 0x714   :  { %v4128_v24 = vpop.xlane.xlu0 %4127 }
 0x716   :  { %v4131_v27 = vpop.xlane.xlu1 %4130 }
 0x71c   :  { %v4140_v5 = vpop.xlane.xlu0 %4139 }
 0x71e   :  { %v4143_v10 = vpop.xlane.xlu1 %4142 }
 0x724   :  { %v4134_v7 = vpop.xlane.xlu0 %4133 }
 0x726   :  { %v4137_v4 = vpop.xlane.xlu1 %4136 }
 0x728   :  { %v4152_v8 = vpop.xlane.xlu0 %4151 }
 0x72a   :  { %v4155_v44 = vpop.xlane.xlu1 %4154 }
 0x72c   :  { %v13915_v26 = vpop.xlane.xlu0 %4145 }
 0x72e   :  { %v13917_v22 = vpop.xlane.xlu1 %4148 }
 0x730   :  { %v13919_v32 = vpop.xlane.xlu0 %4163 }
 0x732   :  { %v13921_v2 = vpop.xlane.xlu1 %4166 }
 0x734   :  { %v4176_v21 = vpop.xlane.xlu0 %4175 }
 0x735   :  { %v4222_v16 = vmax.f32 %v4128_v24, %v4176_v21 }
 0x736   :  { %v13927_v61 = vpop.xlane.xlu1 %4160 }
 0x737   :  { %v4238_v9 = vsub.f32 %v13733_v58, %v4222_v16  ;;  %v4286_v51 = vsub.f32 %v13806_v57, %v4222_v16 }
 0x738   :  { %v13925_v30 = vpop.xlane.xlu0 %4157 }
 0x739   :  { %v4254_v20 = vmul.f32 1.442695, %v4238_v9  ;;  %v4302_v36 = vmul.f32 1.442695, %v4286_v51 }
 0x73b   :  { %11335 = vpow2.f32 %v4254_v20 }
 0x73c   :  { %v4179_v15 = vpop.xlane.xlu0 %4178  ;;  %11337 = vpow2.f32 %v4302_v36 }
 0x73d   :  { %v4223_v53 = vmax.f32 %v4131_v27, %v4179_v15 }
 0x73e   :  { %v4191_v47 = vpop.xlane.xlu1 %4190 }
 0x73f   :  { %v4239_v28 = vsub.f32 %v13737_v39, %v4223_v53  ;;  %v4287_v49 = vsub.f32 %v13821_v3, %v4223_v53  ;;  %v4227_v24 = vmax.f32 %v4143_v10, %v4191_v47 }
 0x740   :  { %v4188_v21 = vpop.xlane.xlu0 %4187 }
 0x741   :  { %v4256_v58 = vmul.f32 1.442695, %v4239_v28  ;;  %v4304_v18 = vmul.f32 1.442695, %v4287_v49  ;;  %v4243_v57 = vsub.f32 %v13753_v60, %v4227_v24  ;;  %v4226_v16 = vmax.f32 %v4140_v5, %v4188_v21 }
 0x742   :  { %v13932_v9 = vpop.xlane.xlu1 %4172  ;;  %v4291_v20 = vsub.f32 %v13829_v14, %v4227_v24 }
 0x743   :  { %11339 = vpow2.f32 %v4256_v58  ;;  %v4242_v51 = vsub.f32 %v13749_v13, %v4226_v16  ;;  %v4290_v15 = vsub.f32 %v13826_v46, %v4226_v16  ;;  %v4264_v47 = vmul.f32 1.442695, %v4243_v57 }
 0x744   :  { %v13937_v36 = vpop.xlane.xlu0 %4169  ;;  %11341 = vpow2.f32 %v4304_v18  ;;  %v4312_v14 = vmul.f32 1.442695, %v4291_v20 }
 0x745   :  { %v13939_v39 = vpop.eup %11335  ;;  %v4262_v28 = vmul.f32 1.442695, %v4242_v51  ;;  %v4310_v3 = vmul.f32 1.442695, %v4290_v15 }
 0x746   :  { %v4185_v49 = vpop.xlane.xlu1 %4184  ;;  %v4334_v53 = vsel %vm2189_vm3, %v13939_v39, 0.0  ;;  %v13943_v60 = vpop.eup %11337 }
 0x747   :  { %v4225_v27 = vmax.f32 %v4137_v4, %v4185_v49  ;;  %4335 = vadd.xlane.f32.xlu0 %v4334_v53  ;;  %11343 = vpow2.f32 %v4262_v28  ;;  %v4382_v18 = vsel %vm2189_vm3, %v13943_v60, 0.0 }
 0x748   :  { %v4182_v13 = vpop.xlane.xlu0 %4181  ;;  %11345 = vpow2.f32 %v4264_v47 }
 0x749   :  { %v4241_v46 = vsub.f32 %v13770_v17, %v4225_v27  ;;  %v4224_v5 = vmax.f32 %v4134_v7, %v4182_v13  ;;  %11347 = vpow2.f32 %v4310_v3  ;;  %v4289_v4 = vsub.f32 %v13849_v55, %v4225_v27 }
 0x74a   :  { %v4203_v10 = vpop.xlane.xlu1 %4202  ;;  %11349 = vpow2.f32 %v4312_v14 }
 0x74b   :  { %v4240_v24 = vsub.f32 %v13764_v43, %v4224_v5  ;;  %v4288_v21 = vsub.f32 %v13846_v48, %v4224_v5  ;;  %4383 = vadd.xlane.f32.xlu0 %v4382_v18  ;;  %v4260_v16 = vmul.f32 1.442695, %v4241_v46  ;;  %v4231_v17 = vmax.f32 %v4155_v44, %v4203_v10 }
 0x74c   :  { %v4200_v58 = vpop.xlane.xlu0 %4199  ;;  %v4308_v55 = vmul.f32 1.442695, %v4289_v4 }
 0x74d   :  { %v13951_v57 = vpop.eup %11339  ;;  %v4258_v20 = vmul.f32 1.442695, %v4240_v24  ;;  %v4230_v7 = vmax.f32 %v4152_v8, %v4200_v58  ;;  %v4306_v43 = vmul.f32 1.442695, %v4288_v21  ;;  %v4247_v28 = vsub.f32 %v13775_v41, %v4231_v17 }
 0x74e   :  { %v4337_v51 = vsel %vm2189_vm3, %v13951_v57, 0.0  ;;  %v13955_v15 = vpop.eup %11341  ;;  %v4197_v53 = vpop.xlane.xlu1 %4196  ;;  %v4295_v46 = vsub.f32 %v13854_v56, %v4231_v17 }
 0x74f   :  { %11351 = vpow2.f32 %v4258_v20  ;;  %v4246_v48 = vsub.f32 %v13767_v34, %v4230_v7  ;;  %4338 = vadd.xlane.f32.xlu1 %v4337_v51  ;;  %v4385_v44 = vsel %vm2189_vm3, %v13955_v15, 0.0  ;;  %v4294_v27 = vsub.f32 %v13859_v11, %v4230_v7 }
 0x750   :  { %v4194_v47 = vpop.xlane.xlu0 %4193  ;;  %11353 = vpow2.f32 %v4260_v16  ;;  %v4272_v41 = vmul.f32 1.442695, %v4247_v28  ;;  %v4229_v5 = vmax.f32 %v13917_v22, %v4197_v53  ;;  %v4320_v56 = vmul.f32 1.442695, %v4295_v46 }
 0x751   :  { %v13959_v49 = vpop.eup %11343  ;;  %11355 = vpow2.f32 %v4306_v43  ;;  %v4270_v3 = vmul.f32 1.442695, %v4246_v48  ;;  %v4228_v34 = vmax.f32 %v13915_v26, %v4194_v47  ;;  %v4318_v26 = vmul.f32 1.442695, %v4294_v27 }
 0x752   :  { %v13963_v8 = vpop.eup %11345  ;;  %v4346_v14 = vsel %vm2189_vm3, %v13959_v49, 0.0  ;;  %11357 = vpow2.f32 %v4308_v55  ;;  %v4245_v22 = vsub.f32 %v13794_v52, %v4229_v5  ;;  %v4215_v16 = vpop.xlane.xlu1 %4214 }
 0x753   :  { %4386 = vadd.xlane.f32.xlu1 %v4385_v44  ;;  %v13969_v13 = vpop.eup %11347  ;;  %4347 = vadd.xlane.f32.xlu0 %v4346_v14  ;;  %v4349_v11 = vsel %vm2189_vm3, %v13963_v8, 0.0  ;;  %11359 = vpow2.f32 %v4270_v3  ;;  %v4244_v18 = vsub.f32 %v13786_v38, %v4228_v34  ;;  %v4292_v58 = vsub.f32 %v13866_v0, %v4228_v34 }
 0x754   :  { %v13973_v10 = vpop.eup %11349  ;;  %v4212_v24 = vpop.xlane.xlu0 %4211  ;;  %v4394_v21 = vsel %vm2189_vm3, %v13969_v13, 0.0  ;;  %11361 = vpow2.f32 %v4272_v41  ;;  %v4268_v52 = vmul.f32 1.442695, %v4245_v22  ;;  %v4293_v0 = vsub.f32 %v13869_v6, %v4229_v5 }
 0x755   :  { %v4397_v20 = vsel %vm2189_vm3, %v13973_v10, 0.0  ;;  %11363 = vpow2.f32 %v4318_v26  ;;  %v4266_v38 = vmul.f32 1.442695, %v4244_v18  ;;  %v4234_v7 = vmax.f32 %v13919_v32, %v4212_v24 }
 0x756   :  { %11365 = vpow2.f32 %v4320_v56  ;;  %v4235_v48 = vmax.f32 %v13921_v2, %v4215_v16  ;;  %v4314_v32 = vmul.f32 1.442695, %v4292_v58  ;;  %v4316_v6 = vmul.f32 1.442695, %v4293_v0  ;;  %v4209_v27 = vpop.xlane.xlu1 %4208 }
 0x757   :  { %4350 = vadd.xlane.f32.xlu1 %v4349_v11  ;;  %4395 = vadd.xlane.f32.xlu0 %v4394_v21  ;;  %11367 = vpow2.f32 %v4266_v38  ;;  %v4250_v28 = vsub.f32 %v13791_v54, %v4234_v7  ;;  %v4298_v41 = vsub.f32 %v13879_v31, %v4234_v7  ;;  %v4233_v18 = vmax.f32 %v13927_v61, %v4209_v27 }
 0x758   :  { %v4206_v53 = vpop.xlane.xlu0 %4205  ;;  %11369 = vpow2.f32 %v4268_v52  ;;  %v4251_v2 = vsub.f32 %v13799_v37, %v4235_v48  ;;  %v4299_v26 = vsub.f32 %v13874_v23, %v4235_v48 }
 0x759   :  { %v13980_v4 = vpop.eup %11351  ;;  %11371 = vpow2.f32 %v4314_v32  ;;  %v4278_v54 = vmul.f32 1.442695, %v4250_v28  ;;  %v4232_v46 = vmax.f32 %v13925_v30, %v4206_v53  ;;  %v4326_v30 = vmul.f32 1.442695, %v4298_v41 }
 0x75a   :  { %v13986_v17 = vpop.eup %11353  ;;  %v4340_v51 = vsel %vm2189_vm3, %v13980_v4, 0.0  ;;  %11373 = vpow2.f32 %v4316_v6  ;;  %v4280_v37 = vmul.f32 1.442695, %v4251_v2  ;;  %v4328_v23 = vmul.f32 1.442695, %v4299_v26 }
 0x75b   :  { %4398 = vadd.xlane.f32.xlu1 %v4397_v20  ;;  %v13991_v43 = vpop.eup %11355  ;;  %4341 = vadd.xlane.f32.xlu0 %v4340_v51  ;;  %v4343_v47 = vsel %vm2189_vm3, %v13986_v17, 0.0  ;;  %11375 = vpow2.f32 %v4278_v54  ;;  %v4248_v31 = vsub.f32 %v13811_v1, %v4232_v46  ;;  %v4249_v61 = vsub.f32 %v13814_v40, %v4233_v18 }
 0x75c   :  { %v13997_v55 = vpop.eup %11357  ;;  %v4388_v44 = vsel %vm2189_vm3, %v13991_v43, 0.0  ;;  %v4218_v56 = vpop.xlane.xlu0 %4217  ;;  %11377 = vpow2.f32 %v4280_v37  ;;  %v4296_v1 = vsub.f32 %v13886_v59, %v4232_v46  ;;  %v4297_v0 = vsub.f32 %v13889_v42, %v4233_v18 }
 0x75d   :  { %v14002_v3 = vpop.eup %11359  ;;  %v4391_v34 = vsel %vm2189_vm3, %v13997_v55, 0.0  ;;  %11379 = vpow2.f32 %v4326_v30  ;;  %v4274_v38 = vmul.f32 1.442695, %v4248_v31  ;;  %v4236_v7 = vmax.f32 %v13937_v36, %v4218_v56 }
 0x75e   :  { %v14007_v14 = vpop.eup %11361  ;;  %v4358_v5 = vsel %vm2189_vm3, %v14002_v3, 0.0  ;;  %11381 = vpow2.f32 %v4328_v23  ;;  %v4276_v40 = vmul.f32 1.442695, %v4249_v61  ;;  %v4322_v59 = vmul.f32 1.442695, %v4296_v1 }
 0x75f   :  { %4344 = vadd.xlane.f32.xlu1 %v4343_v47  ;;  %4389 = vadd.xlane.f32.xlu0 %v4388_v44  ;;  %v14013_v11 = vpop.eup %11363  ;;  %v4361_v24 = vsel %vm2189_vm3, %v14007_v14, 0.0  ;;  %11383 = vpow2.f32 %v4274_v38  ;;  %v4252_v36 = vsub.f32 %v13839_v50, %v4236_v7  ;;  %v4324_v53 = vmul.f32 1.442695, %v4297_v0  ;;  %v14090_v38 = vpop.permute.xlu1 %4751 }
 0x760   :  { %v14019_v21 = vpop.eup %11365  ;;  %v4406_v22 = vsel %vm2189_vm3, %v14013_v11, 0.0  ;;  %11385 = vpow2.f32 %v4276_v40  ;;  %v4300_v2 = vsub.f32 %v13898_v25, %v4236_v7 }
 0x761   :  { %v14024_v58 = vpop.eup %11367  ;;  %v4409_v16 = vsel %vm2189_vm3, %v14019_v21, 0.0  ;;  %11387 = vpow2.f32 %v4322_v59  ;;  %v4282_v6 = vmul.f32 1.442695, %v4252_v36 }
 0x762   :  { %v14029_v20 = vpop.eup %11369  ;;  %v4352_v51 = vsel %vm2189_vm3, %v14024_v58, 0.0  ;;  %11389 = vpow2.f32 %v4324_v53  ;;  %v4330_v41 = vmul.f32 1.442695, %v4300_v2  ;;  %v16102_v2 = vld [vmem:[#allocation34_spill] sm:$0xff] }
 0x763   :  { %4392 = vadd.xlane.f32.xlu1 %v4391_v34  ;;  %4359 = vadd.xlane.f32.xlu0 %v4358_v5  ;;  %v14035_v52 = vpop.eup %11371  ;;  %v4355_v48 = vsel %vm2189_vm3, %v14029_v20, 0.0  ;;  %11391 = vpow2.f32 %v4282_v6  ;;  %v16101_v6 = vld [vmem:[#allocation41_spill] sm:$0xff] }
 0x764   :  { %v14040_v47 = vpop.eup %11373  ;;  %v4400_v32 = vsel %vm2189_vm3, %v14035_v52, 0.0  ;;  %11393 = vpow2.f32 %v4330_v41  ;;  %v16105_v41 = vld [vmem:[#allocation36_spill] sm:$0xff] }
 0x765   :  { %v14045_v28 = vpop.eup %11375  ;;  %v4403_v42 = vsel %vm2189_vm3, %v14040_v47, 0.0 }
 0x766   :  { %v14049_v44 = vpop.eup %11377  ;;  %v4370_v50 = vsel %vm2189_vm3, %v14045_v28, 0.0 }
 0x767   :  { %4362 = vadd.xlane.f32.xlu1 %v4361_v24  ;;  %4407 = vadd.xlane.f32.xlu0 %v4406_v22  ;;  %v14054_v27 = vpop.eup %11379  ;;  %v4373_v34 = vsel %vm2189_vm3, %v14049_v44, 0.0 }
 0x768   :  { %v14058_v54 = vpop.eup %11381  ;;  %v4418_v46 = vsel %vm2189_vm3, %v14054_v27, 0.0 }
 0x769   :  { %v14062_v25 = vpop.eup %11383  ;;  %v4421_v5 = vsel %vm2189_vm3, %v14058_v54, 0.0 }
 0x76a   :  { %v14066_v37 = vpop.eup %11385  ;;  %v4364_v26 = vsel %vm2189_vm3, %v14062_v25, 0.0 }
 0x76b   :  { %4410 = vadd.xlane.f32.xlu1 %v4409_v16  ;;  %4353 = vadd.xlane.f32.xlu0 %v4352_v51  ;;  %v14070_v18 = vpop.eup %11387  ;;  %v4367_v24 = vsel %vm2189_vm3, %v14066_v37, 0.0 }
 0x76c   :  { %v14074_v30 = vpop.eup %11389  ;;  %v4412_v31 = vsel %vm2189_vm3, %v14070_v18, 0.0 }
 0x76d   :  { %v14078_v56 = vpop.eup %11391  ;;  %v4415_v22 = vsel %vm2189_vm3, %v14074_v30, 0.0 }
 0x76e   :  { %v4376_v23 = vsel %vm2189_vm3, %v14078_v56, 0.0  ;;  %v14084_v61 = vpop.eup %11393 }
 0x76f   :  { %4356 = vadd.xlane.f32.xlu1 %v4355_v48  ;;  %4401 = vadd.xlane.f32.xlu0 %v4400_v32  ;;  %v4424_v16 = vsel %vm2189_vm3, %v14084_v61, 0.0  ;;  %v16099_v32 = vld [vmem:[#allocation37_spill] sm:$0xff] }
 0x773   :  { %4404 = vadd.xlane.f32.xlu1 %v4403_v42  ;;  %4371 = vadd.xlane.f32.xlu0 %v4370_v50  ;;  %v16100_v42 = vld [vmem:[#allocation43_spill] sm:$0xff]  ;;  %v16103_v50 = vld [vmem:[#allocation33_spill] sm:$0xff] }
 0x777   :  { %4374 = vadd.xlane.f32.xlu1 %v4373_v34  ;;  %4419 = vadd.xlane.f32.xlu0 %v4418_v46  ;;  %v16104_v34 = vld [vmem:[#allocation54_spill] sm:$0xff]  ;;  %v14131_v46 = vpop.permute.xlu0 %4703 }
 0x77b   :  { %4422 = vadd.xlane.f32.xlu1 %v4421_v5  ;;  %4365 = vadd.xlane.f32.xlu0 %v4364_v26  ;;  %v16106_v5 = vld [vmem:[#allocation58_spill] sm:$0xff]  ;;  %v16107_v26 = vld [vmem:[#allocation35_spill] sm:$0xff] }
 0x77f   :  { %4368 = vadd.xlane.f32.xlu1 %v4367_v24  ;;  %4413 = vadd.xlane.f32.xlu0 %v4412_v31  ;;  %v16108_v31 = vld [vmem:[#allocation61_spill] sm:$0xff] }
 0x783   :  { %4416 = vadd.xlane.f32.xlu1 %v4415_v22  ;;  %4377 = vadd.xlane.f32.xlu0 %v4376_v23  ;;  %v16109_v22 = vld [vmem:[#allocation52_spill] sm:$0xff]  ;;  %v16110_v23 = vld [vmem:[#allocation65_spill] sm:$0xff] }
 0x787   :  { %4425 = vadd.xlane.f32.xlu0 %v4424_v16 }
 0x78b   :  { %v4221_v1 = vpop.xlane.xlu1 %4220 }
 0x78c   :  { %v4237_v7 = vmax.f32 %v13932_v9, %v4221_v1  ;;  %v16111_v1 = vld [vmem:[#allocation55_spill] sm:$0xff] }
 0x78e   :  { %v4253_v51 = vsub.f32 %v13834_v45, %v4237_v7  ;;  %v4301_v0 = vsub.f32 %v13901_v29, %v4237_v7  ;;  %v16097_v45 = vld [vmem:[#allocation40_spill] sm:$0xff]  ;;  %v16098_v29 = vld [vmem:[#allocation39_spill] sm:$0xff] }
 0x790   :  { %v4284_v40 = vmul.f32 1.442695, %v4253_v51  ;;  %v4332_v48 = vmul.f32 1.442695, %v4301_v0  ;;  %v16113_v0 = vld [vmem:[#allocation59_spill] sm:$0xff] }
 0x792   :  { %11395 = vpow2.f32 %v4284_v40  ;;  %v16112_v40 = vld [vmem:[#allocation38_spill] sm:$0xff] }
 0x793   :  { %11397 = vpow2.f32 %v4332_v48 }
 0x794   :  { %4847 = vrot.lane.b32.xlu1 %v16087_v35, %s11966_s12 }
 0x79c   :  { %v14107_v9 = vpop.eup %11395 }
 0x79d   :  { %4799 = vrot.lane.b32.xlu0 %v16084_v63, %s11966_s12  ;;  %v4379_v59 = vsel %vm2189_vm3, %v14107_v9, 0.0  ;;  %v14113_v36 = vpop.eup %11397 }
 0x79e   :  { %v4427_v53 = vsel %vm2189_vm3, %v14113_v36, 0.0 }
 0x7a1   :  { %4895 = vrot.lane.b32.xlu0 %v16086_v62, %s11966_s12 }
 0x7a5   :  { %4991 = vrot.lane.b32.xlu0 %v16088_v12, %s11966_s12 }
 0x7a9   :  { %5087 = vrot.lane.b32.xlu0 %v16090_v33, %s11966_s12 }
 0x7ad   :  { %5183 = vrot.lane.b32.xlu0 %v16092_v19, %s11966_s12 }
 0x7b1   :  { %5361 = vrot.lane.b32.xlu0 %v16097_v45, %s11967_s15 }
 0x7b5   :  { %5359 = vrot.lane.b32.xlu0 %v16098_v29, %s11967_s15 }
 0x7b8   :  { %4380 = vadd.xlane.f32.xlu1 %v4379_v59 }
 0x7b9   :  { %5410 = vrot.lane.b32.xlu0 %v16099_v32, %s11967_s15 }
 0x7bc   :  { %4428 = vadd.xlane.f32.xlu1 %v4427_v53  ;;  %v16114_v53 = vld [vmem:[#allocation44_spill] sm:$0xff] }
 0x7bd   :  { %5461 = vrot.lane.b32.xlu0 %v16100_v42, %s11967_s15 }
 0x7c1   :  { %5512 = vrot.lane.b32.xlu0 %v16101_v6, %s11967_s15 }
 0x7c5   :  { %5563 = vrot.lane.b32.xlu0 %v16102_v2, %s11967_s15 }
 0x7c9   :  { %5614 = vrot.lane.b32.xlu0 %v16103_v50, %s11967_s15 }
 0x7cd   :  { %4943 = vrot.lane.b32.xlu1 %v16104_v34, %s11966_s12  ;;  %5665 = vrot.lane.b32.xlu0 %v16105_v41, %s11967_s15 }
 0x7d1   :  { %5039 = vrot.lane.b32.xlu1 %v16106_v5, %s11966_s12  ;;  %5716 = vrot.lane.b32.xlu0 %v16107_v26, %s11967_s15 }
 0x7d4   :  { %v4336_v24 = vpop.xlane.xlu0 %4335 }
 0x7d5   :  { %5135 = vrot.lane.b32.xlu1 %v16108_v31, %s11966_s12  ;;  %5875 = vrot.lane.b32.xlu0 %v16109_v22, %s11967_s15 }
 0x7d8   :  { %v4384_v16 = vpop.xlane.xlu0 %4383 }
 0x7d9   :  { %5231 = vrot.lane.b32.xlu1 %v16110_v23, %s11966_s12  ;;  %5967 = vrot.lane.b32.xlu0 %v16111_v1, %s11967_s15  ;;  %v4430_v51 = vadd.f32 %v4384_v16, %v4336_v24  ;;  %v16115_v23 = vld [vmem:[#allocation64_spill] sm:$0xff]  ;;  %v16116_v24 = vld [vmem:[#allocation42_spill] sm:$0xff] }
 0x7db   :  { %11399 = vrcp.f32 %v4430_v51  ;;  %v16117_v51 = vld [vmem:[#allocation47_spill] sm:$0xff] }
 0x7dc   :  { %v4339_v7 = vpop.xlane.xlu1 %4338 }
 0x7dd   :  { %5412 = vrot.lane.b32.xlu1 %v16112_v40, %s11967_s15  ;;  %6059 = vrot.lane.b32.xlu0 %v16113_v0, %s11967_s15 }
 0x7e0   :  { %v4387_v48 = vpop.xlane.xlu1 %4386  ;;  %v4348_v22 = vpop.xlane.xlu0 %4347 }
 0x7e1   :  { %v4431_v59 = vadd.f32 %v4387_v48, %v4339_v7  ;;  %5463 = vrot.lane.b32.xlu1 %v16114_v53, %s11967_s15  ;;  %6551 = vrot.lane.b32.xlu0 %v16115_v23, %s11967_s15  ;;  %v16118_v23 = vld [vmem:[#allocation45_spill] sm:$0xff] }
 0x7e3   :  { %11401 = vrcp.f32 %v4431_v59 }
 0x7e4   :  { %v4351_v1 = vpop.xlane.xlu1 %4350  ;;  %v4396_v16 = vpop.xlane.xlu0 %4395 }
 0x7e5   :  { %5514 = vrot.lane.b32.xlu1 %v16116_v24, %s11967_s15  ;;  %v4434_v40 = vadd.f32 %v4396_v16, %v4348_v22  ;;  %v14157_v48 = vpop.eup %11399 }
 0x7e6   :  { %v4486_v24 = vmul.f32 %v14157_v48, %v13943_v60  ;;  %v16121_v60 = vmov 0.0  }
 0x7e7   :  { %11403 = vrcp.f32 %v4434_v40 }
 0x7e8   :  { %v4399_v31 = vpop.xlane.xlu1 %4398  ;;  %v4342_v7 = vpop.xlane.xlu0 %4341 }
 0x7e9   :  { %v4435_v0 = vadd.f32 %v4399_v31, %v4351_v1  ;;  %5565 = vrot.lane.b32.xlu1 %v16117_v51, %s11967_s15 }
 0x7eb   :  { %11405 = vrcp.f32 %v4435_v0  ;;  %v16119_v0 = vld [vmem:[#allocation51_spill] sm:$0xff] }
 0x7ec   :  { %v4345_v59 = vpop.xlane.xlu1 %4344  ;;  %v4390_v31 = vpop.xlane.xlu0 %4389 }
 0x7ed   :  { %v14159_v53 = vpop.eup %11401  ;;  %5616 = vrot.lane.b32.xlu1 %v16118_v23, %s11967_s15  ;;  %v4432_v1 = vadd.f32 %v4390_v31, %v4342_v7  ;;  %v16120_v23 = vld [vmem:[#allocation72_spill] sm:$0xff]  ;;  %v16122_v7 = vld [vmem:[#allocation49_spill] sm:$0xff] }
 0x7ee   :  { %v4487_v22 = vmul.f32 %v14159_v53, %v13955_v15 }
 0x7ef   :  { %11407 = vrcp.f32 %v4432_v1 }
 0x7f0   :  { %v4393_v40 = vpop.xlane.xlu1 %4392  ;;  %v4502_v16 = vpack.c.bf16 %v4487_v22, %v4486_v24  ;;  %v4360_v26 = vpop.xlane.xlu0 %4359 }
 0x7f1   :  { %v4433_v51 = vadd.f32 %v4393_v40, %v4345_v59  ;;  %5667 = vrot.lane.b32.xlu1 %v16119_v0, %s11967_s15  ;;  %v14170_v5 = vpop.eup %11403 }
 0x7f2   :  { %10513 = vmatmul.mubr.msk.bf16.vlgmr.msra.gmra.mrb[112].mxu0 %vm2189_vm3, %v4502_v16  ;;  %v4490_v59 = vmul.f32 %v14170_v5, %v13969_v13  ;;  %v16123_v16 = vld [vmem:[#allocation48_spill] sm:$0xff] }
 0x7f3   :  { %11409 = vrcp.f32 %v4433_v51  ;;  %10523 = vmatpush3.bf16.msra.mxu0 %v16120_v23  ;;  %10524 = vmatprep.mubr.msk.bf16.mxu0 %vm11965_vm1, %v16121_v60 }
 0x7f4   :  { %v4363_v15 = vpop.xlane.xlu1 %4362  ;;  %10534 = vmatprep.subr.bf16.mxu0 %v16121_v60  ;;  %v4408_v51 = vpop.xlane.xlu0 %4407 }
 0x7f5   :  { %v14176_v24 = vpop.eup %11405  ;;  %5718 = vrot.lane.b32.xlu1 %v16122_v7, %s11967_s15  ;;  %v4438_v31 = vadd.f32 %v4408_v51, %v4360_v26  ;;  %v16124_v26 = vld [vmem:[#allocation46_spill] sm:$0xff] }
 0x7f6   :  { %v4491_v22 = vmul.f32 %v14176_v24, %v13973_v10 }
 0x7f7   :  { %11411 = vrcp.f32 %v4438_v31 }
 0x7f8   :  { %v4411_v23 = vpop.xlane.xlu1 %4410  ;;  %v4504_v1 = vpack.c.bf16 %v4491_v22, %v4490_v59  ;;  %v4354_v0 = vpop.xlane.xlu0 %4353 }
 0x7f9   :  { %v4439_v40 = vadd.f32 %v4411_v23, %v4363_v15  ;;  %5783 = vrot.lane.b32.xlu1 %v16123_v16, %s11967_s15  ;;  %v11408_v41 = vpop.eup %11407 }
 0x7fa   :  { %10525 = vmatmul.mubr.msk.bf16.vlgmr.msra.gmra.mrb[116].mxu0 %vm2189_vm3, %v4504_v1  ;;  %v14194_v15 = vmul.f32 %v11408_v41, %v13980_v4  ;;  %v4488_v59 = vmul.f32 %v11408_v41, %v13991_v43 }
 0x7fb   :  { %11413 = vrcp.f32 %v4439_v40  ;;  %10535 = vmatpush3.bf16.msra.mxu0 %v14131_v46  ;;  %10536 = vmatprep.mubr.msk.bf16.mxu0 %vm11965_vm1, %v16121_v60 }
 0x7fc   :  { %v4357_v13 = vpop.xlane.xlu1 %4356  ;;  %10546 = vmatprep.subr.bf16.mxu0 %v16121_v60  ;;  %v4402_v51 = vpop.xlane.xlu0 %4401 }
 0x7fd   :  { %v11410_v10 = vpop.eup %11409  ;;  %5829 = vrot.lane.b32.xlu1 %v16124_v26, %s11967_s15  ;;  %v4436_v31 = vadd.f32 %v4402_v51, %v4354_v0  ;;  %v16125_v26 = vld [vmem:[#allocation50_spill] sm:$0xff]  ;;  %v16127_v0 = vld [vmem:[#allocation53_spill] sm:$0xff] }
 0x7fe   :  { %v14198_v22 = vmul.f32 %v11410_v10, %v13986_v17  ;;  %v4489_v46 = vmul.f32 %v11410_v10, %v13997_v55  ;;  %v16126_v17 = vld [vmem:[#allocation56_spill] sm:$0xff] }
 0x7ff   :  { %11415 = vrcp.f32 %v4436_v31 }
 0x800   :  { %v4405_v23 = vpop.xlane.xlu1 %4404  ;;  %v4503_v1 = vpack.c.bf16 %v4489_v46, %v4488_v59  ;;  %v4372_v4 = vpop.xlane.xlu0 %4371 }
 0x801   :  { %v4437_v16 = vadd.f32 %v4405_v23, %v4357_v13  ;;  %5921 = vrot.lane.b32.xlu1 %v16125_v26, %s11967_s15  ;;  %v14206_v43 = vpop.eup %11411  ;;  %v16128_v23 = vld [vmem:[#allocation57_spill] sm:$0xff] }
 0x802   :  { %10519 = vmatmul.mubr.msk.bf16.vlgmr.msra.gmra.mrb[128].mxu1 %vm2189_vm3, %v4503_v1  ;;  %v4494_v13 = vmul.f32 %v14206_v43, %v14013_v11 }
 0x803   :  { %11417 = vrcp.f32 %v4437_v16  ;;  %10529 = vmatpush3.bf16.msra.mxu1 %v16126_v17  ;;  %10530 = vmatprep.mubr.msk.bf16.mxu1 %vm11965_vm1, %v16121_v60 }
 0x804   :  { %v4375_v55 = vpop.xlane.xlu1 %4374  ;;  %10540 = vmatprep.subr.bf16.mxu1 %v16121_v60  ;;  %v4420_v16 = vpop.xlane.xlu0 %4419 }
 0x805   :  { %v14212_v41 = vpop.eup %11413  ;;  %6013 = vrot.lane.b32.xlu1 %v16127_v0, %s11967_s15  ;;  %v4442_v51 = vadd.f32 %v4420_v16, %v4372_v4 }
 0x806   :  { %v4495_v10 = vmul.f32 %v14212_v41, %v14019_v21  ;;  %v16129_v21 = vld [vmem:[#allocation62_spill] sm:$0xff] }
 0x808   :  { %v4423_v59 = vpop.xlane.xlu1 %4422  ;;  %v4506_v46 = vpack.c.bf16 %v4495_v10, %v4494_v13  ;;  %v4366_v1 = vpop.xlane.xlu0 %4365 }
 0x809   :  { %v4443_v31 = vadd.f32 %v4423_v59, %v4375_v55  ;;  %6105 = vrot.lane.b32.xlu1 %v16128_v23, %s11967_s15  ;;  %v11416_v17 = vpop.eup %11415 }
 0x80a   :  { %10537 = vmatmul.mubr.msk.bf16.vlgmr.msra.gmra.mrb[120].mxu0 %vm2189_vm3, %v4506_v46  ;;  %v14228_v4 = vmul.f32 %v11416_v17, %v14024_v58  ;;  %v4492_v55 = vmul.f32 %v11416_v17, %v14035_v52  ;;  %v16131_v52 = vld [vmem:[#allocation66_spill] sm:$0xff] }
 0x80b   :  { %11419 = vrcp.f32 %v4443_v31  ;;  %10548 = vmatprep.mubr.msk.bf16.mxu0 %vm11965_vm1, %v16121_v60 }
 0x80c   :  { %v4369_v11 = vpop.xlane.xlu1 %4368  ;;  %11421 = vrcp.f32 %v4442_v51  ;;  %v4414_v16 = vpop.xlane.xlu0 %4413 }
 0x80d   :  { %v11418_v40 = vpop.eup %11417  ;;  %6598 = vrot.lane.b32.xlu1 %v16129_v21, %s11967_s15  ;;  %v4440_v59 = vadd.f32 %v4414_v16, %v4366_v1  ;;  %v16130_v21 = vld [vmem:[#allocation68_spill] sm:$0xff] }
 0x80e   :  { %v14232_v13 = vmul.f32 %v11418_v40, %v14029_v20  ;;  %v4493_v10 = vmul.f32 %v11418_v40, %v14040_v47 }
 0x80f   :  { %11423 = vrcp.f32 %v4440_v59 }
 0x810   :  { %v4417_v46 = vpop.xlane.xlu1 %4416  ;;  %v4505_v31 = vpack.c.bf16 %v4493_v10, %v4492_v55  ;;  %v4481_v51 = vpack.c.bf16 %v14232_v13, %v14228_v4  ;;  %v14239_v58 = vpop.xlane.xlu0 %4377 }
 0x811   :  { %v4441_v23 = vadd.f32 %v4417_v46, %v4369_v11  ;;  %6645 = vrot.lane.b32.xlu1 %v16130_v21, %s11967_s15 }
 0x812   :  { %10531 = vmatmul.mubr.msk.bf16.vlgmr.msra.gmra.mrb[132].mxu1 %vm2189_vm3, %v4505_v31 }
 0x813   :  { %11425 = vrcp.f32 %v4441_v23  ;;  %10541 = vmatpush3.bf16.msra.mxu1 %v14090_v38  ;;  %10542 = vmatprep.mubr.msk.bf16.mxu1 %vm11965_vm1, %v16121_v60 }
 0x814   :  { %10552 = vmatprep.subr.bf16.mxu1 %v16121_v60  ;;  %v4426_v47 = vpop.xlane.xlu0 %4425 }
 0x815   :  { %v11420_v20 = vpop.eup %11419  ;;  %6692 = vrot.lane.b32.xlu1 %v16131_v52, %s11967_s15 }
 0x816   :  { %v11422_v40 = vpop.eup %11421  ;;  %v4499_v1 = vmul.f32 %v11420_v20, %v14058_v54 }
 0x817   :  { %v4498_v17 = vmul.f32 %v11422_v40, %v14054_v27  ;;  %v4463_v27 = vmul.f32 %v14159_v53, %v13951_v57  ;;  %v4466_v53 = vmul.f32 %v14170_v5, %v13959_v49  ;;  %v4475_v49 = vmul.f32 %v11420_v20, %v14049_v44 }
 0x818   :  { %v4800_v11 = vpop.permute.xlu0 %4799  ;;  %v4474_v5 = vmul.f32 %v11422_v40, %v14045_v28 }
 0x819   :  { %v11424_v55 = vpop.eup %11423  ;;  %10547 = vmatpush3.bf16.msra.mxu0 %v4800_v11  ;;  %v4508_v23 = vpack.c.bf16 %v4499_v1, %v4498_v17  ;;  %v4471_v17 = vmul.f32 %v14212_v41, %v14007_v14 }
 0x81a   :  { %10558 = vmatprep.subr.bf16.mxu0 %v16121_v60  ;;  %v14252_v10 = vmul.f32 %v11424_v55, %v14062_v25  ;;  %v4496_v16 = vmul.f32 %v11424_v55, %v14070_v18  ;;  %v4848_v18 = vpop.permute.xlu1 %4847  ;;  %v4484_v41 = vpack.c.bf16 %v4475_v49, %v4474_v5  ;;  %v4444_v55 = vadd.f32 %v4426_v47, %v14239_v58 }
 0x81c   :  { %v4896_v54 = vpop.permute.xlu0 %4895  ;;  %10549 = vmatmul.mubr.msk.bf16.vlgmr.msra.gmra.mrb[124].mxu0 %vm2189_vm3, %v4508_v23  ;;  %11427 = vrcp.f32 %v4444_v55 }
 0x81d   :  { %v11426_v38 = vpop.eup %11425  ;;  %10559 = vmatpush3.bf16.msra.mxu0 %v4896_v54  ;;  %10560 = vmatprep.mubr.msk.bf16.mxu0 %vm11965_vm1, %v16121_v60 }
 0x81e   :  { %v14256_v59 = vmul.f32 %v11426_v38, %v14066_v37  ;;  %v4497_v46 = vmul.f32 %v11426_v38, %v14074_v30  ;;  %10570 = vmatprep.subr.bf16.mxu0 %v16121_v60  ;;  %v4462_v37 = vmul.f32 %v14157_v48, %v13939_v39  ;;  %v4467_v39 = vmul.f32 %v14176_v24, %v13963_v8 }
 0x81f   :  { %v4470_v8 = vmul.f32 %v14206_v43, %v14002_v3 }
 0x820   :  { %v4507_v31 = vpack.c.bf16 %v4497_v46, %v4496_v16  ;;  %v4483_v25 = vpack.c.bf16 %v14256_v59, %v14252_v10  ;;  %v4478_v30 = vpack.c.bf16 %v4463_v27, %v4462_v37  ;;  %v4992_v57 = vpop.permute.xlu0 %4991  ;;  %v4480_v48 = vpack.c.bf16 %v4467_v39, %v4466_v53 }
 0x821   :  { %v4482_v24 = vpack.c.bf16 %v4471_v17, %v4470_v8 }
 0x822   :  { %10543 = vmatmul.mubr.msk.bf16.vlgmr.msra.gmra.mrb[136].mxu1 %vm2189_vm3, %v4507_v31 }
 0x823   :  { %10553 = vmatpush3.bf16.msra.mxu1 %v4848_v18  ;;  %10554 = vmatprep.mubr.msk.bf16.mxu1 %vm11965_vm1, %v16121_v60 }
 0x824   :  { %10564 = vmatprep.subr.bf16.mxu1 %v16121_v60  ;;  %10561 = vmatmul.mubr.msk.bf16.vlgmr.msra.gmra.mrb[112].mxu0 %vm2189_vm3, %v4478_v30  ;;  %v5088_v1 = vpop.permute.xlu0 %5087 }
 0x825   :  { %10571 = vmatpush3.bf16.msra.mxu0 %v4992_v57  ;;  %10572 = vmatprep.mubr.msk.bf16.mxu0 %vm11965_vm1, %v16121_v60 }
 0x826   :  { %10582 = vmatprep.subr.bf16.mxu0 %v16121_v60  ;;  %v11428_v38 = vpop.eup %11427 }
 0x827   :  { %v4500_v58 = vmul.f32 %v11428_v38, %v14084_v61 }
 0x828   :  { %v5184_v11 = vpop.permute.xlu0 %5183 }
 0x82c   :  { %10573 = vmatmul.mubr.msk.bf16.vlgmr.msra.gmra.mrb[116].mxu0 %vm2189_vm3, %v4480_v48  ;;  %v5362_v14 = vpop.permute.xlu0 %5361 }
 0x82d   :  { %10583 = vmatpush3.bf16.msra.mxu0 %v5088_v1  ;;  %10584 = vmatprep.mubr.msk.bf16.mxu0 %vm11965_vm1, %v16121_v60  ;;  %v5367_v3 = vsel %vm1428_vm2, %v5362_v14, 0 }
 0x82e   :  { %10594 = vmatprep.subr.bf16.mxu0 %v16121_v60 }
 0x830   :  { %v14301_v44 = vpop.permute.xlu0 %5359 }
 0x834   :  { %10585 = vmatmul.mubr.msk.bf16.vlgmr.msra.gmra.mrb[120].mxu0 %vm2189_vm3, %v4482_v24  ;;  %v14307_v16 = vpop.permute.xlu0 %5410  ;;  %v4476_v24 = vmul.f32 %v11428_v38, %v14078_v56 }
 0x835   :  { %10595 = vmatpush3.bf16.msra.mxu0 %v5184_v11  ;;  %10596 = vmatprep.mubr.msk.bf16.mxu0 %vm11965_vm1, %v16121_v60 }
 0x836   :  { %10606 = vmatprep.subr.bf16.mxu0 %v16121_v60 }
 0x838   :  { %v14311_v37 = vpop.permute.xlu0 %5461 }
 0x83c   :  { %10597 = vmatmul.mubr.msk.bf16.vlgmr.msra.gmra.mrb[124].mxu0 %vm2189_vm3, %v4484_v41  ;;  %v14317_v30 = vpop.permute.xlu0 %5512 }
 0x83d   :  { %10608 = vmatprep.mubr.msk.bf16.mxu0 %vm11965_vm1, %v16121_v60 }
 0x83e   :  { %10607 = vmatpush3.bf16.xpose.msra.mxu0 %v5367_v3 }
 0x83f   :  { %10618 = vmatprep.subr.bf16.mxu0 %v16121_v60 }
 0x840   :  { %v14328_v53 = vpop.permute.xlu0 %5563 }
 0x845   :  { %v4381_v43 = vpop.xlane.xlu1 %4380  ;;  %10609 = vmatmul.mubr.msk.bf16.vlgmr.msra.gmra.mrb[128].mxu0 %vm1428_vm2, %v14301_v44 }
 0x846   :  { %10620 = vmatprep.mubr.msk.bf16.mxu0 %vm11965_vm1, %v16121_v60 }
 0x849   :  { %v4429_v28 = vpop.xlane.xlu1 %4428 }
 0x84a   :  { %v4445_v20 = vadd.f32 %v4429_v28, %v4381_v43 }
 0x84c   :  { %11429 = vrcp.f32 %v4445_v20 }
 0x84d   :  { %v4944_v40 = vpop.permute.xlu1 %4943 }
 0x851   :  { %v5040_v23 = vpop.permute.xlu1 %5039 }
 0x855   :  { %v5136_v46 = vpop.permute.xlu1 %5135 }
 0x856   :  { %v11430_v54 = vpop.eup %11429 }
 0x857   :  { %v4501_v47 = vmul.f32 %v11430_v54, %v14113_v36  ;;  %v16132_v36 = vpack.c.bf16 %v14198_v22, %v14194_v15  ;;  %v14339_v15 = vpop.permute.xlu0 %5614 }
 0x859   :  { %v5232_v27 = vpop.permute.xlu1 %5231  ;;  %v4509_v31 = vpack.c.bf16 %v4501_v47, %v4500_v58 }
 0x85b   :  { %10555 = vmatmul.mubr.msk.bf16.vlgmr.msra.gmra.mrb[140].mxu1 %vm2189_vm3, %v4509_v31  ;;  %v5666_v13 = vpop.permute.xlu0 %5665 }
 0x85c   :  { %10565 = vmatpush3.bf16.msra.mxu1 %v4944_v40  ;;  %10566 = vmatprep.mubr.msk.bf16.mxu1 %vm11965_vm1, %v16121_v60 }
 0x85d   :  { %v5413_v18 = vpop.permute.xlu1 %5412  ;;  %10576 = vmatprep.subr.bf16.mxu1 %v16121_v60 }
 0x85f   :  { %v14360_v10 = vpop.permute.xlu0 %5716 }
 0x861   :  { %v5464_v57 = vpop.permute.xlu1 %5463 }
 0x862   :  { %v5469_v61 = vsel %vm1428_vm2, %v5464_v57, 0 }
 0x863   :  { %10567 = vmatmul.mubr.msk.bf16.vlgmr.msra.gmra.mrb[128].mxu1 %vm2189_vm3, %v16132_v36  ;;  %10619 = vmatpush3.bf16.xpose.msra.mxu0 %v5469_v61  ;;  %v5876_v56 = vpop.permute.xlu0 %5875 }
 0x864   :  { %10577 = vmatpush3.bf16.msra.mxu1 %v5040_v23  ;;  %10578 = vmatprep.mubr.msk.bf16.mxu1 %vm11965_vm1, %v16121_v60  ;;  %v5878_v49 = vsel %vm1428_vm2, %v5876_v56, 0 }
 0x865   :  { %v5515_v39 = vpop.permute.xlu1 %5514  ;;  %10588 = vmatprep.subr.bf16.mxu1 %v16121_v60  ;;  %10630 = vmatprep.subr.bf16.mxu0 %v16121_v60 }
 0x866   :  { %v5520_v5 = vsel %vm1428_vm2, %v5515_v39, 0 }
 0x867   :  { %v5968_v14 = vpop.permute.xlu0 %5967 }
 0x868   :  { %v5970_v41 = vsel %vm1428_vm2, %v5968_v14, 0 }
 0x869   :  { %v5566_v48 = vpop.permute.xlu1 %5565 }
 0x86a   :  { %v5571_v1 = vsel %vm1428_vm2, %v5566_v48, 0  ;;  %10621 = vmatmul.mubr.msk.bf16.vlgmr.msra.gmra.mrb[132].mxu0 %vm1428_vm2, %v14311_v37 }
 0x86b   :  { %10579 = vmatmul.mubr.msk.bf16.vlgmr.msra.gmra.mrb[132].mxu1 %vm2189_vm3, %v4481_v51  ;;  %10631 = vmatpush3.bf16.xpose.msra.mxu0 %v5571_v1  ;;  %v4477_v51 = vmul.f32 %v11430_v54, %v14107_v9  ;;  %v5418_v9 = vsel %vm1428_vm2, %v5413_v18, 0  ;;  %v6060_v43 = vpop.permute.xlu0 %6059 }
 0x86c   :  { %10589 = vmatpush3.bf16.msra.mxu1 %v5136_v46  ;;  %10632 = vmatprep.mubr.msk.bf16.mxu0 %vm11965_vm1, %v16121_v60  ;;  %v6062_v55 = vsel %vm1428_vm2, %v6060_v43, 0 }
 0x86d   :  { %v5617_v22 = vpop.permute.xlu1 %5616  ;;  %10590 = vmatprep.mubr.msk.bf16.mxu1 %vm11965_vm1, %v16121_v60  ;;  %10600 = vmatprep.subr.bf16.mxu1 %v16121_v60 }
 0x86e   :  { %10642 = vmatprep.subr.bf16.mxu0 %v16121_v60  ;;  %v5622_v3 = vsel %vm1428_vm2, %v5617_v22, 0 }
 0x86f   :  { %v6552_v20 = vpop.permute.xlu0 %6551 }
 0x871   :  { %v5668_v17 = vpop.permute.xlu1 %5667 }
 0x872   :  { %v5673_v4 = vsel %vm1428_vm2, %v5668_v17, 0  ;;  %10633 = vmatmul.mubr.msk.bf16.vlgmr.msra.gmra.mrb[136].mxu0 %vm1428_vm2, %v14328_v53 }
 0x873   :  { %10591 = vmatmul.mubr.msk.bf16.vlgmr.msra.gmra.mrb[136].mxu1 %vm2189_vm3, %v4483_v25  ;;  %10643 = vmatpush3.bf16.xpose.msra.mxu0 %v5673_v4  ;;  %v4485_v25 = vpack.c.bf16 %v4477_v51, %v4476_v24 }
 0x874   :  { %10601 = vmatpush3.bf16.msra.mxu1 %v5232_v27  ;;  %10644 = vmatprep.mubr.msk.bf16.mxu0 %vm11965_vm1, %v16121_v60 }
 0x875   :  { %v5719_v8 = vpop.permute.xlu1 %5718  ;;  %10602 = vmatprep.mubr.msk.bf16.mxu1 %vm11965_vm1, %v16121_v60  ;;  %10654 = vmatprep.subr.bf16.mxu0 %v16121_v60 }
 0x876   :  { %10612 = vmatprep.subr.bf16.mxu1 %v16121_v60 }
 0x879   :  { %v5784_v59 = vpop.permute.xlu1 %5783 }
 0x87a   :  { %v5786_v11 = vsel %vm1428_vm2, %v5784_v59, 0  ;;  %10645 = vmatmul.mubr.msk.bf16.vlgmr.msra.gmra.mrb[140].mxu0 %vm1428_vm2, %v5666_v13 }
 0x87b   :  { %10603 = vmatmul.mubr.msk.bf16.vlgmr.msra.gmra.mrb[140].mxu1 %vm2189_vm3, %v4485_v25  ;;  %10655 = vmatpush3.bf16.xpose.msra.mxu0 %v5786_v11 }
 0x87c   :  { %10656 = vmatprep.mubr.msk.bf16.mxu0 %vm11965_vm1, %v16121_v60  ;;  %10614 = vmatprep.mubr.msk.bf16.mxu1 %vm11965_vm1, %v16121_v60 }
 0x87d   :  { %10613 = vmatpush3.bf16.xpose.msra.mxu1 %v5418_v9  ;;  %10666 = vmatprep.subr.bf16.mxu0 %v16121_v60  ;;  %v5830_v28 = vpop.permute.xlu1 %5829 }
 0x87e   :  { %10624 = vmatprep.subr.bf16.mxu1 %v16121_v60  ;;  %v5832_v40 = vsel %vm1428_vm2, %v5830_v28, 0 }
 0x881   :  { %v5922_v23 = vpop.permute.xlu1 %5921 }
 0x882   :  { %10657 = vmatmul.mubr.msk.bf16.vlgmr.msra.gmra.mrb[144].mxu0 %vm1428_vm2, %v14301_v44  ;;  %v5724_v44 = vsel %vm1428_vm2, %v5719_v8, 0  ;;  %v5924_v38 = vsel %vm1428_vm2, %v5922_v23, 0  ;;  %v14459_v8 = vld [vmem:[#allocation8 + $0x28] sm:$0xff] }
 0x883   :  { %10667 = vmatpush3.bf16.xpose.msra.mxu0 %v5878_v49  ;;  %10668 = vmatprep.mubr.msk.bf16.mxu0 %vm11965_vm1, %v16121_v60 }
 0x884   :  { %10615 = vmatmul.mubr.msk.bf16.vlgmr.msra.gmra.mrb[144].mxu1 %vm1428_vm2, %v14307_v16  ;;  %10678 = vmatprep.subr.bf16.mxu0 %v16121_v60 }
 0x885   :  { %10625 = vmatpush3.bf16.xpose.msra.mxu1 %v5520_v5  ;;  %10626 = vmatprep.mubr.msk.bf16.mxu1 %vm11965_vm1, %v16121_v60  ;;  %v6014_v46 = vpop.permute.xlu1 %6013 }
 0x886   :  { %10636 = vmatprep.subr.bf16.mxu1 %v16121_v60  ;;  %v6016_v54 = vsel %vm1428_vm2, %v6014_v46, 0 }
 0x889   :  { %v6106_v58 = vpop.permute.xlu1 %6105 }
 0x88a   :  { %10669 = vmatmul.mubr.msk.bf16.vlgmr.msra.gmra.mrb[148].mxu0 %vm1428_vm2, %v14311_v37 }
 0x88b   :  { %10679 = vmatpush3.bf16.xpose.msra.mxu0 %v5970_v41  ;;  %10680 = vmatprep.mubr.msk.bf16.mxu0 %vm11965_vm1, %v16121_v60 }
 0x88c   :  { %10627 = vmatmul.mubr.msk.bf16.vlgmr.msra.gmra.mrb[148].mxu1 %vm1428_vm2, %v14317_v30  ;;  %10690 = vmatprep.subr.bf16.mxu0 %v16121_v60 }
 0x88d   :  { %10637 = vmatpush3.bf16.xpose.msra.mxu1 %v5622_v3  ;;  %10638 = vmatprep.mubr.msk.bf16.mxu1 %vm11965_vm1, %v16121_v60  ;;  %v6599_v47 = vpop.permute.xlu1 %6598  ;;  %v14475_v3 = vld [vmem:[#allocation8 + $0xa0] sm:$0xff] }
 0x88e   :  { %10648 = vmatprep.subr.bf16.mxu1 %v16121_v60 }
 0x892   :  { %10681 = vmatmul.mubr.msk.bf16.vlgmr.msra.gmra.mrb[152].mxu0 %vm1428_vm2, %v14328_v53 }
 0x893   :  { %10691 = vmatpush3.bf16.xpose.msra.mxu0 %v6062_v55  ;;  %10692 = vmatprep.mubr.msk.bf16.mxu0 %vm11965_vm1, %v16121_v60  ;;  %v14477_v55 = vld [vmem:[#allocation8 + $0xa8] sm:$0xff] }
 0x894   :  { %10639 = vmatmul.mubr.msk.bf16.vlgmr.msra.gmra.mrb[152].mxu1 %vm1428_vm2, %v14339_v15  ;;  %10702 = vmatprep.subr.bf16.mxu0 %v16121_v60 }
 0x895   :  { %10649 = vmatpush3.bf16.xpose.msra.mxu1 %v5724_v44  ;;  %10650 = vmatprep.mubr.msk.bf16.mxu1 %vm11965_vm1, %v16121_v60 }
 0x896   :  { %10660 = vmatprep.subr.bf16.mxu1 %v16121_v60 }
 0x89a   :  { %10693 = vmatmul.mubr.msk.bf16.vlgmr.msra.gmra.mrb[156].mxu0 %vm1428_vm2, %v5666_v13  ;;  %v14457_v13 = vld [vmem:[#allocation8 + $0x20] sm:$0xff] }
 0x89b   :  { %10703 = vmatpush3.bf16.msra.mxu0 %v6552_v20  ;;  %10704 = vmatprep.mubr.msk.bf16.mxu0 %vm11965_vm1, %v16121_v60 }
 0x89c   :  { %10651 = vmatmul.mubr.msk.bf16.vlgmr.msra.gmra.mrb[156].mxu1 %vm1428_vm2, %v14360_v10  ;;  %10714 = vmatprep.subr.bf16.mxu0 %v16121_v60 }
 0x89d   :  { %10661 = vmatpush3.bf16.xpose.msra.mxu1 %v5832_v40  ;;  %10662 = vmatprep.mubr.msk.bf16.mxu1 %vm11965_vm1, %v16121_v60 }
 0x89e   :  { %10672 = vmatprep.subr.bf16.mxu1 %v16121_v60 }
 0x8a4   :  { %10663 = vmatmul.mubr.msk.bf16.vlgmr.msra.gmra.mrb[160].mxu1 %vm1428_vm2, %v14307_v16  ;;  %v6108_v16 = vsel %vm1428_vm2, %v6106_v58, 0 }
 0x8a5   :  { %10673 = vmatpush3.bf16.xpose.msra.mxu1 %v5924_v38  ;;  %10674 = vmatprep.mubr.msk.bf16.mxu1 %vm11965_vm1, %v16121_v60 }
 0x8a6   :  { %10684 = vmatprep.subr.bf16.mxu1 %v16121_v60 }
 0x8ac   :  { %10675 = vmatmul.mubr.msk.bf16.vlgmr.msra.gmra.mrb[164].mxu1 %vm1428_vm2, %v14317_v30 }
 0x8ad   :  { %10685 = vmatpush3.bf16.xpose.msra.mxu1 %v6016_v54  ;;  %10686 = vmatprep.mubr.msk.bf16.mxu1 %vm11965_vm1, %v16121_v60 }
 0x8ae   :  { %10696 = vmatprep.subr.bf16.mxu1 %v16121_v60 }
 0x8b4   :  { %10687 = vmatmul.mubr.msk.bf16.vlgmr.msra.gmra.mrb[168].mxu1 %vm1428_vm2, %v14339_v15 }
 0x8b5   :  { %10697 = vmatpush3.bf16.xpose.msra.mxu1 %v6108_v16  ;;  %10698 = vmatprep.mubr.msk.bf16.mxu1 %vm11965_vm1, %v16121_v60 }
 0x8b6   :  { %10708 = vmatprep.subr.bf16.mxu1 %v16121_v60 }
 0x8bc   :  { %10699 = vmatmul.mubr.msk.bf16.vlgmr.msra.gmra.mrb[172].mxu1 %vm1428_vm2, %v14360_v10 }
 0x8bd   :  { %10709 = vmatpush3.bf16.msra.mxu1 %v6599_v47  ;;  %10710 = vmatprep.mubr.msk.bf16.mxu1 %vm11965_vm1, %v16121_v60 }
 0x8be   :  { %10720 = vmatprep.subr.bf16.mxu1 %v16121_v60 }
 0x8f7   :  { %v14441_v27 = vpop.f32.mrb[112].mxu0 }
 0x8f8   :  { %16133 = vst [vmem:[#allocation71_spill] sm:$0xff] %v14441_v27  ;;  %v10562_v31 = vpop.f32.mrb[113].mxu0 }
 0x8f9   :  { %v14443_v37 = vpop.f32.mrb[114].mxu0 }
 0x8fa   :  { %16134 = vst [vmem:[#allocation60_spill] sm:$0xff] %v14443_v37  ;;  %v10563_v18 = vpop.f32.mrb[115].mxu0 }
 0x8ff   :  { %v14445_v30 = vpop.f32.mrb[116].mxu0 }
 0x900   :  { %16135 = vst [vmem:[#allocation72_spill] sm:$0xff] %v14445_v30  ;;  %v10574_v57 = vpop.f32.mrb[117].mxu0  ;;  %v16150_v30 = vld [vmem:[#allocation70_spill] sm:$0xff] }
 0x901   :  { %v14447_v61 = vpop.f32.mrb[118].mxu0 }
 0x902   :  { %16136 = vst [vmem:[#allocation56_spill] sm:$0xff] %v14447_v61  ;;  %v10575_v36 = vpop.f32.mrb[119].mxu0 }
 0x907   :  { %v14449_v39 = vpop.f32.mrb[120].mxu0 }
 0x908   :  { %16137 = vst [vmem:[#allocation73_spill] sm:$0xff] %v14449_v39  ;;  %v10586_v53 = vpop.f32.mrb[121].mxu0 }
 0x909   :  { %v14451_v48 = vpop.f32.mrb[122].mxu0 }
 0x90a   :  { %16138 = vst [vmem:[#allocation74_spill] sm:$0xff] %v14451_v48  ;;  %v10587_v1 = vpop.f32.mrb[123].mxu0 }
 0x90f   :  { %v14453_v15 = vpop.f32.mrb[124].mxu0 }
 0x910   :  { %16139 = vst [vmem:[#allocation75_spill] sm:$0xff] %v14453_v15  ;;  %v10598_v22 = vpop.f32.mrb[125].mxu0 }
 0x911   :  { %v14455_v17 = vpop.f32.mrb[126].mxu0 }
 0x912   :  { %16140 = vst [vmem:[#allocation76_spill] sm:$0xff] %v14455_v17  ;;  %v10599_v4 = vpop.f32.mrb[127].mxu0 }
 0x918   :  { %v5403_v51 = vpop.f32.mrb[128].mxu0 }
 0x919   :  { %v14462_v24 = vadd.f32 %v5403_v51, %v14457_v13  ;;  %v10610_v10 = vpop.f32.mrb[129].mxu0 }
 0x91a   :  { %v5406_v59 = vpop.f32.mrb[130].mxu0 }
 0x91b   :  { %v14465_v25 = vadd.f32 %v5406_v59, %v14459_v8  ;;  %v10611_v11 = vpop.f32.mrb[131].mxu0  ;;  %v6167_v9 = vsel %vm2189_vm3, %v14462_v24, -inf }
 0x91c   :  { %6168 = vmax.xlane.f32.xlu0 %v6167_v9 }
 0x91d   :  { %v6170_v56 = vsel %vm2189_vm3, %v14465_v25, -inf }
 0x91e   :  { %6171 = vmax.xlane.f32.xlu1 %v6170_v56 }
 0x936   :  { %v14471_v49 = vpop.f32.mrb[128].mxu1 }
 0x937   :  { %16141 = vst [vmem:[#allocation77_spill] sm:$0xff] %v14471_v49  ;;  %v10568_v5 = vpop.f32.mrb[129].mxu1 }
 0x938   :  { %v14473_v14 = vpop.f32.mrb[130].mxu1 }
 0x939   :  { %16142 = vst [vmem:[#allocation78_spill] sm:$0xff] %v14473_v14  ;;  %v10569_v41 = vpop.f32.mrb[131].mxu1 }
 0x93d   :  { %v5505_v43 = vpop.f32.mrb[132].mxu0 }
 0x93e   :  { %v14480_v44 = vadd.f32 %v5505_v43, %v14475_v3  ;;  %v14482_v28 = vpop.f32.mrb[132].mxu1  ;;  %v10622_v20 = vpop.f32.mrb[133].mxu0 }
 0x93f   :  { %16143 = vst [vmem:[#allocation79_spill] sm:$0xff] %v14482_v28  ;;  %v10580_v40 = vpop.f32.mrb[133].mxu1  ;;  %v5508_v23 = vpop.f32.mrb[134].mxu0  ;;  %v14501_v20 = vld [vmem:[#allocation8 + $0x60] sm:$0xff] }
 0x940   :  { %v14485_v38 = vadd.f32 %v5508_v23, %v14477_v55  ;;  %v14487_v46 = vpop.f32.mrb[134].mxu1  ;;  %v10623_v54 = vpop.f32.mrb[135].mxu0  ;;  %v6179_v58 = vsel %vm2189_vm3, %v14480_v44, -inf }
 0x941   :  { %16144 = vst [vmem:[#allocation80_spill] sm:$0xff] %v14487_v46  ;;  %6180 = vmax.xlane.f32.xlu0 %v6179_v58  ;;  %v10581_v16 = vpop.f32.mrb[135].mxu1  ;;  %v14503_v58 = vld [vmem:[#allocation8 + $0x68] sm:$0xff] }
 0x942   :  { %v6182_v47 = vsel %vm2189_vm3, %v14485_v38, -inf }
 0x943   :  { %6183 = vmax.xlane.f32.xlu1 %v6182_v47 }
 0x945   :  { %v5607_v31 = vpop.f32.mrb[136].mxu0 }
 0x946   :  { %v14493_v18 = vpop.f32.mrb[136].mxu1  ;;  %v10634_v57 = vpop.f32.mrb[137].mxu0 }
 0x947   :  { %16145 = vst [vmem:[#allocation81_spill] sm:$0xff] %v14493_v18  ;;  %v10592_v36 = vpop.f32.mrb[137].mxu1  ;;  %v5610_v53 = vpop.f32.mrb[138].mxu0 }
 0x948   :  { %v14495_v1 = vpop.f32.mrb[138].mxu1  ;;  %v10635_v22 = vpop.f32.mrb[139].mxu0 }
 0x949   :  { %16146 = vst [vmem:[#allocation82_spill] sm:$0xff] %v14495_v1  ;;  %v10593_v4 = vpop.f32.mrb[139].mxu1  ;;  %v14509_v22 = vadd.f32 %v5607_v31, %v14457_v13 }
 0x94d   :  { %v5709_v51 = vpop.f32.mrb[140].mxu0 }
 0x94e   :  { %v14497_v10 = vpop.f32.mrb[140].mxu1  ;;  %v10646_v59 = vpop.f32.mrb[141].mxu0 }
 0x94f   :  { %16147 = vst [vmem:[#allocation83_spill] sm:$0xff] %v14497_v10  ;;  %v10604_v11 = vpop.f32.mrb[141].mxu1  ;;  %v5712_v9 = vpop.f32.mrb[142].mxu0 }
 0x950   :  { %v14499_v56 = vpop.f32.mrb[142].mxu1  ;;  %v10647_v5 = vpop.f32.mrb[143].mxu0 }
 0x951   :  { %16148 = vst [vmem:[#allocation84_spill] sm:$0xff] %v14499_v56  ;;  %v10605_v41 = vpop.f32.mrb[143].mxu1  ;;  %v14517_v5 = vadd.f32 %v5610_v53, %v14459_v8 }
 0x955   :  { %v5822_v43 = vpop.f32.mrb[144].mxu0 }
 0x956   :  { %v10658_v40 = vpop.f32.mrb[145].mxu0 }
 0x957   :  { %v5454_v23 = vpop.f32.mrb[144].mxu1  ;;  %v5825_v54 = vpop.f32.mrb[146].mxu0 }
 0x958   :  { %v14506_v16 = vadd.f32 %v5454_v23, %v14501_v20  ;;  %v10616_v47 = vpop.f32.mrb[145].mxu1  ;;  %v10659_v57 = vpop.f32.mrb[147].mxu0  ;;  %v14521_v23 = vld [vmem:[#allocation8 + $0xe0] sm:$0xff] }
 0x959   :  { %v5457_v36 = vpop.f32.mrb[146].mxu1  ;;  %v6191_v47 = vsel %vm2189_vm3, %v14509_v22, -inf }
 0x95a   :  { %v14512_v4 = vadd.f32 %v5457_v36, %v14503_v58  ;;  %v10617_v59 = vpop.f32.mrb[147].mxu1  ;;  %v6173_v11 = vsel %vm2189_vm3, %v14506_v16, -inf }
 0x95b   :  { %6174 = vmax.xlane.f32.xlu0 %v6173_v11  ;;  %v14525_v59 = vld [vmem:[#allocation8 + $0xe8] sm:$0xff] }
 0x95c   :  { %v6176_v41 = vsel %vm2189_vm3, %v14512_v4, -inf }
 0x95d   :  { %6177 = vmax.xlane.f32.xlu1 %v6176_v41  ;;  %v5914_v40 = vpop.f32.mrb[148].mxu0  ;;  %v6194_v41 = vsel %vm2189_vm3, %v14517_v5, -inf }
 0x95e   :  { %v10670_v31 = vpop.f32.mrb[149].mxu0 }
 0x95f   :  { %6192 = vmax.xlane.f32.xlu0 %v6191_v47  ;;  %v5556_v57 = vpop.f32.mrb[148].mxu1  ;;  %v5917_v36 = vpop.f32.mrb[150].mxu0  ;;  %v14533_v31 = vadd.f32 %v5709_v51, %v14475_v3 }
 0x960   :  { %v14528_v11 = vadd.f32 %v5556_v57, %v14521_v23  ;;  %v10628_v53 = vpop.f32.mrb[149].mxu1  ;;  %v10671_v56 = vpop.f32.mrb[151].mxu0  ;;  %v14541_v57 = vadd.f32 %v5712_v9, %v14477_v55 }
 0x961   :  { %6195 = vmax.xlane.f32.xlu1 %v6194_v41  ;;  %v5559_v17 = vpop.f32.mrb[150].mxu1  ;;  %v14546_v41 = vadd.f32 %v5822_v43, %v14457_v13 }
 0x962   :  { %v14536_v1 = vadd.f32 %v5559_v17, %v14525_v59  ;;  %v10629_v47 = vpop.f32.mrb[151].mxu1  ;;  %v6185_v48 = vsel %vm2189_vm3, %v14528_v11, -inf  ;;  %v6203_v17 = vsel %vm2189_vm3, %v14533_v31, -inf  ;;  %v6206_v9 = vsel %vm2189_vm3, %v14541_v57, -inf }
 0x963   :  { %6186 = vmax.xlane.f32.xlu0 %v6185_v48  ;;  %v6215_v15 = vsel %vm2189_vm3, %v14546_v41, -inf }
 0x964   :  { %v6188_v56 = vsel %vm2189_vm3, %v14536_v1, -inf }
 0x965   :  { %6189 = vmax.xlane.f32.xlu1 %v6188_v56  ;;  %v6006_v53 = vpop.f32.mrb[152].mxu0 }
 0x966   :  { %v10682_v51 = vpop.f32.mrb[153].mxu0 }
 0x967   :  { %6204 = vmax.xlane.f32.xlu0 %v6203_v17  ;;  %v5658_v47 = vpop.f32.mrb[152].mxu1  ;;  %v6009_v46 = vpop.f32.mrb[154].mxu0  ;;  %v14561_v17 = vadd.f32 %v5917_v36, %v14477_v55 }
 0x968   :  { %v10640_v61 = vpop.f32.mrb[153].mxu1  ;;  %v10683_v48 = vpop.f32.mrb[155].mxu0  ;;  %v14553_v56 = vadd.f32 %v5658_v47, %v14501_v20 }
 0x969   :  { %6207 = vmax.xlane.f32.xlu1 %v6206_v9  ;;  %v5661_v10 = vpop.f32.mrb[154].mxu1  ;;  %v14566_v9 = vadd.f32 %v5825_v54, %v14459_v8 }
 0x96a   :  { %v14556_v43 = vadd.f32 %v5661_v10, %v14503_v58  ;;  %v10641_v51 = vpop.f32.mrb[155].mxu1 }
 0x96b   :  { %6216 = vmax.xlane.f32.xlu0 %v6215_v15  ;;  %v6197_v51 = vsel %vm2189_vm3, %v14553_v56, -inf }
 0x96c   :  { %v6200_v61 = vsel %vm2189_vm3, %v14556_v43, -inf }
 0x96d   :  { %6201 = vmax.xlane.f32.xlu1 %v6200_v61  ;;  %v6098_v48 = vpop.f32.mrb[156].mxu0  ;;  %v6230_v61 = vsel %vm2189_vm3, %v14561_v17, -inf }
 0x96e   :  { %v14569_v47 = vadd.f32 %v6098_v48, %v14475_v3  ;;  %v10694_v10 = vpop.f32.mrb[157].mxu0  ;;  %v14579_v48 = vadd.f32 %v5914_v40, %v14475_v3 }
 0x96f   :  { %6198 = vmax.xlane.f32.xlu0 %v6197_v51  ;;  %v5760_v15 = vpop.f32.mrb[156].mxu1  ;;  %v6101_v14 = vpop.f32.mrb[158].mxu0  ;;  %v6218_v51 = vsel %vm2189_vm3, %v14566_v9, -inf }
 0x970   :  { %v10652_v36 = vpop.f32.mrb[157].mxu1  ;;  %v14574_v37 = vadd.f32 %v6101_v14, %v14477_v55  ;;  %v10695_v18 = vpop.f32.mrb[159].mxu0  ;;  %v14589_v55 = vadd.f32 %v5760_v15, %v14521_v23  ;;  %v14602_v15 = vadd.f32 %v6009_v46, %v14459_v8 }
 0x971   :  { %6231 = vmax.xlane.f32.xlu1 %v6230_v61  ;;  %v5763_v54 = vpop.f32.mrb[158].mxu1  ;;  %v6227_v18 = vsel %vm2189_vm3, %v14579_v48, -inf }
 0x972   :  { %v14582_v10 = vadd.f32 %v5763_v54, %v14525_v59  ;;  %v10653_v39 = vpop.f32.mrb[159].mxu1 }
 0x973   :  { %6219 = vmax.xlane.f32.xlu0 %v6218_v51  ;;  %v6209_v51 = vsel %vm2189_vm3, %v14589_v55, -inf }
 0x974   :  { %v6212_v14 = vsel %vm2189_vm3, %v14582_v10, -inf }
 0x975   :  { %6213 = vmax.xlane.f32.xlu1 %v6212_v14 }
 0x977   :  { %6228 = vmax.xlane.f32.xlu0 %v6227_v18  ;;  %v5868_v3 = vpop.f32.mrb[160].mxu1  ;;  %v14607_v18 = vadd.f32 %v6006_v53, %v14457_v13 }
 0x978   :  { %v10664_v40 = vpop.f32.mrb[161].mxu1  ;;  %v14594_v39 = vadd.f32 %v5868_v3, %v14501_v20 }
 0x979   :  { %v5871_v36 = vpop.f32.mrb[162].mxu1  ;;  %v6239_v13 = vsel %vm2189_vm3, %v14607_v18, -inf }
 0x97a   :  { %v14597_v61 = vadd.f32 %v5871_v36, %v14503_v58  ;;  %v10665_v54 = vpop.f32.mrb[163].mxu1  ;;  %v6221_v3 = vsel %vm2189_vm3, %v14594_v39, -inf }
 0x97b   :  { %6210 = vmax.xlane.f32.xlu0 %v6209_v51  ;;  %v6242_v54 = vsel %vm2189_vm3, %v14602_v15, -inf }
 0x97c   :  { %v6224_v14 = vsel %vm2189_vm3, %v14597_v61, -inf }
 0x97d   :  { %6225 = vmax.xlane.f32.xlu1 %v6224_v14 }
 0x97f   :  { %6222 = vmax.xlane.f32.xlu0 %v6221_v3  ;;  %v5960_v40 = vpop.f32.mrb[164].mxu1 }
 0x980   :  { %v10676_v36 = vpop.f32.mrb[165].mxu1  ;;  %v14614_v8 = vadd.f32 %v5960_v40, %v14521_v23  ;;  %v6254_v40 = vsel %vm2189_vm3, %v14574_v37, -inf }
 0x981   :  { %6243 = vmax.xlane.f32.xlu1 %v6242_v54  ;;  %v5963_v51 = vpop.f32.mrb[166].mxu1 }
 0x982   :  { %v14617_v46 = vadd.f32 %v5963_v51, %v14525_v59  ;;  %v10677_v14 = vpop.f32.mrb[167].mxu1  ;;  %v6233_v3 = vsel %vm2189_vm3, %v14614_v8, -inf }
 0x983   :  { %6240 = vmax.xlane.f32.xlu0 %v6239_v13 }
 0x984   :  { %v6236_v53 = vsel %vm2189_vm3, %v14617_v46, -inf }
 0x985   :  { %6237 = vmax.xlane.f32.xlu1 %v6236_v53  ;;  %v6251_v53 = vsel %vm2189_vm3, %v14569_v47, -inf }
 0x987   :  { %6234 = vmax.xlane.f32.xlu0 %v6233_v3  ;;  %v6052_v36 = vpop.f32.mrb[168].mxu1 }
 0x988   :  { %v10688_v54 = vpop.f32.mrb[169].mxu1  ;;  %v14628_v14 = vadd.f32 %v6052_v36, %v14501_v20 }
 0x989   :  { %6255 = vmax.xlane.f32.xlu1 %v6254_v40  ;;  %v6055_v51 = vpop.f32.mrb[170].mxu1 }
 0x98a   :  { %v14631_v13 = vadd.f32 %v6055_v51, %v14503_v58  ;;  %v10689_v28 = vpop.f32.mrb[171].mxu1  ;;  %v6245_v54 = vsel %vm2189_vm3, %v14628_v14, -inf }
 0x98b   :  { %6252 = vmax.xlane.f32.xlu0 %v6251_v53 }
 0x98c   :  { %v6248_v3 = vsel %vm2189_vm3, %v14631_v13, -inf }
 0x98d   :  { %6249 = vmax.xlane.f32.xlu1 %v6248_v3  ;;  %v16149_v3 = vld [vmem:[#allocation69_spill] sm:$0xff] }
 0x98f   :  { %6246 = vmax.xlane.f32.xlu0 %v6245_v54  ;;  %v6144_v40 = vpop.f32.mrb[172].mxu1  ;;  %v14653_v54 = vpop.permute.xlu1 %6645 }
 0x990   :  { %v14640_v20 = vadd.f32 %v6144_v40, %v14521_v23  ;;  %v10700_v36 = vpop.f32.mrb[173].mxu1  ;;  %16151 = vst [vmem:[#allocation85_spill] sm:$0xff] %v14653_v54 }
 0x991   :  { %v6147_v58 = vpop.f32.mrb[174].mxu1 }
 0x992   :  { %v14643_v28 = vadd.f32 %v6147_v58, %v14525_v59  ;;  %v10701_v51 = vpop.f32.mrb[175].mxu1  ;;  %v6257_v53 = vsel %vm2189_vm3, %v14640_v20, -inf }
 0x993   :  { %6258 = vmax.xlane.f32.xlu0 %v6257_v53  ;;  %v14655_v40 = vpop.permute.xlu1 %6692 }
 0x994   :  { %v6260_v23 = vsel %vm2189_vm3, %v14643_v28, -inf  ;;  %16152 = vst [vmem:[#allocation86_spill] sm:$0xff] %v14655_v40 }
 0x99e   :  { %6786 = vrot.lane.b32.xlu1 %v16149_v3, %s11967_s15 }
 0x9a9   :  { %6739 = vrot.lane.b32.xlu0 %v16150_v30, %s11967_s15  ;;  %v6169_v59 = vpop.xlane.xlu0 %6168 }
 0x9ab   :  { %v6172_v36 = vpop.xlane.xlu1 %6171 }
 0x9c2   :  { %6261 = vmax.xlane.f32.xlu1 %v6260_v23 }
 0x9ce   :  { %v6181_v58 = vpop.xlane.xlu0 %6180 }
 0x9d0   :  { %v6184_v51 = vpop.xlane.xlu1 %6183 }
 0x9e8   :  { %v6175_v49 = vpop.xlane.xlu0 %6174 }
 0x9ea   :  { %v6178_v53 = vpop.xlane.xlu1 %6177 }
 0x9ec   :  { %v14657_v27 = vpop.xlane.xlu0 %6192 }
 0x9ee   :  { %v6196_v3 = vpop.xlane.xlu1 %6195 }
 0x9f0   :  { %v14659_v52 = vpop.xlane.xlu0 %6186 }
 0x9f2   :  { %v14661_v30 = vpop.xlane.xlu1 %6189 }
 0x9f4   :  { %v14663_v21 = vpop.xlane.xlu0 %6204 }
 0x9f6   :  { %v14665_v23 = vpop.xlane.xlu1 %6207 }
 0x9f8   :  { %v6217_v0 = vpop.xlane.xlu0 %6216 }
 0x9f9   :  { %v6263_v26 = vmax.f32 %v6169_v59, %v6217_v0 }
 0x9fa   :  { %v14667_v40 = vpop.xlane.xlu1 %6201 }
 0x9fb   :  { %v6279_v7 = vsub.f32 %v14462_v24, %v6263_v26  ;;  %v6327_v60 = vsub.f32 %v14546_v41, %v6263_v26 }
 0x9fc   :  { %v14671_v54 = vpop.xlane.xlu0 %6198 }
 0x9fd   :  { %v6295_v34 = vmul.f32 1.442695, %v6279_v7  ;;  %v6343_v50 = vmul.f32 1.442695, %v6327_v60 }
 0x9fe   :  { %v6232_v2 = vpop.xlane.xlu1 %6231 }
 0x9ff   :  { %11431 = vpow2.f32 %v6295_v34  ;;  %v6268_v6 = vmax.f32 %v6184_v51, %v6232_v2 }
 0xa00   :  { %v6220_v42 = vpop.xlane.xlu0 %6219  ;;  %11433 = vpow2.f32 %v6343_v50 }
 0xa01   :  { %v6264_v32 = vmax.f32 %v6172_v36, %v6220_v42  ;;  %v6284_v29 = vsub.f32 %v14485_v38, %v6268_v6  ;;  %v6332_v42 = vsub.f32 %v14561_v17, %v6268_v6 }
 0xa02   :  { %v14676_v33 = vpop.xlane.xlu1 %6213 }
 0xa03   :  { %v6280_v0 = vsub.f32 %v14465_v25, %v6264_v32  ;;  %v6328_v59 = vsub.f32 %v14566_v9, %v6264_v32  ;;  %v6305_v41 = vmul.f32 1.442695, %v6284_v29  ;;  %v6353_v38 = vmul.f32 1.442695, %v6332_v42 }
 0xa04   :  { %v6229_v45 = vpop.xlane.xlu0 %6228 }
 0xa05   :  { %v6297_v24 = vmul.f32 1.442695, %v6280_v0  ;;  %v6345_v19 = vmul.f32 1.442695, %v6328_v59  ;;  %v6267_v26 = vmax.f32 %v6181_v58, %v6229_v45 }
 0xa07   :  { %11435 = vpow2.f32 %v6297_v24  ;;  %v6283_v34 = vsub.f32 %v14480_v44, %v6267_v26  ;;  %v6331_v2 = vsub.f32 %v14579_v48, %v6267_v26 }
 0xa08   :  { %v14681_v50 = vpop.xlane.xlu0 %6210  ;;  %11437 = vpow2.f32 %v6345_v19 }
 0xa09   :  { %v14683_v60 = vpop.eup %11431  ;;  %v6303_v32 = vmul.f32 1.442695, %v6283_v34  ;;  %v6351_v7 = vmul.f32 1.442695, %v6331_v2  ;;  %11439 = vpow2.f32 %v6305_v41 }
 0xa0a   :  { %v6226_v25 = vpop.xlane.xlu1 %6225  ;;  %v6375_v45 = vsel %vm2189_vm3, %v14683_v60, 0.0  ;;  %v14687_v29 = vpop.eup %11433 }
 0xa0b   :  { %11441 = vpow2.f32 %v6303_v32  ;;  %v6266_v44 = vmax.f32 %v6178_v53, %v6226_v25  ;;  %6376 = vadd.xlane.f32.xlu0 %v6375_v45  ;;  %v6423_v19 = vsel %vm2189_vm3, %v14687_v29, 0.0 }
 0xa0c   :  { %v6223_v9 = vpop.xlane.xlu0 %6222  ;;  %11443 = vpow2.f32 %v6351_v7 }
 0xa0d   :  { %v6282_v6 = vsub.f32 %v14512_v4, %v6266_v44  ;;  %v6265_v17 = vmax.f32 %v6175_v49, %v6223_v9  ;;  %11445 = vpow2.f32 %v6353_v38  ;;  %v6330_v53 = vsub.f32 %v14597_v61, %v6266_v44 }
 0xa0e   :  { %v6244_v48 = vpop.xlane.xlu1 %6243 }
 0xa0f   :  { %v6281_v36 = vsub.f32 %v14506_v16, %v6265_v17  ;;  %v6329_v58 = vsub.f32 %v14594_v39, %v6265_v17  ;;  %6424 = vadd.xlane.f32.xlu0 %v6423_v19  ;;  %v6301_v51 = vmul.f32 1.442695, %v6282_v6  ;;  %v6272_v4 = vmax.f32 %v6196_v3, %v6244_v48 }
 0xa10   :  { %v6241_v0 = vpop.xlane.xlu0 %6240  ;;  %v6349_v42 = vmul.f32 1.442695, %v6330_v53 }
 0xa11   :  { %v14695_v59 = vpop.eup %11435  ;;  %v6299_v24 = vmul.f32 1.442695, %v6281_v36  ;;  %v6347_v26 = vmul.f32 1.442695, %v6329_v58  ;;  %v6271_v49 = vmax.f32 %v14657_v27, %v6241_v0  ;;  %v6288_v3 = vsub.f32 %v14517_v5, %v6272_v4 }
 0xa12   :  { %v6378_v41 = vsel %vm2189_vm3, %v14695_v59, 0.0  ;;  %v14700_v34 = vpop.eup %11437  ;;  %v6238_v7 = vpop.xlane.xlu1 %6237 }
 0xa13   :  { %11447 = vpow2.f32 %v6299_v24  ;;  %v6287_v16 = vsub.f32 %v14509_v22, %v6271_v49  ;;  %6379 = vadd.xlane.f32.xlu1 %v6378_v41  ;;  %v14703_v39 = vpop.eup %11439  ;;  %v6335_v27 = vsub.f32 %v14607_v18, %v6271_v49  ;;  %v6426_v45 = vsel %vm2189_vm3, %v14700_v34, 0.0 }
 0xa14   :  { %11449 = vpow2.f32 %v6301_v51  ;;  %v6235_v61 = vpop.xlane.xlu0 %6234  ;;  %v6390_v38 = vsel %vm2189_vm3, %v14703_v39, 0.0  ;;  %v6313_v5 = vmul.f32 1.442695, %v6288_v3  ;;  %v6336_v18 = vsub.f32 %v14602_v15, %v6272_v4 }
 0xa15   :  { %v14705_v2 = vpop.eup %11441  ;;  %11451 = vpow2.f32 %v6347_v26  ;;  %v6311_v32 = vmul.f32 1.442695, %v6287_v16  ;;  %v6269_v25 = vmax.f32 %v14659_v52, %v6235_v61  ;;  %v6270_v9 = vmax.f32 %v14661_v30, %v6238_v7 }
 0xa16   :  { %v6387_v22 = vsel %vm2189_vm3, %v14705_v2, 0.0  ;;  %v14714_v44 = vpop.eup %11443  ;;  %11453 = vpow2.f32 %v6349_v42  ;;  %v6359_v6 = vmul.f32 1.442695, %v6335_v27  ;;  %v6361_v58 = vmul.f32 1.442695, %v6336_v18  ;;  %v6256_v0 = vpop.xlane.xlu1 %6255 }
 0xa17   :  { %6388 = vadd.xlane.f32.xlu0 %v6387_v22  ;;  %6427 = vadd.xlane.f32.xlu1 %v6426_v45  ;;  %v14720_v52 = vpop.eup %11445  ;;  %11455 = vpow2.f32 %v6311_v32  ;;  %v6285_v17 = vsub.f32 %v14528_v11, %v6269_v25  ;;  %v6435_v48 = vsel %vm2189_vm3, %v14714_v44, 0.0  ;;  %v6286_v15 = vsub.f32 %v14536_v1, %v6270_v9 }
 0xa18   :  { %v6253_v19 = vpop.xlane.xlu0 %6252  ;;  %11457 = vpow2.f32 %v6313_v5  ;;  %v6438_v30 = vsel %vm2189_vm3, %v14720_v52, 0.0  ;;  %v6333_v11 = vsub.f32 %v14614_v8, %v6269_v25  ;;  %v6334_v49 = vsub.f32 %v14617_v46, %v6270_v9 }
 0xa19   :  { %11459 = vpow2.f32 %v6359_v6  ;;  %v6307_v53 = vmul.f32 1.442695, %v6285_v17  ;;  %v6275_v24 = vmax.f32 %v14663_v21, %v6253_v19  ;;  %v6309_v1 = vmul.f32 1.442695, %v6286_v15 }
 0xa1a   :  { %11461 = vpow2.f32 %v6361_v58  ;;  %v6276_v41 = vmax.f32 %v14665_v23, %v6256_v0  ;;  %v6355_v16 = vmul.f32 1.442695, %v6333_v11  ;;  %v6357_v46 = vmul.f32 1.442695, %v6334_v49  ;;  %v6250_v7 = vpop.xlane.xlu1 %6249 }
 0xa1b   :  { %6436 = vadd.xlane.f32.xlu0 %v6435_v48  ;;  %6391 = vadd.xlane.f32.xlu1 %v6390_v38  ;;  %11463 = vpow2.f32 %v6307_v53  ;;  %v6291_v8 = vsub.f32 %v14533_v31, %v6275_v24  ;;  %v6339_v32 = vsub.f32 %v14569_v47, %v6275_v24  ;;  %v6274_v18 = vmax.f32 %v14667_v40, %v6250_v7 }
 0xa1c   :  { %v6247_v42 = vpop.xlane.xlu0 %6246  ;;  %11465 = vpow2.f32 %v6309_v1  ;;  %v6292_v23 = vsub.f32 %v14541_v57, %v6276_v41  ;;  %v6340_v47 = vsub.f32 %v14574_v37, %v6276_v41 }
 0xa1d   :  { %v14725_v36 = vpop.eup %11447  ;;  %11467 = vpow2.f32 %v6355_v16  ;;  %v6319_v31 = vmul.f32 1.442695, %v6291_v8  ;;  %v6273_v25 = vmax.f32 %v14671_v54, %v6247_v42  ;;  %v6367_v54 = vmul.f32 1.442695, %v6339_v32 }
 0xa1e   :  { %v14730_v51 = vpop.eup %11449  ;;  %v6381_v4 = vsel %vm2189_vm3, %v14725_v36, 0.0  ;;  %11469 = vpow2.f32 %v6357_v46  ;;  %v6321_v57 = vmul.f32 1.442695, %v6292_v23  ;;  %v6369_v37 = vmul.f32 1.442695, %v6340_v47 }
 0xa1f   :  { %v14734_v26 = vpop.eup %11451  ;;  %6439 = vadd.xlane.f32.xlu1 %v6438_v30  ;;  %6382 = vadd.xlane.f32.xlu0 %v6381_v4  ;;  %v6384_v21 = vsel %vm2189_vm3, %v14730_v51, 0.0  ;;  %11471 = vpow2.f32 %v6319_v31  ;;  %v6289_v9 = vsub.f32 %v14553_v56, %v6273_v25  ;;  %v6290_v40 = vsub.f32 %v14556_v43, %v6274_v18 }
 0xa20   :  { %v14743_v61 = vpop.eup %11453  ;;  %v6429_v3 = vsel %vm2189_vm3, %v14734_v26, 0.0  ;;  %v6259_v48 = vpop.xlane.xlu0 %6258  ;;  %11473 = vpow2.f32 %v6321_v57  ;;  %v6337_v15 = vsub.f32 %v14628_v14, %v6273_v25  ;;  %v6338_v14 = vsub.f32 %v14631_v13, %v6274_v18 }
 0xa21   :  { %v14747_v27 = vpop.eup %11455  ;;  %v6432_v22 = vsel %vm2189_vm3, %v14743_v61, 0.0  ;;  %11475 = vpow2.f32 %v6367_v54  ;;  %v6315_v56 = vmul.f32 1.442695, %v6289_v9  ;;  %v6277_v30 = vmax.f32 %v14681_v50, %v6259_v48 }
 0xa22   :  { %v14754_v45 = vpop.eup %11457  ;;  %v6399_v38 = vsel %vm2189_vm3, %v14747_v27, 0.0  ;;  %11477 = vpow2.f32 %v6369_v37  ;;  %v6317_v43 = vmul.f32 1.442695, %v6290_v40  ;;  %v6363_v4 = vmul.f32 1.442695, %v6337_v15  ;;  %v14835_v40 = vpop.permute.xlu1 %6786 }
 0xa23   :  { %6385 = vadd.xlane.f32.xlu1 %v6384_v21  ;;  %6430 = vadd.xlane.f32.xlu0 %v6429_v3  ;;  %v14758_v5 = vpop.eup %11459  ;;  %v6402_v6 = vsel %vm2189_vm3, %v14754_v45, 0.0  ;;  %11479 = vpow2.f32 %v6315_v56  ;;  %v6293_v50 = vsub.f32 %v14589_v55, %v6277_v30  ;;  %v6365_v8 = vmul.f32 1.442695, %v6338_v14  ;;  %v16153_v14 = vld [vmem:[#allocation63_spill] sm:$0xff] }
 0xa24   :  { %v14765_v17 = vpop.eup %11461  ;;  %v6447_v19 = vsel %vm2189_vm3, %v14758_v5, 0.0  ;;  %11481 = vpow2.f32 %v6317_v43  ;;  %v6341_v21 = vsub.f32 %v14640_v20, %v6277_v30 }
 0xa25   :  { %v14769_v58 = vpop.eup %11463  ;;  %v6450_v53 = vsel %vm2189_vm3, %v14765_v17, 0.0  ;;  %11483 = vpow2.f32 %v6363_v4  ;;  %v6323_v13 = vmul.f32 1.442695, %v6293_v50 }
 0xa26   :  { %v14776_v11 = vpop.eup %11465  ;;  %v6393_v0 = vsel %vm2189_vm3, %v14769_v58, 0.0  ;;  %11485 = vpow2.f32 %v6365_v8  ;;  %v6371_v23 = vmul.f32 1.442695, %v6341_v21  ;;  %v16159_v21 = vld [vmem:[#allocation41_spill] sm:$0xff] }
 0xa27   :  { %6433 = vadd.xlane.f32.xlu1 %v6432_v22  ;;  %6400 = vadd.xlane.f32.xlu0 %v6399_v38  ;;  %v14780_v24 = vpop.eup %11467  ;;  %v6396_v1 = vsel %vm2189_vm3, %v14776_v11, 0.0  ;;  %11487 = vpow2.f32 %v6323_v13  ;;  %v16158_v13 = vld [vmem:[#allocation43_spill] sm:$0xff] }
 0xa28   :  { %v14786_v49 = vpop.eup %11469  ;;  %v6441_v41 = vsel %vm2189_vm3, %v14780_v24, 0.0  ;;  %11489 = vpow2.f32 %v6371_v23  ;;  %v16162_v23 = vld [vmem:[#allocation54_spill] sm:$0xff] }
 0xa29   :  { %v14790_v16 = vpop.eup %11471  ;;  %v6444_v55 = vsel %vm2189_vm3, %v14786_v49, 0.0 }
 0xa2a   :  { %v14795_v42 = vpop.eup %11473  ;;  %v6411_v3 = vsel %vm2189_vm3, %v14790_v16, 0.0 }
 0xa2b   :  { %6403 = vadd.xlane.f32.xlu1 %v6402_v6  ;;  %6448 = vadd.xlane.f32.xlu0 %v6447_v19  ;;  %v14799_v46 = vpop.eup %11475  ;;  %v6414_v32 = vsel %vm2189_vm3, %v14795_v42, 0.0 }
 0xa2c   :  { %v14803_v31 = vpop.eup %11477  ;;  %v6459_v20 = vsel %vm2189_vm3, %v14799_v46, 0.0 }
 0xa2d   :  { %v14807_v7 = vpop.eup %11479  ;;  %v6462_v25 = vsel %vm2189_vm3, %v14803_v31, 0.0 }
 0xa2e   :  { %v14811_v22 = vpop.eup %11481  ;;  %v6405_v38 = vsel %vm2189_vm3, %v14807_v7, 0.0 }
 0xa2f   :  { %6451 = vadd.xlane.f32.xlu1 %v6450_v53  ;;  %6394 = vadd.xlane.f32.xlu0 %v6393_v0  ;;  %v14815_v57 = vpop.eup %11483  ;;  %v6408_v47 = vsel %vm2189_vm3, %v14811_v22, 0.0 }
 0xa30   :  { %v14819_v18 = vpop.eup %11485  ;;  %v6453_v54 = vsel %vm2189_vm3, %v14815_v57, 0.0 }
 0xa31   :  { %v14823_v9 = vpop.eup %11487  ;;  %v6456_v6 = vsel %vm2189_vm3, %v14819_v18, 0.0 }
 0xa32   :  { %v6417_v48 = vsel %vm2189_vm3, %v14823_v9, 0.0  ;;  %v14829_v19 = vpop.eup %11489 }
 0xa33   :  { %6397 = vadd.xlane.f32.xlu1 %v6396_v1  ;;  %6442 = vadd.xlane.f32.xlu0 %v6441_v41  ;;  %v6465_v37 = vsel %vm2189_vm3, %v14829_v19, 0.0  ;;  %v16157_v41 = vld [vmem:[#allocation37_spill] sm:$0xff] }
 0xa37   :  { %6445 = vadd.xlane.f32.xlu1 %v6444_v55  ;;  %6412 = vadd.xlane.f32.xlu0 %v6411_v3  ;;  %v16160_v55 = vld [vmem:[#allocation34_spill] sm:$0xff]  ;;  %v16161_v3 = vld [vmem:[#allocation33_spill] sm:$0xff] }
 0xa3b   :  { %6415 = vadd.xlane.f32.xlu1 %v6414_v32  ;;  %6460 = vadd.xlane.f32.xlu0 %v6459_v20  ;;  %v16163_v32 = vld [vmem:[#allocation36_spill] sm:$0xff]  ;;  %v14876_v20 = vpop.permute.xlu0 %6739 }
 0xa3f   :  { %6463 = vadd.xlane.f32.xlu1 %v6462_v25  ;;  %6406 = vadd.xlane.f32.xlu0 %v6405_v38  ;;  %v16164_v25 = vld [vmem:[#allocation58_spill] sm:$0xff]  ;;  %v16165_v38 = vld [vmem:[#allocation35_spill] sm:$0xff] }
 0xa43   :  { %6409 = vadd.xlane.f32.xlu1 %v6408_v47  ;;  %6454 = vadd.xlane.f32.xlu0 %v6453_v54  ;;  %v16166_v54 = vld [vmem:[#allocation61_spill] sm:$0xff] }
 0xa47   :  { %6457 = vadd.xlane.f32.xlu1 %v6456_v6  ;;  %6418 = vadd.xlane.f32.xlu0 %v6417_v48  ;;  %v16167_v6 = vld [vmem:[#allocation52_spill] sm:$0xff]  ;;  %v16168_v48 = vld [vmem:[#allocation65_spill] sm:$0xff] }
 0xa4b   :  { %6466 = vadd.xlane.f32.xlu0 %v6465_v37 }
 0xa4f   :  { %v6262_v15 = vpop.xlane.xlu1 %6261 }
 0xa50   :  { %v6278_v56 = vmax.f32 %v14676_v33, %v6262_v15  ;;  %v16154_v33 = vld [vmem:[#allocation67_spill] sm:$0xff] }
 0xa51   :  { %v16169_v15 = vld [vmem:[#allocation55_spill] sm:$0xff] }
 0xa52   :  { %v6294_v30 = vsub.f32 %v14582_v10, %v6278_v56  ;;  %v6342_v0 = vsub.f32 %v14643_v28, %v6278_v56  ;;  %v16155_v10 = vld [vmem:[#allocation40_spill] sm:$0xff]  ;;  %v16156_v28 = vld [vmem:[#allocation39_spill] sm:$0xff] }
 0xa54   :  { %v6325_v53 = vmul.f32 1.442695, %v6294_v30  ;;  %v6373_v43 = vmul.f32 1.442695, %v6342_v0  ;;  %v16171_v0 = vld [vmem:[#allocation59_spill] sm:$0xff] }
 0xa56   :  { %11491 = vpow2.f32 %v6325_v53  ;;  %v16170_v53 = vld [vmem:[#allocation38_spill] sm:$0xff] }
 0xa57   :  { %11493 = vpow2.f32 %v6373_v43 }
 0xa58   :  { %6880 = vrot.lane.b32.xlu1 %v16087_v35, %s11967_s15 }
 0xa60   :  { %v14852_v4 = vpop.eup %11491 }
 0xa61   :  { %6833 = vrot.lane.b32.xlu0 %v16084_v63, %s11967_s15  ;;  %v6420_v50 = vsel %vm2189_vm3, %v14852_v4, 0.0  ;;  %v14858_v1 = vpop.eup %11493 }
 0xa62   :  { %v6468_v8 = vsel %vm2189_vm3, %v14858_v1, 0.0 }
 0xa65   :  { %6927 = vrot.lane.b32.xlu0 %v16086_v62, %s11967_s15 }
 0xa69   :  { %7021 = vrot.lane.b32.xlu0 %v16088_v12, %s11967_s15 }
 0xa6d   :  { %7115 = vrot.lane.b32.xlu0 %v16153_v14, %s11967_s15 }
 0xa71   :  { %7209 = vrot.lane.b32.xlu0 %v16154_v33, %s11967_s15 }
 0xa75   :  { %7386 = vrot.lane.b32.xlu0 %v16155_v10, %s11968_s1 }
 0xa79   :  { %7384 = vrot.lane.b32.xlu0 %v16156_v28, %s11968_s1 }
 0xa7c   :  { %6421 = vadd.xlane.f32.xlu1 %v6420_v50  ;;  %v16172_v50 = vld [vmem:[#allocation44_spill] sm:$0xff] }
 0xa7d   :  { %7435 = vrot.lane.b32.xlu0 %v16157_v41, %s11968_s1  ;;  %v16173_v41 = vld [vmem:[#allocation64_spill] sm:$0xff] }
 0xa80   :  { %6469 = vadd.xlane.f32.xlu1 %v6468_v8 }
 0xa81   :  { %7486 = vrot.lane.b32.xlu0 %v16158_v13, %s11968_s1 }
 0xa85   :  { %7537 = vrot.lane.b32.xlu0 %v16159_v21, %s11968_s1 }
 0xa89   :  { %7588 = vrot.lane.b32.xlu0 %v16160_v55, %s11968_s1  ;;  %v16174_v55 = vld [vmem:[#allocation42_spill] sm:$0xff] }
 0xa8d   :  { %7639 = vrot.lane.b32.xlu0 %v16161_v3, %s11968_s1 }
 0xa91   :  { %6974 = vrot.lane.b32.xlu1 %v16162_v23, %s11967_s15  ;;  %7690 = vrot.lane.b32.xlu0 %v16163_v32, %s11968_s1 }
 0xa95   :  { %7068 = vrot.lane.b32.xlu1 %v16164_v25, %s11967_s15  ;;  %7741 = vrot.lane.b32.xlu0 %v16165_v38, %s11968_s1 }
 0xa98   :  { %v6377_v47 = vpop.xlane.xlu0 %6376 }
 0xa99   :  { %7162 = vrot.lane.b32.xlu1 %v16166_v54, %s11967_s15  ;;  %7900 = vrot.lane.b32.xlu0 %v16167_v6, %s11968_s1 }
 0xa9c   :  { %v6425_v37 = vpop.xlane.xlu0 %6424 }
 0xa9d   :  { %7256 = vrot.lane.b32.xlu1 %v16168_v48, %s11967_s15  ;;  %7992 = vrot.lane.b32.xlu0 %v16169_v15, %s11968_s1  ;;  %v6471_v30 = vadd.f32 %v6425_v37, %v6377_v47  ;;  %v16175_v47 = vld [vmem:[#allocation47_spill] sm:$0xff] }
 0xa9f   :  { %11495 = vrcp.f32 %v6471_v30  ;;  %v16176_v30 = vld [vmem:[#allocation45_spill] sm:$0xff] }
 0xaa0   :  { %v6380_v56 = vpop.xlane.xlu1 %6379 }
 0xaa1   :  { %7437 = vrot.lane.b32.xlu1 %v16170_v53, %s11968_s1  ;;  %8084 = vrot.lane.b32.xlu0 %v16171_v0, %s11968_s1 }
 0xaa4   :  { %v6389_v43 = vpop.xlane.xlu0 %6388  ;;  %v6428_v10 = vpop.xlane.xlu1 %6427 }
 0xaa5   :  { %v6472_v28 = vadd.f32 %v6428_v10, %v6380_v56  ;;  %7488 = vrot.lane.b32.xlu1 %v16172_v50, %s11968_s1  ;;  %8576 = vrot.lane.b32.xlu0 %v16173_v41, %s11968_s1 }
 0xaa7   :  { %11497 = vrcp.f32 %v6472_v28 }
 0xaa8   :  { %v6437_v8 = vpop.xlane.xlu0 %6436  ;;  %v6392_v13 = vpop.xlane.xlu1 %6391 }
 0xaa9   :  { %v6475_v21 = vadd.f32 %v6437_v8, %v6389_v43  ;;  %7539 = vrot.lane.b32.xlu1 %v16174_v55, %s11968_s1  ;;  %v14902_v6 = vpop.eup %11495  ;;  %v16177_v8 = vld [vmem:[#allocation51_spill] sm:$0xff] }
 0xaaa   :  { %v6527_v53 = vmul.f32 %v14902_v6, %v14687_v29  ;;  %v16179_v29 = vmov 0.0  }
 0xaab   :  { %11499 = vrcp.f32 %v6475_v21  ;;  %v16178_v21 = vld [vmem:[#allocation85_spill] sm:$0xff] }
 0xaac   :  { %v6440_v3 = vpop.xlane.xlu1 %6439  ;;  %v6383_v32 = vpop.xlane.xlu0 %6382 }
 0xaad   :  { %v6476_v38 = vadd.f32 %v6440_v3, %v6392_v13  ;;  %7590 = vrot.lane.b32.xlu1 %v16175_v47, %s11968_s1 }
 0xaaf   :  { %11501 = vrcp.f32 %v6476_v38 }
 0xab0   :  { %v6386_v37 = vpop.xlane.xlu1 %6385  ;;  %v6431_v56 = vpop.xlane.xlu0 %6430 }
 0xab1   :  { %v14904_v15 = vpop.eup %11497  ;;  %7641 = vrot.lane.b32.xlu1 %v16176_v30, %s11968_s1  ;;  %v6473_v43 = vadd.f32 %v6431_v56, %v6383_v32  ;;  %v16180_v32 = vld [vmem:[#allocation49_spill] sm:$0xff] }
 0xab2   :  { %v6528_v0 = vmul.f32 %v14904_v15, %v14700_v34 }
 0xab3   :  { %11503 = vrcp.f32 %v6473_v43  ;;  %v16181_v43 = vld [vmem:[#allocation48_spill] sm:$0xff] }
 0xab4   :  { %v6434_v10 = vpop.xlane.xlu1 %6433  ;;  %v6543_v28 = vpack.c.bf16 %v6528_v0, %v6527_v53  ;;  %v6401_v50 = vpop.xlane.xlu0 %6400 }
 0xab5   :  { %v6474_v41 = vadd.f32 %v6434_v10, %v6386_v37  ;;  %7692 = vrot.lane.b32.xlu1 %v16177_v8, %s11968_s1  ;;  %v14915_v13 = vpop.eup %11499 }
 0xab6   :  { %10705 = vmatmul.mubr.msk.bf16.vlgmr.msra.gmra.mrb[160].mxu0 %vm2189_vm3, %v6543_v28  ;;  %v6531_v38 = vmul.f32 %v14915_v13, %v14714_v44 }
 0xab7   :  { %11505 = vrcp.f32 %v6474_v41  ;;  %10715 = vmatpush3.bf16.msra.mxu0 %v16178_v21  ;;  %10716 = vmatprep.mubr.msk.bf16.mxu0 %vm11965_vm1, %v16179_v29  ;;  %v16182_v41 = vld [vmem:[#allocation46_spill] sm:$0xff] }
 0xab8   :  { %v6404_v34 = vpop.xlane.xlu1 %6403  ;;  %10726 = vmatprep.subr.bf16.mxu0 %v16179_v29  ;;  %v6449_v3 = vpop.xlane.xlu0 %6448 }
 0xab9   :  { %v14921_v55 = vpop.eup %11501  ;;  %7743 = vrot.lane.b32.xlu1 %v16180_v32, %s11968_s1  ;;  %v6479_v37 = vadd.f32 %v6449_v3, %v6401_v50 }
 0xaba   :  { %v6532_v47 = vmul.f32 %v14921_v55, %v14720_v52 }
 0xabb   :  { %11507 = vrcp.f32 %v6479_v37  ;;  %v16183_v37 = vld [vmem:[#allocation50_spill] sm:$0xff] }
 0xabc   :  { %v6452_v56 = vpop.xlane.xlu1 %6451  ;;  %v6545_v30 = vpack.c.bf16 %v6532_v47, %v6531_v38  ;;  %v6395_v53 = vpop.xlane.xlu0 %6394 }
 0xabd   :  { %v6480_v0 = vadd.f32 %v6452_v56, %v6404_v34  ;;  %7808 = vrot.lane.b32.xlu1 %v16181_v43, %s11968_s1  ;;  %v11504_v10 = vpop.eup %11503 }
 0xabe   :  { %10717 = vmatmul.mubr.msk.bf16.vlgmr.msra.gmra.mrb[164].mxu0 %vm2189_vm3, %v6545_v30  ;;  %v14937_v28 = vmul.f32 %v11504_v10, %v14725_v36  ;;  %v6529_v8 = vmul.f32 %v11504_v10, %v14734_v26 }
 0xabf   :  { %11509 = vrcp.f32 %v6480_v0  ;;  %10727 = vmatpush3.bf16.msra.mxu0 %v14876_v20  ;;  %10728 = vmatprep.mubr.msk.bf16.mxu0 %vm11965_vm1, %v16179_v29 }
 0xac0   :  { %v6398_v44 = vpop.xlane.xlu1 %6397  ;;  %10738 = vmatprep.subr.bf16.mxu0 %v16179_v29  ;;  %v6443_v50 = vpop.xlane.xlu0 %6442 }
 0xac1   :  { %v11506_v52 = vpop.eup %11505  ;;  %7854 = vrot.lane.b32.xlu1 %v16182_v41, %s11968_s1  ;;  %v6477_v34 = vadd.f32 %v6443_v50, %v6395_v53  ;;  %v16185_v53 = vld [vmem:[#allocation53_spill] sm:$0xff] }
 0xac2   :  { %v14943_v21 = vmul.f32 %v11506_v52, %v14730_v51  ;;  %v6530_v20 = vmul.f32 %v11506_v52, %v14743_v61  ;;  %v16184_v51 = vld [vmem:[#allocation86_spill] sm:$0xff] }
 0xac3   :  { %11511 = vrcp.f32 %v6477_v34 }
 0xac4   :  { %v6446_v3 = vpop.xlane.xlu1 %6445  ;;  %v6544_v32 = vpack.c.bf16 %v6530_v20, %v6529_v8  ;;  %v6520_v38 = vpack.c.bf16 %v14943_v21, %v14937_v28  ;;  %v6413_v36 = vpop.xlane.xlu0 %6412  ;;  %v16186_v8 = vld [vmem:[#allocation57_spill] sm:$0xff] }
 0xac5   :  { %v6478_v47 = vadd.f32 %v6446_v3, %v6398_v44  ;;  %7946 = vrot.lane.b32.xlu1 %v16183_v37, %s11968_s1  ;;  %v14951_v26 = vpop.eup %11507 }
 0xac6   :  { %10711 = vmatmul.mubr.msk.bf16.vlgmr.msra.gmra.mrb[176].mxu1 %vm2189_vm3, %v6544_v32  ;;  %v6535_v0 = vmul.f32 %v14951_v26, %v14758_v5  ;;  %v16187_v32 = vld [vmem:[#allocation62_spill] sm:$0xff] }
 0xac7   :  { %11513 = vrcp.f32 %v6478_v47  ;;  %10721 = vmatpush3.bf16.msra.mxu1 %v16184_v51  ;;  %10722 = vmatprep.mubr.msk.bf16.mxu1 %vm11965_vm1, %v16179_v29 }
 0xac8   :  { %v6416_v61 = vpop.xlane.xlu1 %6415  ;;  %10732 = vmatprep.subr.bf16.mxu1 %v16179_v29  ;;  %v6461_v30 = vpop.xlane.xlu0 %6460 }
 0xac9   :  { %v14957_v56 = vpop.eup %11509  ;;  %8038 = vrot.lane.b32.xlu1 %v16185_v53, %s11968_s1  ;;  %v6483_v10 = vadd.f32 %v6461_v30, %v6413_v36 }
 0xaca   :  { %v6536_v43 = vmul.f32 %v14957_v56, %v14765_v17 }
 0xacc   :  { %v6464_v44 = vpop.xlane.xlu1 %6463  ;;  %v6547_v52 = vpack.c.bf16 %v6536_v43, %v6535_v0  ;;  %v6407_v50 = vpop.xlane.xlu0 %6406  ;;  %v16188_v43 = vld [vmem:[#allocation68_spill] sm:$0xff] }
 0xacd   :  { %v6484_v41 = vadd.f32 %v6464_v44, %v6416_v61  ;;  %8130 = vrot.lane.b32.xlu1 %v16186_v8, %s11968_s1  ;;  %v11512_v20 = vpop.eup %11511 }
 0xace   :  { %10729 = vmatmul.mubr.msk.bf16.vlgmr.msra.gmra.mrb[168].mxu0 %vm2189_vm3, %v6547_v52  ;;  %v14971_v17 = vmul.f32 %v11512_v20, %v14769_v58  ;;  %v6533_v36 = vmul.f32 %v11512_v20, %v14780_v24 }
 0xacf   :  { %11515 = vrcp.f32 %v6484_v41  ;;  %10740 = vmatprep.mubr.msk.bf16.mxu0 %vm11965_vm1, %v16179_v29 }
 0xad0   :  { %11517 = vrcp.f32 %v6483_v10  ;;  %v6410_v5 = vpop.xlane.xlu1 %6409  ;;  %v6455_v3 = vpop.xlane.xlu0 %6454 }
 0xad1   :  { %v11514_v34 = vpop.eup %11513  ;;  %8623 = vrot.lane.b32.xlu1 %v16187_v32, %s11968_s1  ;;  %v6481_v51 = vadd.f32 %v6455_v3, %v6407_v50 }
 0xad2   :  { %v14977_v47 = vmul.f32 %v11514_v34, %v14776_v11  ;;  %v6534_v37 = vmul.f32 %v11514_v34, %v14786_v49  ;;  %v16189_v49 = vld [vmem:[#allocation66_spill] sm:$0xff] }
 0xad3   :  { %11519 = vrcp.f32 %v6481_v51 }
 0xad4   :  { %v6458_v61 = vpop.xlane.xlu1 %6457  ;;  %v6546_v30 = vpack.c.bf16 %v6534_v37, %v6533_v36  ;;  %v6522_v53 = vpack.c.bf16 %v14977_v47, %v14971_v17  ;;  %v14982_v58 = vpop.xlane.xlu0 %6418  ;;  %v6512_v37 = vmul.f32 %v14957_v56, %v14754_v45 }
 0xad5   :  { %v6482_v0 = vadd.f32 %v6458_v61, %v6410_v5  ;;  %8670 = vrot.lane.b32.xlu1 %v16188_v43, %s11968_s1 }
 0xad6   :  { %10723 = vmatmul.mubr.msk.bf16.vlgmr.msra.gmra.mrb[180].mxu1 %vm2189_vm3, %v6546_v30 }
 0xad7   :  { %11521 = vrcp.f32 %v6482_v0  ;;  %10733 = vmatpush3.bf16.msra.mxu1 %v14835_v40  ;;  %10734 = vmatprep.mubr.msk.bf16.mxu1 %vm11965_vm1, %v16179_v29 }
 0xad8   :  { %10744 = vmatprep.subr.bf16.mxu1 %v16179_v29  ;;  %v6467_v24 = vpop.xlane.xlu0 %6466 }
 0xad9   :  { %v11516_v11 = vpop.eup %11515  ;;  %8717 = vrot.lane.b32.xlu1 %v16189_v49, %s11968_s1 }
 0xada   :  { %v11518_v10 = vpop.eup %11517  ;;  %v6540_v44 = vmul.f32 %v11516_v11, %v14803_v31  ;;  %v6504_v31 = vmul.f32 %v14904_v15, %v14695_v59 }
 0xadb   :  { %v6539_v52 = vmul.f32 %v11518_v10, %v14799_v46 }
 0xadc   :  { %v6834_v50 = vpop.permute.xlu0 %6833 }
 0xadd   :  { %v11520_v41 = vpop.eup %11519  ;;  %10739 = vmatpush3.bf16.msra.mxu0 %v6834_v50  ;;  %v6549_v8 = vpack.c.bf16 %v6540_v44, %v6539_v52 }
 0xade   :  { %10750 = vmatprep.subr.bf16.mxu0 %v16179_v29  ;;  %v14997_v20 = vmul.f32 %v11520_v41, %v14807_v7  ;;  %v6537_v34 = vmul.f32 %v11520_v41, %v14815_v57  ;;  %v6503_v57 = vmul.f32 %v14902_v6, %v14683_v60  ;;  %v6508_v60 = vmul.f32 %v14921_v55, %v14703_v39 }
 0xadf   :  { %v6507_v6 = vmul.f32 %v14915_v13, %v14705_v2  ;;  %v6511_v39 = vmul.f32 %v14951_v26, %v14747_v27  ;;  %v6516_v2 = vmul.f32 %v11516_v11, %v14795_v42  ;;  %v6515_v13 = vmul.f32 %v11518_v10, %v14790_v16 }
 0xae0   :  { %v6928_v5 = vpop.permute.xlu0 %6927  ;;  %10741 = vmatmul.mubr.msk.bf16.vlgmr.msra.gmra.mrb[172].mxu0 %vm2189_vm3, %v6549_v8  ;;  %v6485_v42 = vadd.f32 %v6467_v24, %v14982_v58 }
 0xae1   :  { %v11522_v40 = vpop.eup %11521  ;;  %10751 = vmatpush3.bf16.msra.mxu0 %v6928_v5  ;;  %10752 = vmatprep.mubr.msk.bf16.mxu0 %vm11965_vm1, %v16179_v29  ;;  %v6521_v15 = vpack.c.bf16 %v6508_v60, %v6507_v6  ;;  %v6523_v55 = vpack.c.bf16 %v6512_v37, %v6511_v39  ;;  %v6525_v56 = vpack.c.bf16 %v6516_v2, %v6515_v13 }
 0xae2   :  { %v15002_v3 = vmul.f32 %v11522_v40, %v14811_v22  ;;  %v6538_v46 = vmul.f32 %v11522_v40, %v14819_v18  ;;  %10762 = vmatprep.subr.bf16.mxu0 %v16179_v29  ;;  %v6881_v22 = vpop.permute.xlu1 %6880  ;;  %v6519_v18 = vpack.c.bf16 %v6504_v31, %v6503_v57  ;;  %11523 = vrcp.f32 %v6485_v42 }
 0xae4   :  { %v6548_v7 = vpack.c.bf16 %v6538_v46, %v6537_v34  ;;  %v6524_v32 = vpack.c.bf16 %v15002_v3, %v14997_v20  ;;  %v7022_v59 = vpop.permute.xlu0 %7021 }
 0xae6   :  { %10735 = vmatmul.mubr.msk.bf16.vlgmr.msra.gmra.mrb[184].mxu1 %vm2189_vm3, %v6548_v7 }
 0xae7   :  { %10745 = vmatpush3.bf16.msra.mxu1 %v6881_v22  ;;  %10746 = vmatprep.mubr.msk.bf16.mxu1 %vm11965_vm1, %v16179_v29 }
 0xae8   :  { %10756 = vmatprep.subr.bf16.mxu1 %v16179_v29  ;;  %10753 = vmatmul.mubr.msk.bf16.vlgmr.msra.gmra.mrb[160].mxu0 %vm2189_vm3, %v6519_v18  ;;  %v7116_v36 = vpop.permute.xlu0 %7115 }
 0xae9   :  { %10763 = vmatpush3.bf16.msra.mxu0 %v7022_v59  ;;  %10764 = vmatprep.mubr.msk.bf16.mxu0 %vm11965_vm1, %v16179_v29 }
 0xaea   :  { %10774 = vmatprep.subr.bf16.mxu0 %v16179_v29 }
 0xaec   :  { %v7210_v51 = vpop.permute.xlu0 %7209  ;;  %v11524_v11 = vpop.eup %11523 }
 0xaed   :  { %v6541_v52 = vmul.f32 %v11524_v11, %v14829_v19  ;;  %v6517_v57 = vmul.f32 %v11524_v11, %v14823_v9 }
 0xaf0   :  { %10765 = vmatmul.mubr.msk.bf16.vlgmr.msra.gmra.mrb[164].mxu0 %vm2189_vm3, %v6521_v15  ;;  %v7387_v45 = vpop.permute.xlu0 %7386 }
 0xaf1   :  { %10775 = vmatpush3.bf16.msra.mxu0 %v7116_v36  ;;  %10776 = vmatprep.mubr.msk.bf16.mxu0 %vm11965_vm1, %v16179_v29  ;;  %v7392_v27 = vsel %vm1428_vm2, %v7387_v45, 0 }
 0xaf2   :  { %10786 = vmatprep.subr.bf16.mxu0 %v16179_v29 }
 0xaf4   :  { %v15045_v26 = vpop.permute.xlu0 %7384 }
 0xaf8   :  { %10777 = vmatmul.mubr.msk.bf16.vlgmr.msra.gmra.mrb[168].mxu0 %vm2189_vm3, %v6523_v55  ;;  %v15052_v49 = vpop.permute.xlu0 %7435 }
 0xaf9   :  { %10787 = vmatpush3.bf16.msra.mxu0 %v7210_v51  ;;  %10788 = vmatprep.mubr.msk.bf16.mxu0 %vm11965_vm1, %v16179_v29 }
 0xafa   :  { %10798 = vmatprep.subr.bf16.mxu0 %v16179_v29 }
 0xafc   :  { %v15056_v41 = vpop.permute.xlu0 %7486 }
 0xb00   :  { %10789 = vmatmul.mubr.msk.bf16.vlgmr.msra.gmra.mrb[172].mxu0 %vm2189_vm3, %v6525_v56  ;;  %v15062_v40 = vpop.permute.xlu0 %7537 }
 0xb01   :  { %10800 = vmatprep.mubr.msk.bf16.mxu0 %vm11965_vm1, %v16179_v29 }
 0xb02   :  { %10799 = vmatpush3.bf16.xpose.msra.mxu0 %v7392_v27 }
 0xb03   :  { %10810 = vmatprep.subr.bf16.mxu0 %v16179_v29 }
 0xb04   :  { %v15073_v34 = vpop.permute.xlu0 %7588 }
 0xb08   :  { %v15084_v28 = vpop.permute.xlu0 %7639 }
 0xb09   :  { %v6422_v61 = vpop.xlane.xlu1 %6421  ;;  %10801 = vmatmul.mubr.msk.bf16.vlgmr.msra.gmra.mrb[176].mxu0 %vm1428_vm2, %v15045_v26 }
 0xb0a   :  { %10812 = vmatprep.mubr.msk.bf16.mxu0 %vm11965_vm1, %v16179_v29 }
 0xb0c   :  { %v7691_v47 = vpop.permute.xlu0 %7690 }
 0xb0d   :  { %v6470_v16 = vpop.xlane.xlu1 %6469 }
 0xb0e   :  { %v6486_v30 = vadd.f32 %v6470_v16, %v6422_v61 }
 0xb10   :  { %11525 = vrcp.f32 %v6486_v30  ;;  %v15105_v20 = vpop.permute.xlu0 %7741 }
 0xb11   :  { %v6975_v0 = vpop.permute.xlu1 %6974 }
 0xb14   :  { %v7901_v9 = vpop.permute.xlu0 %7900 }
 0xb15   :  { %v7069_v43 = vpop.permute.xlu1 %7068  ;;  %v7903_v18 = vsel %vm1428_vm2, %v7901_v9, 0 }
 0xb18   :  { %v7993_v60 = vpop.permute.xlu0 %7992 }
 0xb19   :  { %v7163_v10 = vpop.permute.xlu1 %7162  ;;  %v7995_v6 = vsel %vm1428_vm2, %v7993_v60, 0 }
 0xb1a   :  { %v11526_v44 = vpop.eup %11525 }
 0xb1b   :  { %v6542_v58 = vmul.f32 %v11526_v44, %v14858_v1 }
 0xb1c   :  { %v8085_v36 = vpop.permute.xlu0 %8084 }
 0xb1d   :  { %v7257_v24 = vpop.permute.xlu1 %7256  ;;  %v6550_v50 = vpack.c.bf16 %v6542_v58, %v6541_v52  ;;  %v8087_v37 = vsel %vm1428_vm2, %v8085_v36, 0 }
 0xb1f   :  { %10747 = vmatmul.mubr.msk.bf16.vlgmr.msra.gmra.mrb[188].mxu1 %vm2189_vm3, %v6550_v50 }
 0xb20   :  { %10757 = vmatpush3.bf16.msra.mxu1 %v6975_v0  ;;  %10758 = vmatprep.mubr.msk.bf16.mxu1 %vm11965_vm1, %v16179_v29  ;;  %v8577_v51 = vpop.permute.xlu0 %8576 }
 0xb21   :  { %v7438_v8 = vpop.permute.xlu1 %7437  ;;  %10768 = vmatprep.subr.bf16.mxu1 %v16179_v29 }
 0xb25   :  { %v7489_v5 = vpop.permute.xlu1 %7488 }
 0xb26   :  { %v7494_v19 = vsel %vm1428_vm2, %v7489_v5, 0 }
 0xb27   :  { %10759 = vmatmul.mubr.msk.bf16.vlgmr.msra.gmra.mrb[176].mxu1 %vm2189_vm3, %v6520_v38  ;;  %10811 = vmatpush3.bf16.xpose.msra.mxu0 %v7494_v19  ;;  %v15202_v19 = vld [vmem:[#allocation8 + $0x30] sm:$0xff] }
 0xb28   :  { %10769 = vmatpush3.bf16.msra.mxu1 %v7069_v43  ;;  %10770 = vmatprep.mubr.msk.bf16.mxu1 %vm11965_vm1, %v16179_v29 }
 0xb29   :  { %v7540_v1 = vpop.permute.xlu1 %7539  ;;  %10780 = vmatprep.subr.bf16.mxu1 %v16179_v29  ;;  %10822 = vmatprep.subr.bf16.mxu0 %v16179_v29 }
 0xb2a   :  { %v7545_v59 = vsel %vm1428_vm2, %v7540_v1, 0 }
 0xb2d   :  { %v7591_v46 = vpop.permute.xlu1 %7590 }
 0xb2e   :  { %v7596_v31 = vsel %vm1428_vm2, %v7591_v46, 0  ;;  %10813 = vmatmul.mubr.msk.bf16.vlgmr.msra.gmra.mrb[180].mxu0 %vm1428_vm2, %v15056_v41 }
 0xb2f   :  { %10771 = vmatmul.mubr.msk.bf16.vlgmr.msra.gmra.mrb[180].mxu1 %vm2189_vm3, %v6522_v53  ;;  %10823 = vmatpush3.bf16.xpose.msra.mxu0 %v7596_v31  ;;  %v6518_v53 = vmul.f32 %v11526_v44, %v14852_v4  ;;  %v7443_v4 = vsel %vm1428_vm2, %v7438_v8, 0 }
 0xb30   :  { %10781 = vmatpush3.bf16.msra.mxu1 %v7163_v10  ;;  %10824 = vmatprep.mubr.msk.bf16.mxu0 %vm11965_vm1, %v16179_v29 }
 0xb31   :  { %v7642_v21 = vpop.permute.xlu1 %7641  ;;  %10782 = vmatprep.mubr.msk.bf16.mxu1 %vm11965_vm1, %v16179_v29  ;;  %10792 = vmatprep.subr.bf16.mxu1 %v16179_v29 }
 0xb32   :  { %10834 = vmatprep.subr.bf16.mxu0 %v16179_v29  ;;  %v7647_v15 = vsel %vm1428_vm2, %v7642_v21, 0 }
 0xb35   :  { %v7693_v38 = vpop.permute.xlu1 %7692 }
 0xb36   :  { %v7698_v17 = vsel %vm1428_vm2, %v7693_v38, 0  ;;  %10825 = vmatmul.mubr.msk.bf16.vlgmr.msra.gmra.mrb[184].mxu0 %vm1428_vm2, %v15073_v34 }
 0xb37   :  { %10783 = vmatmul.mubr.msk.bf16.vlgmr.msra.gmra.mrb[184].mxu1 %vm2189_vm3, %v6524_v32  ;;  %10835 = vmatpush3.bf16.xpose.msra.mxu0 %v7698_v17  ;;  %v6526_v32 = vpack.c.bf16 %v6518_v53, %v6517_v57 }
 0xb38   :  { %10793 = vmatpush3.bf16.msra.mxu1 %v7257_v24  ;;  %10836 = vmatprep.mubr.msk.bf16.mxu0 %vm11965_vm1, %v16179_v29 }
 0xb39   :  { %v7744_v7 = vpop.permute.xlu1 %7743  ;;  %10794 = vmatprep.mubr.msk.bf16.mxu1 %vm11965_vm1, %v16179_v29  ;;  %10846 = vmatprep.subr.bf16.mxu0 %v16179_v29 }
 0xb3a   :  { %10804 = vmatprep.subr.bf16.mxu1 %v16179_v29  ;;  %v7749_v39 = vsel %vm1428_vm2, %v7744_v7, 0 }
 0xb3d   :  { %v7809_v3 = vpop.permute.xlu1 %7808 }
 0xb3e   :  { %v7811_v22 = vsel %vm1428_vm2, %v7809_v3, 0  ;;  %10837 = vmatmul.mubr.msk.bf16.vlgmr.msra.gmra.mrb[188].mxu0 %vm1428_vm2, %v7691_v47  ;;  %v15220_v3 = vld [vmem:[#allocation8 + $0xb0] sm:$0xff] }
 0xb3f   :  { %10795 = vmatmul.mubr.msk.bf16.vlgmr.msra.gmra.mrb[188].mxu1 %vm2189_vm3, %v6526_v32  ;;  %10847 = vmatpush3.bf16.xpose.msra.mxu0 %v7811_v22  ;;  %v15222_v22 = vld [vmem:[#allocation8 + $0xb8] sm:$0xff] }
 0xb40   :  { %10848 = vmatprep.mubr.msk.bf16.mxu0 %vm11965_vm1, %v16179_v29  ;;  %10806 = vmatprep.mubr.msk.bf16.mxu1 %vm11965_vm1, %v16179_v29 }
 0xb41   :  { %10805 = vmatpush3.bf16.xpose.msra.mxu1 %v7443_v4  ;;  %10858 = vmatprep.subr.bf16.mxu0 %v16179_v29  ;;  %v7855_v55 = vpop.permute.xlu1 %7854 }
 0xb42   :  { %10816 = vmatprep.subr.bf16.mxu1 %v16179_v29  ;;  %v7857_v2 = vsel %vm1428_vm2, %v7855_v55, 0 }
 0xb45   :  { %v7947_v13 = vpop.permute.xlu1 %7946 }
 0xb46   :  { %10849 = vmatmul.mubr.msk.bf16.vlgmr.msra.gmra.mrb[192].mxu0 %vm1428_vm2, %v15045_v26  ;;  %v7949_v45 = vsel %vm1428_vm2, %v7947_v13, 0 }
 0xb47   :  { %10859 = vmatpush3.bf16.xpose.msra.mxu0 %v7903_v18  ;;  %10860 = vmatprep.mubr.msk.bf16.mxu0 %vm11965_vm1, %v16179_v29 }
 0xb48   :  { %10807 = vmatmul.mubr.msk.bf16.vlgmr.msra.gmra.mrb[192].mxu1 %vm1428_vm2, %v15052_v49  ;;  %10870 = vmatprep.subr.bf16.mxu0 %v16179_v29 }
 0xb49   :  { %10817 = vmatpush3.bf16.xpose.msra.mxu1 %v7545_v59  ;;  %10818 = vmatprep.mubr.msk.bf16.mxu1 %vm11965_vm1, %v16179_v29  ;;  %v8039_v56 = vpop.permute.xlu1 %8038 }
 0xb4a   :  { %10828 = vmatprep.subr.bf16.mxu1 %v16179_v29  ;;  %v8041_v27 = vsel %vm1428_vm2, %v8039_v56, 0 }
 0xb4d   :  { %v8131_v26 = vpop.permute.xlu1 %8130 }
 0xb4e   :  { %10861 = vmatmul.mubr.msk.bf16.vlgmr.msra.gmra.mrb[196].mxu0 %vm1428_vm2, %v15056_v41  ;;  %v8133_v61 = vsel %vm1428_vm2, %v8131_v26, 0 }
 0xb4f   :  { %10871 = vmatpush3.bf16.xpose.msra.mxu0 %v7995_v6  ;;  %10872 = vmatprep.mubr.msk.bf16.mxu0 %vm11965_vm1, %v16179_v29 }
 0xb50   :  { %10819 = vmatmul.mubr.msk.bf16.vlgmr.msra.gmra.mrb[196].mxu1 %vm1428_vm2, %v15062_v40  ;;  %10882 = vmatprep.subr.bf16.mxu0 %v16179_v29 }
 0xb51   :  { %10829 = vmatpush3.bf16.xpose.msra.mxu1 %v7647_v15  ;;  %10830 = vmatprep.mubr.msk.bf16.mxu1 %vm11965_vm1, %v16179_v29  ;;  %v8624_v42 = vpop.permute.xlu1 %8623 }
 0xb52   :  { %10840 = vmatprep.subr.bf16.mxu1 %v16179_v29 }
 0xb56   :  { %10873 = vmatmul.mubr.msk.bf16.vlgmr.msra.gmra.mrb[200].mxu0 %vm1428_vm2, %v15073_v34  ;;  %v15204_v34 = vld [vmem:[#allocation8 + $0x38] sm:$0xff] }
 0xb57   :  { %10883 = vmatpush3.bf16.xpose.msra.mxu0 %v8087_v37  ;;  %10884 = vmatprep.mubr.msk.bf16.mxu0 %vm11965_vm1, %v16179_v29 }
 0xb58   :  { %10831 = vmatmul.mubr.msk.bf16.vlgmr.msra.gmra.mrb[200].mxu1 %vm1428_vm2, %v15084_v28  ;;  %10894 = vmatprep.subr.bf16.mxu0 %v16179_v29 }
 0xb59   :  { %10841 = vmatpush3.bf16.xpose.msra.mxu1 %v7749_v39  ;;  %10842 = vmatprep.mubr.msk.bf16.mxu1 %vm11965_vm1, %v16179_v29 }
 0xb5a   :  { %10852 = vmatprep.subr.bf16.mxu1 %v16179_v29 }
 0xb5e   :  { %10885 = vmatmul.mubr.msk.bf16.vlgmr.msra.gmra.mrb[204].mxu0 %vm1428_vm2, %v7691_v47 }
 0xb5f   :  { %10895 = vmatpush3.bf16.msra.mxu0 %v8577_v51  ;;  %10896 = vmatprep.mubr.msk.bf16.mxu0 %vm11965_vm1, %v16179_v29 }
 0xb60   :  { %10843 = vmatmul.mubr.msk.bf16.vlgmr.msra.gmra.mrb[204].mxu1 %vm1428_vm2, %v15105_v20  ;;  %10906 = vmatprep.subr.bf16.mxu0 %v16179_v29 }
 0xb61   :  { %10853 = vmatpush3.bf16.xpose.msra.mxu1 %v7857_v2  ;;  %10854 = vmatprep.mubr.msk.bf16.mxu1 %vm11965_vm1, %v16179_v29 }
 0xb62   :  { %10864 = vmatprep.subr.bf16.mxu1 %v16179_v29 }
 0xb68   :  { %10855 = vmatmul.mubr.msk.bf16.vlgmr.msra.gmra.mrb[208].mxu1 %vm1428_vm2, %v15052_v49 }
 0xb69   :  { %10865 = vmatpush3.bf16.xpose.msra.mxu1 %v7949_v45  ;;  %10866 = vmatprep.mubr.msk.bf16.mxu1 %vm11965_vm1, %v16179_v29 }
 0xb6a   :  { %10876 = vmatprep.subr.bf16.mxu1 %v16179_v29 }
 0xb70   :  { %10867 = vmatmul.mubr.msk.bf16.vlgmr.msra.gmra.mrb[212].mxu1 %vm1428_vm2, %v15062_v40 }
 0xb71   :  { %10877 = vmatpush3.bf16.xpose.msra.mxu1 %v8041_v27  ;;  %10878 = vmatprep.mubr.msk.bf16.mxu1 %vm11965_vm1, %v16179_v29 }
 0xb72   :  { %10888 = vmatprep.subr.bf16.mxu1 %v16179_v29 }
 0xb78   :  { %10879 = vmatmul.mubr.msk.bf16.vlgmr.msra.gmra.mrb[216].mxu1 %vm1428_vm2, %v15084_v28 }
 0xb79   :  { %10889 = vmatpush3.bf16.xpose.msra.mxu1 %v8133_v61  ;;  %10890 = vmatprep.mubr.msk.bf16.mxu1 %vm11965_vm1, %v16179_v29 }
 0xb7a   :  { %10900 = vmatprep.subr.bf16.mxu1 %v16179_v29 }
 0xb80   :  { %10891 = vmatmul.mubr.msk.bf16.vlgmr.msra.gmra.mrb[220].mxu1 %vm1428_vm2, %v15105_v20 }
 0xb81   :  { %10901 = vmatpush3.bf16.msra.mxu1 %v8624_v42  ;;  %10902 = vmatprep.mubr.msk.bf16.mxu1 %vm11965_vm1, %v16179_v29 }
 0xb82   :  { %10912 = vmatprep.subr.bf16.mxu1 %v16179_v29 }
 0xbbb   :  { %v15186_v16 = vpop.f32.mrb[160].mxu0 }
 0xbbc   :  { %16190 = vst [vmem:[#allocation40_spill] sm:$0xff] %v15186_v16  ;;  %v10754_v30 = vpop.f32.mrb[161].mxu0 }
 0xbbd   :  { %v15188_v0 = vpop.f32.mrb[162].mxu0 }
 0xbbe   :  { %16191 = vst [vmem:[#allocation39_spill] sm:$0xff] %v15188_v0  ;;  %v10755_v43 = vpop.f32.mrb[163].mxu0 }
 0xbc3   :  { %v15190_v11 = vpop.f32.mrb[164].mxu0 }
 0xbc4   :  { %16192 = vst [vmem:[#allocation37_spill] sm:$0xff] %v15190_v11  ;;  %v10766_v49 = vpop.f32.mrb[165].mxu0 }
 0xbc5   :  { %v15192_v10 = vpop.f32.mrb[166].mxu0 }
 0xbc6   :  { %16193 = vst [vmem:[#allocation43_spill] sm:$0xff] %v15192_v10  ;;  %v10767_v44 = vpop.f32.mrb[167].mxu0 }
 0xbcb   :  { %v15194_v52 = vpop.f32.mrb[168].mxu0 }
 0xbcc   :  { %16194 = vst [vmem:[#allocation41_spill] sm:$0xff] %v15194_v52  ;;  %v10778_v58 = vpop.f32.mrb[169].mxu0 }
 0xbcd   :  { %v15196_v24 = vpop.f32.mrb[170].mxu0 }
 0xbce   :  { %16195 = vst [vmem:[#allocation34_spill] sm:$0xff] %v15196_v24  ;;  %v10779_v50 = vpop.f32.mrb[171].mxu0  ;;  %v16207_v24 = vld [vmem:[#allocation70_spill] sm:$0xff] }
 0xbd3   :  { %v15198_v41 = vpop.f32.mrb[172].mxu0 }
 0xbd4   :  { %16196 = vst [vmem:[#allocation33_spill] sm:$0xff] %v15198_v41  ;;  %v10790_v8 = vpop.f32.mrb[173].mxu0 }
 0xbd5   :  { %v15200_v40 = vpop.f32.mrb[174].mxu0 }
 0xbd6   :  { %16197 = vst [vmem:[#allocation36_spill] sm:$0xff] %v15200_v40  ;;  %v10791_v5 = vpop.f32.mrb[175].mxu0 }
 0xbdc   :  { %v7428_v1 = vpop.f32.mrb[176].mxu0 }
 0xbdd   :  { %v15207_v46 = vadd.f32 %v7428_v1, %v15202_v19  ;;  %v10802_v31 = vpop.f32.mrb[177].mxu0  ;;  %v15246_v1 = vld [vmem:[#allocation8 + $0x70] sm:$0xff] }
 0xbde   :  { %v7431_v28 = vpop.f32.mrb[178].mxu0 }
 0xbdf   :  { %v15210_v21 = vadd.f32 %v7431_v28, %v15204_v34  ;;  %v10803_v38 = vpop.f32.mrb[179].mxu0  ;;  %v8192_v17 = vsel %vm2189_vm3, %v15207_v46, -inf }
 0xbe0   :  { %8193 = vmax.xlane.f32.xlu0 %v8192_v17  ;;  %v15248_v17 = vld [vmem:[#allocation8 + $0x78] sm:$0xff] }
 0xbe1   :  { %v8195_v47 = vsel %vm2189_vm3, %v15210_v21, -inf }
 0xbe2   :  { %8196 = vmax.xlane.f32.xlu1 %v8195_v47 }
 0xbfa   :  { %v15216_v53 = vpop.f32.mrb[176].mxu1 }
 0xbfb   :  { %16198 = vst [vmem:[#allocation35_spill] sm:$0xff] %v15216_v53  ;;  %v10760_v7 = vpop.f32.mrb[177].mxu1 }
 0xbfc   :  { %v15218_v57 = vpop.f32.mrb[178].mxu1 }
 0xbfd   :  { %16199 = vst [vmem:[#allocation52_spill] sm:$0xff] %v15218_v57  ;;  %v10761_v20 = vpop.f32.mrb[179].mxu1 }
 0xc01   :  { %v7530_v32 = vpop.f32.mrb[180].mxu0 }
 0xc02   :  { %v15225_v4 = vadd.f32 %v7530_v32, %v15220_v3  ;;  %v15227_v9 = vpop.f32.mrb[180].mxu1  ;;  %v10814_v18 = vpop.f32.mrb[181].mxu0 }
 0xc03   :  { %16200 = vst [vmem:[#allocation55_spill] sm:$0xff] %v15227_v9  ;;  %v10772_v59 = vpop.f32.mrb[181].mxu1  ;;  %v7533_v60 = vpop.f32.mrb[182].mxu0 }
 0xc04   :  { %v15230_v6 = vadd.f32 %v7533_v60, %v15222_v22  ;;  %v15232_v15 = vpop.f32.mrb[182].mxu1  ;;  %v10815_v36 = vpop.f32.mrb[183].mxu0  ;;  %v8204_v37 = vsel %vm2189_vm3, %v15225_v4, -inf }
 0xc05   :  { %16201 = vst [vmem:[#allocation38_spill] sm:$0xff] %v15232_v15  ;;  %8205 = vmax.xlane.f32.xlu0 %v8204_v37  ;;  %v10773_v39 = vpop.f32.mrb[183].mxu1 }
 0xc06   :  { %v8207_v55 = vsel %vm2189_vm3, %v15230_v6, -inf }
 0xc07   :  { %8208 = vmax.xlane.f32.xlu1 %v8207_v55 }
 0xc09   :  { %v7632_v51 = vpop.f32.mrb[184].mxu0 }
 0xc0a   :  { %v15238_v2 = vpop.f32.mrb[184].mxu1  ;;  %v10826_v13 = vpop.f32.mrb[185].mxu0  ;;  %v15254_v18 = vadd.f32 %v7632_v51, %v15202_v19 }
 0xc0b   :  { %16202 = vst [vmem:[#allocation59_spill] sm:$0xff] %v15238_v2  ;;  %v10784_v45 = vpop.f32.mrb[185].mxu1  ;;  %v7635_v56 = vpop.f32.mrb[186].mxu0  ;;  %v15266_v13 = vld [vmem:[#allocation8 + $0xf0] sm:$0xff] }
 0xc0c   :  { %v15240_v27 = vpop.f32.mrb[186].mxu1  ;;  %v10827_v26 = vpop.f32.mrb[187].mxu0  ;;  %v15262_v37 = vadd.f32 %v7635_v56, %v15204_v34  ;;  %v8216_v45 = vsel %vm2189_vm3, %v15254_v18, -inf }
 0xc0d   :  { %16203 = vst [vmem:[#allocation44_spill] sm:$0xff] %v15240_v27  ;;  %v10785_v61 = vpop.f32.mrb[187].mxu1 }
 0xc11   :  { %v7734_v42 = vpop.f32.mrb[188].mxu0 }
 0xc12   :  { %v15242_v30 = vpop.f32.mrb[188].mxu1  ;;  %v10838_v43 = vpop.f32.mrb[189].mxu0 }
 0xc13   :  { %16204 = vst [vmem:[#allocation64_spill] sm:$0xff] %v15242_v30  ;;  %v10796_v49 = vpop.f32.mrb[189].mxu1  ;;  %v7737_v44 = vpop.f32.mrb[190].mxu0  ;;  %v15270_v43 = vld [vmem:[#allocation8 + $0xf8] sm:$0xff] }
 0xc14   :  { %v15244_v58 = vpop.f32.mrb[190].mxu1  ;;  %v10839_v50 = vpop.f32.mrb[191].mxu0 }
 0xc15   :  { %16205 = vst [vmem:[#allocation42_spill] sm:$0xff] %v15244_v58  ;;  %v10797_v8 = vpop.f32.mrb[191].mxu1 }
 0xc16   :  { %v8219_v8 = vsel %vm2189_vm3, %v15262_v37, -inf }
 0xc19   :  { %v7847_v5 = vpop.f32.mrb[192].mxu0 }
 0xc1a   :  { %v10850_v31 = vpop.f32.mrb[193].mxu0 }
 0xc1b   :  { %v7479_v28 = vpop.f32.mrb[192].mxu1  ;;  %v7850_v38 = vpop.f32.mrb[194].mxu0 }
 0xc1c   :  { %v15251_v47 = vadd.f32 %v7479_v28, %v15246_v1  ;;  %v10808_v7 = vpop.f32.mrb[193].mxu1  ;;  %v10851_v20 = vpop.f32.mrb[195].mxu0  ;;  %v15278_v28 = vadd.f32 %v7734_v42, %v15220_v3 }
 0xc1d   :  { %v7482_v32 = vpop.f32.mrb[194].mxu1 }
 0xc1e   :  { %v15257_v59 = vadd.f32 %v7482_v32, %v15248_v17  ;;  %v10809_v60 = vpop.f32.mrb[195].mxu1  ;;  %v8198_v36 = vsel %vm2189_vm3, %v15251_v47, -inf }
 0xc1f   :  { %8199 = vmax.xlane.f32.xlu0 %v8198_v36  ;;  %v15286_v60 = vadd.f32 %v7737_v44, %v15222_v22 }
 0xc20   :  { %v8201_v39 = vsel %vm2189_vm3, %v15257_v59, -inf }
 0xc21   :  { %8202 = vmax.xlane.f32.xlu1 %v8201_v39  ;;  %v7939_v55 = vpop.f32.mrb[196].mxu0  ;;  %v8231_v44 = vsel %vm2189_vm3, %v15286_v60, -inf }
 0xc22   :  { %v10862_v51 = vpop.f32.mrb[197].mxu0 }
 0xc23   :  { %8217 = vmax.xlane.f32.xlu0 %v8216_v45  ;;  %v7581_v26 = vpop.f32.mrb[196].mxu1  ;;  %v7942_v61 = vpop.f32.mrb[198].mxu0  ;;  %v15291_v51 = vadd.f32 %v7847_v5, %v15202_v19  ;;  %v8228_v45 = vsel %vm2189_vm3, %v15278_v28, -inf }
 0xc24   :  { %v15273_v49 = vadd.f32 %v7581_v26, %v15266_v13  ;;  %v10820_v56 = vpop.f32.mrb[197].mxu1  ;;  %v10863_v50 = vpop.f32.mrb[199].mxu0 }
 0xc25   :  { %8220 = vmax.xlane.f32.xlu1 %v8219_v8  ;;  %v7584_v31 = vpop.f32.mrb[198].mxu1 }
 0xc26   :  { %v15281_v7 = vadd.f32 %v7584_v31, %v15270_v43  ;;  %v10821_v20 = vpop.f32.mrb[199].mxu1  ;;  %v8210_v32 = vsel %vm2189_vm3, %v15273_v49, -inf }
 0xc27   :  { %8211 = vmax.xlane.f32.xlu0 %v8210_v32 }
 0xc28   :  { %v8213_v36 = vsel %vm2189_vm3, %v15281_v7, -inf }
 0xc29   :  { %8214 = vmax.xlane.f32.xlu1 %v8213_v36  ;;  %v8031_v39 = vpop.f32.mrb[200].mxu0  ;;  %v8240_v36 = vsel %vm2189_vm3, %v15291_v51, -inf }
 0xc2a   :  { %v10874_v42 = vpop.f32.mrb[201].mxu0 }
 0xc2b   :  { %8229 = vmax.xlane.f32.xlu0 %v8228_v45  ;;  %v7683_v26 = vpop.f32.mrb[200].mxu1  ;;  %v8034_v56 = vpop.f32.mrb[202].mxu0  ;;  %v15306_v42 = vadd.f32 %v7942_v61, %v15222_v22 }
 0xc2c   :  { %v10832_v50 = vpop.f32.mrb[201].mxu1  ;;  %v10875_v8 = vpop.f32.mrb[203].mxu0  ;;  %v15298_v20 = vadd.f32 %v7683_v26, %v15246_v1 }
 0xc2d   :  { %8232 = vmax.xlane.f32.xlu1 %v8231_v44  ;;  %v7686_v31 = vpop.f32.mrb[202].mxu1  ;;  %v15311_v8 = vadd.f32 %v7850_v38, %v15204_v34 }
 0xc2e   :  { %v15301_v5 = vadd.f32 %v7686_v31, %v15248_v17  ;;  %v10833_v32 = vpop.f32.mrb[203].mxu1  ;;  %v8222_v31 = vsel %vm2189_vm3, %v15298_v20, -inf }
 0xc2f   :  { %8241 = vmax.xlane.f32.xlu0 %v8240_v36 }
 0xc30   :  { %v8225_v45 = vsel %vm2189_vm3, %v15301_v5, -inf }
 0xc31   :  { %8226 = vmax.xlane.f32.xlu1 %v8225_v45  ;;  %v8123_v50 = vpop.f32.mrb[204].mxu0  ;;  %v8255_v45 = vsel %vm2189_vm3, %v15306_v42, -inf }
 0xc32   :  { %v15314_v26 = vadd.f32 %v8123_v50, %v15220_v3  ;;  %v10886_v44 = vpop.f32.mrb[205].mxu0  ;;  %v15324_v50 = vadd.f32 %v7939_v55, %v15220_v3 }
 0xc33   :  { %8223 = vmax.xlane.f32.xlu0 %v8222_v31  ;;  %v7785_v32 = vpop.f32.mrb[204].mxu1  ;;  %v8126_v36 = vpop.f32.mrb[206].mxu0  ;;  %v8243_v31 = vsel %vm2189_vm3, %v15311_v8, -inf }
 0xc34   :  { %v10844_v61 = vpop.f32.mrb[205].mxu1  ;;  %v15319_v58 = vadd.f32 %v8126_v36, %v15222_v22  ;;  %v10887_v30 = vpop.f32.mrb[207].mxu0  ;;  %v8252_v36 = vsel %vm2189_vm3, %v15324_v50, -inf }
 0xc35   :  { %8256 = vmax.xlane.f32.xlu1 %v8255_v45  ;;  %v7788_v38 = vpop.f32.mrb[206].mxu1  ;;  %v15334_v30 = vadd.f32 %v7785_v32, %v15266_v13  ;;  %v15347_v32 = vadd.f32 %v8034_v56, %v15204_v34 }
 0xc36   :  { %v15327_v44 = vadd.f32 %v7788_v38, %v15270_v43  ;;  %v10845_v40 = vpop.f32.mrb[207].mxu1 }
 0xc37   :  { %8244 = vmax.xlane.f32.xlu0 %v8243_v31  ;;  %v8234_v31 = vsel %vm2189_vm3, %v15334_v30, -inf }
 0xc38   :  { %v8237_v22 = vsel %vm2189_vm3, %v15327_v44, -inf }
 0xc39   :  { %8238 = vmax.xlane.f32.xlu1 %v8237_v22 }
 0xc3b   :  { %8253 = vmax.xlane.f32.xlu0 %v8252_v36  ;;  %v7893_v3 = vpop.f32.mrb[208].mxu1  ;;  %v15352_v36 = vadd.f32 %v8031_v39, %v15202_v19 }
 0xc3c   :  { %v10856_v55 = vpop.f32.mrb[209].mxu1  ;;  %v15339_v40 = vadd.f32 %v7893_v3, %v15246_v1 }
 0xc3d   :  { %v7896_v61 = vpop.f32.mrb[210].mxu1  ;;  %v8264_v19 = vsel %vm2189_vm3, %v15352_v36, -inf }
 0xc3e   :  { %v15342_v45 = vadd.f32 %v7896_v61, %v15248_v17  ;;  %v10857_v38 = vpop.f32.mrb[211].mxu1  ;;  %v8246_v3 = vsel %vm2189_vm3, %v15339_v40, -inf }
 0xc3f   :  { %8235 = vmax.xlane.f32.xlu0 %v8234_v31  ;;  %v8267_v38 = vsel %vm2189_vm3, %v15347_v32, -inf }
 0xc40   :  { %v8249_v22 = vsel %vm2189_vm3, %v15342_v45, -inf }
 0xc41   :  { %8250 = vmax.xlane.f32.xlu1 %v8249_v22 }
 0xc43   :  { %8247 = vmax.xlane.f32.xlu0 %v8246_v3  ;;  %v7985_v55 = vpop.f32.mrb[212].mxu1 }
 0xc44   :  { %v10868_v61 = vpop.f32.mrb[213].mxu1  ;;  %v15359_v34 = vadd.f32 %v7985_v55, %v15266_v13  ;;  %v8279_v55 = vsel %vm2189_vm3, %v15319_v58, -inf }
 0xc45   :  { %8268 = vmax.xlane.f32.xlu1 %v8267_v38  ;;  %v7988_v31 = vpop.f32.mrb[214].mxu1 }
 0xc46   :  { %v15362_v56 = vadd.f32 %v7988_v31, %v15270_v43  ;;  %v10869_v22 = vpop.f32.mrb[215].mxu1  ;;  %v8258_v3 = vsel %vm2189_vm3, %v15359_v34, -inf }
 0xc47   :  { %8265 = vmax.xlane.f32.xlu0 %v8264_v19 }
 0xc48   :  { %v8261_v39 = vsel %vm2189_vm3, %v15362_v56, -inf }
 0xc49   :  { %8262 = vmax.xlane.f32.xlu1 %v8261_v39  ;;  %v8276_v39 = vsel %vm2189_vm3, %v15314_v26, -inf }
 0xc4b   :  { %8259 = vmax.xlane.f32.xlu0 %v8258_v3  ;;  %v8077_v61 = vpop.f32.mrb[216].mxu1 }
 0xc4c   :  { %v10880_v38 = vpop.f32.mrb[217].mxu1  ;;  %v15373_v22 = vadd.f32 %v8077_v61, %v15246_v1 }
 0xc4d   :  { %8280 = vmax.xlane.f32.xlu1 %v8279_v55  ;;  %v8080_v31 = vpop.f32.mrb[218].mxu1 }
 0xc4e   :  { %v15376_v19 = vadd.f32 %v8080_v31, %v15248_v17  ;;  %v10881_v27 = vpop.f32.mrb[219].mxu1  ;;  %v8270_v38 = vsel %vm2189_vm3, %v15373_v22, -inf }
 0xc4f   :  { %8277 = vmax.xlane.f32.xlu0 %v8276_v39 }
 0xc50   :  { %v8273_v3 = vsel %vm2189_vm3, %v15376_v19, -inf }
 0xc51   :  { %8274 = vmax.xlane.f32.xlu1 %v8273_v3  ;;  %v16206_v3 = vld [vmem:[#allocation69_spill] sm:$0xff] }
 0xc53   :  { %8271 = vmax.xlane.f32.xlu0 %v8270_v38  ;;  %v8169_v55 = vpop.f32.mrb[220].mxu1  ;;  %v15398_v38 = vpop.permute.xlu1 %8670 }
 0xc54   :  { %v15385_v1 = vadd.f32 %v8169_v55, %v15266_v13  ;;  %v10892_v61 = vpop.f32.mrb[221].mxu1  ;;  %16208 = vst [vmem:[#allocation47_spill] sm:$0xff] %v15398_v38 }
 0xc55   :  { %v8172_v17 = vpop.f32.mrb[222].mxu1 }
 0xc56   :  { %v15388_v27 = vadd.f32 %v8172_v17, %v15270_v43  ;;  %v10893_v31 = vpop.f32.mrb[223].mxu1  ;;  %v8282_v39 = vsel %vm2189_vm3, %v15385_v1, -inf }
 0xc57   :  { %8283 = vmax.xlane.f32.xlu0 %v8282_v39  ;;  %v15400_v55 = vpop.permute.xlu1 %8717 }
 0xc58   :  { %v8285_v13 = vsel %vm2189_vm3, %v15388_v27, -inf  ;;  %16209 = vst [vmem:[#allocation45_spill] sm:$0xff] %v15400_v55 }
 0xc62   :  { %8811 = vrot.lane.b32.xlu1 %v16206_v3, %s11968_s1 }
 0xc6d   :  { %8764 = vrot.lane.b32.xlu0 %v16207_v24, %s11968_s1  ;;  %v8194_v43 = vpop.xlane.xlu0 %8193 }
 0xc6f   :  { %v8197_v61 = vpop.xlane.xlu1 %8196 }
 0xc86   :  { %8286 = vmax.xlane.f32.xlu1 %v8285_v13 }
 0xc92   :  { %v8206_v17 = vpop.xlane.xlu0 %8205 }
 0xc94   :  { %v8209_v31 = vpop.xlane.xlu1 %8208 }
 0xcac   :  { %v8200_v15 = vpop.xlane.xlu0 %8199 }
 0xcae   :  { %v8203_v39 = vpop.xlane.xlu1 %8202 }
 0xcb0   :  { %v15402_v10 = vpop.xlane.xlu0 %8217 }
 0xcb2   :  { %v8221_v3 = vpop.xlane.xlu1 %8220 }
 0xcb4   :  { %v15404_v29 = vpop.xlane.xlu0 %8211 }
 0xcb6   :  { %v15406_v24 = vpop.xlane.xlu1 %8214 }
 0xcb8   :  { %v15408_v41 = vpop.xlane.xlu0 %8229 }
 0xcba   :  { %v15410_v13 = vpop.xlane.xlu1 %8232 }
 0xcbc   :  { %v8242_v38 = vpop.xlane.xlu0 %8241 }
 0xcbd   :  { %v8288_v57 = vmax.f32 %v8194_v43, %v8242_v38 }
 0xcbe   :  { %v15412_v55 = vpop.xlane.xlu1 %8226 }
 0xcbf   :  { %v8304_v0 = vsub.f32 %v15207_v46, %v8288_v57  ;;  %v8352_v2 = vsub.f32 %v15291_v51, %v8288_v57 }
 0xcc0   :  { %v15416_v52 = vpop.xlane.xlu0 %8223 }
 0xcc1   :  { %v8320_v48 = vmul.f32 1.442695, %v8304_v0  ;;  %v8368_v54 = vmul.f32 1.442695, %v8352_v2 }
 0xcc2   :  { %v8257_v25 = vpop.xlane.xlu1 %8256 }
 0xcc3   :  { %11527 = vpow2.f32 %v8320_v48  ;;  %v8293_v9 = vmax.f32 %v8209_v31, %v8257_v25 }
 0xcc4   :  { %v8245_v23 = vpop.xlane.xlu0 %8244  ;;  %11529 = vpow2.f32 %v8368_v54 }
 0xcc5   :  { %v8289_v11 = vmax.f32 %v8197_v61, %v8245_v23  ;;  %v8309_v53 = vsub.f32 %v15230_v6, %v8293_v9  ;;  %v8357_v23 = vsub.f32 %v15306_v42, %v8293_v9 }
 0xcc6   :  { %v15421_v14 = vpop.xlane.xlu1 %8238 }
 0xcc7   :  { %v8305_v38 = vsub.f32 %v15210_v21, %v8289_v11  ;;  %v8353_v43 = vsub.f32 %v15311_v8, %v8289_v11  ;;  %v8330_v51 = vmul.f32 1.442695, %v8309_v53  ;;  %v8378_v2 = vmul.f32 1.442695, %v8357_v23 }
 0xcc8   :  { %v8254_v16 = vpop.xlane.xlu0 %8253 }
 0xcc9   :  { %v8322_v46 = vmul.f32 1.442695, %v8305_v38  ;;  %v8370_v33 = vmul.f32 1.442695, %v8353_v43  ;;  %v8292_v57 = vmax.f32 %v8206_v17, %v8254_v16 }
 0xccb   :  { %11531 = vpow2.f32 %v8322_v46  ;;  %v8308_v48 = vsub.f32 %v15225_v4, %v8292_v57  ;;  %v8356_v25 = vsub.f32 %v15324_v50, %v8292_v57 }
 0xccc   :  { %v15426_v54 = vpop.xlane.xlu0 %8235  ;;  %11533 = vpow2.f32 %v8370_v33 }
 0xccd   :  { %v15428_v0 = vpop.eup %11527  ;;  %v8328_v11 = vmul.f32 1.442695, %v8308_v48  ;;  %v8376_v21 = vmul.f32 1.442695, %v8356_v25  ;;  %11535 = vpow2.f32 %v8330_v51 }
 0xcce   :  { %v8251_v6 = vpop.xlane.xlu1 %8250  ;;  %v8400_v16 = vsel %vm2189_vm3, %v15428_v0, 0.0  ;;  %v15432_v53 = vpop.eup %11529 }
 0xccf   :  { %11537 = vpow2.f32 %v8328_v11  ;;  %v8291_v4 = vmax.f32 %v8203_v39, %v8251_v6  ;;  %8401 = vadd.xlane.f32.xlu0 %v8400_v16  ;;  %v8448_v33 = vsel %vm2189_vm3, %v15432_v53, 0.0 }
 0xcd0   :  { %v8248_v8 = vpop.xlane.xlu0 %8247  ;;  %11539 = vpow2.f32 %v8376_v21 }
 0xcd1   :  { %v8307_v9 = vsub.f32 %v15257_v59, %v8291_v4  ;;  %v8290_v42 = vmax.f32 %v8200_v15, %v8248_v8  ;;  %11541 = vpow2.f32 %v8378_v2  ;;  %v8355_v39 = vsub.f32 %v15342_v45, %v8291_v4 }
 0xcd2   :  { %v8269_v50 = vpop.xlane.xlu1 %8268 }
 0xcd3   :  { %v8306_v61 = vsub.f32 %v15251_v47, %v8290_v42  ;;  %v8354_v17 = vsub.f32 %v15339_v40, %v8290_v42  ;;  %8449 = vadd.xlane.f32.xlu0 %v8448_v33  ;;  %v8326_v31 = vmul.f32 1.442695, %v8307_v9  ;;  %v8297_v59 = vmax.f32 %v8221_v3, %v8269_v50 }
 0xcd4   :  { %v8266_v38 = vpop.xlane.xlu0 %8265  ;;  %v8374_v23 = vmul.f32 1.442695, %v8355_v39 }
 0xcd5   :  { %v15440_v43 = vpop.eup %11531  ;;  %v8324_v46 = vmul.f32 1.442695, %v8306_v61  ;;  %v8372_v57 = vmul.f32 1.442695, %v8354_v17  ;;  %v8296_v15 = vmax.f32 %v15402_v10, %v8266_v38  ;;  %v8313_v3 = vsub.f32 %v15262_v37, %v8297_v59 }
 0xcd6   :  { %v8403_v51 = vsel %vm2189_vm3, %v15440_v43, 0.0  ;;  %v15445_v48 = vpop.eup %11533  ;;  %v8263_v21 = vpop.xlane.xlu1 %8262 }
 0xcd7   :  { %11543 = vpow2.f32 %v8324_v46  ;;  %v8312_v47 = vsub.f32 %v15254_v18, %v8296_v15  ;;  %8404 = vadd.xlane.f32.xlu1 %v8403_v51  ;;  %v15448_v40 = vpop.eup %11535  ;;  %v8360_v10 = vsub.f32 %v15352_v36, %v8296_v15  ;;  %v8451_v16 = vsel %vm2189_vm3, %v15445_v48, 0.0 }
 0xcd8   :  { %11545 = vpow2.f32 %v8326_v31  ;;  %v8260_v45 = vpop.xlane.xlu0 %8259  ;;  %v8415_v2 = vsel %vm2189_vm3, %v15448_v40, 0.0  ;;  %v8338_v37 = vmul.f32 1.442695, %v8313_v3  ;;  %v8361_v36 = vsub.f32 %v15347_v32, %v8297_v59 }
 0xcd9   :  { %v15450_v25 = vpop.eup %11537  ;;  %11547 = vpow2.f32 %v8372_v57  ;;  %v8336_v11 = vmul.f32 1.442695, %v8312_v47  ;;  %v8294_v6 = vmax.f32 %v15404_v29, %v8260_v45  ;;  %v8295_v8 = vmax.f32 %v15406_v24, %v8263_v21 }
 0xcda   :  { %v8412_v18 = vsel %vm2189_vm3, %v15450_v25, 0.0  ;;  %v15459_v4 = vpop.eup %11539  ;;  %11549 = vpow2.f32 %v8374_v23  ;;  %v8384_v9 = vmul.f32 1.442695, %v8360_v10  ;;  %v8386_v17 = vmul.f32 1.442695, %v8361_v36  ;;  %v8281_v38 = vpop.xlane.xlu1 %8280 }
 0xcdb   :  { %8413 = vadd.xlane.f32.xlu0 %v8412_v18  ;;  %8452 = vadd.xlane.f32.xlu1 %v8451_v16  ;;  %v15465_v29 = vpop.eup %11541  ;;  %11551 = vpow2.f32 %v8336_v11  ;;  %v8310_v42 = vsub.f32 %v15273_v49, %v8294_v6  ;;  %v8460_v50 = vsel %vm2189_vm3, %v15459_v4, 0.0  ;;  %v8311_v32 = vsub.f32 %v15281_v7, %v8295_v8 }
 0xcdc   :  { %v8278_v33 = vpop.xlane.xlu0 %8277  ;;  %11553 = vpow2.f32 %v8338_v37  ;;  %v8463_v24 = vsel %vm2189_vm3, %v15465_v29, 0.0  ;;  %v8358_v49 = vsub.f32 %v15359_v34, %v8294_v6  ;;  %v8359_v15 = vsub.f32 %v15362_v56, %v8295_v8 }
 0xcdd   :  { %11555 = vpow2.f32 %v8384_v9  ;;  %v8332_v39 = vmul.f32 1.442695, %v8310_v42  ;;  %v8300_v46 = vmax.f32 %v15408_v41, %v8278_v33  ;;  %v8334_v7 = vmul.f32 1.442695, %v8311_v32 }
 0xcde   :  { %11557 = vpow2.f32 %v8386_v17  ;;  %v8301_v51 = vmax.f32 %v15410_v13, %v8281_v38  ;;  %v8380_v47 = vmul.f32 1.442695, %v8358_v49  ;;  %v8382_v56 = vmul.f32 1.442695, %v8359_v15  ;;  %v8275_v21 = vpop.xlane.xlu1 %8274 }
 0xcdf   :  { %8461 = vadd.xlane.f32.xlu0 %v8460_v50  ;;  %8416 = vadd.xlane.f32.xlu1 %v8415_v2  ;;  %11559 = vpow2.f32 %v8332_v39  ;;  %v8316_v34 = vsub.f32 %v15278_v28, %v8300_v46  ;;  %v8364_v11 = vsub.f32 %v15314_v26, %v8300_v46  ;;  %v8299_v36 = vmax.f32 %v15412_v55, %v8275_v21 }
 0xce0   :  { %v8272_v23 = vpop.xlane.xlu0 %8271  ;;  %11561 = vpow2.f32 %v8334_v7  ;;  %v8317_v13 = vsub.f32 %v15286_v60, %v8301_v51  ;;  %v8365_v26 = vsub.f32 %v15319_v58, %v8301_v51 }
 0xce1   :  { %v15470_v61 = vpop.eup %11543  ;;  %11563 = vpow2.f32 %v8380_v47  ;;  %v8344_v28 = vmul.f32 1.442695, %v8316_v34  ;;  %v8298_v6 = vmax.f32 %v15416_v52, %v8272_v23  ;;  %v8392_v52 = vmul.f32 1.442695, %v8364_v11 }
 0xce2   :  { %v15475_v31 = vpop.eup %11545  ;;  %v8406_v59 = vsel %vm2189_vm3, %v15470_v61, 0.0  ;;  %11565 = vpow2.f32 %v8382_v56  ;;  %v8346_v60 = vmul.f32 1.442695, %v8317_v13  ;;  %v8394_v58 = vmul.f32 1.442695, %v8365_v26 }
 0xce3   :  { %v15479_v57 = vpop.eup %11547  ;;  %8464 = vadd.xlane.f32.xlu1 %v8463_v24  ;;  %8407 = vadd.xlane.f32.xlu0 %v8406_v59  ;;  %v8409_v41 = vsel %vm2189_vm3, %v15475_v31, 0.0  ;;  %11567 = vpow2.f32 %v8344_v28  ;;  %v8314_v8 = vsub.f32 %v15298_v20, %v8298_v6  ;;  %v8315_v55 = vsub.f32 %v15301_v5, %v8299_v36 }
 0xce4   :  { %v15488_v45 = vpop.eup %11549  ;;  %v8454_v3 = vsel %vm2189_vm3, %v15479_v57, 0.0  ;;  %v8284_v50 = vpop.xlane.xlu0 %8283  ;;  %11569 = vpow2.f32 %v8346_v60  ;;  %v8362_v32 = vsub.f32 %v15373_v22, %v8298_v6  ;;  %v8363_v22 = vsub.f32 %v15376_v19, %v8299_v36 }
 0xce5   :  { %v15492_v10 = vpop.eup %11551  ;;  %v8457_v18 = vsel %vm2189_vm3, %v15488_v45, 0.0  ;;  %11571 = vpow2.f32 %v8392_v52  ;;  %v8340_v20 = vmul.f32 1.442695, %v8314_v8  ;;  %v8302_v24 = vmax.f32 %v15426_v54, %v8284_v50 }
 0xce6   :  { %v15499_v16 = vpop.eup %11553  ;;  %v8424_v2 = vsel %vm2189_vm3, %v15492_v10, 0.0  ;;  %11573 = vpow2.f32 %v8394_v58  ;;  %v8342_v5 = vmul.f32 1.442695, %v8315_v55  ;;  %v8388_v59 = vmul.f32 1.442695, %v8362_v32  ;;  %v15580_v55 = vpop.permute.xlu1 %8811 }
 0xce7   :  { %8410 = vadd.xlane.f32.xlu1 %v8409_v41  ;;  %8455 = vadd.xlane.f32.xlu0 %v8454_v3  ;;  %v15503_v37 = vpop.eup %11555  ;;  %v8427_v9 = vsel %vm2189_vm3, %v15499_v16, 0.0  ;;  %11575 = vpow2.f32 %v8340_v20  ;;  %v8318_v54 = vsub.f32 %v15334_v30, %v8302_v24  ;;  %v8390_v34 = vmul.f32 1.442695, %v8363_v22  ;;  %v16214_v22 = vld [vmem:[#allocation40_spill] sm:$0xff] }
 0xce8   :  { %v15510_v42 = vpop.eup %11557  ;;  %v8472_v33 = vsel %vm2189_vm3, %v15503_v37, 0.0  ;;  %11577 = vpow2.f32 %v8342_v5  ;;  %v8366_v41 = vsub.f32 %v15385_v1, %v8302_v24  ;;  %v16210_v5 = vld [vmem:[#allocation63_spill] sm:$0xff] }
 0xce9   :  { %v15514_v17 = vpop.eup %11559  ;;  %v8475_v39 = vsel %vm2189_vm3, %v15510_v42, 0.0  ;;  %11579 = vpow2.f32 %v8388_v59  ;;  %v8348_v19 = vmul.f32 1.442695, %v8318_v54  ;;  %v16215_v54 = vld [vmem:[#allocation35_spill] sm:$0xff] }
 0xcea   :  { %v15521_v49 = vpop.eup %11561  ;;  %v8418_v38 = vsel %vm2189_vm3, %v15514_v17, 0.0  ;;  %11581 = vpow2.f32 %v8390_v34  ;;  %v8396_v13 = vmul.f32 1.442695, %v8366_v41  ;;  %v16218_v34 = vld [vmem:[#allocation37_spill] sm:$0xff]  ;;  %v16220_v41 = vld [vmem:[#allocation55_spill] sm:$0xff] }
 0xceb   :  { %8458 = vadd.xlane.f32.xlu1 %v8457_v18  ;;  %8425 = vadd.xlane.f32.xlu0 %v8424_v2  ;;  %v15525_v46 = vpop.eup %11563  ;;  %v8421_v7 = vsel %vm2189_vm3, %v15521_v49, 0.0  ;;  %11583 = vpow2.f32 %v8348_v19  ;;  %v16219_v19 = vld [vmem:[#allocation54_spill] sm:$0xff] }
 0xcec   :  { %v15531_v15 = vpop.eup %11565  ;;  %v8466_v51 = vsel %vm2189_vm3, %v15525_v46, 0.0  ;;  %11585 = vpow2.f32 %v8396_v13  ;;  %v16222_v13 = vld [vmem:[#allocation73_spill] sm:$0xff] }
 0xced   :  { %v15535_v47 = vpop.eup %11567  ;;  %v8469_v30 = vsel %vm2189_vm3, %v15531_v15, 0.0 }
 0xcee   :  { %v15540_v23 = vpop.eup %11569  ;;  %v8436_v3 = vsel %vm2189_vm3, %v15535_v47, 0.0 }
 0xcef   :  { %8428 = vadd.xlane.f32.xlu1 %v8427_v9  ;;  %8473 = vadd.xlane.f32.xlu0 %v8472_v33  ;;  %v15544_v56 = vpop.eup %11571  ;;  %v8439_v11 = vsel %vm2189_vm3, %v15540_v23, 0.0 }
 0xcf0   :  { %v15548_v28 = vpop.eup %11573  ;;  %v8484_v1 = vsel %vm2189_vm3, %v15544_v56, 0.0 }
 0xcf1   :  { %v15552_v21 = vpop.eup %11575  ;;  %v8487_v6 = vsel %vm2189_vm3, %v15548_v28, 0.0 }
 0xcf2   :  { %v15556_v18 = vpop.eup %11577  ;;  %v8430_v2 = vsel %vm2189_vm3, %v15552_v21, 0.0 }
 0xcf3   :  { %8476 = vadd.xlane.f32.xlu1 %v8475_v39  ;;  %8419 = vadd.xlane.f32.xlu0 %v8418_v38  ;;  %v15560_v60 = vpop.eup %11579  ;;  %v8433_v26 = vsel %vm2189_vm3, %v15556_v18, 0.0 }
 0xcf4   :  { %v15564_v36 = vpop.eup %11581  ;;  %v8478_v52 = vsel %vm2189_vm3, %v15560_v60, 0.0 }
 0xcf5   :  { %v15568_v8 = vpop.eup %11583  ;;  %v8481_v9 = vsel %vm2189_vm3, %v15564_v36, 0.0 }
 0xcf6   :  { %v8442_v50 = vsel %vm2189_vm3, %v15568_v8, 0.0  ;;  %v15574_v33 = vpop.eup %11585 }
 0xcf7   :  { %8422 = vadd.xlane.f32.xlu1 %v8421_v7  ;;  %8467 = vadd.xlane.f32.xlu0 %v8466_v51  ;;  %v8490_v58 = vsel %vm2189_vm3, %v15574_v33, 0.0  ;;  %v16216_v7 = vld [vmem:[#allocation72_spill] sm:$0xff]  ;;  %v16217_v51 = vld [vmem:[#allocation79_spill] sm:$0xff] }
 0xcfb   :  { %8470 = vadd.xlane.f32.xlu1 %v8469_v30  ;;  %8437 = vadd.xlane.f32.xlu0 %v8436_v3  ;;  %v15621_v30 = vpop.permute.xlu0 %8764  ;;  %v16221_v3 = vld [vmem:[#allocation58_spill] sm:$0xff] }
 0xcff   :  { %8440 = vadd.xlane.f32.xlu1 %v8439_v11  ;;  %8485 = vadd.xlane.f32.xlu0 %v8484_v1  ;;  %v16223_v1 = vld [vmem:[#allocation61_spill] sm:$0xff] }
 0xd03   :  { %8488 = vadd.xlane.f32.xlu1 %v8487_v6  ;;  %8431 = vadd.xlane.f32.xlu0 %v8430_v2  ;;  %v16224_v6 = vld [vmem:[#allocation81_spill] sm:$0xff] }
 0xd04   :  { %v16225_v2 = vld [vmem:[#allocation65_spill] sm:$0xff] }
 0xd07   :  { %8434 = vadd.xlane.f32.xlu1 %v8433_v26  ;;  %8479 = vadd.xlane.f32.xlu0 %v8478_v52  ;;  %v16226_v52 = vld [vmem:[#allocation41_spill] sm:$0xff] }
 0xd0b   :  { %8482 = vadd.xlane.f32.xlu1 %v8481_v9  ;;  %8443 = vadd.xlane.f32.xlu0 %v8442_v50 }
 0xd0f   :  { %8491 = vadd.xlane.f32.xlu0 %v8490_v58  ;;  %v16227_v58 = vld [vmem:[#allocation60_spill] sm:$0xff] }
 0xd13   :  { %v8287_v32 = vpop.xlane.xlu1 %8286 }
 0xd14   :  { %v8303_v20 = vmax.f32 %v15421_v14, %v8287_v32  ;;  %v16211_v14 = vld [vmem:[#allocation67_spill] sm:$0xff] }
 0xd15   :  { %v16228_v32 = vld [vmem:[#allocation59_spill] sm:$0xff] }
 0xd16   :  { %v8319_v24 = vsub.f32 %v15327_v44, %v8303_v20  ;;  %v8367_v38 = vsub.f32 %v15388_v27, %v8303_v20 }
 0xd18   :  { %v8350_v39 = vmul.f32 1.442695, %v8319_v24 }
 0xd1a   :  { %11587 = vpow2.f32 %v8350_v39 }
 0xd1c   :  { %8905 = vrot.lane.b32.xlu1 %v16087_v35, %s11968_s1  ;;  %v8398_v35 = vmul.f32 1.442695, %v8367_v38  ;;  %v16229_v38 = vld [vmem:[#allocation78_spill] sm:$0xff] }
 0xd1e   :  { %11589 = vpow2.f32 %v8398_v35  ;;  %v16230_v35 = vld [vmem:[#allocation75_spill] sm:$0xff] }
 0xd24   :  { %v15597_v44 = vpop.eup %11587 }
 0xd25   :  { %8858 = vrot.lane.b32.xlu0 %v16084_v63, %s11968_s1  ;;  %v16212_v63 = vld [vmem:[#allocation71_spill] sm:$0xff] }
 0xd28   :  { %v15603_v27 = vpop.eup %11589 }
 0xd29   :  { %8952 = vrot.lane.b32.xlu0 %v16086_v62, %s11968_s1  ;;  %v16213_v62 = vld [vmem:[#allocation77_spill] sm:$0xff]  ;;  %v8493_v59 = vsel %vm2189_vm3, %v15603_v27, 0.0 }
 0xd2d   :  { %9046 = vrot.lane.b32.xlu0 %v16088_v12, %s11968_s1  ;;  %v8445_v12 = vsel %vm2189_vm3, %v15597_v44, 0.0 }
 0xd31   :  { %9140 = vrot.lane.b32.xlu0 %v16210_v5, %s11968_s1 }
 0xd35   :  { %9234 = vrot.lane.b32.xlu0 %v16211_v14, %s11968_s1 }
 0xd39   :  { %5294 = vrot.lane.b32.xlu0 %v16212_v63, %s11950_s21 }
 0xd3d   :  { %5298 = vrot.lane.b32.xlu0 %v16213_v62, %s11950_s21  ;;  %v16231_v62 = vld [vmem:[#allocation39_spill] sm:$0xff] }
 0xd40   :  { %8446 = vadd.xlane.f32.xlu1 %v8445_v12  ;;  %v16232_v12 = vld [vmem:[#allocation83_spill] sm:$0xff] }
 0xd41   :  { %7319 = vrot.lane.b32.xlu0 %v16214_v22, %s11969_s17 }
 0xd44   :  { %8494 = vadd.xlane.f32.xlu1 %v8493_v59 }
 0xd45   :  { %7323 = vrot.lane.b32.xlu0 %v16215_v54, %s11969_s17 }
 0xd49   :  { %5302 = vrot.lane.b32.xlu0 %v16216_v7, %s11950_s21  ;;  %v16233_v7 = vld [vmem:[#allocation52_spill] sm:$0xff] }
 0xd4d   :  { %5306 = vrot.lane.b32.xlu0 %v16217_v51, %s11950_s21  ;;  %v16234_v51 = vld [vmem:[#allocation33_spill] sm:$0xff] }
 0xd51   :  { %7327 = vrot.lane.b32.xlu0 %v16218_v34, %s11969_s17 }
 0xd55   :  { %8999 = vrot.lane.b32.xlu1 %v16219_v19, %s11968_s1  ;;  %7331 = vrot.lane.b32.xlu0 %v16220_v41, %s11969_s17 }
 0xd59   :  { %9093 = vrot.lane.b32.xlu1 %v16221_v3, %s11968_s1  ;;  %5310 = vrot.lane.b32.xlu0 %v16222_v13, %s11950_s21  ;;  %v16235_v13 = vld [vmem:[#allocation56_spill] sm:$0xff] }
 0xd5c   :  { %v8402_v11 = vpop.xlane.xlu0 %8401 }
 0xd5d   :  { %9187 = vrot.lane.b32.xlu1 %v16223_v1, %s11968_s1  ;;  %5314 = vrot.lane.b32.xlu0 %v16224_v6, %s11950_s21 }
 0xd60   :  { %v8450_v26 = vpop.xlane.xlu0 %8449 }
 0xd61   :  { %9281 = vrot.lane.b32.xlu1 %v16225_v2, %s11968_s1  ;;  %7335 = vrot.lane.b32.xlu0 %v16226_v52, %s11969_s17  ;;  %v8496_v50 = vadd.f32 %v8450_v26, %v8402_v11 }
 0xd63   :  { %11591 = vrcp.f32 %v8496_v50  ;;  %v16236_v50 = vld [vmem:[#allocation80_spill] sm:$0xff] }
 0xd64   :  { %v8405_v9 = vpop.xlane.xlu1 %8404 }
 0xd65   :  { %5296 = vrot.lane.b32.xlu1 %v16227_v58, %s11950_s21  ;;  %7339 = vrot.lane.b32.xlu0 %v16228_v32, %s11969_s17  ;;  %v16237_v32 = vld [vmem:[#allocation47_spill] sm:$0xff] }
 0xd68   :  { %v8414_v20 = vpop.xlane.xlu0 %8413  ;;  %v8453_v24 = vpop.xlane.xlu1 %8452 }
 0xd69   :  { %v8497_v39 = vadd.f32 %v8453_v24, %v8405_v9  ;;  %5300 = vrot.lane.b32.xlu1 %v16229_v38, %s11950_s21  ;;  %5318 = vrot.lane.b32.xlu0 %v16230_v35, %s11950_s21 }
 0xd6b   :  { %11593 = vrcp.f32 %v8497_v39  ;;  %v16239_v39 = vld [vmem:[#allocation43_spill] sm:$0xff] }
 0xd6c   :  { %v8462_v5 = vpop.xlane.xlu0 %8461  ;;  %v8417_v14 = vpop.xlane.xlu1 %8416 }
 0xd6d   :  { %v8500_v63 = vadd.f32 %v8462_v5, %v8414_v20  ;;  %7321 = vrot.lane.b32.xlu1 %v16231_v62, %s11969_s17  ;;  %5322 = vrot.lane.b32.xlu0 %v16232_v12, %s11950_s21  ;;  %v15651_v34 = vpop.eup %11591 }
 0xd6e   :  { %v8552_v11 = vmul.f32 %v15651_v34, %v15432_v53  ;;  %v16238_v53 = vmov 0.0  }
 0xd6f   :  { %11595 = vrcp.f32 %v8500_v63 }
 0xd70   :  { %v8465_v22 = vpop.xlane.xlu1 %8464  ;;  %v8408_v59 = vpop.xlane.xlu0 %8407 }
 0xd71   :  { %v8501_v54 = vadd.f32 %v8465_v22, %v8417_v14  ;;  %7325 = vrot.lane.b32.xlu1 %v16233_v7, %s11969_s17  ;;  %7343 = vrot.lane.b32.xlu0 %v16234_v51, %s11969_s17  ;;  %v16240_v22 = vld [vmem:[#allocation38_spill] sm:$0xff] }
 0xd72   :  { %v16241_v51 = vld [vmem:[#allocation74_spill] sm:$0xff] }
 0xd73   :  { %11597 = vrcp.f32 %v8501_v54 }
 0xd74   :  { %v8411_v19 = vpop.xlane.xlu1 %8410  ;;  %v8456_v3 = vpop.xlane.xlu0 %8455 }
 0xd75   :  { %v15653_v41 = vpop.eup %11593  ;;  %5304 = vrot.lane.b32.xlu1 %v16235_v13, %s11950_s21  ;;  %v8498_v6 = vadd.f32 %v8456_v3, %v8408_v59 }
 0xd76   :  { %v8553_v1 = vmul.f32 %v15653_v41, %v15445_v48 }
 0xd77   :  { %11599 = vrcp.f32 %v8498_v6 }
 0xd78   :  { %v8459_v2 = vpop.xlane.xlu1 %8458  ;;  %v8568_v26 = vpack.c.bf16 %v8553_v1, %v8552_v11  ;;  %v8426_v52 = vpop.xlane.xlu0 %8425 }
 0xd79   :  { %v8499_v9 = vadd.f32 %v8459_v2, %v8411_v19  ;;  %5308 = vrot.lane.b32.xlu1 %v16236_v50, %s11950_s21  ;;  %v15664_v58 = vpop.eup %11595  ;;  %v16244_v50 = vld [vmem:[#allocation34_spill] sm:$0xff] }
 0xd7a   :  { %10897 = vmatmul.mubr.msk.bf16.vlgmr.msra.gmra.mrb[208].mxu0 %vm2189_vm3, %v8568_v26  ;;  %v8556_v38 = vmul.f32 %v15664_v58, %v15459_v4  ;;  %v16242_v26 = vld [vmem:[#allocation82_spill] sm:$0xff] }
 0xd7b   :  { %11601 = vrcp.f32 %v8499_v9  ;;  %10907 = vmatpush3.bf16.msra.mxu0 %v16237_v32  ;;  %10908 = vmatprep.mubr.msk.bf16.mxu0 %vm11965_vm1, %v16238_v53 }
 0xd7c   :  { %v8429_v48 = vpop.xlane.xlu1 %8428  ;;  %10918 = vmatprep.subr.bf16.mxu0 %v16238_v53  ;;  %v8474_v24 = vpop.xlane.xlu0 %8473 }
 0xd7d   :  { %v15670_v20 = vpop.eup %11597  ;;  %7329 = vrot.lane.b32.xlu1 %v16239_v39, %s11969_s17  ;;  %v8504_v5 = vadd.f32 %v8474_v24, %v8426_v52 }
 0xd7e   :  { %v8557_v35 = vmul.f32 %v15670_v20, %v15465_v29 }
 0xd7f   :  { %11603 = vrcp.f32 %v8504_v5 }
 0xd80   :  { %v8477_v14 = vpop.xlane.xlu1 %8476  ;;  %v8570_v63 = vpack.c.bf16 %v8557_v35, %v8556_v38  ;;  %v8420_v62 = vpop.xlane.xlu0 %8419 }
 0xd81   :  { %v8505_v12 = vadd.f32 %v8477_v14, %v8429_v48  ;;  %7333 = vrot.lane.b32.xlu1 %v16240_v22, %s11969_s17  ;;  %v11600_v59 = vpop.eup %11599  ;;  %v16245_v14 = vld [vmem:[#allocation44_spill] sm:$0xff] }
 0xd82   :  { %10909 = vmatmul.mubr.msk.bf16.vlgmr.msra.gmra.mrb[212].mxu0 %vm2189_vm3, %v8570_v63  ;;  %v15686_v54 = vmul.f32 %v11600_v59, %v15470_v61  ;;  %v8554_v19 = vmul.f32 %v11600_v59, %v15479_v57  ;;  %v16246_v22 = vld [vmem:[#allocation76_spill] sm:$0xff] }
 0xd83   :  { %11605 = vrcp.f32 %v8505_v12  ;;  %10919 = vmatpush3.bf16.msra.mxu0 %v15621_v30  ;;  %10920 = vmatprep.mubr.msk.bf16.mxu0 %vm11965_vm1, %v16238_v53 }
 0xd84   :  { %v8423_v4 = vpop.xlane.xlu1 %8422  ;;  %10930 = vmatprep.subr.bf16.mxu0 %v16238_v53  ;;  %v8468_v7 = vpop.xlane.xlu0 %8467 }
 0xd85   :  { %v11602_v29 = vpop.eup %11601  ;;  %5312 = vrot.lane.b32.xlu1 %v16241_v51, %s11950_s21  ;;  %v8502_v13 = vadd.f32 %v8468_v7, %v8420_v62 }
 0xd86   :  { %v15692_v3 = vmul.f32 %v11602_v29, %v15475_v31  ;;  %v8555_v30 = vmul.f32 %v11602_v29, %v15488_v45  ;;  %v16243_v31 = vld [vmem:[#allocation45_spill] sm:$0xff] }
 0xd87   :  { %11607 = vrcp.f32 %v8502_v13 }
 0xd88   :  { %v8471_v11 = vpop.xlane.xlu1 %8470  ;;  %v8569_v1 = vpack.c.bf16 %v8555_v30, %v8554_v19  ;;  %v8545_v6 = vpack.c.bf16 %v15692_v3, %v15686_v54  ;;  %v8438_v61 = vpop.xlane.xlu0 %8437 }
 0xd89   :  { %v8503_v2 = vadd.f32 %v8471_v11, %v8423_v4  ;;  %5316 = vrot.lane.b32.xlu1 %v16242_v26, %s11950_s21  ;;  %v15700_v57 = vpop.eup %11603  ;;  %v16247_v11 = vld [vmem:[#allocation84_spill] sm:$0xff] }
 0xd8a   :  { %10903 = vmatmul.mubr.msk.bf16.vlgmr.msra.gmra.mrb[224].mxu1 %vm2189_vm3, %v8569_v1  ;;  %v8560_v32 = vmul.f32 %v15700_v57, %v15503_v37 }
 0xd8b   :  { %11609 = vrcp.f32 %v8503_v2  ;;  %10913 = vmatpush3.bf16.msra.mxu1 %v16243_v31  ;;  %10914 = vmatprep.mubr.msk.bf16.mxu1 %vm11965_vm1, %v16238_v53 }
 0xd8c   :  { %v8441_v45 = vpop.xlane.xlu1 %8440  ;;  %10924 = vmatprep.subr.bf16.mxu1 %v16238_v53  ;;  %v8486_v9 = vpop.xlane.xlu0 %8485 }
 0xd8d   :  { %v15706_v52 = vpop.eup %11605  ;;  %7337 = vrot.lane.b32.xlu1 %v16244_v50, %s11969_s17  ;;  %v8508_v24 = vadd.f32 %v8486_v9, %v8438_v61 }
 0xd8e   :  { %v8561_v48 = vmul.f32 %v15706_v52, %v15510_v42 }
 0xd90   :  { %v8489_v39 = vpop.xlane.xlu1 %8488  ;;  %v8572_v38 = vpack.c.bf16 %v8561_v48, %v8560_v32  ;;  %v8432_v35 = vpop.xlane.xlu0 %8431 }
 0xd91   :  { %v8509_v5 = vadd.f32 %v8489_v39, %v8441_v45  ;;  %7341 = vrot.lane.b32.xlu1 %v16245_v14, %s11969_s17  ;;  %v11608_v63 = vpop.eup %11607 }
 0xd92   :  { %10921 = vmatmul.mubr.msk.bf16.vlgmr.msra.gmra.mrb[216].mxu0 %vm2189_vm3, %v8572_v38  ;;  %v15720_v42 = vmul.f32 %v11608_v63, %v15514_v17  ;;  %v8558_v59 = vmul.f32 %v11608_v63, %v15525_v46 }
 0xd93   :  { %11611 = vrcp.f32 %v8509_v5  ;;  %10932 = vmatprep.mubr.msk.bf16.mxu0 %vm11965_vm1, %v16238_v53 }
 0xd94   :  { %11613 = vrcp.f32 %v8508_v24  ;;  %v8435_v37 = vpop.xlane.xlu1 %8434  ;;  %v8480_v12 = vpop.xlane.xlu0 %8479 }
 0xd95   :  { %v11610_v62 = vpop.eup %11609  ;;  %5320 = vrot.lane.b32.xlu1 %v16246_v22, %s11950_s21  ;;  %v8506_v7 = vadd.f32 %v8480_v12, %v8432_v35 }
 0xd96   :  { %v15726_v4 = vmul.f32 %v11610_v62, %v15521_v49  ;;  %v8559_v29 = vmul.f32 %v11610_v62, %v15531_v15  ;;  %v16248_v15 = vld [vmem:[#allocation36_spill] sm:$0xff] }
 0xd97   :  { %11615 = vrcp.f32 %v8506_v7 }
 0xd98   :  { %v8483_v51 = vpop.xlane.xlu1 %8482  ;;  %v8571_v19 = vpack.c.bf16 %v8559_v29, %v8558_v59  ;;  %v8547_v30 = vpack.c.bf16 %v15726_v4, %v15720_v42  ;;  %v15731_v17 = vpop.xlane.xlu0 %8443 }
 0xd99   :  { %v8507_v13 = vadd.f32 %v8483_v51, %v8435_v37  ;;  %5324 = vrot.lane.b32.xlu1 %v16247_v11, %s11950_s21 }
 0xd9a   :  { %10915 = vmatmul.mubr.msk.bf16.vlgmr.msra.gmra.mrb[228].mxu1 %vm2189_vm3, %v8571_v19 }
 0xd9b   :  { %11617 = vrcp.f32 %v8507_v13  ;;  %10925 = vmatpush3.bf16.msra.mxu1 %v15580_v55  ;;  %10926 = vmatprep.mubr.msk.bf16.mxu1 %vm11965_vm1, %v16238_v53 }
 0xd9c   :  { %10936 = vmatprep.subr.bf16.mxu1 %v16238_v53  ;;  %v15740_v46 = vpop.xlane.xlu0 %8491  ;;  %v8906_v39 = vpop.permute.xlu1 %8905 }
 0xd9d   :  { %v11612_v49 = vpop.eup %11611  ;;  %7345 = vrot.lane.b32.xlu1 %v16248_v15, %s11969_s17  ;;  %v8510_v12 = vadd.f32 %v15740_v46, %v15731_v17 }
 0xd9e   :  { %v11614_v1 = vpop.eup %11613  ;;  %v8565_v61 = vmul.f32 %v11612_v49, %v15548_v28  ;;  %v8529_v28 = vmul.f32 %v15653_v41, %v15440_v43 }
 0xd9f   :  { %v8564_v2 = vmul.f32 %v11614_v1, %v15544_v56  ;;  %11619 = vrcp.f32 %v8510_v12  ;;  %v16249_v12 = vld [vmem:[#allocation64_spill] sm:$0xff] }
 0xda0   :  { %v8859_v26 = vpop.permute.xlu0 %8858 }
 0xda1   :  { %v11616_v31 = vpop.eup %11615  ;;  %10931 = vmatpush3.bf16.msra.mxu0 %v8859_v26  ;;  %v8574_v55 = vpack.c.bf16 %v8565_v61, %v8564_v2 }
 0xda2   :  { %10942 = vmatprep.subr.bf16.mxu0 %v16238_v53  ;;  %v15748_v9 = vmul.f32 %v11616_v31, %v15552_v21  ;;  %v8562_v32 = vmul.f32 %v11616_v31, %v15560_v60  ;;  %v8528_v60 = vmul.f32 %v15651_v34, %v15428_v0  ;;  %v8533_v0 = vmul.f32 %v15670_v20, %v15448_v40 }
 0xda3   :  { %v8532_v34 = vmul.f32 %v15664_v58, %v15450_v25  ;;  %v8537_v40 = vmul.f32 %v15706_v52, %v15499_v16  ;;  %v8536_v25 = vmul.f32 %v15700_v57, %v15492_v10  ;;  %v8541_v16 = vmul.f32 %v11612_v49, %v15540_v23 }
 0xda4   :  { %v8953_v50 = vpop.permute.xlu0 %8952  ;;  %10933 = vmatmul.mubr.msk.bf16.vlgmr.msra.gmra.mrb[220].mxu0 %vm2189_vm3, %v8574_v55  ;;  %v8540_v52 = vmul.f32 %v11614_v1, %v15535_v47 }
 0xda5   :  { %v11618_v45 = vpop.eup %11617  ;;  %10943 = vmatpush3.bf16.msra.mxu0 %v8953_v50  ;;  %10944 = vmatprep.mubr.msk.bf16.mxu0 %vm11965_vm1, %v16238_v53  ;;  %v8546_v38 = vpack.c.bf16 %v8533_v0, %v8532_v34  ;;  %v8548_v20 = vpack.c.bf16 %v8537_v40, %v8536_v25 }
 0xda6   :  { %v15753_v48 = vmul.f32 %v11618_v45, %v15556_v18  ;;  %v8563_v56 = vmul.f32 %v11618_v45, %v15564_v36  ;;  %10954 = vmatprep.subr.bf16.mxu0 %v16238_v53  ;;  %v8544_v36 = vpack.c.bf16 %v8529_v28, %v8528_v60  ;;  %v8550_v10 = vpack.c.bf16 %v8541_v16, %v8540_v52 }
 0xda8   :  { %v8573_v21 = vpack.c.bf16 %v8563_v56, %v8562_v32  ;;  %v8549_v24 = vpack.c.bf16 %v15753_v48, %v15748_v9  ;;  %v9047_v18 = vpop.permute.xlu0 %9046 }
 0xda9   :  { %v11620_v19 = vpop.eup %11619 }
 0xdaa   :  { %10927 = vmatmul.mubr.msk.bf16.vlgmr.msra.gmra.mrb[232].mxu1 %vm2189_vm3, %v8573_v21  ;;  %v8566_v49 = vmul.f32 %v11620_v19, %v15574_v33  ;;  %v8542_v4 = vmul.f32 %v11620_v19, %v15568_v8 }
 0xdab   :  { %10937 = vmatpush3.bf16.msra.mxu1 %v8906_v39  ;;  %10938 = vmatprep.mubr.msk.bf16.mxu1 %vm11965_vm1, %v16238_v53 }
 0xdac   :  { %10948 = vmatprep.subr.bf16.mxu1 %v16238_v53  ;;  %v9141_v43 = vpop.permute.xlu0 %9140  ;;  %10945 = vmatmul.mubr.msk.bf16.vlgmr.msra.gmra.mrb[208].mxu0 %vm2189_vm3, %v8544_v36 }
 0xdad   :  { %10955 = vmatpush3.bf16.msra.mxu0 %v9047_v18  ;;  %10956 = vmatprep.mubr.msk.bf16.mxu0 %vm11965_vm1, %v16238_v53 }
 0xdae   :  { %10966 = vmatprep.subr.bf16.mxu0 %v16238_v53 }
 0xdb0   :  { %v9235_v41 = vpop.permute.xlu0 %9234 }
 0xdb4   :  { %v5295_v35 = vpop.permute.xlu0 %5294  ;;  %10957 = vmatmul.mubr.msk.bf16.vlgmr.msra.gmra.mrb[212].mxu0 %vm2189_vm3, %v8546_v38 }
 0xdb5   :  { %5343 = vst.msk [vmem:[#allocation2] sm:$0xff] %vm5342_vm4, %v5295_v35  ;;  %10967 = vmatpush3.bf16.msra.mxu0 %v9141_v43  ;;  %10968 = vmatprep.mubr.msk.bf16.mxu0 %vm11965_vm1, %v16238_v53 }
 0xdb6   :  { %10978 = vmatprep.subr.bf16.mxu0 %v16238_v53 }
 0xdb8   :  { %v5299_v58 = vpop.permute.xlu0 %5298 }
 0xdb9   :  { %5345 = vst.msk [vmem:[#allocation2 + $0x10] sm:$0xff] %vm5342_vm4, %v5299_v58 }
 0xdbc   :  { %v7320_v5 = vpop.permute.xlu0 %7319  ;;  %10969 = vmatmul.mubr.msk.bf16.vlgmr.msra.gmra.mrb[216].mxu0 %vm2189_vm3, %v8548_v20  ;;  %v11173_v20 = vld [vmem:[#allocation21] sm:$0xff]  }
 0xdbd   :  { %7368 = vst.msk [vmem:[#allocation2] sm:$0xff] %vm7367_vm5, %v7320_v5  ;;  %10979 = vmatpush3.bf16.msra.mxu0 %v9235_v41  ;;  %10980 = vmatprep.mubr.msk.bf16.mxu0 %vm11965_vm1, %v16238_v53  ;;  %v11174_v5 = vld [vmem:[#allocation21 + $0x8] sm:$0xff]  }
 0xdbe   :  { %10990 = vmatprep.subr.bf16.mxu0 %v11173_v20 }
 0xdc0   :  { %v7324_v14 = vpop.permute.xlu0 %7323 }
 0xdc1   :  { %7370 = vst.msk [vmem:[#allocation2 + $0x10] sm:$0xff] %vm7367_vm5, %v7324_v14 }
 0xdc4   :  { %v5303_v57 = vpop.permute.xlu0 %5302  ;;  %10981 = vmatmul.mubr.msk.bf16.vlgmr.msra.gmra.mrb[220].mxu0 %vm2189_vm3, %v8550_v10 }
 0xdc5   :  { %5347 = vst.msk [vmem:[#allocation2 + $0x20] sm:$0xff] %vm5342_vm4, %v5303_v57  ;;  %10991 = vmatpush3.bf16.msra.mxu0 %v11173_v20 }
 0xdc6   :  { %10992 = vmatprep.subr.bf16.mxu0 %v11174_v5 }
 0xdc8   :  { %v5307_v63 = vpop.permute.xlu0 %5306 }
 0xdc9   :  { %5349 = vst.msk [vmem:[#allocation2 + $0x30] sm:$0xff] %vm5342_vm4, %v5307_v63  ;;  %10993 = vmatpush3.bf16.msra.mxu0 %v11174_v5 }
 0xdcc   :  { %v7328_v37 = vpop.permute.xlu0 %7327 }
 0xdcd   :  { %v8447_v62 = vpop.xlane.xlu1 %8446  ;;  %7372 = vst.msk [vmem:[#allocation2 + $0x20] sm:$0xff] %vm7367_vm5, %v7328_v37 }
 0xdd0   :  { %v7332_v47 = vpop.permute.xlu0 %7331 }
 0xdd1   :  { %v8495_v23 = vpop.xlane.xlu1 %8494  ;;  %7374 = vst.msk [vmem:[#allocation2 + $0x30] sm:$0xff] %vm7367_vm5, %v7332_v47  ;;  %v16250_v47 = vld [vmem:[#allocation42_spill] sm:$0xff] }
 0xdd2   :  { %v8511_v22 = vadd.f32 %v8495_v23, %v8447_v62 }
 0xdd4   :  { %11621 = vrcp.f32 %v8511_v22  ;;  %v5311_v59 = vpop.permute.xlu0 %5310 }
 0xdd5   :  { %v9000_v29 = vpop.permute.xlu1 %8999  ;;  %5351 = vst.msk [vmem:[#allocation2 + $0x40] sm:$0xff] %vm5342_vm4, %v5311_v59 }
 0xdd8   :  { %v5315_v7 = vpop.permute.xlu0 %5314 }
 0xdd9   :  { %v9094_v51 = vpop.permute.xlu1 %9093  ;;  %5353 = vst.msk [vmem:[#allocation2 + $0x50] sm:$0xff] %vm5342_vm4, %v5315_v7 }
 0xddc   :  { %v7336_v13 = vpop.permute.xlu0 %7335 }
 0xddd   :  { %v9188_v17 = vpop.permute.xlu1 %9187  ;;  %7376 = vst.msk [vmem:[#allocation2 + $0x40] sm:$0xff] %vm7367_vm5, %v7336_v13 }
 0xdde   :  { %v11622_v11 = vpop.eup %11621 }
 0xddf   :  { %v8567_v46 = vmul.f32 %v11622_v11, %v15603_v27 }
 0xde0   :  { %v7340_v15 = vpop.permute.xlu0 %7339 }
 0xde1   :  { %v9282_v1 = vpop.permute.xlu1 %9281  ;;  %v8575_v61 = vpack.c.bf16 %v8567_v46, %v8566_v49  ;;  %7378 = vst.msk [vmem:[#allocation2 + $0x50] sm:$0xff] %vm7367_vm5, %v7340_v15 }
 0xde3   :  { %10939 = vmatmul.mubr.msk.bf16.vlgmr.msra.gmra.mrb[236].mxu1 %vm2189_vm3, %v8575_v61 }
 0xde4   :  { %10949 = vmatpush3.bf16.msra.mxu1 %v9000_v29  ;;  %10950 = vmatprep.mubr.msk.bf16.mxu1 %vm11965_vm1, %v16238_v53  ;;  %v5319_v2 = vpop.permute.xlu0 %5318 }
 0xde5   :  { %v5297_v26 = vpop.permute.xlu1 %5296  ;;  %10960 = vmatprep.subr.bf16.mxu1 %v16238_v53  ;;  %5355 = vst.msk [vmem:[#allocation2 + $0x60] sm:$0xff] %vm5342_vm4, %v5319_v2 }
 0xde6   :  { %5344 = vst.msk [vmem:[#allocation2 + $0x8] sm:$0xff] %vm5342_vm4, %v5297_v26 }
 0xde8   :  { %v5323_v33 = vpop.permute.xlu0 %5322 }
 0xde9   :  { %v5301_v27 = vpop.permute.xlu1 %5300  ;;  %5357 = vst.msk [vmem:[#allocation2 + $0x70] sm:$0xff] %vm5342_vm4, %v5323_v33 }
 0xdea   :  { %5346 = vst.msk [vmem:[#allocation2 + $0x18] sm:$0xff] %vm5342_vm4, %v5301_v27 }
 0xdeb   :  { %10951 = vmatmul.mubr.msk.bf16.vlgmr.msra.gmra.mrb[224].mxu1 %vm2189_vm3, %v8545_v6  ;;  %v8543_v6 = vmul.f32 %v11622_v11, %v15597_v44 }
 0xdec   :  { %10961 = vmatpush3.bf16.msra.mxu1 %v9094_v51  ;;  %10962 = vmatprep.mubr.msk.bf16.mxu1 %vm11965_vm1, %v16238_v53  ;;  %v7344_v31 = vpop.permute.xlu0 %7343 }
 0xded   :  { %v7322_v55 = vpop.permute.xlu1 %7321  ;;  %10972 = vmatprep.subr.bf16.mxu1 %v16238_v53  ;;  %7380 = vst.msk [vmem:[#allocation2 + $0x60] sm:$0xff] %vm7367_vm5, %v7344_v31  ;;  %v8551_v50 = vpack.c.bf16 %v8543_v6, %v8542_v4 }
 0xdee   :  { %7369 = vst.msk [vmem:[#allocation2 + $0x8] sm:$0xff] %vm7367_vm5, %v7322_v55 }
 0xdf1   :  { %v7326_v45 = vpop.permute.xlu1 %7325 }
 0xdf2   :  { %7371 = vst.msk [vmem:[#allocation2 + $0x18] sm:$0xff] %vm7367_vm5, %v7326_v45 }
 0xdf3   :  { %10963 = vmatmul.mubr.msk.bf16.vlgmr.msra.gmra.mrb[228].mxu1 %vm2189_vm3, %v8547_v30 }
 0xdf4   :  { %10973 = vmatpush3.bf16.msra.mxu1 %v9188_v17  ;;  %10974 = vmatprep.mubr.msk.bf16.mxu1 %vm11965_vm1, %v16238_v53 }
 0xdf5   :  { %v5305_v54 = vpop.permute.xlu1 %5304  ;;  %10984 = vmatprep.subr.bf16.mxu1 %v16238_v53 }
 0xdf6   :  { %5348 = vst.msk [vmem:[#allocation2 + $0x28] sm:$0xff] %vm5342_vm4, %v5305_v54 }
 0xdf9   :  { %v5309_v3 = vpop.permute.xlu1 %5308 }
 0xdfa   :  { %5350 = vst.msk [vmem:[#allocation2 + $0x38] sm:$0xff] %vm5342_vm4, %v5309_v3 }
 0xdfb   :  { %10975 = vmatmul.mubr.msk.bf16.vlgmr.msra.gmra.mrb[232].mxu1 %vm2189_vm3, %v8549_v24 }
 0xdfc   :  { %10985 = vmatpush3.bf16.msra.mxu1 %v9282_v1  ;;  %10986 = vmatprep.mubr.msk.bf16.mxu1 %vm11965_vm1, %v16238_v53 }
 0xdfd   :  { %v7330_v42 = vpop.permute.xlu1 %7329 }
 0xdfe   :  { %7373 = vst.msk [vmem:[#allocation2 + $0x28] sm:$0xff] %vm7367_vm5, %v7330_v42 }
 0xe01   :  { %v7334_v30 = vpop.permute.xlu1 %7333 }
 0xe02   :  { %7375 = vst.msk [vmem:[#allocation2 + $0x38] sm:$0xff] %vm7367_vm5, %v7334_v30 }
 0xe03   :  { %10987 = vmatmul.mubr.msk.bf16.vlgmr.msra.gmra.mrb[236].mxu1 %vm2189_vm3, %v8551_v50 }
 0xe05   :  { %v5313_v9 = vpop.permute.xlu1 %5312 }
 0xe06   :  { %5352 = vst.msk [vmem:[#allocation2 + $0x48] sm:$0xff] %vm5342_vm4, %v5313_v9 }
 0xe09   :  { %v5317_v32 = vpop.permute.xlu1 %5316 }
 0xe0a   :  { %5354 = vst.msk [vmem:[#allocation2 + $0x58] sm:$0xff] %vm5342_vm4, %v5317_v32 }
 0xe0d   :  { %v7338_v53 = vpop.permute.xlu1 %7337 }
 0xe0e   :  { %7377 = vst.msk [vmem:[#allocation2 + $0x48] sm:$0xff] %vm7367_vm5, %v7338_v53 }
 0xe11   :  { %v7342_v44 = vpop.permute.xlu1 %7341 }
 0xe12   :  { %7379 = vst.msk [vmem:[#allocation2 + $0x58] sm:$0xff] %vm7367_vm5, %v7342_v44 }
 0xe15   :  { %v5321_v48 = vpop.permute.xlu1 %5320 }
 0xe16   :  { %5356 = vst.msk [vmem:[#allocation2 + $0x68] sm:$0xff] %vm5342_vm4, %v5321_v48 }
 0xe19   :  { %v5325_v8 = vpop.permute.xlu1 %5324 }
 0xe1a   :  { %5358 = vst.msk [vmem:[#allocation2 + $0x78] sm:$0xff] %vm5342_vm4, %v5325_v8 }
 0xe1d   :  { %v7346_v56 = vpop.permute.xlu1 %7345 }
 0xe1e   :  { %7381 = vst.msk [vmem:[#allocation2 + $0x68] sm:$0xff] %vm7367_vm5, %v7346_v56 }
 0xe7f   :  { %v8992_v28 = vpop.f32.mrb[208].mxu0 }
 0xe80   :  { %9344 = vrot.lane.b32.xlu0 %v8992_v28, %s11970_s9  ;;  %v10946_v21 = vpop.f32.mrb[209].mxu0 }
 0xe81   :  { %v8995_v24 = vpop.f32.mrb[210].mxu0 }
 0xe82   :  { %9346 = vrot.lane.b32.xlu1 %v8995_v24, %s11970_s9  ;;  %v10947_v60 = vpop.f32.mrb[211].mxu0 }
 0xe87   :  { %v9086_v18 = vpop.f32.mrb[212].mxu0 }
 0xe88   :  { %9352 = vrot.lane.b32.xlu0 %v9086_v18, %s11970_s9  ;;  %v10958_v39 = vpop.f32.mrb[213].mxu0 }
 0xe89   :  { %v9089_v36 = vpop.f32.mrb[214].mxu0 }
 0xe8a   :  { %9354 = vrot.lane.b32.xlu1 %v9089_v36, %s11970_s9  ;;  %v10959_v43 = vpop.f32.mrb[215].mxu0 }
 0xe8f   :  { %v9180_v0 = vpop.f32.mrb[216].mxu0 }
 0xe90   :  { %v10970_v34 = vpop.f32.mrb[217].mxu0 }
 0xe91   :  { %v9183_v41 = vpop.f32.mrb[218].mxu0 }
 0xe92   :  { %v10971_v38 = vpop.f32.mrb[219].mxu0 }
 0xe97   :  { %v9274_v35 = vpop.f32.mrb[220].mxu0 }
 0xe98   :  { %v10982_v40 = vpop.f32.mrb[221].mxu0 }
 0xe99   :  { %v9277_v25 = vpop.f32.mrb[222].mxu0 }
 0xe9a   :  { %v10983_v58 = vpop.f32.mrb[223].mxu0 }
 0xebe   :  { %v9039_v16 = vpop.f32.mrb[224].mxu1 }
 0xebf   :  { %9348 = vrot.lane.b32.xlu0 %v9039_v16, %s11970_s9  ;;  %v10952_v52 = vpop.f32.mrb[225].mxu1 }
 0xec0   :  { %v9042_v14 = vpop.f32.mrb[226].mxu1 }
 0xec1   :  { %9350 = vrot.lane.b32.xlu1 %v9042_v14, %s11970_s9  ;;  %v10953_v10 = vpop.f32.mrb[227].mxu1 }
 0xec3   :  { %9360 = vrot.lane.b32.xlu0 %v9180_v0, %s11970_s9 }
 0xec5   :  { %9362 = vrot.lane.b32.xlu1 %v9183_v41, %s11970_s9 }
 0xec6   :  { %v9133_v57 = vpop.f32.mrb[228].mxu1 }
 0xec7   :  { %9356 = vrot.lane.b32.xlu0 %v9133_v57, %s11970_s9  ;;  %v10964_v63 = vpop.f32.mrb[229].mxu1 }
 0xec8   :  { %v9136_v37 = vpop.f32.mrb[230].mxu1 }
 0xec9   :  { %9358 = vrot.lane.b32.xlu1 %v9136_v37, %s11970_s9  ;;  %v10965_v62 = vpop.f32.mrb[231].mxu1 }
 0xecb   :  { %7347 = vrot.lane.b32.xlu0 %v16249_v12, %s11969_s17 }
 0xecd   :  { %7349 = vrot.lane.b32.xlu1 %v16250_v47, %s11969_s17 }
 0xece   :  { %v9227_v23 = vpop.f32.mrb[232].mxu1 }
 0xecf   :  { %9364 = vrot.lane.b32.xlu0 %v9227_v23, %s11970_s9  ;;  %v10976_v22 = vpop.f32.mrb[233].mxu1 }
 0xed0   :  { %v9230_v59 = vpop.f32.mrb[234].mxu1 }
 0xed1   :  { %9366 = vrot.lane.b32.xlu1 %v9230_v59, %s11970_s9  ;;  %v10977_v29 = vpop.f32.mrb[235].mxu1 }
 0xed3   :  { %9368 = vrot.lane.b32.xlu0 %v9274_v35, %s11970_s9 }
 0xed5   :  { %9370 = vrot.lane.b32.xlu1 %v9277_v25, %s11970_s9  ;;  %v9795_v25 = vld [vmem:[#allocation23] ss:$0 sm:$0xff] }
 0xed6   :  { %v9321_v7 = vpop.f32.mrb[236].mxu1 }
 0xed7   :  { %9372 = vrot.lane.b32.xlu0 %v9321_v7, %s11970_s9  ;;  %v10988_v51 = vpop.f32.mrb[237].mxu1 }
 0xed8   :  { %v9324_v19 = vpop.f32.mrb[238].mxu1 }
 0xed9   :  { %9374 = vrot.lane.b32.xlu1 %v9324_v19, %s11970_s9  ;;  %v10989_v13 = vpop.f32.mrb[239].mxu1 }
 0xef2   :  { %v9345_v17 = vpop.permute.xlu0 %9344 }
 0xef3   :  { %9393 = vst.msk [vmem:[#allocation2] sm:$0xff] %vm9392_vm6, %v9345_v17 }
 0xef4   :  { %v9347_v11 = vpop.permute.xlu1 %9346 }
 0xef5   :  { %9394 = vst.msk [vmem:[#allocation2 + $0x8] sm:$0xff] %vm9392_vm6, %v9347_v11 }
 0xefa   :  { %v9353_v49 = vpop.permute.xlu0 %9352  ;;  %v9409_v15 = vld [vmem:[#allocation2] sm:$0xff] }
 0xefb   :  { %9397 = vst.msk [vmem:[#allocation2 + $0x20] sm:$0xff] %vm9392_vm6, %v9353_v49 }
 0xefc   :  { %v9355_v46 = vpop.permute.xlu1 %9354  ;;  %v9410_v1 = vld [vmem:[#allocation2 + $0x8] sm:$0xff] }
 0xefd   :  { %9398 = vst.msk [vmem:[#allocation2 + $0x28] sm:$0xff] %vm9392_vm6, %v9355_v46  ;;  %v9425_v61 = vpack.c.bf16 %v9410_v1, %v9409_v15 }
 0xeff   :  { %10994 = vmatprep.mubr.msk.bf16.mxu0 %vm244_vm0, %v9425_v61 }
 0xf02   :  { %v9413_v42 = vld [vmem:[#allocation2 + $0x20] sm:$0xff] }
 0xf04   :  { %v9414_v55 = vld [vmem:[#allocation2 + $0x28] sm:$0xff] }
 0xf05   :  { %v9427_v30 = vpack.c.bf16 %v9414_v55, %v9413_v42 }
 0xf31   :  { %v9349_v2 = vpop.permute.xlu0 %9348 }
 0xf32   :  { %9395 = vst.msk [vmem:[#allocation2 + $0x10] sm:$0xff] %vm9392_vm6, %v9349_v2 }
 0xf33   :  { %v9351_v26 = vpop.permute.xlu1 %9350 }
 0xf34   :  { %9396 = vst.msk [vmem:[#allocation2 + $0x18] sm:$0xff] %vm9392_vm6, %v9351_v26 }
 0xf35   :  { %v9361_v33 = vpop.permute.xlu0 %9360 }
 0xf36   :  { %9401 = vst.msk [vmem:[#allocation2 + $0x40] sm:$0xff] %vm9392_vm6, %v9361_v33 }
 0xf37   :  { %v9363_v27 = vpop.permute.xlu1 %9362 }
 0xf38   :  { %9402 = vst.msk [vmem:[#allocation2 + $0x48] sm:$0xff] %vm9392_vm6, %v9363_v27 }
 0xf39   :  { %v9357_v31 = vpop.permute.xlu0 %9356  ;;  %v9411_v54 = vld [vmem:[#allocation2 + $0x10] sm:$0xff] }
 0xf3a   :  { %9399 = vst.msk [vmem:[#allocation2 + $0x30] sm:$0xff] %vm9392_vm6, %v9357_v31 }
 0xf3b   :  { %v9359_v45 = vpop.permute.xlu1 %9358  ;;  %v9412_v3 = vld [vmem:[#allocation2 + $0x18] sm:$0xff] }
 0xf3c   :  { %9400 = vst.msk [vmem:[#allocation2 + $0x38] sm:$0xff] %vm9392_vm6, %v9359_v45  ;;  %v9426_v6 = vpack.c.bf16 %v9412_v3, %v9411_v54 }
 0xf3d   :  { %v7348_v4 = vpop.permute.xlu0 %7347  ;;  %v9417_v56 = vld [vmem:[#allocation2 + $0x40] sm:$0xff] }
 0xf3e   :  { %7382 = vst.msk [vmem:[#allocation2 + $0x70] sm:$0xff] %vm7367_vm5, %v7348_v4  ;;  %10995 = vmatmul.mubr.msk.bf16.vlgmr.msra.gmra.mrb[224].mxu0 %vm244_vm0, %v9426_v6 }
 0xf3f   :  { %10998 = vmatprep.mubr.msk.bf16.mxu0 %vm244_vm0, %v9427_v30  ;;  %v7350_v50 = vpop.permute.xlu1 %7349  ;;  %v9418_v32 = vld [vmem:[#allocation2 + $0x48] sm:$0xff] }
 0xf40   :  { %7383 = vst.msk [vmem:[#allocation2 + $0x78] sm:$0xff] %vm7367_vm5, %v7350_v50  ;;  %v9429_v21 = vpack.c.bf16 %v9418_v32, %v9417_v56 }
 0xf41   :  { %v9365_v9 = vpop.permute.xlu0 %9364  ;;  %v9415_v44 = vld [vmem:[#allocation2 + $0x30] sm:$0xff] }
 0xf42   :  { %9403 = vst.msk [vmem:[#allocation2 + $0x50] sm:$0xff] %vm9392_vm6, %v9365_v9 }
 0xf43   :  { %v9367_v53 = vpop.permute.xlu1 %9366  ;;  %v9416_v48 = vld [vmem:[#allocation2 + $0x38] sm:$0xff] }
 0xf44   :  { %9404 = vst.msk [vmem:[#allocation2 + $0x58] sm:$0xff] %vm9392_vm6, %v9367_v53  ;;  %v9428_v8 = vpack.c.bf16 %v9416_v48, %v9415_v44 }
 0xf45   :  { %v9369_v28 = vpop.permute.xlu0 %9368 }
 0xf46   :  { %9405 = vst.msk [vmem:[#allocation2 + $0x60] sm:$0xff] %vm9392_vm6, %v9369_v28  ;;  %10999 = vmatmul.mubr.msk.bf16.gmra.mrb[228].mxu0 %vm244_vm0, %v9428_v8 }
 0xf47   :  { %11002 = vmatprep.mubr.msk.bf16.mxu0 %vm244_vm0, %v9429_v21  ;;  %v9371_v24 = vpop.permute.xlu1 %9370 }
 0xf48   :  { %9406 = vst.msk [vmem:[#allocation2 + $0x68] sm:$0xff] %vm9392_vm6, %v9371_v24 }
 0xf49   :  { %v9373_v60 = vpop.permute.xlu0 %9372  ;;  %v9419_v39 = vld [vmem:[#allocation2 + $0x50] sm:$0xff] }
 0xf4a   :  { %9407 = vst.msk [vmem:[#allocation2 + $0x70] sm:$0xff] %vm9392_vm6, %v9373_v60 }
 0xf4b   :  { %v9375_v18 = vpop.permute.xlu1 %9374  ;;  %v9420_v36 = vld [vmem:[#allocation2 + $0x58] sm:$0xff] }
 0xf4c   :  { %9408 = vst.msk [vmem:[#allocation2 + $0x78] sm:$0xff] %vm9392_vm6, %v9375_v18  ;;  %v9430_v43 = vpack.c.bf16 %v9420_v36, %v9419_v39 }
 0xf4d   :  { %v9421_v0 = vld [vmem:[#allocation2 + $0x60] sm:$0xff] }
 0xf4e   :  { %11003 = vmatmul.mubr.msk.bf16.gmra.mrb[232].mxu0 %vm244_vm0, %v9430_v43 }
 0xf4f   :  { %v9422_v34 = vld [vmem:[#allocation2 + $0x68] sm:$0xff] }
 0xf50   :  { %v9431_v41 = vpack.c.bf16 %v9422_v34, %v9421_v0 }
 0xf51   :  { %v9423_v38 = vld [vmem:[#allocation2 + $0x70] sm:$0xff] }
 0xf52   :  { %11006 = vmatprep.mubr.msk.bf16.mxu0 %vm244_vm0, %v9431_v41 }
 0xf53   :  { %v9424_v35 = vld [vmem:[#allocation2 + $0x78] sm:$0xff] }
 0xf54   :  { %v9432_v40 = vpack.c.bf16 %v9424_v35, %v9423_v38 }
 0xf56   :  { %11007 = vmatmul.mubr.msk.bf16.gmra.mrb[236].mxu0 %vm244_vm0, %v9432_v40 }
0x1011   :  { %v10996_v58 = vpop.f32.mrb[224].mxu0 }
0x1012   :  { %v9523_v20 = vadd.f32 %v10996_v58, %v9795_v25  ;;  %v9514_v5 = vpop.f32.mrb[225].mxu0 }
0x1013   :  { %v9515_v16 = vadd.f32 %v9795_v25, %v9514_v5  ;;  %v10997_v52 = vpop.f32.mrb[226].mxu0 }
0x1014   :  { %9579 = vst.msk [vmem:[#allocation24 + $0x10] sm:$0xff] %vm244_vm0, %v9523_v20  ;;  %v9526_v14 = vadd.f32 %v10997_v52, %v9795_v25  ;;  %v9517_v10 = vpop.f32.mrb[227].mxu0 }
0x1015   :  { %9577 = vst.msk [vmem:[#allocation24] sm:$0xff] %vm244_vm0, %v9515_v16  ;;  %v9518_v57 = vadd.f32 %v9795_v25, %v9517_v10 }
0x1016   :  { %9580 = vst.msk [vmem:[#allocation24 + $0x18] sm:$0xff] %vm244_vm0, %v9526_v14 }
0x1017   :  { %9578 = vst.msk [vmem:[#allocation24 + $0x8] sm:$0xff] %vm244_vm0, %v9518_v57 }
0x1019   :  { %v11000_v63 = vpop.f32.mrb[228].mxu0 }
0x101a   :  { %v9539_v37 = vadd.f32 %v11000_v63, %v9795_v25  ;;  %v9530_v62 = vpop.f32.mrb[229].mxu0 }
0x101b   :  { %v9531_v12 = vadd.f32 %v9795_v25, %v9530_v62  ;;  %v11001_v47 = vpop.f32.mrb[230].mxu0 }
0x101c   :  { %9583 = vst.msk [vmem:[#allocation24 + $0x30] sm:$0xff] %vm244_vm0, %v9539_v37  ;;  %v9542_v23 = vadd.f32 %v11001_v47, %v9795_v25  ;;  %v9533_v22 = vpop.f32.mrb[231].mxu0 }
0x101d   :  { %9581 = vst.msk [vmem:[#allocation24 + $0x20] sm:$0xff] %vm244_vm0, %v9531_v12  ;;  %v9534_v59 = vadd.f32 %v9795_v25, %v9533_v22 }
0x101e   :  { %9584 = vst.msk [vmem:[#allocation24 + $0x38] sm:$0xff] %vm244_vm0, %v9542_v23 }
0x101f   :  { %9582 = vst.msk [vmem:[#allocation24 + $0x28] sm:$0xff] %vm244_vm0, %v9534_v59 }
0x1021   :  { %v11004_v29 = vpop.f32.mrb[232].mxu0 }
0x1022   :  { %v9555_v7 = vadd.f32 %v11004_v29, %v9795_v25  ;;  %v9546_v51 = vpop.f32.mrb[233].mxu0 }
0x1023   :  { %v9547_v19 = vadd.f32 %v9795_v25, %v9546_v51  ;;  %v11005_v13 = vpop.f32.mrb[234].mxu0 }
0x1024   :  { %9587 = vst.msk [vmem:[#allocation24 + $0x50] sm:$0xff] %vm244_vm0, %v9555_v7  ;;  %v9558_v17 = vadd.f32 %v11005_v13, %v9795_v25  ;;  %v9549_v11 = vpop.f32.mrb[235].mxu0 }
0x1025   :  { %9585 = vst.msk [vmem:[#allocation24 + $0x40] sm:$0xff] %vm244_vm0, %v9547_v19  ;;  %v9550_v49 = vadd.f32 %v9795_v25, %v9549_v11 }
0x1026   :  { %9588 = vst.msk [vmem:[#allocation24 + $0x58] sm:$0xff] %vm244_vm0, %v9558_v17 }
0x1027   :  { %9586 = vst.msk [vmem:[#allocation24 + $0x48] sm:$0xff] %vm244_vm0, %v9550_v49 }
0x1029   :  { %v11008_v46 = vpop.f32.mrb[236].mxu0 }
0x102a   :  { %v9571_v15 = vadd.f32 %v11008_v46, %v9795_v25  ;;  %v9562_v1 = vpop.f32.mrb[237].mxu0 }
0x102b   :  { %v9563_v61 = vadd.f32 %v9795_v25, %v9562_v1  ;;  %v11009_v2 = vpop.f32.mrb[238].mxu0 }
0x102c   :  { %9591 = vst.msk [vmem:[#allocation24 + $0x70] sm:$0xff] %vm244_vm0, %v9571_v15  ;;  %v9574_v26 = vadd.f32 %v11009_v2, %v9795_v25  ;;  %v9565_v33 = vpop.f32.mrb[239].mxu0 }
0x102d   :  { %9589 = vst.msk [vmem:[#allocation24 + $0x60] sm:$0xff] %vm244_vm0, %v9563_v61  ;;  %v9566_v27 = vadd.f32 %v9795_v25, %v9565_v33 }
0x102e   :  { %9592 = vst.msk [vmem:[#allocation24 + $0x78] sm:$0xff] %vm244_vm0, %v9574_v26 }
0x102f   :  { %9590 = vst.msk [vmem:[#allocation24 + $0x68] sm:$0xff] %vm244_vm0, %v9566_v27 }
0x1030   :  { %11920 = shalt.err (!%p11917_p10)
}
0x1031   :  { %s11921_s25 = scalar_lea.hbm %s15942_s13, 2048 }
0x1032   :  { %p11922_p11 = scmp.ne.s32.totalorder %s15942_s13, %s11921_s25  ;;  %p11925_p12 = scmp.lt.u32.totalorder %s11921_s25, %s15942_s13 }
0x1034   :  { %p11927_p13 = pnand %p11925_p12, %p11922_p11 }
0x1036   :  { %11930 = shalt.err (!%p11927_p13)
}
0x1037   :  { %9604 = dma.vmem_to_hbm [thread:$0]  %s9599_s23, 2048, %s15942_s13, [#allocation5], %s11949_s20, %s11949_s20, %s11950_s21  }
0x1038   :  { %11945 = dma.done.wait [#allocation5], 2048  }
0x1039   :  { %11946 = vsyncadd [#allocation5], 4294965248 }
0x103a   :  { %9608 = vsyncpa [#allocation4], 1 }
0x103b   :  { %9609 = vsyncpa [#allocation7], 1 }
0x103c   :  { %9610 = vsyncpa [#allocation10], 1 }
0x103d   :  { %9611 = vsyncpa [#allocation13], 1 }
0x103e   :  { %9612 = vsyncpa [#allocation16], 1 }
0x103f   :  { %9613 = vsyncpa [#allocation19], 1 }
0x1040   :  { %9614 = vsyncpa [#allocation22], 1 }
0x1041   :  { %9615 = vsyncpa [#allocation5], 1 }

</bundles_post_ra>
